<compile_context>
chip_gen: v7x
topology: tpu7x:2x2x1
jax: 0.10.0
libtpu: 0.0.40
codegen_flags: <defaults>
</compile_context>

<pallas_src>
import math

import jax
import jax.numpy as jnp
from jax.experimental import pallas as pl
from jax.experimental.pallas import tpu as pltpu

# Full f32 matmul precision so the pure-JAX reference matches the kernel.
jax.config.update("jax_default_matmul_precision", "highest")


# ---------------------------------------------------------------------------
# Fused KGNet forward kernel (entire network, grid=() -> runs once)
# ---------------------------------------------------------------------------
def _make_kgnet_kernel(num_layers):
    def kernel(*refs):
        it = iter(refs)
        # -------- inputs ---------------------------------------------------
        xr_ref, xi_ref = next(it), next(it)
        fin_wr, fin_wi, fin_br, fin_bi = next(it), next(it), next(it), next(it)
        alphas_ref = next(it)                                   # SMEM (2,)
        gru_refs = [next(it) for _ in range(8 * num_layers)]    # per (layer, gru)
        hrr_ref, hir_ref, hri_ref, hii_ref = next(it), next(it), next(it), next(it)
        o1_wr, o1_wi, o1_br, o1_bi = next(it), next(it), next(it), next(it)
        o2_wr, o2_wi, o2_br, o2_bi = next(it), next(it), next(it), next(it)
        # -------- outputs --------------------------------------------------
        kgr_ref, kgi_ref = next(it), next(it)
        hrr_out, hir_out, hri_out, hii_out = next(it), next(it), next(it), next(it)

        a_in = alphas_ref[0]     # fc_in PReLU alpha   (scalar from SMEM)
        a_out = alphas_ref[1]    # fc_out PReLU alpha

        def prelu(v, a):
            return jnp.where(v >= 0.0, v, a * v)

        def dense(x, w_ref, b_ref):
            # NOTE: ComplexDense in the reference module has NO real/imag
            # cross terms: y_real = x.real @ Wr^T + br, y_imag = x.imag @ Wi^T + bi.
            return jnp.dot(x, w_ref[...],
                           preferred_element_type=jnp.float32) + b_ref[...]

        # fc_in (ComplexDense + ComplexPReLU); real / imag kept separate.
        fr = prelu(dense(xr_ref[...], fin_wr, fin_br), a_in)
        fi = prelu(dense(xi_ref[...], fin_wi, fin_bi), a_in)

        def gru_cell(x, h, wih_ref, whh_ref, bih_ref, bhh_ref):
            # PyTorch GRU cell, single time step. Weights pre-packed per gate:
            #   wih_ref: (3, in, H), whh_ref: (3, H, H), biases: (3, 1, H).
            gi_r = jnp.dot(x, wih_ref[0], preferred_element_type=jnp.float32) + bih_ref[0]
            gi_z = jnp.dot(x, wih_ref[1], preferred_element_type=jnp.float32) + bih_ref[1]
            gi_n = jnp.dot(x, wih_ref[2], preferred_element_type=jnp.float32) + bih_ref[2]
            gh_r = jnp.dot(h, whh_ref[0], preferred_element_type=jnp.float32) + bhh_ref[0]
            gh_z = jnp.dot(h, whh_ref[1], preferred_element_type=jnp.float32) + bhh_ref[1]
            gh_n = jnp.dot(h, whh_ref[2], preferred_element_type=jnp.float32) + bhh_ref[2]
            r = jax.nn.sigmoid(gi_r + gh_r)
            z = jax.nn.sigmoid(gi_z + gh_z)
            n = jnp.tanh(gi_n + r * gh_n)
            return (1.0 - z) * n + z * h

        # ComplexGRU with seq_len == 1 (the torch .unsqueeze(1)):
        #   Frr: real input / gru_r / h_rr     Fir: imag input / gru_r / h_ir
        #   Fri: real input / gru_i / h_ri     Fii: imag input / gru_i / h_ii
        x_rr, x_ir, x_ri, x_ii = fr, fi, fr, fi
        for l in range(num_layers):
            wr_set = gru_refs[8 * l:8 * l + 4]        # gru_r layer l weights
            wi_set = gru_refs[8 * l + 4:8 * l + 8]    # gru_i layer l weights
            n_rr = gru_cell(x_rr, hrr_ref[l], *wr_set)
            n_ir = gru_cell(x_ir, hir_ref[l], *wr_set)
            n_ri = gru_cell(x_ri, hri_ref[l], *wi_set)
            n_ii = gru_cell(x_ii, hii_ref[l], *wi_set)
            hrr_out[l] = n_rr
            hir_out[l] = n_ir
            hri_out[l] = n_ri
            hii_out[l] = n_ii
            x_rr, x_ir, x_ri, x_ii = n_rr, n_ir, n_ri, n_ii

        # y = (Frr - Fii) + i (Fri + Fir)
        yr = x_rr - x_ii
        yi = x_ri + x_ir

        # fc_out: ComplexDense + ComplexPReLU + ComplexDense -> true (B, L).
        z1r = prelu(dense(yr, o1_wr, o1_br), a_out)
        z1i = prelu(dense(yi, o1_wi, o1_bi), a_out)
        kgr_ref[...] = dense(z1r, o2_wr, o2_br).astype(kgr_ref.dtype)
        kgi_ref[...] = dense(z1i, o2_wi, o2_bi).astype(kgi_ref.dtype)

    return kernel


# ---------------------------------------------------------------------------
# One-time parameter packing (hoisted out of the per-step forward)
# ---------------------------------------------------------------------------
def pack_params(params):
    f32 = jnp.float32

    def pack_dense(d):
        return dict(
            wr_t=jnp.asarray(d["w_real"], f32).T,              # (in, out)
            wi_t=jnp.asarray(d["w_imag"], f32).T,
            br=jnp.asarray(d["b_real"], f32).reshape(1, -1),
            bi=jnp.asarray(d["b_imag"], f32).reshape(1, -1),
        )

    def pack_gru_layer(lp):
        H = lp["w_hh"].shape[-1]
        in_dim = lp["w_ih"].shape[-1]
        return dict(
            w_ih=jnp.asarray(lp["w_ih"], f32).reshape(3, H, in_dim).transpose(0, 2, 1),
            w_hh=jnp.asarray(lp["w_hh"], f32).reshape(3, H, H).transpose(0, 2, 1),
            b_ih=jnp.asarray(lp["b_ih"], f32).reshape(3, 1, H),
            b_hh=jnp.asarray(lp["b_hh"], f32).reshape(3, 1, H),
        )

    return dict(
        fc_in=pack_dense(params["fc_in"]),
        alphas=jnp.stack([jnp.asarray(params["fc_in"]["alpha"], f32),
                          jnp.asarray(params["fc_out_alpha"], f32)]),
        gru_r=[pack_gru_layer(lp) for lp in params["gru_r"]],
        gru_i=[pack_gru_layer(lp) for lp in params["gru_i"]],
        fc_out1=pack_dense(params["fc_out1"]),
        fc_out2=pack_dense(params["fc_out2"]),
    )


# ---------------------------------------------------------------------------
# KGNet forward (single fused pallas_call)
# ---------------------------------------------------------------------------
def kgnet_forward(packed, input_feature, h_rr, h_ir, h_ri, h_ii):
    f32 = jnp.float32
    xr = jnp.real(input_feature).astype(f32)
    xi = jnp.imag(input_feature).astype(f32)
    B = xr.shape[0]
    num_layers = len(packed["gru_r"])
    H = packed["gru_r"][0]["w_hh"].shape[-1]
    L = packed["fc_out2"]["wr_t"].shape[-1]

    vmem = pl.BlockSpec(memory_space=pltpu.MemorySpace.VMEM)
    smem = pl.BlockSpec(memory_space=pltpu.MemorySpace.SMEM)

    args = [xr, xi,
            packed["fc_in"]["wr_t"], packed["fc_in"]["wi_t"],
            packed["fc_in"]["br"], packed["fc_in"]["bi"],
            packed["alphas"]]
    specs = [vmem] * 6 + [smem]
    for l in range(num_layers):
        for g in (packed["gru_r"][l], packed["gru_i"][l]):
            args += [g["w_ih"], g["w_hh"], g["b_ih"], g["b_hh"]]
            specs += [vmem] * 4
    for h in (h_rr, h_ir, h_ri, h_ii):
        args.append(jnp.asarray(h, f32))
        specs.append(vmem)
    for d in (packed["fc_out1"], packed["fc_out2"]):
        args += [d["wr_t"], d["wi_t"], d["br"], d["bi"]]
        specs += [vmem] * 4

    out_shape = (
        jax.ShapeDtypeStruct((B, L), f32),                  # kg real
        jax.ShapeDtypeStruct((B, L), f32),                  # kg imag
        jax.ShapeDtypeStruct((num_layers, B, H), f32),      # h_rr'
        jax.ShapeDtypeStruct((num_layers, B, H), f32),      # h_ir'
        jax.ShapeDtypeStruct((num_layers, B, H), f32),      # h_ri'
        jax.ShapeDtypeStruct((num_layers, B, H), f32),      # h_ii'
    )
    out_specs = (vmem,) * 6

    kg_r, kg_i, hrr_n, hir_n, hri_n, hii_n = pl.pallas_call(
        _make_kgnet_kernel(num_layers),
        out_shape=out_shape,
        in_specs=specs,
        out_specs=out_specs,
    )(*args)

    # torch: (B, 1, L).permute(0, 2, 1) -> (B, L, 1); only here do we build complex64.
    kg = jax.lax.complex(kg_r, kg_i)[:, :, None]
    return kg, hrr_n, hir_n, hri_n, hii_n


# ---------------------------------------------------------------------------
# Pure-JAX reference (mirrors the PyTorch module semantics)
# ---------------------------------------------------------------------------
def _ref_complex_dense(x, wr, wi, br, bi):
    return jax.lax.complex(jnp.real(x) @ wr.T + br, jnp.imag(x) @ wi.T + bi)


def _ref_complex_prelu(x, a):
    def prelu(v):
        return jnp.where(v >= 0, v, a * v)
    return jax.lax.complex(prelu(jnp.real(x)), prelu(jnp.imag(x)))


def _ref_gru_cell(x, h, w_ih, w_hh, b_ih, b_hh):
    gi = x @ w_ih.T + b_ih
    gh = h @ w_hh.T + b_hh
    H = h.shape[-1]
    r = jax.nn.sigmoid(gi[:, :H] + gh[:, :H])
    z = jax.nn.sigmoid(gi[:, H:2 * H] + gh[:, H:2 * H])
    n = jnp.tanh(gi[:, 2 * H:] + r * gh[:, 2 * H:])
    return (1.0 - z) * n + z * h


def _ref_gru(x, h0, layers):   # single time-step, multi-layer
    inp = x
    h_new = []
    for l, lp in enumerate(layers):
        h = _ref_gru_cell(inp, h0[l], lp["w_ih"], lp["w_hh"], lp["b_ih"], lp["b_hh"])
        h_new.append(h)
        inp = h
    return inp, jnp.stack(h_new, axis=0)


def _ref_kgnet(params, x, h_rr, h_ir, h_ri, h_ii):
    p = params
    f = _ref_complex_dense(x, p["fc_in"]["w_real"], p["fc_in"]["w_imag"],
                           p["fc_in"]["b_real"], p["fc_in"]["b_imag"])
    f = _ref_complex_prelu(f, p["fc_in"]["alpha"])
    Frr, h_rr_n = _ref_gru(jnp.real(f), h_rr, p["gru_r"])
    Fir, h_ir_n = _ref_gru(jnp.imag(f), h_ir, p["gru_r"])
    Fri, h_ri_n = _ref_gru(jnp.real(f), h_ri, p["gru_i"])
    Fii, h_ii_n = _ref_gru(jnp.imag(f), h_ii, p["gru_i"])
    y = jax.lax.complex(Frr - Fii, Fri + Fir)
    z1 = _ref_complex_dense(y, p["fc_out1"]["w_real"], p["fc_out1"]["w_imag"],
                            p["fc_out1"]["b_real"], p["fc_out1"]["b_imag"])
    z1 = _ref_complex_prelu(z1, p["fc_out_alpha"])
    kg = _ref_complex_dense(z1, p["fc_out2"]["w_real"], p["fc_out2"]["w_imag"],
                            p["fc_out2"]["b_real"], p["fc_out2"]["b_imag"])
    return kg[:, :, None], h_rr_n, h_ir_n, h_ri_n, h_ii_n


# ---------------------------------------------------------------------------
# Deterministic parameter init (mimics nn.Linear / nn.GRU uniform init)
# ---------------------------------------------------------------------------
def _init_dense(key, in_ch, out_ch):
    k = jax.random.split(key, 4)
    bound = 1.0 / math.sqrt(in_ch)
    return {
        "w_real": jax.random.uniform(k[0], (out_ch, in_ch), jnp.float32, -bound, bound),
        "w_imag": jax.random.uniform(k[1], (out_ch, in_ch), jnp.float32, -bound, bound),
        "b_real": jax.random.uniform(k[2], (out_ch,), jnp.float32, -bound, bound),
        "b_imag": jax.random.uniform(k[3], (out_ch,), jnp.float32, -bound, bound),
    }


def _init_gru_layer(key, in_size, hidden):
    k = jax.random.split(key, 4)
    bound = 1.0 / math.sqrt(hidden)
    return {
        "w_ih": jax.random.uniform(k[0], (3 * hidden, in_size), jnp.float32, -bound, bound),
        "w_hh": jax.random.uniform(k[1], (3 * hidden, hidden), jnp.float32, -bound, bound),
        "b_ih": jax.random.uniform(k[2], (3 * hidden,), jnp.float32, -bound, bound),
        "b_hh": jax.random.uniform(k[3], (3 * hidden,), jnp.float32, -bound, bound),
    }


def init_params(key, L, fc_dim, rnn_layers, rnn_dim):
    in_ch = 2 * L + 1
    keys = jax.random.split(key, 3 + 2 * rnn_layers)
    gru_r = [_init_gru_layer(keys[3 + l],
                             fc_dim if l == 0 else rnn_dim, rnn_dim)
             for l in range(rnn_layers)]
    gru_i = [_init_gru_layer(keys[3 + rnn_layers + l],
                             fc_dim if l == 0 else rnn_dim, rnn_dim)
             for l in range(rnn_layers)]
    return {
        "fc_in": {**_init_dense(keys[0], in_ch, fc_dim),
                  "alpha": jnp.asarray(0.25, jnp.float32)},
        "gru_r": gru_r,
        "gru_i": gru_i,
        "fc_out1": _init_dense(keys[1], rnn_dim, fc_dim),
        "fc_out_alpha": jnp.asarray(0.1, jnp.float32),
        "fc_out2": _init_dense(keys[2], fc_dim, L),
    }


# ---------------------------------------------------------------------------
if __name__ == "__main__":
    L, fc_dim, rnn_layers, rnn_dim = 8, 32, 2, 32
    batch = 2
    in_ch = 2 * L + 1

    key = jax.random.PRNGKey(0)
    k_par, k_xr, k_xi, k_h = jax.random.split(key, 4)

    params = init_params(k_par, L, fc_dim, rnn_layers, rnn_dim)
    packed = pack_params(params)      # one-time weight packing (not per step)

    xr = jax.random.normal(k_xr, (batch, in_ch), jnp.float32)
    xi = jax.random.normal(k_xi, (batch, in_ch), jnp.float32)
    x = jax.lax.complex(xr, xi)                               # complex64 (2, 17)

    hk = jax.random.split(k_h, 4)
    h_rr = jax.random.normal(hk[0], (rnn_layers, batch, rnn_dim), jnp.float32)
    h_ir = jax.random.normal(hk[1], (rnn_layers, batch, rnn_dim), jnp.float32)
    h_ri = jax.random.normal(hk[2], (rnn_layers, batch, rnn_dim), jnp.float32)
    h_ii = jax.random.normal(hk[3], (rnn_layers, batch, rnn_dim), jnp.float32)

    fwd = jax.jit(kgnet_forward)
    out = jax.block_until_ready(fwd(packed, x, h_rr, h_ir, h_ri, h_ii))
    kg, h_rr_n, h_ir_n, h_ri_n, h_ii_n = out

    # Reference check (same semantics as the PyTorch module).
    kg_ref, rr_ref, ir_ref, ri_ref, ii_ref = _ref_kgnet(
        params, x, h_rr, h_ir, h_ri, h_ii)

    assert kg.shape == (batch, L, 1) and kg.dtype == jnp.complex64
    assert h_rr_n.shape == (rnn_layers, batch, rnn_dim)
    assert jnp.allclose(kg, kg_ref, atol=1e-4, rtol=1e-4)
    for got, want in ((h_rr_n, rr_ref), (h_ir_n, ir_ref),
                      (h_ri_n, ri_ref), (h_ii_n, ii_ref)):
        assert jnp.allclose(got, want, atol=1e-4, rtol=1e-4)

    print("KERNEL_OK")
</pallas_src>

<mosaic_0001>
module attributes {stable_mosaic.version = 11 : i64} {
  func.func @kernel(%arg0: memref<2x17xf32, #tpu.memory_space<vmem>>, %arg1: memref<2x17xf32, #tpu.memory_space<vmem>>, %arg2: memref<17x32xf32, #tpu.memory_space<vmem>>, %arg3: memref<17x32xf32, #tpu.memory_space<vmem>>, %arg4: memref<1x32xf32, #tpu.memory_space<vmem>>, %arg5: memref<1x32xf32, #tpu.memory_space<vmem>>, %arg6: memref<2xf32, #tpu.memory_space<smem>>, %arg7: memref<3x32x32xf32, #tpu.memory_space<vmem>>, %arg8: memref<3x32x32xf32, #tpu.memory_space<vmem>>, %arg9: memref<3x1x32xf32, #tpu.memory_space<vmem>>, %arg10: memref<3x1x32xf32, #tpu.memory_space<vmem>>, %arg11: memref<3x32x32xf32, #tpu.memory_space<vmem>>, %arg12: memref<3x32x32xf32, #tpu.memory_space<vmem>>, %arg13: memref<3x1x32xf32, #tpu.memory_space<vmem>>, %arg14: memref<3x1x32xf32, #tpu.memory_space<vmem>>, %arg15: memref<3x32x32xf32, #tpu.memory_space<vmem>>, %arg16: memref<3x32x32xf32, #tpu.memory_space<vmem>>, %arg17: memref<3x1x32xf32, #tpu.memory_space<vmem>>, %arg18: memref<3x1x32xf32, #tpu.memory_space<vmem>>, %arg19: memref<3x32x32xf32, #tpu.memory_space<vmem>>, %arg20: memref<3x32x32xf32, #tpu.memory_space<vmem>>, %arg21: memref<3x1x32xf32, #tpu.memory_space<vmem>>, %arg22: memref<3x1x32xf32, #tpu.memory_space<vmem>>, %arg23: memref<2x2x32xf32, #tpu.memory_space<vmem>>, %arg24: memref<2x2x32xf32, #tpu.memory_space<vmem>>, %arg25: memref<2x2x32xf32, #tpu.memory_space<vmem>>, %arg26: memref<2x2x32xf32, #tpu.memory_space<vmem>>, %arg27: memref<32x32xf32, #tpu.memory_space<vmem>>, %arg28: memref<32x32xf32, #tpu.memory_space<vmem>>, %arg29: memref<1x32xf32, #tpu.memory_space<vmem>>, %arg30: memref<1x32xf32, #tpu.memory_space<vmem>>, %arg31: memref<32x8xf32, #tpu.memory_space<vmem>>, %arg32: memref<32x8xf32, #tpu.memory_space<vmem>>, %arg33: memref<1x8xf32, #tpu.memory_space<vmem>>, %arg34: memref<1x8xf32, #tpu.memory_space<vmem>>, %arg35: memref<2x8xf32, #tpu.memory_space<vmem>>, %arg36: memref<2x8xf32, #tpu.memory_space<vmem>>, %arg37: memref<2x2x32xf32, #tpu.memory_space<vmem>>, %arg38: memref<2x2x32xf32, #tpu.memory_space<vmem>>, %arg39: memref<2x2x32xf32, #tpu.memory_space<vmem>>, %arg40: memref<2x2x32xf32, #tpu.memory_space<vmem>>) attributes {dimension_semantics = [], scalar_prefetch = 0 : i64, scratch_operands = 0 : i64, tpu.core_type = #tpu.core_type<tc>} {
    %c0 = arith.constant 0 : index
    %0 = memref.load %arg6[%c0] : memref<2xf32, #tpu.memory_space<smem>>
    %c1 = arith.constant 1 : index
    %1 = memref.load %arg6[%c1] : memref<2xf32, #tpu.memory_space<smem>>
    %c0_0 = arith.constant 0 : index
    %c0_1 = arith.constant 0 : index
    %2 = vector.load %arg0[%c0_0, %c0_1] : memref<2x17xf32, #tpu.memory_space<vmem>>, vector<2x17xf32>
    %c0_2 = arith.constant 0 : index
    %c0_3 = arith.constant 0 : index
    %3 = vector.load %arg2[%c0_2, %c0_3] : memref<17x32xf32, #tpu.memory_space<vmem>>, vector<17x32xf32>
    %cst = arith.constant dense<0.000000e+00> : vector<2x32xf32>
    %4 = tpu.matmul %2, %3, %cst {dimension_numbers = #tpu.dot_dimension_numbers<[1], [0], [0], [1], [0, 0, 1, 1], [], []>, precision = #tpu.contract_precision<fp32>} : vector<2x17xf32>, vector<17x32xf32>, vector<2x32xf32> -> vector<2x32xf32>
    %c0_4 = arith.constant 0 : index
    %c0_5 = arith.constant 0 : index
    %5 = vector.load %arg4[%c0_4, %c0_5] : memref<1x32xf32, #tpu.memory_space<vmem>>, vector<1x32xf32>
    %6 = vector.broadcast %5 : vector<1x32xf32> to vector<2x32xf32>
    %7 = arith.addf %4, %6 : vector<2x32xf32>
    %cst_6 = arith.constant 0.000000e+00 : f32
    %8 = vector.broadcast %cst_6 : f32 to vector<2x32xf32>
    %9 = arith.cmpf oge, %7, %8 : vector<2x32xf32>
    %10 = vector.broadcast %0 : f32 to vector<2x32xf32>
    %11 = arith.mulf %10, %7 : vector<2x32xf32>
    %12 = arith.select %9, %7, %11 : vector<2x32xi1>, vector<2x32xf32>
    %c0_7 = arith.constant 0 : index
    %c0_8 = arith.constant 0 : index
    %13 = vector.load %arg1[%c0_7, %c0_8] : memref<2x17xf32, #tpu.memory_space<vmem>>, vector<2x17xf32>
    %c0_9 = arith.constant 0 : index
    %c0_10 = arith.constant 0 : index
    %14 = vector.load %arg3[%c0_9, %c0_10] : memref<17x32xf32, #tpu.memory_space<vmem>>, vector<17x32xf32>
    %cst_11 = arith.constant dense<0.000000e+00> : vector<2x32xf32>
    %15 = tpu.matmul %13, %14, %cst_11 {dimension_numbers = #tpu.dot_dimension_numbers<[1], [0], [0], [1], [0, 0, 1, 1], [], []>, precision = #tpu.contract_precision<fp32>} : vector<2x17xf32>, vector<17x32xf32>, vector<2x32xf32> -> vector<2x32xf32>
    %c0_12 = arith.constant 0 : index
    %c0_13 = arith.constant 0 : index
    %16 = vector.load %arg5[%c0_12, %c0_13] : memref<1x32xf32, #tpu.memory_space<vmem>>, vector<1x32xf32>
    %17 = vector.broadcast %16 : vector<1x32xf32> to vector<2x32xf32>
    %18 = arith.addf %15, %17 : vector<2x32xf32>
    %cst_14 = arith.constant 0.000000e+00 : f32
    %19 = vector.broadcast %cst_14 : f32 to vector<2x32xf32>
    %20 = arith.cmpf oge, %18, %19 : vector<2x32xf32>
    %21 = vector.broadcast %0 : f32 to vector<2x32xf32>
    %22 = arith.mulf %21, %18 : vector<2x32xf32>
    %23 = arith.select %20, %18, %22 : vector<2x32xi1>, vector<2x32xf32>
    %c0_15 = arith.constant 0 : index
    %c0_16 = arith.constant 0 : index
    %c0_17 = arith.constant 0 : index
    %24 = vector.load %arg23[%c0_15, %c0_16, %c0_17] : memref<2x2x32xf32, #tpu.memory_space<vmem>>, vector<1x2x32xf32>
    %25 = vector.shape_cast %24 : vector<1x2x32xf32> to vector<2x32xf32>
    %c0_18 = arith.constant 0 : index
    %c0_19 = arith.constant 0 : index
    %c0_20 = arith.constant 0 : index
    %26 = vector.load %arg7[%c0_18, %c0_19, %c0_20] : memref<3x32x32xf32, #tpu.memory_space<vmem>>, vector<1x32x32xf32>
    %27 = vector.shape_cast %26 : vector<1x32x32xf32> to vector<32x32xf32>
    %cst_21 = arith.constant dense<0.000000e+00> : vector<2x32xf32>
    %28 = tpu.matmul %12, %27, %cst_21 {dimension_numbers = #tpu.dot_dimension_numbers<[1], [0], [0], [1], [0, 0, 1, 1], [], []>, precision = #tpu.contract_precision<fp32>} : vector<2x32xf32>, vector<32x32xf32>, vector<2x32xf32> -> vector<2x32xf32>
    %c0_22 = arith.constant 0 : index
    %c0_23 = arith.constant 0 : index
    %c0_24 = arith.constant 0 : index
    %29 = vector.load %arg9[%c0_22, %c0_23, %c0_24] : memref<3x1x32xf32, #tpu.memory_space<vmem>>, vector<1x1x32xf32>
    %30 = vector.shape_cast %29 : vector<1x1x32xf32> to vector<1x32xf32>
    %31 = vector.broadcast %30 : vector<1x32xf32> to vector<2x32xf32>
    %32 = arith.addf %28, %31 : vector<2x32xf32>
    %c1_25 = arith.constant 1 : index
    %c0_26 = arith.constant 0 : index
    %c0_27 = arith.constant 0 : index
    %33 = vector.load %arg7[%c1_25, %c0_26, %c0_27] : memref<3x32x32xf32, #tpu.memory_space<vmem>>, vector<1x32x32xf32>
    %34 = vector.shape_cast %33 : vector<1x32x32xf32> to vector<32x32xf32>
    %cst_28 = arith.constant dense<0.000000e+00> : vector<2x32xf32>
    %35 = tpu.matmul %12, %34, %cst_28 {dimension_numbers = #tpu.dot_dimension_numbers<[1], [0], [0], [1], [0, 0, 1, 1], [], []>, precision = #tpu.contract_precision<fp32>} : vector<2x32xf32>, vector<32x32xf32>, vector<2x32xf32> -> vector<2x32xf32>
    %c1_29 = arith.constant 1 : index
    %c0_30 = arith.constant 0 : index
    %c0_31 = arith.constant 0 : index
    %36 = vector.load %arg9[%c1_29, %c0_30, %c0_31] : memref<3x1x32xf32, #tpu.memory_space<vmem>>, vector<1x1x32xf32>
    %37 = vector.shape_cast %36 : vector<1x1x32xf32> to vector<1x32xf32>
    %38 = vector.broadcast %37 : vector<1x32xf32> to vector<2x32xf32>
    %39 = arith.addf %35, %38 : vector<2x32xf32>
    %c2 = arith.constant 2 : index
    %c0_32 = arith.constant 0 : index
    %c0_33 = arith.constant 0 : index
    %40 = vector.load %arg7[%c2, %c0_32, %c0_33] : memref<3x32x32xf32, #tpu.memory_space<vmem>>, vector<1x32x32xf32>
    %41 = vector.shape_cast %40 : vector<1x32x32xf32> to vector<32x32xf32>
    %cst_34 = arith.constant dense<0.000000e+00> : vector<2x32xf32>
    %42 = tpu.matmul %12, %41, %cst_34 {dimension_numbers = #tpu.dot_dimension_numbers<[1], [0], [0], [1], [0, 0, 1, 1], [], []>, precision = #tpu.contract_precision<fp32>} : vector<2x32xf32>, vector<32x32xf32>, vector<2x32xf32> -> vector<2x32xf32>
    %c2_35 = arith.constant 2 : index
    %c0_36 = arith.constant 0 : index
    %c0_37 = arith.constant 0 : index
    %43 = vector.load %arg9[%c2_35, %c0_36, %c0_37] : memref<3x1x32xf32, #tpu.memory_space<vmem>>, vector<1x1x32xf32>
    %44 = vector.shape_cast %43 : vector<1x1x32xf32> to vector<1x32xf32>
    %45 = vector.broadcast %44 : vector<1x32xf32> to vector<2x32xf32>
    %46 = arith.addf %42, %45 : vector<2x32xf32>
    %c0_38 = arith.constant 0 : index
    %c0_39 = arith.constant 0 : index
    %c0_40 = arith.constant 0 : index
    %47 = vector.load %arg8[%c0_38, %c0_39, %c0_40] : memref<3x32x32xf32, #tpu.memory_space<vmem>>, vector<1x32x32xf32>
    %48 = vector.shape_cast %47 : vector<1x32x32xf32> to vector<32x32xf32>
    %cst_41 = arith.constant dense<0.000000e+00> : vector<2x32xf32>
    %49 = tpu.matmul %25, %48, %cst_41 {dimension_numbers = #tpu.dot_dimension_numbers<[1], [0], [0], [1], [0, 0, 1, 1], [], []>, precision = #tpu.contract_precision<fp32>} : vector<2x32xf32>, vector<32x32xf32>, vector<2x32xf32> -> vector<2x32xf32>
    %c0_42 = arith.constant 0 : index
    %c0_43 = arith.constant 0 : index
    %c0_44 = arith.constant 0 : index
    %50 = vector.load %arg10[%c0_42, %c0_43, %c0_44] : memref<3x1x32xf32, #tpu.memory_space<vmem>>, vector<1x1x32xf32>
    %51 = vector.shape_cast %50 : vector<1x1x32xf32> to vector<1x32xf32>
    %52 = vector.broadcast %51 : vector<1x32xf32> to vector<2x32xf32>
    %53 = arith.addf %49, %52 : vector<2x32xf32>
    %c1_45 = arith.constant 1 : index
    %c0_46 = arith.constant 0 : index
    %c0_47 = arith.constant 0 : index
    %54 = vector.load %arg8[%c1_45, %c0_46, %c0_47] : memref<3x32x32xf32, #tpu.memory_space<vmem>>, vector<1x32x32xf32>
    %55 = vector.shape_cast %54 : vector<1x32x32xf32> to vector<32x32xf32>
    %cst_48 = arith.constant dense<0.000000e+00> : vector<2x32xf32>
    %56 = tpu.matmul %25, %55, %cst_48 {dimension_numbers = #tpu.dot_dimension_numbers<[1], [0], [0], [1], [0, 0, 1, 1], [], []>, precision = #tpu.contract_precision<fp32>} : vector<2x32xf32>, vector<32x32xf32>, vector<2x32xf32> -> vector<2x32xf32>
    %c1_49 = arith.constant 1 : index
    %c0_50 = arith.constant 0 : index
    %c0_51 = arith.constant 0 : index
    %57 = vector.load %arg10[%c1_49, %c0_50, %c0_51] : memref<3x1x32xf32, #tpu.memory_space<vmem>>, vector<1x1x32xf32>
    %58 = vector.shape_cast %57 : vector<1x1x32xf32> to vector<1x32xf32>
    %59 = vector.broadcast %58 : vector<1x32xf32> to vector<2x32xf32>
    %60 = arith.addf %56, %59 : vector<2x32xf32>
    %c2_52 = arith.constant 2 : index
    %c0_53 = arith.constant 0 : index
    %c0_54 = arith.constant 0 : index
    %61 = vector.load %arg8[%c2_52, %c0_53, %c0_54] : memref<3x32x32xf32, #tpu.memory_space<vmem>>, vector<1x32x32xf32>
    %62 = vector.shape_cast %61 : vector<1x32x32xf32> to vector<32x32xf32>
    %cst_55 = arith.constant dense<0.000000e+00> : vector<2x32xf32>
    %63 = tpu.matmul %25, %62, %cst_55 {dimension_numbers = #tpu.dot_dimension_numbers<[1], [0], [0], [1], [0, 0, 1, 1], [], []>, precision = #tpu.contract_precision<fp32>} : vector<2x32xf32>, vector<32x32xf32>, vector<2x32xf32> -> vector<2x32xf32>
    %c2_56 = arith.constant 2 : index
    %c0_57 = arith.constant 0 : index
    %c0_58 = arith.constant 0 : index
    %64 = vector.load %arg10[%c2_56, %c0_57, %c0_58] : memref<3x1x32xf32, #tpu.memory_space<vmem>>, vector<1x1x32xf32>
    %65 = vector.shape_cast %64 : vector<1x1x32xf32> to vector<1x32xf32>
    %66 = vector.broadcast %65 : vector<1x32xf32> to vector<2x32xf32>
    %67 = arith.addf %63, %66 : vector<2x32xf32>
    %68 = arith.addf %32, %53 : vector<2x32xf32>
    %69 = arith.negf %68 : vector<2x32xf32>
    %70 = math.exp %69 : vector<2x32xf32>
    %cst_59 = arith.constant 1.000000e+00 : f32
    %71 = vector.broadcast %cst_59 : f32 to vector<2x32xf32>
    %72 = arith.addf %71, %70 : vector<2x32xf32>
    %73 = arith.divf %71, %72 : vector<2x32xf32>
    %74 = arith.addf %39, %60 : vector<2x32xf32>
    %75 = arith.negf %74 : vector<2x32xf32>
    %76 = math.exp %75 : vector<2x32xf32>
    %cst_60 = arith.constant 1.000000e+00 : f32
    %77 = vector.broadcast %cst_60 : f32 to vector<2x32xf32>
    %78 = arith.addf %77, %76 : vector<2x32xf32>
    %79 = arith.divf %77, %78 : vector<2x32xf32>
    %80 = arith.mulf %73, %67 : vector<2x32xf32>
    %81 = arith.addf %46, %80 : vector<2x32xf32>
    %82 = math.tanh %81 : vector<2x32xf32>
    %cst_61 = arith.constant 1.000000e+00 : f32
    %83 = vector.broadcast %cst_61 : f32 to vector<2x32xf32>
    %84 = arith.subf %83, %79 : vector<2x32xf32>
    %85 = arith.mulf %84, %82 : vector<2x32xf32>
    %86 = arith.mulf %79, %25 : vector<2x32xf32>
    %87 = arith.addf %85, %86 : vector<2x32xf32>
    %c0_62 = arith.constant 0 : index
    %c0_63 = arith.constant 0 : index
    %c0_64 = arith.constant 0 : index
    %88 = vector.load %arg24[%c0_62, %c0_63, %c0_64] : memref<2x2x32xf32, #tpu.memory_space<vmem>>, vector<1x2x32xf32>
    %89 = vector.shape_cast %88 : vector<1x2x32xf32> to vector<2x32xf32>
    %c0_65 = arith.constant 0 : index
    %c0_66 = arith.constant 0 : index
    %c0_67 = arith.constant 0 : index
    %90 = vector.load %arg7[%c0_65, %c0_66, %c0_67] : memref<3x32x32xf32, #tpu.memory_space<vmem>>, vector<1x32x32xf32>
    %91 = vector.shape_cast %90 : vector<1x32x32xf32> to vector<32x32xf32>
    %cst_68 = arith.constant dense<0.000000e+00> : vector<2x32xf32>
    %92 = tpu.matmul %23, %91, %cst_68 {dimension_numbers = #tpu.dot_dimension_numbers<[1], [0], [0], [1], [0, 0, 1, 1], [], []>, precision = #tpu.contract_precision<fp32>} : vector<2x32xf32>, vector<32x32xf32>, vector<2x32xf32> -> vector<2x32xf32>
    %c0_69 = arith.constant 0 : index
    %c0_70 = arith.constant 0 : index
    %c0_71 = arith.constant 0 : index
    %93 = vector.load %arg9[%c0_69, %c0_70, %c0_71] : memref<3x1x32xf32, #tpu.memory_space<vmem>>, vector<1x1x32xf32>
    %94 = vector.shape_cast %93 : vector<1x1x32xf32> to vector<1x32xf32>
    %95 = vector.broadcast %94 : vector<1x32xf32> to vector<2x32xf32>
    %96 = arith.addf %92, %95 : vector<2x32xf32>
    %c1_72 = arith.constant 1 : index
    %c0_73 = arith.constant 0 : index
    %c0_74 = arith.constant 0 : index
    %97 = vector.load %arg7[%c1_72, %c0_73, %c0_74] : memref<3x32x32xf32, #tpu.memory_space<vmem>>, vector<1x32x32xf32>
    %98 = vector.shape_cast %97 : vector<1x32x32xf32> to vector<32x32xf32>
    %cst_75 = arith.constant dense<0.000000e+00> : vector<2x32xf32>
    %99 = tpu.matmul %23, %98, %cst_75 {dimension_numbers = #tpu.dot_dimension_numbers<[1], [0], [0], [1], [0, 0, 1, 1], [], []>, precision = #tpu.contract_precision<fp32>} : vector<2x32xf32>, vector<32x32xf32>, vector<2x32xf32> -> vector<2x32xf32>
    %c1_76 = arith.constant 1 : index
    %c0_77 = arith.constant 0 : index
    %c0_78 = arith.constant 0 : index
    %100 = vector.load %arg9[%c1_76, %c0_77, %c0_78] : memref<3x1x32xf32, #tpu.memory_space<vmem>>, vector<1x1x32xf32>
    %101 = vector.shape_cast %100 : vector<1x1x32xf32> to vector<1x32xf32>
    %102 = vector.broadcast %101 : vector<1x32xf32> to vector<2x32xf32>
    %103 = arith.addf %99, %102 : vector<2x32xf32>
    %c2_79 = arith.constant 2 : index
    %c0_80 = arith.constant 0 : index
    %c0_81 = arith.constant 0 : index
    %104 = vector.load %arg7[%c2_79, %c0_80, %c0_81] : memref<3x32x32xf32, #tpu.memory_space<vmem>>, vector<1x32x32xf32>
    %105 = vector.shape_cast %104 : vector<1x32x32xf32> to vector<32x32xf32>
    %cst_82 = arith.constant dense<0.000000e+00> : vector<2x32xf32>
    %106 = tpu.matmul %23, %105, %cst_82 {dimension_numbers = #tpu.dot_dimension_numbers<[1], [0], [0], [1], [0, 0, 1, 1], [], []>, precision = #tpu.contract_precision<fp32>} : vector<2x32xf32>, vector<32x32xf32>, vector<2x32xf32> -> vector<2x32xf32>
    %c2_83 = arith.constant 2 : index
    %c0_84 = arith.constant 0 : index
    %c0_85 = arith.constant 0 : index
    %107 = vector.load %arg9[%c2_83, %c0_84, %c0_85] : memref<3x1x32xf32, #tpu.memory_space<vmem>>, vector<1x1x32xf32>
    %108 = vector.shape_cast %107 : vector<1x1x32xf32> to vector<1x32xf32>
    %109 = vector.broadcast %108 : vector<1x32xf32> to vector<2x32xf32>
    %110 = arith.addf %106, %109 : vector<2x32xf32>
    %c0_86 = arith.constant 0 : index
    %c0_87 = arith.constant 0 : index
    %c0_88 = arith.constant 0 : index
    %111 = vector.load %arg8[%c0_86, %c0_87, %c0_88] : memref<3x32x32xf32, #tpu.memory_space<vmem>>, vector<1x32x32xf32>
    %112 = vector.shape_cast %111 : vector<1x32x32xf32> to vector<32x32xf32>
    %cst_89 = arith.constant dense<0.000000e+00> : vector<2x32xf32>
    %113 = tpu.matmul %89, %112, %cst_89 {dimension_numbers = #tpu.dot_dimension_numbers<[1], [0], [0], [1], [0, 0, 1, 1], [], []>, precision = #tpu.contract_precision<fp32>} : vector<2x32xf32>, vector<32x32xf32>, vector<2x32xf32> -> vector<2x32xf32>
    %c0_90 = arith.constant 0 : index
    %c0_91 = arith.constant 0 : index
    %c0_92 = arith.constant 0 : index
    %114 = vector.load %arg10[%c0_90, %c0_91, %c0_92] : memref<3x1x32xf32, #tpu.memory_space<vmem>>, vector<1x1x32xf32>
    %115 = vector.shape_cast %114 : vector<1x1x32xf32> to vector<1x32xf32>
    %116 = vector.broadcast %115 : vector<1x32xf32> to vector<2x32xf32>
    %117 = arith.addf %113, %116 : vector<2x32xf32>
    %c1_93 = arith.constant 1 : index
    %c0_94 = arith.constant 0 : index
    %c0_95 = arith.constant 0 : index
    %118 = vector.load %arg8[%c1_93, %c0_94, %c0_95] : memref<3x32x32xf32, #tpu.memory_space<vmem>>, vector<1x32x32xf32>
    %119 = vector.shape_cast %118 : vector<1x32x32xf32> to vector<32x32xf32>
    %cst_96 = arith.constant dense<0.000000e+00> : vector<2x32xf32>
    %120 = tpu.matmul %89, %119, %cst_96 {dimension_numbers = #tpu.dot_dimension_numbers<[1], [0], [0], [1], [0, 0, 1, 1], [], []>, precision = #tpu.contract_precision<fp32>} : vector<2x32xf32>, vector<32x32xf32>, vector<2x32xf32> -> vector<2x32xf32>
    %c1_97 = arith.constant 1 : index
    %c0_98 = arith.constant 0 : index
    %c0_99 = arith.constant 0 : index
    %121 = vector.load %arg10[%c1_97, %c0_98, %c0_99] : memref<3x1x32xf32, #tpu.memory_space<vmem>>, vector<1x1x32xf32>
    %122 = vector.shape_cast %121 : vector<1x1x32xf32> to vector<1x32xf32>
    %123 = vector.broadcast %122 : vector<1x32xf32> to vector<2x32xf32>
    %124 = arith.addf %120, %123 : vector<2x32xf32>
    %c2_100 = arith.constant 2 : index
    %c0_101 = arith.constant 0 : index
    %c0_102 = arith.constant 0 : index
    %125 = vector.load %arg8[%c2_100, %c0_101, %c0_102] : memref<3x32x32xf32, #tpu.memory_space<vmem>>, vector<1x32x32xf32>
    %126 = vector.shape_cast %125 : vector<1x32x32xf32> to vector<32x32xf32>
    %cst_103 = arith.constant dense<0.000000e+00> : vector<2x32xf32>
    %127 = tpu.matmul %89, %126, %cst_103 {dimension_numbers = #tpu.dot_dimension_numbers<[1], [0], [0], [1], [0, 0, 1, 1], [], []>, precision = #tpu.contract_precision<fp32>} : vector<2x32xf32>, vector<32x32xf32>, vector<2x32xf32> -> vector<2x32xf32>
    %c2_104 = arith.constant 2 : index
    %c0_105 = arith.constant 0 : index
    %c0_106 = arith.constant 0 : index
    %128 = vector.load %arg10[%c2_104, %c0_105, %c0_106] : memref<3x1x32xf32, #tpu.memory_space<vmem>>, vector<1x1x32xf32>
    %129 = vector.shape_cast %128 : vector<1x1x32xf32> to vector<1x32xf32>
    %130 = vector.broadcast %129 : vector<1x32xf32> to vector<2x32xf32>
    %131 = arith.addf %127, %130 : vector<2x32xf32>
    %132 = arith.addf %96, %117 : vector<2x32xf32>
    %133 = arith.negf %132 : vector<2x32xf32>
    %134 = math.exp %133 : vector<2x32xf32>
    %cst_107 = arith.constant 1.000000e+00 : f32
    %135 = vector.broadcast %cst_107 : f32 to vector<2x32xf32>
    %136 = arith.addf %135, %134 : vector<2x32xf32>
    %137 = arith.divf %135, %136 : vector<2x32xf32>
    %138 = arith.addf %103, %124 : vector<2x32xf32>
    %139 = arith.negf %138 : vector<2x32xf32>
    %140 = math.exp %139 : vector<2x32xf32>
    %cst_108 = arith.constant 1.000000e+00 : f32
    %141 = vector.broadcast %cst_108 : f32 to vector<2x32xf32>
    %142 = arith.addf %141, %140 : vector<2x32xf32>
    %143 = arith.divf %141, %142 : vector<2x32xf32>
    %144 = arith.mulf %137, %131 : vector<2x32xf32>
    %145 = arith.addf %110, %144 : vector<2x32xf32>
    %146 = math.tanh %145 : vector<2x32xf32>
    %cst_109 = arith.constant 1.000000e+00 : f32
    %147 = vector.broadcast %cst_109 : f32 to vector<2x32xf32>
    %148 = arith.subf %147, %143 : vector<2x32xf32>
    %149 = arith.mulf %148, %146 : vector<2x32xf32>
    %150 = arith.mulf %143, %89 : vector<2x32xf32>
    %151 = arith.addf %149, %150 : vector<2x32xf32>
    %c0_110 = arith.constant 0 : index
    %c0_111 = arith.constant 0 : index
    %c0_112 = arith.constant 0 : index
    %152 = vector.load %arg25[%c0_110, %c0_111, %c0_112] : memref<2x2x32xf32, #tpu.memory_space<vmem>>, vector<1x2x32xf32>
    %153 = vector.shape_cast %152 : vector<1x2x32xf32> to vector<2x32xf32>
    %c0_113 = arith.constant 0 : index
    %c0_114 = arith.constant 0 : index
    %c0_115 = arith.constant 0 : index
    %154 = vector.load %arg11[%c0_113, %c0_114, %c0_115] : memref<3x32x32xf32, #tpu.memory_space<vmem>>, vector<1x32x32xf32>
    %155 = vector.shape_cast %154 : vector<1x32x32xf32> to vector<32x32xf32>
    %cst_116 = arith.constant dense<0.000000e+00> : vector<2x32xf32>
    %156 = tpu.matmul %12, %155, %cst_116 {dimension_numbers = #tpu.dot_dimension_numbers<[1], [0], [0], [1], [0, 0, 1, 1], [], []>, precision = #tpu.contract_precision<fp32>} : vector<2x32xf32>, vector<32x32xf32>, vector<2x32xf32> -> vector<2x32xf32>
    %c0_117 = arith.constant 0 : index
    %c0_118 = arith.constant 0 : index
    %c0_119 = arith.constant 0 : index
    %157 = vector.load %arg13[%c0_117, %c0_118, %c0_119] : memref<3x1x32xf32, #tpu.memory_space<vmem>>, vector<1x1x32xf32>
    %158 = vector.shape_cast %157 : vector<1x1x32xf32> to vector<1x32xf32>
    %159 = vector.broadcast %158 : vector<1x32xf32> to vector<2x32xf32>
    %160 = arith.addf %156, %159 : vector<2x32xf32>
    %c1_120 = arith.constant 1 : index
    %c0_121 = arith.constant 0 : index
    %c0_122 = arith.constant 0 : index
    %161 = vector.load %arg11[%c1_120, %c0_121, %c0_122] : memref<3x32x32xf32, #tpu.memory_space<vmem>>, vector<1x32x32xf32>
    %162 = vector.shape_cast %161 : vector<1x32x32xf32> to vector<32x32xf32>
    %cst_123 = arith.constant dense<0.000000e+00> : vector<2x32xf32>
    %163 = tpu.matmul %12, %162, %cst_123 {dimension_numbers = #tpu.dot_dimension_numbers<[1], [0], [0], [1], [0, 0, 1, 1], [], []>, precision = #tpu.contract_precision<fp32>} : vector<2x32xf32>, vector<32x32xf32>, vector<2x32xf32> -> vector<2x32xf32>
    %c1_124 = arith.constant 1 : index
    %c0_125 = arith.constant 0 : index
    %c0_126 = arith.constant 0 : index
    %164 = vector.load %arg13[%c1_124, %c0_125, %c0_126] : memref<3x1x32xf32, #tpu.memory_space<vmem>>, vector<1x1x32xf32>
    %165 = vector.shape_cast %164 : vector<1x1x32xf32> to vector<1x32xf32>
    %166 = vector.broadcast %165 : vector<1x32xf32> to vector<2x32xf32>
    %167 = arith.addf %163, %166 : vector<2x32xf32>
    %c2_127 = arith.constant 2 : index
    %c0_128 = arith.constant 0 : index
    %c0_129 = arith.constant 0 : index
    %168 = vector.load %arg11[%c2_127, %c0_128, %c0_129] : memref<3x32x32xf32, #tpu.memory_space<vmem>>, vector<1x32x32xf32>
    %169 = vector.shape_cast %168 : vector<1x32x32xf32> to vector<32x32xf32>
    %cst_130 = arith.constant dense<0.000000e+00> : vector<2x32xf32>
    %170 = tpu.matmul %12, %169, %cst_130 {dimension_numbers = #tpu.dot_dimension_numbers<[1], [0], [0], [1], [0, 0, 1, 1], [], []>, precision = #tpu.contract_precision<fp32>} : vector<2x32xf32>, vector<32x32xf32>, vector<2x32xf32> -> vector<2x32xf32>
    %c2_131 = arith.constant 2 : index
    %c0_132 = arith.constant 0 : index
    %c0_133 = arith.constant 0 : index
    %171 = vector.load %arg13[%c2_131, %c0_132, %c0_133] : memref<3x1x32xf32, #tpu.memory_space<vmem>>, vector<1x1x32xf32>
    %172 = vector.shape_cast %171 : vector<1x1x32xf32> to vector<1x32xf32>
    %173 = vector.broadcast %172 : vector<1x32xf32> to vector<2x32xf32>
    %174 = arith.addf %170, %173 : vector<2x32xf32>
    %c0_134 = arith.constant 0 : index
    %c0_135 = arith.constant 0 : index
    %c0_136 = arith.constant 0 : index
    %175 = vector.load %arg12[%c0_134, %c0_135, %c0_136] : memref<3x32x32xf32, #tpu.memory_space<vmem>>, vector<1x32x32xf32>
    %176 = vector.shape_cast %175 : vector<1x32x32xf32> to vector<32x32xf32>
    %cst_137 = arith.constant dense<0.000000e+00> : vector<2x32xf32>
    %177 = tpu.matmul %153, %176, %cst_137 {dimension_numbers = #tpu.dot_dimension_numbers<[1], [0], [0], [1], [0, 0, 1, 1], [], []>, precision = #tpu.contract_precision<fp32>} : vector<2x32xf32>, vector<32x32xf32>, vector<2x32xf32> -> vector<2x32xf32>
    %c0_138 = arith.constant 0 : index
    %c0_139 = arith.constant 0 : index
    %c0_140 = arith.constant 0 : index
    %178 = vector.load %arg14[%c0_138, %c0_139, %c0_140] : memref<3x1x32xf32, #tpu.memory_space<vmem>>, vector<1x1x32xf32>
    %179 = vector.shape_cast %178 : vector<1x1x32xf32> to vector<1x32xf32>
    %180 = vector.broadcast %179 : vector<1x32xf32> to vector<2x32xf32>
    %181 = arith.addf %177, %180 : vector<2x32xf32>
    %c1_141 = arith.constant 1 : index
    %c0_142 = arith.constant 0 : index
    %c0_143 = arith.constant 0 : index
    %182 = vector.load %arg12[%c1_141, %c0_142, %c0_143] : memref<3x32x32xf32, #tpu.memory_space<vmem>>, vector<1x32x32xf32>
    %183 = vector.shape_cast %182 : vector<1x32x32xf32> to vector<32x32xf32>
    %cst_144 = arith.constant dense<0.000000e+00> : vector<2x32xf32>
    %184 = tpu.matmul %153, %183, %cst_144 {dimension_numbers = #tpu.dot_dimension_numbers<[1], [0], [0], [1], [0, 0, 1, 1], [], []>, precision = #tpu.contract_precision<fp32>} : vector<2x32xf32>, vector<32x32xf32>, vector<2x32xf32> -> vector<2x32xf32>
    %c1_145 = arith.constant 1 : index
    %c0_146 = arith.constant 0 : index
    %c0_147 = arith.constant 0 : index
    %185 = vector.load %arg14[%c1_145, %c0_146, %c0_147] : memref<3x1x32xf32, #tpu.memory_space<vmem>>, vector<1x1x32xf32>
    %186 = vector.shape_cast %185 : vector<1x1x32xf32> to vector<1x32xf32>
    %187 = vector.broadcast %186 : vector<1x32xf32> to vector<2x32xf32>
    %188 = arith.addf %184, %187 : vector<2x32xf32>
    %c2_148 = arith.constant 2 : index
    %c0_149 = arith.constant 0 : index
    %c0_150 = arith.constant 0 : index
    %189 = vector.load %arg12[%c2_148, %c0_149, %c0_150] : memref<3x32x32xf32, #tpu.memory_space<vmem>>, vector<1x32x32xf32>
    %190 = vector.shape_cast %189 : vector<1x32x32xf32> to vector<32x32xf32>
    %cst_151 = arith.constant dense<0.000000e+00> : vector<2x32xf32>
    %191 = tpu.matmul %153, %190, %cst_151 {dimension_numbers = #tpu.dot_dimension_numbers<[1], [0], [0], [1], [0, 0, 1, 1], [], []>, precision = #tpu.contract_precision<fp32>} : vector<2x32xf32>, vector<32x32xf32>, vector<2x32xf32> -> vector<2x32xf32>
    %c2_152 = arith.constant 2 : index
    %c0_153 = arith.constant 0 : index
    %c0_154 = arith.constant 0 : index
    %192 = vector.load %arg14[%c2_152, %c0_153, %c0_154] : memref<3x1x32xf32, #tpu.memory_space<vmem>>, vector<1x1x32xf32>
    %193 = vector.shape_cast %192 : vector<1x1x32xf32> to vector<1x32xf32>
    %194 = vector.broadcast %193 : vector<1x32xf32> to vector<2x32xf32>
    %195 = arith.addf %191, %194 : vector<2x32xf32>
    %196 = arith.addf %160, %181 : vector<2x32xf32>
    %197 = arith.negf %196 : vector<2x32xf32>
    %198 = math.exp %197 : vector<2x32xf32>
    %cst_155 = arith.constant 1.000000e+00 : f32
    %199 = vector.broadcast %cst_155 : f32 to vector<2x32xf32>
    %200 = arith.addf %199, %198 : vector<2x32xf32>
    %201 = arith.divf %199, %200 : vector<2x32xf32>
    %202 = arith.addf %167, %188 : vector<2x32xf32>
    %203 = arith.negf %202 : vector<2x32xf32>
    %204 = math.exp %203 : vector<2x32xf32>
    %cst_156 = arith.constant 1.000000e+00 : f32
    %205 = vector.broadcast %cst_156 : f32 to vector<2x32xf32>
    %206 = arith.addf %205, %204 : vector<2x32xf32>
    %207 = arith.divf %205, %206 : vector<2x32xf32>
    %208 = arith.mulf %201, %195 : vector<2x32xf32>
    %209 = arith.addf %174, %208 : vector<2x32xf32>
    %210 = math.tanh %209 : vector<2x32xf32>
    %cst_157 = arith.constant 1.000000e+00 : f32
    %211 = vector.broadcast %cst_157 : f32 to vector<2x32xf32>
    %212 = arith.subf %211, %207 : vector<2x32xf32>
    %213 = arith.mulf %212, %210 : vector<2x32xf32>
    %214 = arith.mulf %207, %153 : vector<2x32xf32>
    %215 = arith.addf %213, %214 : vector<2x32xf32>
    %c0_158 = arith.constant 0 : index
    %c0_159 = arith.constant 0 : index
    %c0_160 = arith.constant 0 : index
    %216 = vector.load %arg26[%c0_158, %c0_159, %c0_160] : memref<2x2x32xf32, #tpu.memory_space<vmem>>, vector<1x2x32xf32>
    %217 = vector.shape_cast %216 : vector<1x2x32xf32> to vector<2x32xf32>
    %c0_161 = arith.constant 0 : index
    %c0_162 = arith.constant 0 : index
    %c0_163 = arith.constant 0 : index
    %218 = vector.load %arg11[%c0_161, %c0_162, %c0_163] : memref<3x32x32xf32, #tpu.memory_space<vmem>>, vector<1x32x32xf32>
    %219 = vector.shape_cast %218 : vector<1x32x32xf32> to vector<32x32xf32>
    %cst_164 = arith.constant dense<0.000000e+00> : vector<2x32xf32>
    %220 = tpu.matmul %23, %219, %cst_164 {dimension_numbers = #tpu.dot_dimension_numbers<[1], [0], [0], [1], [0, 0, 1, 1], [], []>, precision = #tpu.contract_precision<fp32>} : vector<2x32xf32>, vector<32x32xf32>, vector<2x32xf32> -> vector<2x32xf32>
    %c0_165 = arith.constant 0 : index
    %c0_166 = arith.constant 0 : index
    %c0_167 = arith.constant 0 : index
    %221 = vector.load %arg13[%c0_165, %c0_166, %c0_167] : memref<3x1x32xf32, #tpu.memory_space<vmem>>, vector<1x1x32xf32>
    %222 = vector.shape_cast %221 : vector<1x1x32xf32> to vector<1x32xf32>
    %223 = vector.broadcast %222 : vector<1x32xf32> to vector<2x32xf32>
    %224 = arith.addf %220, %223 : vector<2x32xf32>
    %c1_168 = arith.constant 1 : index
    %c0_169 = arith.constant 0 : index
    %c0_170 = arith.constant 0 : index
    %225 = vector.load %arg11[%c1_168, %c0_169, %c0_170] : memref<3x32x32xf32, #tpu.memory_space<vmem>>, vector<1x32x32xf32>
    %226 = vector.shape_cast %225 : vector<1x32x32xf32> to vector<32x32xf32>
    %cst_171 = arith.constant dense<0.000000e+00> : vector<2x32xf32>
    %227 = tpu.matmul %23, %226, %cst_171 {dimension_numbers = #tpu.dot_dimension_numbers<[1], [0], [0], [1], [0, 0, 1, 1], [], []>, precision = #tpu.contract_precision<fp32>} : vector<2x32xf32>, vector<32x32xf32>, vector<2x32xf32> -> vector<2x32xf32>
    %c1_172 = arith.constant 1 : index
    %c0_173 = arith.constant 0 : index
    %c0_174 = arith.constant 0 : index
    %228 = vector.load %arg13[%c1_172, %c0_173, %c0_174] : memref<3x1x32xf32, #tpu.memory_space<vmem>>, vector<1x1x32xf32>
    %229 = vector.shape_cast %228 : vector<1x1x32xf32> to vector<1x32xf32>
    %230 = vector.broadcast %229 : vector<1x32xf32> to vector<2x32xf32>
    %231 = arith.addf %227, %230 : vector<2x32xf32>
    %c2_175 = arith.constant 2 : index
    %c0_176 = arith.constant 0 : index
    %c0_177 = arith.constant 0 : index
    %232 = vector.load %arg11[%c2_175, %c0_176, %c0_177] : memref<3x32x32xf32, #tpu.memory_space<vmem>>, vector<1x32x32xf32>
    %233 = vector.shape_cast %232 : vector<1x32x32xf32> to vector<32x32xf32>
    %cst_178 = arith.constant dense<0.000000e+00> : vector<2x32xf32>
    %234 = tpu.matmul %23, %233, %cst_178 {dimension_numbers = #tpu.dot_dimension_numbers<[1], [0], [0], [1], [0, 0, 1, 1], [], []>, precision = #tpu.contract_precision<fp32>} : vector<2x32xf32>, vector<32x32xf32>, vector<2x32xf32> -> vector<2x32xf32>
    %c2_179 = arith.constant 2 : index
    %c0_180 = arith.constant 0 : index
    %c0_181 = arith.constant 0 : index
    %235 = vector.load %arg13[%c2_179, %c0_180, %c0_181] : memref<3x1x32xf32, #tpu.memory_space<vmem>>, vector<1x1x32xf32>
    %236 = vector.shape_cast %235 : vector<1x1x32xf32> to vector<1x32xf32>
    %237 = vector.broadcast %236 : vector<1x32xf32> to vector<2x32xf32>
    %238 = arith.addf %234, %237 : vector<2x32xf32>
    %c0_182 = arith.constant 0 : index
    %c0_183 = arith.constant 0 : index
    %c0_184 = arith.constant 0 : index
    %239 = vector.load %arg12[%c0_182, %c0_183, %c0_184] : memref<3x32x32xf32, #tpu.memory_space<vmem>>, vector<1x32x32xf32>
    %240 = vector.shape_cast %239 : vector<1x32x32xf32> to vector<32x32xf32>
    %cst_185 = arith.constant dense<0.000000e+00> : vector<2x32xf32>
    %241 = tpu.matmul %217, %240, %cst_185 {dimension_numbers = #tpu.dot_dimension_numbers<[1], [0], [0], [1], [0, 0, 1, 1], [], []>, precision = #tpu.contract_precision<fp32>} : vector<2x32xf32>, vector<32x32xf32>, vector<2x32xf32> -> vector<2x32xf32>
    %c0_186 = arith.constant 0 : index
    %c0_187 = arith.constant 0 : index
    %c0_188 = arith.constant 0 : index
    %242 = vector.load %arg14[%c0_186, %c0_187, %c0_188] : memref<3x1x32xf32, #tpu.memory_space<vmem>>, vector<1x1x32xf32>
    %243 = vector.shape_cast %242 : vector<1x1x32xf32> to vector<1x32xf32>
    %244 = vector.broadcast %243 : vector<1x32xf32> to vector<2x32xf32>
    %245 = arith.addf %241, %244 : vector<2x32xf32>
    %c1_189 = arith.constant 1 : index
    %c0_190 = arith.constant 0 : index
    %c0_191 = arith.constant 0 : index
    %246 = vector.load %arg12[%c1_189, %c0_190, %c0_191] : memref<3x32x32xf32, #tpu.memory_space<vmem>>, vector<1x32x32xf32>
    %247 = vector.shape_cast %246 : vector<1x32x32xf32> to vector<32x32xf32>
    %cst_192 = arith.constant dense<0.000000e+00> : vector<2x32xf32>
    %248 = tpu.matmul %217, %247, %cst_192 {dimension_numbers = #tpu.dot_dimension_numbers<[1], [0], [0], [1], [0, 0, 1, 1], [], []>, precision = #tpu.contract_precision<fp32>} : vector<2x32xf32>, vector<32x32xf32>, vector<2x32xf32> -> vector<2x32xf32>
    %c1_193 = arith.constant 1 : index
    %c0_194 = arith.constant 0 : index
    %c0_195 = arith.constant 0 : index
    %249 = vector.load %arg14[%c1_193, %c0_194, %c0_195] : memref<3x1x32xf32, #tpu.memory_space<vmem>>, vector<1x1x32xf32>
    %250 = vector.shape_cast %249 : vector<1x1x32xf32> to vector<1x32xf32>
    %251 = vector.broadcast %250 : vector<1x32xf32> to vector<2x32xf32>
    %252 = arith.addf %248, %251 : vector<2x32xf32>
    %c2_196 = arith.constant 2 : index
    %c0_197 = arith.constant 0 : index
    %c0_198 = arith.constant 0 : index
    %253 = vector.load %arg12[%c2_196, %c0_197, %c0_198] : memref<3x32x32xf32, #tpu.memory_space<vmem>>, vector<1x32x32xf32>
    %254 = vector.shape_cast %253 : vector<1x32x32xf32> to vector<32x32xf32>
    %cst_199 = arith.constant dense<0.000000e+00> : vector<2x32xf32>
    %255 = tpu.matmul %217, %254, %cst_199 {dimension_numbers = #tpu.dot_dimension_numbers<[1], [0], [0], [1], [0, 0, 1, 1], [], []>, precision = #tpu.contract_precision<fp32>} : vector<2x32xf32>, vector<32x32xf32>, vector<2x32xf32> -> vector<2x32xf32>
    %c2_200 = arith.constant 2 : index
    %c0_201 = arith.constant 0 : index
    %c0_202 = arith.constant 0 : index
    %256 = vector.load %arg14[%c2_200, %c0_201, %c0_202] : memref<3x1x32xf32, #tpu.memory_space<vmem>>, vector<1x1x32xf32>
    %257 = vector.shape_cast %256 : vector<1x1x32xf32> to vector<1x32xf32>
    %258 = vector.broadcast %257 : vector<1x32xf32> to vector<2x32xf32>
    %259 = arith.addf %255, %258 : vector<2x32xf32>
    %260 = arith.addf %224, %245 : vector<2x32xf32>
    %261 = arith.negf %260 : vector<2x32xf32>
    %262 = math.exp %261 : vector<2x32xf32>
    %cst_203 = arith.constant 1.000000e+00 : f32
    %263 = vector.broadcast %cst_203 : f32 to vector<2x32xf32>
    %264 = arith.addf %263, %262 : vector<2x32xf32>
    %265 = arith.divf %263, %264 : vector<2x32xf32>
    %266 = arith.addf %231, %252 : vector<2x32xf32>
    %267 = arith.negf %266 : vector<2x32xf32>
    %268 = math.exp %267 : vector<2x32xf32>
    %cst_204 = arith.constant 1.000000e+00 : f32
    %269 = vector.broadcast %cst_204 : f32 to vector<2x32xf32>
    %270 = arith.addf %269, %268 : vector<2x32xf32>
    %271 = arith.divf %269, %270 : vector<2x32xf32>
    %272 = arith.mulf %265, %259 : vector<2x32xf32>
    %273 = arith.addf %238, %272 : vector<2x32xf32>
    %274 = math.tanh %273 : vector<2x32xf32>
    %cst_205 = arith.constant 1.000000e+00 : f32
    %275 = vector.broadcast %cst_205 : f32 to vector<2x32xf32>
    %276 = arith.subf %275, %271 : vector<2x32xf32>
    %277 = arith.mulf %276, %274 : vector<2x32xf32>
    %278 = arith.mulf %271, %217 : vector<2x32xf32>
    %279 = arith.addf %277, %278 : vector<2x32xf32>
    %c0_206 = arith.constant 0 : index
    %c0_207 = arith.constant 0 : index
    %c0_208 = arith.constant 0 : index
    %280 = vector.load %arg37[%c0_206, %c0_207, %c0_208] : memref<2x2x32xf32, #tpu.memory_space<vmem>>, vector<1x2x32xf32>
    %281 = vector.shape_cast %280 : vector<1x2x32xf32> to vector<2x32xf32>
    %282 = vector.shape_cast %87 : vector<2x32xf32> to vector<1x2x32xf32>
    tpu.vector_store %arg37[%c0_206, %c0_207, %c0_208], %282 {strides = array<i32>} : memref<2x2x32xf32, #tpu.memory_space<vmem>>, vector<1x2x32xf32>,
    %c0_209 = arith.constant 0 : index
    %c0_210 = arith.constant 0 : index
    %c0_211 = arith.constant 0 : index
    %283 = vector.load %arg38[%c0_209, %c0_210, %c0_211] : memref<2x2x32xf32, #tpu.memory_space<vmem>>, vector<1x2x32xf32>
    %284 = vector.shape_cast %283 : vector<1x2x32xf32> to vector<2x32xf32>
    %285 = vector.shape_cast %151 : vector<2x32xf32> to vector<1x2x32xf32>
    tpu.vector_store %arg38[%c0_209, %c0_210, %c0_211], %285 {strides = array<i32>} : memref<2x2x32xf32, #tpu.memory_space<vmem>>, vector<1x2x32xf32>,
    %c0_212 = arith.constant 0 : index
    %c0_213 = arith.constant 0 : index
    %c0_214 = arith.constant 0 : index
    %286 = vector.load %arg39[%c0_212, %c0_213, %c0_214] : memref<2x2x32xf32, #tpu.memory_space<vmem>>, vector<1x2x32xf32>
    %287 = vector.shape_cast %286 : vector<1x2x32xf32> to vector<2x32xf32>
    %288 = vector.shape_cast %215 : vector<2x32xf32> to vector<1x2x32xf32>
    tpu.vector_store %arg39[%c0_212, %c0_213, %c0_214], %288 {strides = array<i32>} : memref<2x2x32xf32, #tpu.memory_space<vmem>>, vector<1x2x32xf32>,
    %c0_215 = arith.constant 0 : index
    %c0_216 = arith.constant 0 : index
    %c0_217 = arith.constant 0 : index
    %289 = vector.load %arg40[%c0_215, %c0_216, %c0_217] : memref<2x2x32xf32, #tpu.memory_space<vmem>>, vector<1x2x32xf32>
    %290 = vector.shape_cast %289 : vector<1x2x32xf32> to vector<2x32xf32>
    %291 = vector.shape_cast %279 : vector<2x32xf32> to vector<1x2x32xf32>
    tpu.vector_store %arg40[%c0_215, %c0_216, %c0_217], %291 {strides = array<i32>} : memref<2x2x32xf32, #tpu.memory_space<vmem>>, vector<1x2x32xf32>,
    %c1_218 = arith.constant 1 : index
    %c0_219 = arith.constant 0 : index
    %c0_220 = arith.constant 0 : index
    %292 = vector.load %arg23[%c1_218, %c0_219, %c0_220] : memref<2x2x32xf32, #tpu.memory_space<vmem>>, vector<1x2x32xf32>
    %293 = vector.shape_cast %292 : vector<1x2x32xf32> to vector<2x32xf32>
    %c0_221 = arith.constant 0 : index
    %c0_222 = arith.constant 0 : index
    %c0_223 = arith.constant 0 : index
    %294 = vector.load %arg15[%c0_221, %c0_222, %c0_223] : memref<3x32x32xf32, #tpu.memory_space<vmem>>, vector<1x32x32xf32>
    %295 = vector.shape_cast %294 : vector<1x32x32xf32> to vector<32x32xf32>
    %cst_224 = arith.constant dense<0.000000e+00> : vector<2x32xf32>
    %296 = tpu.matmul %87, %295, %cst_224 {dimension_numbers = #tpu.dot_dimension_numbers<[1], [0], [0], [1], [0, 0, 1, 1], [], []>, precision = #tpu.contract_precision<fp32>} : vector<2x32xf32>, vector<32x32xf32>, vector<2x32xf32> -> vector<2x32xf32>
    %c0_225 = arith.constant 0 : index
    %c0_226 = arith.constant 0 : index
    %c0_227 = arith.constant 0 : index
    %297 = vector.load %arg17[%c0_225, %c0_226, %c0_227] : memref<3x1x32xf32, #tpu.memory_space<vmem>>, vector<1x1x32xf32>
    %298 = vector.shape_cast %297 : vector<1x1x32xf32> to vector<1x32xf32>
    %299 = vector.broadcast %298 : vector<1x32xf32> to vector<2x32xf32>
    %300 = arith.addf %296, %299 : vector<2x32xf32>
    %c1_228 = arith.constant 1 : index
    %c0_229 = arith.constant 0 : index
    %c0_230 = arith.constant 0 : index
    %301 = vector.load %arg15[%c1_228, %c0_229, %c0_230] : memref<3x32x32xf32, #tpu.memory_space<vmem>>, vector<1x32x32xf32>
    %302 = vector.shape_cast %301 : vector<1x32x32xf32> to vector<32x32xf32>
    %cst_231 = arith.constant dense<0.000000e+00> : vector<2x32xf32>
    %303 = tpu.matmul %87, %302, %cst_231 {dimension_numbers = #tpu.dot_dimension_numbers<[1], [0], [0], [1], [0, 0, 1, 1], [], []>, precision = #tpu.contract_precision<fp32>} : vector<2x32xf32>, vector<32x32xf32>, vector<2x32xf32> -> vector<2x32xf32>
    %c1_232 = arith.constant 1 : index
    %c0_233 = arith.constant 0 : index
    %c0_234 = arith.constant 0 : index
    %304 = vector.load %arg17[%c1_232, %c0_233, %c0_234] : memref<3x1x32xf32, #tpu.memory_space<vmem>>, vector<1x1x32xf32>
    %305 = vector.shape_cast %304 : vector<1x1x32xf32> to vector<1x32xf32>
    %306 = vector.broadcast %305 : vector<1x32xf32> to vector<2x32xf32>
    %307 = arith.addf %303, %306 : vector<2x32xf32>
    %c2_235 = arith.constant 2 : index
    %c0_236 = arith.constant 0 : index
    %c0_237 = arith.constant 0 : index
    %308 = vector.load %arg15[%c2_235, %c0_236, %c0_237] : memref<3x32x32xf32, #tpu.memory_space<vmem>>, vector<1x32x32xf32>
    %309 = vector.shape_cast %308 : vector<1x32x32xf32> to vector<32x32xf32>
    %cst_238 = arith.constant dense<0.000000e+00> : vector<2x32xf32>
    %310 = tpu.matmul %87, %309, %cst_238 {dimension_numbers = #tpu.dot_dimension_numbers<[1], [0], [0], [1], [0, 0, 1, 1], [], []>, precision = #tpu.contract_precision<fp32>} : vector<2x32xf32>, vector<32x32xf32>, vector<2x32xf32> -> vector<2x32xf32>
    %c2_239 = arith.constant 2 : index
    %c0_240 = arith.constant 0 : index
    %c0_241 = arith.constant 0 : index
    %311 = vector.load %arg17[%c2_239, %c0_240, %c0_241] : memref<3x1x32xf32, #tpu.memory_space<vmem>>, vector<1x1x32xf32>
    %312 = vector.shape_cast %311 : vector<1x1x32xf32> to vector<1x32xf32>
    %313 = vector.broadcast %312 : vector<1x32xf32> to vector<2x32xf32>
    %314 = arith.addf %310, %313 : vector<2x32xf32>
    %c0_242 = arith.constant 0 : index
    %c0_243 = arith.constant 0 : index
    %c0_244 = arith.constant 0 : index
    %315 = vector.load %arg16[%c0_242, %c0_243, %c0_244] : memref<3x32x32xf32, #tpu.memory_space<vmem>>, vector<1x32x32xf32>
    %316 = vector.shape_cast %315 : vector<1x32x32xf32> to vector<32x32xf32>
    %cst_245 = arith.constant dense<0.000000e+00> : vector<2x32xf32>
    %317 = tpu.matmul %293, %316, %cst_245 {dimension_numbers = #tpu.dot_dimension_numbers<[1], [0], [0], [1], [0, 0, 1, 1], [], []>, precision = #tpu.contract_precision<fp32>} : vector<2x32xf32>, vector<32x32xf32>, vector<2x32xf32> -> vector<2x32xf32>
    %c0_246 = arith.constant 0 : index
    %c0_247 = arith.constant 0 : index
    %c0_248 = arith.constant 0 : index
    %318 = vector.load %arg18[%c0_246, %c0_247, %c0_248] : memref<3x1x32xf32, #tpu.memory_space<vmem>>, vector<1x1x32xf32>
    %319 = vector.shape_cast %318 : vector<1x1x32xf32> to vector<1x32xf32>
    %320 = vector.broadcast %319 : vector<1x32xf32> to vector<2x32xf32>
    %321 = arith.addf %317, %320 : vector<2x32xf32>
    %c1_249 = arith.constant 1 : index
    %c0_250 = arith.constant 0 : index
    %c0_251 = arith.constant 0 : index
    %322 = vector.load %arg16[%c1_249, %c0_250, %c0_251] : memref<3x32x32xf32, #tpu.memory_space<vmem>>, vector<1x32x32xf32>
    %323 = vector.shape_cast %322 : vector<1x32x32xf32> to vector<32x32xf32>
    %cst_252 = arith.constant dense<0.000000e+00> : vector<2x32xf32>
    %324 = tpu.matmul %293, %323, %cst_252 {dimension_numbers = #tpu.dot_dimension_numbers<[1], [0], [0], [1], [0, 0, 1, 1], [], []>, precision = #tpu.contract_precision<fp32>} : vector<2x32xf32>, vector<32x32xf32>, vector<2x32xf32> -> vector<2x32xf32>
    %c1_253 = arith.constant 1 : index
    %c0_254 = arith.constant 0 : index
    %c0_255 = arith.constant 0 : index
    %325 = vector.load %arg18[%c1_253, %c0_254, %c0_255] : memref<3x1x32xf32, #tpu.memory_space<vmem>>, vector<1x1x32xf32>
    %326 = vector.shape_cast %325 : vector<1x1x32xf32> to vector<1x32xf32>
    %327 = vector.broadcast %326 : vector<1x32xf32> to vector<2x32xf32>
    %328 = arith.addf %324, %327 : vector<2x32xf32>
    %c2_256 = arith.constant 2 : index
    %c0_257 = arith.constant 0 : index
    %c0_258 = arith.constant 0 : index
    %329 = vector.load %arg16[%c2_256, %c0_257, %c0_258] : memref<3x32x32xf32, #tpu.memory_space<vmem>>, vector<1x32x32xf32>
    %330 = vector.shape_cast %329 : vector<1x32x32xf32> to vector<32x32xf32>
    %cst_259 = arith.constant dense<0.000000e+00> : vector<2x32xf32>
    %331 = tpu.matmul %293, %330, %cst_259 {dimension_numbers = #tpu.dot_dimension_numbers<[1], [0], [0], [1], [0, 0, 1, 1], [], []>, precision = #tpu.contract_precision<fp32>} : vector<2x32xf32>, vector<32x32xf32>, vector<2x32xf32> -> vector<2x32xf32>
    %c2_260 = arith.constant 2 : index
    %c0_261 = arith.constant 0 : index
    %c0_262 = arith.constant 0 : index
    %332 = vector.load %arg18[%c2_260, %c0_261, %c0_262] : memref<3x1x32xf32, #tpu.memory_space<vmem>>, vector<1x1x32xf32>
    %333 = vector.shape_cast %332 : vector<1x1x32xf32> to vector<1x32xf32>
    %334 = vector.broadcast %333 : vector<1x32xf32> to vector<2x32xf32>
    %335 = arith.addf %331, %334 : vector<2x32xf32>
    %336 = arith.addf %300, %321 : vector<2x32xf32>
    %337 = arith.negf %336 : vector<2x32xf32>
    %338 = math.exp %337 : vector<2x32xf32>
    %cst_263 = arith.constant 1.000000e+00 : f32
    %339 = vector.broadcast %cst_263 : f32 to vector<2x32xf32>
    %340 = arith.addf %339, %338 : vector<2x32xf32>
    %341 = arith.divf %339, %340 : vector<2x32xf32>
    %342 = arith.addf %307, %328 : vector<2x32xf32>
    %343 = arith.negf %342 : vector<2x32xf32>
    %344 = math.exp %343 : vector<2x32xf32>
    %cst_264 = arith.constant 1.000000e+00 : f32
    %345 = vector.broadcast %cst_264 : f32 to vector<2x32xf32>
    %346 = arith.addf %345, %344 : vector<2x32xf32>
    %347 = arith.divf %345, %346 : vector<2x32xf32>
    %348 = arith.mulf %341, %335 : vector<2x32xf32>
    %349 = arith.addf %314, %348 : vector<2x32xf32>
    %350 = math.tanh %349 : vector<2x32xf32>
    %cst_265 = arith.constant 1.000000e+00 : f32
    %351 = vector.broadcast %cst_265 : f32 to vector<2x32xf32>
    %352 = arith.subf %351, %347 : vector<2x32xf32>
    %353 = arith.mulf %352, %350 : vector<2x32xf32>
    %354 = arith.mulf %347, %293 : vector<2x32xf32>
    %355 = arith.addf %353, %354 : vector<2x32xf32>
    %c1_266 = arith.constant 1 : index
    %c0_267 = arith.constant 0 : index
    %c0_268 = arith.constant 0 : index
    %356 = vector.load %arg24[%c1_266, %c0_267, %c0_268] : memref<2x2x32xf32, #tpu.memory_space<vmem>>, vector<1x2x32xf32>
    %357 = vector.shape_cast %356 : vector<1x2x32xf32> to vector<2x32xf32>
    %c0_269 = arith.constant 0 : index
    %c0_270 = arith.constant 0 : index
    %c0_271 = arith.constant 0 : index
    %358 = vector.load %arg15[%c0_269, %c0_270, %c0_271] : memref<3x32x32xf32, #tpu.memory_space<vmem>>, vector<1x32x32xf32>
    %359 = vector.shape_cast %358 : vector<1x32x32xf32> to vector<32x32xf32>
    %cst_272 = arith.constant dense<0.000000e+00> : vector<2x32xf32>
    %360 = tpu.matmul %151, %359, %cst_272 {dimension_numbers = #tpu.dot_dimension_numbers<[1], [0], [0], [1], [0, 0, 1, 1], [], []>, precision = #tpu.contract_precision<fp32>} : vector<2x32xf32>, vector<32x32xf32>, vector<2x32xf32> -> vector<2x32xf32>
    %c0_273 = arith.constant 0 : index
    %c0_274 = arith.constant 0 : index
    %c0_275 = arith.constant 0 : index
    %361 = vector.load %arg17[%c0_273, %c0_274, %c0_275] : memref<3x1x32xf32, #tpu.memory_space<vmem>>, vector<1x1x32xf32>
    %362 = vector.shape_cast %361 : vector<1x1x32xf32> to vector<1x32xf32>
    %363 = vector.broadcast %362 : vector<1x32xf32> to vector<2x32xf32>
    %364 = arith.addf %360, %363 : vector<2x32xf32>
    %c1_276 = arith.constant 1 : index
    %c0_277 = arith.constant 0 : index
    %c0_278 = arith.constant 0 : index
    %365 = vector.load %arg15[%c1_276, %c0_277, %c0_278] : memref<3x32x32xf32, #tpu.memory_space<vmem>>, vector<1x32x32xf32>
    %366 = vector.shape_cast %365 : vector<1x32x32xf32> to vector<32x32xf32>
    %cst_279 = arith.constant dense<0.000000e+00> : vector<2x32xf32>
    %367 = tpu.matmul %151, %366, %cst_279 {dimension_numbers = #tpu.dot_dimension_numbers<[1], [0], [0], [1], [0, 0, 1, 1], [], []>, precision = #tpu.contract_precision<fp32>} : vector<2x32xf32>, vector<32x32xf32>, vector<2x32xf32> -> vector<2x32xf32>
    %c1_280 = arith.constant 1 : index
    %c0_281 = arith.constant 0 : index
    %c0_282 = arith.constant 0 : index
    %368 = vector.load %arg17[%c1_280, %c0_281, %c0_282] : memref<3x1x32xf32, #tpu.memory_space<vmem>>, vector<1x1x32xf32>
    %369 = vector.shape_cast %368 : vector<1x1x32xf32> to vector<1x32xf32>
    %370 = vector.broadcast %369 : vector<1x32xf32> to vector<2x32xf32>
    %371 = arith.addf %367, %370 : vector<2x32xf32>
    %c2_283 = arith.constant 2 : index
    %c0_284 = arith.constant 0 : index
    %c0_285 = arith.constant 0 : index
    %372 = vector.load %arg15[%c2_283, %c0_284, %c0_285] : memref<3x32x32xf32, #tpu.memory_space<vmem>>, vector<1x32x32xf32>
    %373 = vector.shape_cast %372 : vector<1x32x32xf32> to vector<32x32xf32>
    %cst_286 = arith.constant dense<0.000000e+00> : vector<2x32xf32>
    %374 = tpu.matmul %151, %373, %cst_286 {dimension_numbers = #tpu.dot_dimension_numbers<[1], [0], [0], [1], [0, 0, 1, 1], [], []>, precision = #tpu.contract_precision<fp32>} : vector<2x32xf32>, vector<32x32xf32>, vector<2x32xf32> -> vector<2x32xf32>
    %c2_287 = arith.constant 2 : index
    %c0_288 = arith.constant 0 : index
    %c0_289 = arith.constant 0 : index
    %375 = vector.load %arg17[%c2_287, %c0_288, %c0_289] : memref<3x1x32xf32, #tpu.memory_space<vmem>>, vector<1x1x32xf32>
    %376 = vector.shape_cast %375 : vector<1x1x32xf32> to vector<1x32xf32>
    %377 = vector.broadcast %376 : vector<1x32xf32> to vector<2x32xf32>
    %378 = arith.addf %374, %377 : vector<2x32xf32>
    %c0_290 = arith.constant 0 : index
    %c0_291 = arith.constant 0 : index
    %c0_292 = arith.constant 0 : index
    %379 = vector.load %arg16[%c0_290, %c0_291, %c0_292] : memref<3x32x32xf32, #tpu.memory_space<vmem>>, vector<1x32x32xf32>
    %380 = vector.shape_cast %379 : vector<1x32x32xf32> to vector<32x32xf32>
    %cst_293 = arith.constant dense<0.000000e+00> : vector<2x32xf32>
    %381 = tpu.matmul %357, %380, %cst_293 {dimension_numbers = #tpu.dot_dimension_numbers<[1], [0], [0], [1], [0, 0, 1, 1], [], []>, precision = #tpu.contract_precision<fp32>} : vector<2x32xf32>, vector<32x32xf32>, vector<2x32xf32> -> vector<2x32xf32>
    %c0_294 = arith.constant 0 : index
    %c0_295 = arith.constant 0 : index
    %c0_296 = arith.constant 0 : index
    %382 = vector.load %arg18[%c0_294, %c0_295, %c0_296] : memref<3x1x32xf32, #tpu.memory_space<vmem>>, vector<1x1x32xf32>
    %383 = vector.shape_cast %382 : vector<1x1x32xf32> to vector<1x32xf32>
    %384 = vector.broadcast %383 : vector<1x32xf32> to vector<2x32xf32>
    %385 = arith.addf %381, %384 : vector<2x32xf32>
    %c1_297 = arith.constant 1 : index
    %c0_298 = arith.constant 0 : index
    %c0_299 = arith.constant 0 : index
    %386 = vector.load %arg16[%c1_297, %c0_298, %c0_299] : memref<3x32x32xf32, #tpu.memory_space<vmem>>, vector<1x32x32xf32>
    %387 = vector.shape_cast %386 : vector<1x32x32xf32> to vector<32x32xf32>
    %cst_300 = arith.constant dense<0.000000e+00> : vector<2x32xf32>
    %388 = tpu.matmul %357, %387, %cst_300 {dimension_numbers = #tpu.dot_dimension_numbers<[1], [0], [0], [1], [0, 0, 1, 1], [], []>, precision = #tpu.contract_precision<fp32>} : vector<2x32xf32>, vector<32x32xf32>, vector<2x32xf32> -> vector<2x32xf32>
    %c1_301 = arith.constant 1 : index
    %c0_302 = arith.constant 0 : index
    %c0_303 = arith.constant 0 : index
    %389 = vector.load %arg18[%c1_301, %c0_302, %c0_303] : memref<3x1x32xf32, #tpu.memory_space<vmem>>, vector<1x1x32xf32>
    %390 = vector.shape_cast %389 : vector<1x1x32xf32> to vector<1x32xf32>
    %391 = vector.broadcast %390 : vector<1x32xf32> to vector<2x32xf32>
    %392 = arith.addf %388, %391 : vector<2x32xf32>
    %c2_304 = arith.constant 2 : index
    %c0_305 = arith.constant 0 : index
    %c0_306 = arith.constant 0 : index
    %393 = vector.load %arg16[%c2_304, %c0_305, %c0_306] : memref<3x32x32xf32, #tpu.memory_space<vmem>>, vector<1x32x32xf32>
    %394 = vector.shape_cast %393 : vector<1x32x32xf32> to vector<32x32xf32>
    %cst_307 = arith.constant dense<0.000000e+00> : vector<2x32xf32>
    %395 = tpu.matmul %357, %394, %cst_307 {dimension_numbers = #tpu.dot_dimension_numbers<[1], [0], [0], [1], [0, 0, 1, 1], [], []>, precision = #tpu.contract_precision<fp32>} : vector<2x32xf32>, vector<32x32xf32>, vector<2x32xf32> -> vector<2x32xf32>
    %c2_308 = arith.constant 2 : index
    %c0_309 = arith.constant 0 : index
    %c0_310 = arith.constant 0 : index
    %396 = vector.load %arg18[%c2_308, %c0_309, %c0_310] : memref<3x1x32xf32, #tpu.memory_space<vmem>>, vector<1x1x32xf32>
    %397 = vector.shape_cast %396 : vector<1x1x32xf32> to vector<1x32xf32>
    %398 = vector.broadcast %397 : vector<1x32xf32> to vector<2x32xf32>
    %399 = arith.addf %395, %398 : vector<2x32xf32>
    %400 = arith.addf %364, %385 : vector<2x32xf32>
    %401 = arith.negf %400 : vector<2x32xf32>
    %402 = math.exp %401 : vector<2x32xf32>
    %cst_311 = arith.constant 1.000000e+00 : f32
    %403 = vector.broadcast %cst_311 : f32 to vector<2x32xf32>
    %404 = arith.addf %403, %402 : vector<2x32xf32>
    %405 = arith.divf %403, %404 : vector<2x32xf32>
    %406 = arith.addf %371, %392 : vector<2x32xf32>
    %407 = arith.negf %406 : vector<2x32xf32>
    %408 = math.exp %407 : vector<2x32xf32>
    %cst_312 = arith.constant 1.000000e+00 : f32
    %409 = vector.broadcast %cst_312 : f32 to vector<2x32xf32>
    %410 = arith.addf %409, %408 : vector<2x32xf32>
    %411 = arith.divf %409, %410 : vector<2x32xf32>
    %412 = arith.mulf %405, %399 : vector<2x32xf32>
    %413 = arith.addf %378, %412 : vector<2x32xf32>
    %414 = math.tanh %413 : vector<2x32xf32>
    %cst_313 = arith.constant 1.000000e+00 : f32
    %415 = vector.broadcast %cst_313 : f32 to vector<2x32xf32>
    %416 = arith.subf %415, %411 : vector<2x32xf32>
    %417 = arith.mulf %416, %414 : vector<2x32xf32>
    %418 = arith.mulf %411, %357 : vector<2x32xf32>
    %419 = arith.addf %417, %418 : vector<2x32xf32>
    %c1_314 = arith.constant 1 : index
    %c0_315 = arith.constant 0 : index
    %c0_316 = arith.constant 0 : index
    %420 = vector.load %arg25[%c1_314, %c0_315, %c0_316] : memref<2x2x32xf32, #tpu.memory_space<vmem>>, vector<1x2x32xf32>
    %421 = vector.shape_cast %420 : vector<1x2x32xf32> to vector<2x32xf32>
    %c0_317 = arith.constant 0 : index
    %c0_318 = arith.constant 0 : index
    %c0_319 = arith.constant 0 : index
    %422 = vector.load %arg19[%c0_317, %c0_318, %c0_319] : memref<3x32x32xf32, #tpu.memory_space<vmem>>, vector<1x32x32xf32>
    %423 = vector.shape_cast %422 : vector<1x32x32xf32> to vector<32x32xf32>
    %cst_320 = arith.constant dense<0.000000e+00> : vector<2x32xf32>
    %424 = tpu.matmul %215, %423, %cst_320 {dimension_numbers = #tpu.dot_dimension_numbers<[1], [0], [0], [1], [0, 0, 1, 1], [], []>, precision = #tpu.contract_precision<fp32>} : vector<2x32xf32>, vector<32x32xf32>, vector<2x32xf32> -> vector<2x32xf32>
    %c0_321 = arith.constant 0 : index
    %c0_322 = arith.constant 0 : index
    %c0_323 = arith.constant 0 : index
    %425 = vector.load %arg21[%c0_321, %c0_322, %c0_323] : memref<3x1x32xf32, #tpu.memory_space<vmem>>, vector<1x1x32xf32>
    %426 = vector.shape_cast %425 : vector<1x1x32xf32> to vector<1x32xf32>
    %427 = vector.broadcast %426 : vector<1x32xf32> to vector<2x32xf32>
    %428 = arith.addf %424, %427 : vector<2x32xf32>
    %c1_324 = arith.constant 1 : index
    %c0_325 = arith.constant 0 : index
    %c0_326 = arith.constant 0 : index
    %429 = vector.load %arg19[%c1_324, %c0_325, %c0_326] : memref<3x32x32xf32, #tpu.memory_space<vmem>>, vector<1x32x32xf32>
    %430 = vector.shape_cast %429 : vector<1x32x32xf32> to vector<32x32xf32>
    %cst_327 = arith.constant dense<0.000000e+00> : vector<2x32xf32>
    %431 = tpu.matmul %215, %430, %cst_327 {dimension_numbers = #tpu.dot_dimension_numbers<[1], [0], [0], [1], [0, 0, 1, 1], [], []>, precision = #tpu.contract_precision<fp32>} : vector<2x32xf32>, vector<32x32xf32>, vector<2x32xf32> -> vector<2x32xf32>
    %c1_328 = arith.constant 1 : index
    %c0_329 = arith.constant 0 : index
    %c0_330 = arith.constant 0 : index
    %432 = vector.load %arg21[%c1_328, %c0_329, %c0_330] : memref<3x1x32xf32, #tpu.memory_space<vmem>>, vector<1x1x32xf32>
    %433 = vector.shape_cast %432 : vector<1x1x32xf32> to vector<1x32xf32>
    %434 = vector.broadcast %433 : vector<1x32xf32> to vector<2x32xf32>
    %435 = arith.addf %431, %434 : vector<2x32xf32>
    %c2_331 = arith.constant 2 : index
    %c0_332 = arith.constant 0 : index
    %c0_333 = arith.constant 0 : index
    %436 = vector.load %arg19[%c2_331, %c0_332, %c0_333] : memref<3x32x32xf32, #tpu.memory_space<vmem>>, vector<1x32x32xf32>
    %437 = vector.shape_cast %436 : vector<1x32x32xf32> to vector<32x32xf32>
    %cst_334 = arith.constant dense<0.000000e+00> : vector<2x32xf32>
    %438 = tpu.matmul %215, %437, %cst_334 {dimension_numbers = #tpu.dot_dimension_numbers<[1], [0], [0], [1], [0, 0, 1, 1], [], []>, precision = #tpu.contract_precision<fp32>} : vector<2x32xf32>, vector<32x32xf32>, vector<2x32xf32> -> vector<2x32xf32>
    %c2_335 = arith.constant 2 : index
    %c0_336 = arith.constant 0 : index
    %c0_337 = arith.constant 0 : index
    %439 = vector.load %arg21[%c2_335, %c0_336, %c0_337] : memref<3x1x32xf32, #tpu.memory_space<vmem>>, vector<1x1x32xf32>
    %440 = vector.shape_cast %439 : vector<1x1x32xf32> to vector<1x32xf32>
    %441 = vector.broadcast %440 : vector<1x32xf32> to vector<2x32xf32>
    %442 = arith.addf %438, %441 : vector<2x32xf32>
    %c0_338 = arith.constant 0 : index
    %c0_339 = arith.constant 0 : index
    %c0_340 = arith.constant 0 : index
    %443 = vector.load %arg20[%c0_338, %c0_339, %c0_340] : memref<3x32x32xf32, #tpu.memory_space<vmem>>, vector<1x32x32xf32>
    %444 = vector.shape_cast %443 : vector<1x32x32xf32> to vector<32x32xf32>
    %cst_341 = arith.constant dense<0.000000e+00> : vector<2x32xf32>
    %445 = tpu.matmul %421, %444, %cst_341 {dimension_numbers = #tpu.dot_dimension_numbers<[1], [0], [0], [1], [0, 0, 1, 1], [], []>, precision = #tpu.contract_precision<fp32>} : vector<2x32xf32>, vector<32x32xf32>, vector<2x32xf32> -> vector<2x32xf32>
    %c0_342 = arith.constant 0 : index
    %c0_343 = arith.constant 0 : index
    %c0_344 = arith.constant 0 : index
    %446 = vector.load %arg22[%c0_342, %c0_343, %c0_344] : memref<3x1x32xf32, #tpu.memory_space<vmem>>, vector<1x1x32xf32>
    %447 = vector.shape_cast %446 : vector<1x1x32xf32> to vector<1x32xf32>
    %448 = vector.broadcast %447 : vector<1x32xf32> to vector<2x32xf32>
    %449 = arith.addf %445, %448 : vector<2x32xf32>
    %c1_345 = arith.constant 1 : index
    %c0_346 = arith.constant 0 : index
    %c0_347 = arith.constant 0 : index
    %450 = vector.load %arg20[%c1_345, %c0_346, %c0_347] : memref<3x32x32xf32, #tpu.memory_space<vmem>>, vector<1x32x32xf32>
    %451 = vector.shape_cast %450 : vector<1x32x32xf32> to vector<32x32xf32>
    %cst_348 = arith.constant dense<0.000000e+00> : vector<2x32xf32>
    %452 = tpu.matmul %421, %451, %cst_348 {dimension_numbers = #tpu.dot_dimension_numbers<[1], [0], [0], [1], [0, 0, 1, 1], [], []>, precision = #tpu.contract_precision<fp32>} : vector<2x32xf32>, vector<32x32xf32>, vector<2x32xf32> -> vector<2x32xf32>
    %c1_349 = arith.constant 1 : index
    %c0_350 = arith.constant 0 : index
    %c0_351 = arith.constant 0 : index
    %453 = vector.load %arg22[%c1_349, %c0_350, %c0_351] : memref<3x1x32xf32, #tpu.memory_space<vmem>>, vector<1x1x32xf32>
    %454 = vector.shape_cast %453 : vector<1x1x32xf32> to vector<1x32xf32>
    %455 = vector.broadcast %454 : vector<1x32xf32> to vector<2x32xf32>
    %456 = arith.addf %452, %455 : vector<2x32xf32>
    %c2_352 = arith.constant 2 : index
    %c0_353 = arith.constant 0 : index
    %c0_354 = arith.constant 0 : index
    %457 = vector.load %arg20[%c2_352, %c0_353, %c0_354] : memref<3x32x32xf32, #tpu.memory_space<vmem>>, vector<1x32x32xf32>
    %458 = vector.shape_cast %457 : vector<1x32x32xf32> to vector<32x32xf32>
    %cst_355 = arith.constant dense<0.000000e+00> : vector<2x32xf32>
    %459 = tpu.matmul %421, %458, %cst_355 {dimension_numbers = #tpu.dot_dimension_numbers<[1], [0], [0], [1], [0, 0, 1, 1], [], []>, precision = #tpu.contract_precision<fp32>} : vector<2x32xf32>, vector<32x32xf32>, vector<2x32xf32> -> vector<2x32xf32>
    %c2_356 = arith.constant 2 : index
    %c0_357 = arith.constant 0 : index
    %c0_358 = arith.constant 0 : index
    %460 = vector.load %arg22[%c2_356, %c0_357, %c0_358] : memref<3x1x32xf32, #tpu.memory_space<vmem>>, vector<1x1x32xf32>
    %461 = vector.shape_cast %460 : vector<1x1x32xf32> to vector<1x32xf32>
    %462 = vector.broadcast %461 : vector<1x32xf32> to vector<2x32xf32>
    %463 = arith.addf %459, %462 : vector<2x32xf32>
    %464 = arith.addf %428, %449 : vector<2x32xf32>
    %465 = arith.negf %464 : vector<2x32xf32>
    %466 = math.exp %465 : vector<2x32xf32>
    %cst_359 = arith.constant 1.000000e+00 : f32
    %467 = vector.broadcast %cst_359 : f32 to vector<2x32xf32>
    %468 = arith.addf %467, %466 : vector<2x32xf32>
    %469 = arith.divf %467, %468 : vector<2x32xf32>
    %470 = arith.addf %435, %456 : vector<2x32xf32>
    %471 = arith.negf %470 : vector<2x32xf32>
    %472 = math.exp %471 : vector<2x32xf32>
    %cst_360 = arith.constant 1.000000e+00 : f32
    %473 = vector.broadcast %cst_360 : f32 to vector<2x32xf32>
    %474 = arith.addf %473, %472 : vector<2x32xf32>
    %475 = arith.divf %473, %474 : vector<2x32xf32>
    %476 = arith.mulf %469, %463 : vector<2x32xf32>
    %477 = arith.addf %442, %476 : vector<2x32xf32>
    %478 = math.tanh %477 : vector<2x32xf32>
    %cst_361 = arith.constant 1.000000e+00 : f32
    %479 = vector.broadcast %cst_361 : f32 to vector<2x32xf32>
    %480 = arith.subf %479, %475 : vector<2x32xf32>
    %481 = arith.mulf %480, %478 : vector<2x32xf32>
    %482 = arith.mulf %475, %421 : vector<2x32xf32>
    %483 = arith.addf %481, %482 : vector<2x32xf32>
    %c1_362 = arith.constant 1 : index
    %c0_363 = arith.constant 0 : index
    %c0_364 = arith.constant 0 : index
    %484 = vector.load %arg26[%c1_362, %c0_363, %c0_364] : memref<2x2x32xf32, #tpu.memory_space<vmem>>, vector<1x2x32xf32>
    %485 = vector.shape_cast %484 : vector<1x2x32xf32> to vector<2x32xf32>
    %c0_365 = arith.constant 0 : index
    %c0_366 = arith.constant 0 : index
    %c0_367 = arith.constant 0 : index
    %486 = vector.load %arg19[%c0_365, %c0_366, %c0_367] : memref<3x32x32xf32, #tpu.memory_space<vmem>>, vector<1x32x32xf32>
    %487 = vector.shape_cast %486 : vector<1x32x32xf32> to vector<32x32xf32>
    %cst_368 = arith.constant dense<0.000000e+00> : vector<2x32xf32>
    %488 = tpu.matmul %279, %487, %cst_368 {dimension_numbers = #tpu.dot_dimension_numbers<[1], [0], [0], [1], [0, 0, 1, 1], [], []>, precision = #tpu.contract_precision<fp32>} : vector<2x32xf32>, vector<32x32xf32>, vector<2x32xf32> -> vector<2x32xf32>
    %c0_369 = arith.constant 0 : index
    %c0_370 = arith.constant 0 : index
    %c0_371 = arith.constant 0 : index
    %489 = vector.load %arg21[%c0_369, %c0_370, %c0_371] : memref<3x1x32xf32, #tpu.memory_space<vmem>>, vector<1x1x32xf32>
    %490 = vector.shape_cast %489 : vector<1x1x32xf32> to vector<1x32xf32>
    %491 = vector.broadcast %490 : vector<1x32xf32> to vector<2x32xf32>
    %492 = arith.addf %488, %491 : vector<2x32xf32>
    %c1_372 = arith.constant 1 : index
    %c0_373 = arith.constant 0 : index
    %c0_374 = arith.constant 0 : index
    %493 = vector.load %arg19[%c1_372, %c0_373, %c0_374] : memref<3x32x32xf32, #tpu.memory_space<vmem>>, vector<1x32x32xf32>
    %494 = vector.shape_cast %493 : vector<1x32x32xf32> to vector<32x32xf32>
    %cst_375 = arith.constant dense<0.000000e+00> : vector<2x32xf32>
    %495 = tpu.matmul %279, %494, %cst_375 {dimension_numbers = #tpu.dot_dimension_numbers<[1], [0], [0], [1], [0, 0, 1, 1], [], []>, precision = #tpu.contract_precision<fp32>} : vector<2x32xf32>, vector<32x32xf32>, vector<2x32xf32> -> vector<2x32xf32>
    %c1_376 = arith.constant 1 : index
    %c0_377 = arith.constant 0 : index
    %c0_378 = arith.constant 0 : index
    %496 = vector.load %arg21[%c1_376, %c0_377, %c0_378] : memref<3x1x32xf32, #tpu.memory_space<vmem>>, vector<1x1x32xf32>
    %497 = vector.shape_cast %496 : vector<1x1x32xf32> to vector<1x32xf32>
    %498 = vector.broadcast %497 : vector<1x32xf32> to vector<2x32xf32>
    %499 = arith.addf %495, %498 : vector<2x32xf32>
    %c2_379 = arith.constant 2 : index
    %c0_380 = arith.constant 0 : index
    %c0_381 = arith.constant 0 : index
    %500 = vector.load %arg19[%c2_379, %c0_380, %c0_381] : memref<3x32x32xf32, #tpu.memory_space<vmem>>, vector<1x32x32xf32>
    %501 = vector.shape_cast %500 : vector<1x32x32xf32> to vector<32x32xf32>
    %cst_382 = arith.constant dense<0.000000e+00> : vector<2x32xf32>
    %502 = tpu.matmul %279, %501, %cst_382 {dimension_numbers = #tpu.dot_dimension_numbers<[1], [0], [0], [1], [0, 0, 1, 1], [], []>, precision = #tpu.contract_precision<fp32>} : vector<2x32xf32>, vector<32x32xf32>, vector<2x32xf32> -> vector<2x32xf32>
    %c2_383 = arith.constant 2 : index
    %c0_384 = arith.constant 0 : index
    %c0_385 = arith.constant 0 : index
    %503 = vector.load %arg21[%c2_383, %c0_384, %c0_385] : memref<3x1x32xf32, #tpu.memory_space<vmem>>, vector<1x1x32xf32>
    %504 = vector.shape_cast %503 : vector<1x1x32xf32> to vector<1x32xf32>
    %505 = vector.broadcast %504 : vector<1x32xf32> to vector<2x32xf32>
    %506 = arith.addf %502, %505 : vector<2x32xf32>
    %c0_386 = arith.constant 0 : index
    %c0_387 = arith.constant 0 : index
    %c0_388 = arith.constant 0 : index
    %507 = vector.load %arg20[%c0_386, %c0_387, %c0_388] : memref<3x32x32xf32, #tpu.memory_space<vmem>>, vector<1x32x32xf32>
    %508 = vector.shape_cast %507 : vector<1x32x32xf32> to vector<32x32xf32>
    %cst_389 = arith.constant dense<0.000000e+00> : vector<2x32xf32>
    %509 = tpu.matmul %485, %508, %cst_389 {dimension_numbers = #tpu.dot_dimension_numbers<[1], [0], [0], [1], [0, 0, 1, 1], [], []>, precision = #tpu.contract_precision<fp32>} : vector<2x32xf32>, vector<32x32xf32>, vector<2x32xf32> -> vector<2x32xf32>
    %c0_390 = arith.constant 0 : index
    %c0_391 = arith.constant 0 : index
    %c0_392 = arith.constant 0 : index
    %510 = vector.load %arg22[%c0_390, %c0_391, %c0_392] : memref<3x1x32xf32, #tpu.memory_space<vmem>>, vector<1x1x32xf32>
    %511 = vector.shape_cast %510 : vector<1x1x32xf32> to vector<1x32xf32>
    %512 = vector.broadcast %511 : vector<1x32xf32> to vector<2x32xf32>
    %513 = arith.addf %509, %512 : vector<2x32xf32>
    %c1_393 = arith.constant 1 : index
    %c0_394 = arith.constant 0 : index
    %c0_395 = arith.constant 0 : index
    %514 = vector.load %arg20[%c1_393, %c0_394, %c0_395] : memref<3x32x32xf32, #tpu.memory_space<vmem>>, vector<1x32x32xf32>
    %515 = vector.shape_cast %514 : vector<1x32x32xf32> to vector<32x32xf32>
    %cst_396 = arith.constant dense<0.000000e+00> : vector<2x32xf32>
    %516 = tpu.matmul %485, %515, %cst_396 {dimension_numbers = #tpu.dot_dimension_numbers<[1], [0], [0], [1], [0, 0, 1, 1], [], []>, precision = #tpu.contract_precision<fp32>} : vector<2x32xf32>, vector<32x32xf32>, vector<2x32xf32> -> vector<2x32xf32>
    %c1_397 = arith.constant 1 : index
    %c0_398 = arith.constant 0 : index
    %c0_399 = arith.constant 0 : index
    %517 = vector.load %arg22[%c1_397, %c0_398, %c0_399] : memref<3x1x32xf32, #tpu.memory_space<vmem>>, vector<1x1x32xf32>
    %518 = vector.shape_cast %517 : vector<1x1x32xf32> to vector<1x32xf32>
    %519 = vector.broadcast %518 : vector<1x32xf32> to vector<2x32xf32>
    %520 = arith.addf %516, %519 : vector<2x32xf32>
    %c2_400 = arith.constant 2 : index
    %c0_401 = arith.constant 0 : index
    %c0_402 = arith.constant 0 : index
    %521 = vector.load %arg20[%c2_400, %c0_401, %c0_402] : memref<3x32x32xf32, #tpu.memory_space<vmem>>, vector<1x32x32xf32>
    %522 = vector.shape_cast %521 : vector<1x32x32xf32> to vector<32x32xf32>
    %cst_403 = arith.constant dense<0.000000e+00> : vector<2x32xf32>
    %523 = tpu.matmul %485, %522, %cst_403 {dimension_numbers = #tpu.dot_dimension_numbers<[1], [0], [0], [1], [0, 0, 1, 1], [], []>, precision = #tpu.contract_precision<fp32>} : vector<2x32xf32>, vector<32x32xf32>, vector<2x32xf32> -> vector<2x32xf32>
    %c2_404 = arith.constant 2 : index
    %c0_405 = arith.constant 0 : index
    %c0_406 = arith.constant 0 : index
    %524 = vector.load %arg22[%c2_404, %c0_405, %c0_406] : memref<3x1x32xf32, #tpu.memory_space<vmem>>, vector<1x1x32xf32>
    %525 = vector.shape_cast %524 : vector<1x1x32xf32> to vector<1x32xf32>
    %526 = vector.broadcast %525 : vector<1x32xf32> to vector<2x32xf32>
    %527 = arith.addf %523, %526 : vector<2x32xf32>
    %528 = arith.addf %492, %513 : vector<2x32xf32>
    %529 = arith.negf %528 : vector<2x32xf32>
    %530 = math.exp %529 : vector<2x32xf32>
    %cst_407 = arith.constant 1.000000e+00 : f32
    %531 = vector.broadcast %cst_407 : f32 to vector<2x32xf32>
    %532 = arith.addf %531, %530 : vector<2x32xf32>
    %533 = arith.divf %531, %532 : vector<2x32xf32>
    %534 = arith.addf %499, %520 : vector<2x32xf32>
    %535 = arith.negf %534 : vector<2x32xf32>
    %536 = math.exp %535 : vector<2x32xf32>
    %cst_408 = arith.constant 1.000000e+00 : f32
    %537 = vector.broadcast %cst_408 : f32 to vector<2x32xf32>
    %538 = arith.addf %537, %536 : vector<2x32xf32>
    %539 = arith.divf %537, %538 : vector<2x32xf32>
    %540 = arith.mulf %533, %527 : vector<2x32xf32>
    %541 = arith.addf %506, %540 : vector<2x32xf32>
    %542 = math.tanh %541 : vector<2x32xf32>
    %cst_409 = arith.constant 1.000000e+00 : f32
    %543 = vector.broadcast %cst_409 : f32 to vector<2x32xf32>
    %544 = arith.subf %543, %539 : vector<2x32xf32>
    %545 = arith.mulf %544, %542 : vector<2x32xf32>
    %546 = arith.mulf %539, %485 : vector<2x32xf32>
    %547 = arith.addf %545, %546 : vector<2x32xf32>
    %c1_410 = arith.constant 1 : index
    %c0_411 = arith.constant 0 : index
    %c0_412 = arith.constant 0 : index
    %548 = vector.load %arg37[%c1_410, %c0_411, %c0_412] : memref<2x2x32xf32, #tpu.memory_space<vmem>>, vector<1x2x32xf32>
    %549 = vector.shape_cast %548 : vector<1x2x32xf32> to vector<2x32xf32>
    %550 = vector.shape_cast %355 : vector<2x32xf32> to vector<1x2x32xf32>
    tpu.vector_store %arg37[%c1_410, %c0_411, %c0_412], %550 {strides = array<i32>} : memref<2x2x32xf32, #tpu.memory_space<vmem>>, vector<1x2x32xf32>,
    %c1_413 = arith.constant 1 : index
    %c0_414 = arith.constant 0 : index
    %c0_415 = arith.constant 0 : index
    %551 = vector.load %arg38[%c1_413, %c0_414, %c0_415] : memref<2x2x32xf32, #tpu.memory_space<vmem>>, vector<1x2x32xf32>
    %552 = vector.shape_cast %551 : vector<1x2x32xf32> to vector<2x32xf32>
    %553 = vector.shape_cast %419 : vector<2x32xf32> to vector<1x2x32xf32>
    tpu.vector_store %arg38[%c1_413, %c0_414, %c0_415], %553 {strides = array<i32>} : memref<2x2x32xf32, #tpu.memory_space<vmem>>, vector<1x2x32xf32>,
    %c1_416 = arith.constant 1 : index
    %c0_417 = arith.constant 0 : index
    %c0_418 = arith.constant 0 : index
    %554 = vector.load %arg39[%c1_416, %c0_417, %c0_418] : memref<2x2x32xf32, #tpu.memory_space<vmem>>, vector<1x2x32xf32>
    %555 = vector.shape_cast %554 : vector<1x2x32xf32> to vector<2x32xf32>
    %556 = vector.shape_cast %483 : vector<2x32xf32> to vector<1x2x32xf32>
    tpu.vector_store %arg39[%c1_416, %c0_417, %c0_418], %556 {strides = array<i32>} : memref<2x2x32xf32, #tpu.memory_space<vmem>>, vector<1x2x32xf32>,
    %c1_419 = arith.constant 1 : index
    %c0_420 = arith.constant 0 : index
    %c0_421 = arith.constant 0 : index
    %557 = vector.load %arg40[%c1_419, %c0_420, %c0_421] : memref<2x2x32xf32, #tpu.memory_space<vmem>>, vector<1x2x32xf32>
    %558 = vector.shape_cast %557 : vector<1x2x32xf32> to vector<2x32xf32>
    %559 = vector.shape_cast %547 : vector<2x32xf32> to vector<1x2x32xf32>
    tpu.vector_store %arg40[%c1_419, %c0_420, %c0_421], %559 {strides = array<i32>} : memref<2x2x32xf32, #tpu.memory_space<vmem>>, vector<1x2x32xf32>,
    %560 = arith.subf %355, %547 : vector<2x32xf32>
    %561 = arith.addf %483, %419 : vector<2x32xf32>
    %c0_422 = arith.constant 0 : index
    %c0_423 = arith.constant 0 : index
    %562 = vector.load %arg27[%c0_422, %c0_423] : memref<32x32xf32, #tpu.memory_space<vmem>>, vector<32x32xf32>
    %cst_424 = arith.constant dense<0.000000e+00> : vector<2x32xf32>
    %563 = tpu.matmul %560, %562, %cst_424 {dimension_numbers = #tpu.dot_dimension_numbers<[1], [0], [0], [1], [0, 0, 1, 1], [], []>, precision = #tpu.contract_precision<fp32>} : vector<2x32xf32>, vector<32x32xf32>, vector<2x32xf32> -> vector<2x32xf32>
    %c0_425 = arith.constant 0 : index
    %c0_426 = arith.constant 0 : index
    %564 = vector.load %arg29[%c0_425, %c0_426] : memref<1x32xf32, #tpu.memory_space<vmem>>, vector<1x32xf32>
    %565 = vector.broadcast %564 : vector<1x32xf32> to vector<2x32xf32>
    %566 = arith.addf %563, %565 : vector<2x32xf32>
    %cst_427 = arith.constant 0.000000e+00 : f32
    %567 = vector.broadcast %cst_427 : f32 to vector<2x32xf32>
    %568 = arith.cmpf oge, %566, %567 : vector<2x32xf32>
    %569 = vector.broadcast %1 : f32 to vector<2x32xf32>
    %570 = arith.mulf %569, %566 : vector<2x32xf32>
    %571 = arith.select %568, %566, %570 : vector<2x32xi1>, vector<2x32xf32>
    %c0_428 = arith.constant 0 : index
    %c0_429 = arith.constant 0 : index
    %572 = vector.load %arg28[%c0_428, %c0_429] : memref<32x32xf32, #tpu.memory_space<vmem>>, vector<32x32xf32>
    %cst_430 = arith.constant dense<0.000000e+00> : vector<2x32xf32>
    %573 = tpu.matmul %561, %572, %cst_430 {dimension_numbers = #tpu.dot_dimension_numbers<[1], [0], [0], [1], [0, 0, 1, 1], [], []>, precision = #tpu.contract_precision<fp32>} : vector<2x32xf32>, vector<32x32xf32>, vector<2x32xf32> -> vector<2x32xf32>
    %c0_431 = arith.constant 0 : index
    %c0_432 = arith.constant 0 : index
    %574 = vector.load %arg30[%c0_431, %c0_432] : memref<1x32xf32, #tpu.memory_space<vmem>>, vector<1x32xf32>
    %575 = vector.broadcast %574 : vector<1x32xf32> to vector<2x32xf32>
    %576 = arith.addf %573, %575 : vector<2x32xf32>
    %cst_433 = arith.constant 0.000000e+00 : f32
    %577 = vector.broadcast %cst_433 : f32 to vector<2x32xf32>
    %578 = arith.cmpf oge, %576, %577 : vector<2x32xf32>
    %579 = vector.broadcast %1 : f32 to vector<2x32xf32>
    %580 = arith.mulf %579, %576 : vector<2x32xf32>
    %581 = arith.select %578, %576, %580 : vector<2x32xi1>, vector<2x32xf32>
    %c0_434 = arith.constant 0 : index
    %c0_435 = arith.constant 0 : index
    %582 = vector.load %arg31[%c0_434, %c0_435] : memref<32x8xf32, #tpu.memory_space<vmem>>, vector<32x8xf32>
    %cst_436 = arith.constant dense<0.000000e+00> : vector<2x8xf32>
    %583 = tpu.matmul %571, %582, %cst_436 {dimension_numbers = #tpu.dot_dimension_numbers<[1], [0], [0], [1], [0, 0, 1, 1], [], []>, precision = #tpu.contract_precision<fp32>} : vector<2x32xf32>, vector<32x8xf32>, vector<2x8xf32> -> vector<2x8xf32>
    %c0_437 = arith.constant 0 : index
    %c0_438 = arith.constant 0 : index
    %584 = vector.load %arg33[%c0_437, %c0_438] : memref<1x8xf32, #tpu.memory_space<vmem>>, vector<1x8xf32>
    %585 = vector.broadcast %584 : vector<1x8xf32> to vector<2x8xf32>
    %586 = arith.addf %583, %585 : vector<2x8xf32>
    %c0_439 = arith.constant 0 : index
    %c0_440 = arith.constant 0 : index
    %587 = vector.load %arg35[%c0_439, %c0_440] : memref<2x8xf32, #tpu.memory_space<vmem>>, vector<2x8xf32>
    tpu.vector_store %arg35[%c0_439, %c0_440], %586 {strides = array<i32>} : memref<2x8xf32, #tpu.memory_space<vmem>>, vector<2x8xf32>,
    %c0_441 = arith.constant 0 : index
    %c0_442 = arith.constant 0 : index
    %588 = vector.load %arg32[%c0_441, %c0_442] : memref<32x8xf32, #tpu.memory_space<vmem>>, vector<32x8xf32>
    %cst_443 = arith.constant dense<0.000000e+00> : vector<2x8xf32>
    %589 = tpu.matmul %581, %588, %cst_443 {dimension_numbers = #tpu.dot_dimension_numbers<[1], [0], [0], [1], [0, 0, 1, 1], [], []>, precision = #tpu.contract_precision<fp32>} : vector<2x32xf32>, vector<32x8xf32>, vector<2x8xf32> -> vector<2x8xf32>
    %c0_444 = arith.constant 0 : index
    %c0_445 = arith.constant 0 : index
    %590 = vector.load %arg34[%c0_444, %c0_445] : memref<1x8xf32, #tpu.memory_space<vmem>>, vector<1x8xf32>
    %591 = vector.broadcast %590 : vector<1x8xf32> to vector<2x8xf32>
    %592 = arith.addf %589, %591 : vector<2x8xf32>
    %c0_446 = arith.constant 0 : index
    %c0_447 = arith.constant 0 : index
    %593 = vector.load %arg36[%c0_446, %c0_447] : memref<2x8xf32, #tpu.memory_space<vmem>>, vector<2x8xf32>
    tpu.vector_store %arg36[%c0_446, %c0_447], %592 {strides = array<i32>} : memref<2x8xf32, #tpu.memory_space<vmem>>, vector<2x8xf32>,
    return
  }
}

</mosaic_0001>

<bundles_post_ra>
// kernel: custom-call
= control target key start
LH: loop header
LB: loop body
LE: loop exit
PB: predicated region body
PF: predicated region fallthrough
CT: control target
= control target key end

     0   :  { %2 = vsyncpa [#allocation0], 0  ;;  %s61_s0 = inlined_call_operand.hbm [shape: c64[2,17], index: 0, kind: input, shape index: {}]   ;;  %s62_s1 = inlined_call_operand.vmem [shape: f32[2,17], index: 1, kind: output, shape index: {}]  }
   0x1   :  { %s3_s8 = sshll.u32 %s62_s1, 4  ;;  %s9_s11 = scalar_lea.hbm %s61_s0, 32  ;;  %s4_s8 = int_to_ptr.vmem [resolvable:$true] %s3_s8 }
   0x2   :  { %p10_p0 = scmp.ne.s32.totalorder %s61_s0, %s9_s11  ;;  %s11_s16 = scalar_lea.hbm %s61_s0, 64 }
   0x3   :  { %p12_p1 = scmp.lt.u32.totalorder %s11_s16, %s9_s11  ;;  %p13_p2 = scmp.lt.u32.totalorder %s9_s11, %s61_s0 }
   0x5   :  { %p14_p3 = por %p13_p2, %p12_p1 }
   0x7   :  { %p15_p4 = pnand %p14_p3, %p10_p0 }
   0x9   :  { %18 = shalt.err (!%p15_p4)  }
   0xa   :  { %s19_s1 = scalar_lea.vmem %s4_s8, 32  ;;  %p24_p6 = scmp.lt.s32.totalorder %s4_s8, %s4_s8 }
   0xb   :  { %p20_p5 = scmp.ne.s32.totalorder %s4_s8, %s19_s1  ;;  %p25_p7 = scmp.lt.s32.totalorder %s19_s1, %s19_s1 }
   0xd   :  { %p26_p8 = por %p25_p7, %p24_p6 }
   0xf   :  { %p27_p9 = pnand %p26_p8, %p20_p5 }
  0x11   :  { %30 = shalt.err (!%p27_p9)  }
  0x12   :  { %6 = dma.hbm_to_vmem [thread:$0]  %s61_s0, 32, %s4_s8, [#allocation0] }
  0x13   :  { %31 = dma.done.wait [#allocation0], 32  }
  0x14   :  { %32 = vsyncadd [#allocation0], 4294967264 }
  0x15   :  { %8 = vsyncpa [#allocation0], 1 }

// kernel: custom-call.1
= control target key start
LH: loop header
LB: loop body
LE: loop exit
PB: predicated region body
PF: predicated region fallthrough
CT: control target
= control target key end

     0   :  { %s59_s0 = inlined_call_operand.hbm [shape: c64[2,17], index: 0, kind: input, shape index: {}]   ;;  %s60_s1 = inlined_call_operand.vmem [shape: f32[2,17], index: 1, kind: output, shape index: {}]  }
   0x1   :  { %s2_s8 = scalar_lea.hbm %s59_s0, 32 }
   0x2   :  { %3 = vsyncpa [#allocation0], 0  ;;  %s4_s11 = sshll.u32 %s60_s1, 4  ;;  %s34_s14 = scalar_lea.hbm %s59_s0, 64  ;;  %s5_s11 = int_to_ptr.vmem [resolvable:$true] %s4_s11 }
   0x3   :  { %p11_p0 = scmp.ne.s32.totalorder %s2_s8, %s34_s14  ;;  %p13_p1 = scmp.lt.u32.totalorder %s2_s8, %s59_s0 }
   0x4   :  { %p14_p2 = scmp.lt.u32.totalorder %s34_s14, %s34_s14  ;;  %p16_p4 = scmp.lt.u32.totalorder %s34_s14, %s2_s8 }
   0x6   :  { %p15_p3 = por %p14_p2, %p13_p1 }
   0x8   :  { %p17_p5 = por %p16_p4, %p15_p3 }
   0xa   :  { %p18_p6 = pnand %p17_p5, %p11_p0 }
   0xc   :  { %21 = shalt.err (!%p18_p6)  }
   0xd   :  { %s22_s17 = scalar_lea.vmem %s5_s11, 32  ;;  %p27_p8 = scmp.lt.s32.totalorder %s5_s11, %s5_s11 }
   0xe   :  { %p23_p7 = scmp.ne.s32.totalorder %s5_s11, %s22_s17  ;;  %p28_p9 = scmp.lt.s32.totalorder %s22_s17, %s22_s17 }
  0x10   :  { %p29_p10 = por %p28_p9, %p27_p8 }
  0x12   :  { %p30_p11 = pnand %p29_p10, %p23_p7 }
  0x14   :  { %33 = shalt.err (!%p30_p11)  }
  0x15   :  { %7 = dma.hbm_to_vmem [thread:$0]  %s2_s8, 32, %s5_s11, [#allocation0] }
  0x16   :  { %35 = dma.done.wait [#allocation0], 32  }
  0x17   :  { %36 = vsyncadd [#allocation0], 4294967264 }
  0x18   :  { %9 = vsyncpa [#allocation0], 1 }

// kernel: custom-call.2
= control target key start
LH: loop header
LB: loop body
LE: loop exit
PB: predicated region body
PF: predicated region fallthrough
CT: control target
= control target key end

     0   :  { %s126_s0 = inlined_call_operand.vmem [shape: f32[2,8,1], index: 0, kind: input, shape index: {}]   ;;  %s127_s1 = inlined_call_operand.vmem [shape: f32[2,8,1], index: 1, kind: input, shape index: {}]   ;;  %s128_s2 = inlined_call_operand.hbm [shape: c64[2,8,1], index: 2, kind: output, shape index: {}]  }
   0x1   :  { %s87_s11 = scalar_lea.hbm %s128_s2, 32 }
   0x2   :  { %4 = vsyncpa [#allocation0], 0  ;;  %s5_s14 = sshll.u32 %s126_s0, 4  ;;  %s6_s14 = int_to_ptr.vmem [resolvable:$true] %s5_s14 }
   0x3   :  { %s18_s15 = scalar_lea.vmem %s6_s14, 32  ;;  %p23_p1 = scmp.lt.s32.totalorder %s6_s14, %s6_s14 }
   0x4   :  { %p19_p0 = scmp.ne.s32.totalorder %s6_s14, %s18_s15  ;;  %p24_p2 = scmp.lt.s32.totalorder %s18_s15, %s18_s15 }
   0x6   :  { %p25_p3 = por %p24_p2, %p23_p1 }
   0x8   :  { %p26_p4 = pnand %p25_p3, %p19_p0 }
   0xa   :  { %29 = shalt.err (!%p26_p4)  }
   0xb   :  { %p31_p5 = scmp.ne.s32.totalorder %s128_s2, %s87_s11  ;;  %s32_s0 = scalar_lea.hbm %s128_s2, 64 }
   0xc   :  { %p33_p6 = scmp.lt.u32.totalorder %s32_s0, %s87_s11  ;;  %p34_p7 = scmp.lt.u32.totalorder %s87_s11, %s128_s2 }
   0xe   :  { %p35_p8 = por %p34_p7, %p33_p6 }
  0x10   :  { %p36_p9 = pnand %p35_p8, %p31_p5 }
  0x12   :  { %39 = shalt.err (!%p36_p9)  }
  0x13   :  { %8 = dma.vmem_to_hbm [thread:$0]  %s6_s14, 32, %s128_s2, [#allocation0] }
  0x14   :  { %65 = dma.done.wait [#allocation0], 32  }
  0x15   :  { %66 = vsyncadd [#allocation0], 4294967264 }
  0x16   :  { %10 = vsyncpa [#allocation0], 1 }
  0x17   :  { %11 = vsyncpa [#allocation1], 0  ;;  %s12_s28 = sshll.u32 %s127_s1, 4  ;;  %s13_s28 = int_to_ptr.vmem [resolvable:$true] %s12_s28 }
  0x18   :  { %s40_s29 = scalar_lea.vmem %s13_s28, 32  ;;  %p45_p11 = scmp.lt.s32.totalorder %s13_s28, %s13_s28 }
  0x19   :  { %p41_p10 = scmp.ne.s32.totalorder %s13_s28, %s40_s29  ;;  %p46_p12 = scmp.lt.s32.totalorder %s40_s29, %s40_s29 }
  0x1b   :  { %p47_p13 = por %p46_p12, %p45_p11 }
  0x1d   :  { %p48_p0 = pnand %p47_p13, %p41_p10 }
  0x1f   :  { %51 = shalt.err (!%p48_p0)  }
  0x20   :  { %p53_p1 = scmp.ne.s32.totalorder %s87_s11, %s32_s0  ;;  %p56_p2 = scmp.lt.u32.totalorder %s32_s0, %s32_s0 }
  0x22   :  { %p57_p3 = por %p56_p2, %p34_p7 }
  0x24   :  { %p59_p4 = por %p57_p3, %p33_p6 }
  0x26   :  { %p60_p5 = pnand %p59_p4, %p53_p1 }
  0x28   :  { %63 = shalt.err (!%p60_p5)  }
  0x29   :  { %15 = dma.vmem_to_hbm [thread:$0]  %s13_s28, 32, %s87_s11, [#allocation1] }
  0x2a   :  { %67 = dma.done.wait [#allocation1], 32  }
  0x2b   :  { %68 = vsyncadd [#allocation1], 4294967264 }
  0x2c   :  { %17 = vsyncpa [#allocation1], 1 }

// kernel: kgnet_forward.1
= control target key start
LH: loop header
LB: loop body
LE: loop exit
PB: predicated region body
PF: predicated region fallthrough
CT: control target
= control target key end

     0   :  { %s35826_s6 = smov 1   ;;  %s35827_s10 = smov 2   ;;  %s40374_s0 = inlined_call_operand.smem [shape: u32[41], index: -1, kind: input, shape index: {}] }
   0x1   :  { %s35910_s5 = sld [smem:[%s40374_s0]]   ;;  %s35828_s14 = smov 3  }
   0x2   :  { %s35915_s9 = sld [smem:[%s40374_s0 + %s35826_s6]]   ;;  %s35829_s18 = smov 4  }
   0x3   :  { %s35920_s13 = sld [smem:[%s40374_s0 + %s35827_s10]]   ;;  %s35830_s22 = smov 5  }
   0x4   :  { %s35925_s17 = sld [smem:[%s40374_s0 + %s35828_s14]]   ;;  %s35831_s26 = smov 6  }
   0x5   :  { %s35930_s21 = sld [smem:[%s40374_s0 + %s35829_s18]]   ;;  %s35832_s30 = smov 7  }
   0x6   :  { %s35935_s25 = sld [smem:[%s40374_s0 + %s35830_s22]]   ;;  %s35833_s4 = smov 8  }
   0x7   :  { %40464 = sst [smem:[#allocation61_spill]] %s35910_s5  ;;  %s35834_s10 = smov 9  }
   0x8   :  { %40465 = sst [smem:[#allocation62_spill]] %s35915_s9  ;;  %s35835_s15 = smov 10  }
   0x9   :  { %s35940_s29 = sld [smem:[%s40374_s0 + %s35831_s26]]   ;;  %s35836_s20 = smov 11  }
   0xa   :  { %s35945_s3 = sld [smem:[%s40374_s0 + %s35832_s30]]   ;;  %s35837_s26 = smov 12  }
   0xb   :  { %40466 = sst [smem:[#allocation63_spill]] %s35930_s21  ;;  %s35838_s1 = smov 13  }
   0xc   :  { %s35950_s8 = sld [smem:[%s40374_s0 + %s35833_s4]]   ;;  %s35839_s7 = smov 14  }
   0xd   :  { %s35955_s14 = sld [smem:[%s40374_s0 + %s35834_s10]]   ;;  %s35841_s22 = smov 16  }
   0xe   :  { %s35960_s19 = sld [smem:[%s40374_s0 + %s35835_s15]]   ;;  %s35840_s15 = smov 15  }
   0xf   :  { %s35965_s24 = sld [smem:[%s40374_s0 + %s35836_s20]]   ;;  %s35842_s28 = smov 17  }
  0x10   :  { %40467 = sst [smem:[#allocation64_spill]] %s35945_s3 }
  0x11   :  { %s35970_s30 = sld [smem:[%s40374_s0 + %s35837_s26]]  }
  0x12   :  { %s35975_s6 = sld [smem:[%s40374_s0 + %s35838_s1]]  }
  0x13   :  { %s35980_s12 = sld [smem:[%s40374_s0 + %s35839_s7]]   ;;  %s35843_s7 = smov 18  }
  0x14   :  { %s35985_s20 = sld [smem:[%s40374_s0 + %s35840_s15]]   ;;  %s35844_s15 = smov 19  }
  0x15   :  { %40468 = sst [smem:[#allocation65_spill]] %s35965_s24 }
  0x16   :  { %s35990_s27 = sld [smem:[%s40374_s0 + %s35841_s22]]   ;;  %s35845_s22 = smov 20  }
  0x17   :  { %s35995_s4 = sld [smem:[%s40374_s0 + %s35842_s28]]   ;;  %s35846_s28 = smov 21  }
  0x18   :  { %40469 = sst [smem:[#allocation66_spill]] %s35975_s6 }
  0x19   :  { %s36000_s21 = sld [smem:[%s40374_s0 + %s35843_s7]]   ;;  %s35847_s7 = smov 22  }
  0x1a   :  { %40470 = sst [smem:[#allocation67_spill]] %s35985_s20 }
  0x1b   :  { %s36005_s3 = sld [smem:[%s40374_s0 + %s35844_s15]]   ;;  %s35848_s15 = smov 23  }
  0x1c   :  { %s36010_s9 = sld [smem:[%s40374_s0 + %s35845_s22]]   ;;  %s35849_s22 = smov 24  }
  0x1d   :  { %40471 = sst [smem:[#allocation68_spill]] %s35995_s4 }
  0x1e   :  { %s36015_s5 = sld [smem:[%s40374_s0 + %s35846_s28]]   ;;  %s35850_s28 = smov 25  }
  0x1f   :  { %s36020_s4 = sld [smem:[%s40374_s0 + %s35847_s7]]   ;;  %s35851_s7 = smov 26  }
  0x20   :  { %s36030_s20 = sld [smem:[%s40374_s0 + %s35849_s22]]   ;;  %s35853_s22 = smov 28  }
  0x21   :  { %40472 = sst [smem:[#allocation69_spill]] %s36005_s3 }
  0x22   :  { %s36025_s3 = sld [smem:[%s40374_s0 + %s35848_s15]]   ;;  %s35852_s15 = smov 27  }
  0x23   :  { %s36040_s6 = sld [smem:[%s40374_s0 + %s35851_s7]]   ;;  %s35855_s7 = smov 30  }
  0x24   :  { %40473 = sst [smem:[#allocation70_spill]] %s36015_s5 }
  0x25   :  { %s36035_s5 = sld [smem:[%s40374_s0 + %s35850_s28]]   ;;  %s35854_s28 = smov 29  }
  0x26   :  { %s36050_s24 = sld [smem:[%s40374_s0 + %s35853_s22]]   ;;  %s35857_s22 = smov 32  }
  0x28   :  { %40474 = sst [smem:[#allocation71_spill]] %s36025_s3 }
  0x29   :  { %40476 = sst [smem:[#allocation73_spill]] %s36040_s6 }
  0x2a   :  { %s36045_s3 = sld [smem:[%s40374_s0 + %s35852_s15]]   ;;  %s35856_s15 = smov 31  }
  0x2b   :  { %40475 = sst [smem:[#allocation72_spill]] %s36035_s5 }
  0x2c   :  { %40478 = sst [smem:[#allocation75_spill]] %s36050_s24 }
  0x2d   :  { %s36055_s5 = sld [smem:[%s40374_s0 + %s35854_s28]]   ;;  %s35858_s28 = smov 33  }
  0x2e   :  { %s36060_s6 = sld [smem:[%s40374_s0 + %s35855_s7]]   ;;  %s35859_s7 = smov 34  }
  0x2f   :  { %s36070_s24 = sld [smem:[%s40374_s0 + %s35857_s22]]   ;;  %s35861_s22 = smov 36  }
  0x30   :  { %40477 = sst [smem:[#allocation74_spill]] %s36045_s3 }
  0x31   :  { %s36065_s3 = sld [smem:[%s40374_s0 + %s35856_s15]]   ;;  %s35860_s15 = smov 35  }
  0x33   :  { %40479 = sst [smem:[#allocation76_spill]] %s36055_s5 }
  0x34   :  { %40480 = sst [smem:[#allocation77_spill]] %s36060_s6 }
  0x35   :  { %40482 = sst [smem:[#allocation79_spill]] %s36070_s24 }
  0x36   :  { %s36075_s5 = sld [smem:[%s40374_s0 + %s35858_s28]]   ;;  %s35862_s28 = smov 37  }
  0x37   :  { %40481 = sst [smem:[#allocation78_spill]] %s36065_s3 }
  0x38   :  { %s36080_s6 = sld [smem:[%s40374_s0 + %s35859_s7]]   ;;  %s35863_s7 = smov 38  }
  0x39   :  { %s36085_s3 = sld [smem:[%s40374_s0 + %s35860_s15]]   ;;  %s35864_s15 = smov 39  }
  0x3a   :  { %s36090_s24 = sld [smem:[%s40374_s0 + %s35861_s22]]   ;;  %s35865_s22 = smov 40  }
  0x3c   :  { %40483 = sst [smem:[#allocation80_spill]] %s36075_s5 }
  0x3d   :  { %s36095_s5 = sld [smem:[%s40374_s0 + %s35862_s28]]  }
  0x3e   :  { %40484 = sst [smem:[#allocation81_spill]] %s36080_s6 }
  0x3f   :  { %40485 = sst [smem:[#allocation82_spill]] %s36085_s3 }
  0x40   :  { %40486 = sst [smem:[#allocation83_spill]] %s36090_s24 }
  0x41   :  { %s36100_s6 = sld [smem:[%s40374_s0 + %s35863_s7]]  }
  0x42   :  { %s36105_s3 = sld [smem:[%s40374_s0 + %s35864_s15]]  }
  0x43   :  { %s36110_s24 = sld [smem:[%s40374_s0 + %s35865_s22]]  }
  0x44   :  { %87 = vsyncpa [#allocation3], 0 }
  0x45   :  { %88 = vsyncpa [#allocation7], 0 }
  0x46   :  { %89 = vsyncpa [#allocation5], 0 }
  0x47   :  { %90 = vsyncpa [#allocation11], 0 }
  0x48   :  { %91 = vsyncpa [#allocation14], 0 }
  0x49   :  { %92 = vsyncpa [#allocation17], 0 }
  0x4a   :  { %93 = vsyncpa [#allocation20], 0 }
  0x4b   :  { %94 = vsyncpa [#allocation23], 0 }
  0x4c   :  { %95 = vsyncpa [#allocation26], 0 }
  0x4d   :  { %96 = vsyncpa [#allocation29], 0 }
  0x4e   :  { %97 = vsyncpa [#allocation32], 0 }
  0x4f   :  { %98 = vsyncpa [#allocation35], 0 }
  0x50   :  { %99 = vsyncpa [#allocation38], 0 }
  0x51   :  { %100 = vsyncpa [#allocation4], 0 }
  0x52   :  { %101 = vsyncpa [#allocation41], 0 }
  0x53   :  { %102 = vsyncpa [#allocation44], 0  ;;  %s35866_s0 = smov [#allocation6]   ;;  %s35867_s1 = smov [#allocation10]  }
  0x54   :  { %s124_s28 = sshll.u32 %s35866_s0, 4  ;;  %s158_s2 = sshll.u32 %s35867_s1, 4  ;;  %s125_s28 = int_to_ptr.vmem [resolvable:$true] %s124_s28  ;;  %s36112_s2 = int_to_ptr.vmem [resolvable:$true] %s158_s2 }
  0x55   :  { %s35212_s7 = scalar_lea.hbm %s35925_s17, 384 }
  0x56   :  { %p35213_p0 = scmp.ne.s32.totalorder %s35925_s17, %s35212_s7  ;;  %p35216_p1 = scmp.lt.u32.totalorder %s35212_s7, %s35925_s17 }
  0x58   :  { %p35218_p2 = pnand %p35216_p1, %p35213_p0 }
  0x5a   :  { %35221 = shalt.err (!%p35218_p2)
}
  0x5b   :  { %s35222_s10 = scalar_lea.vmem %s125_s28, 384  ;;  %p35227_p4 = scmp.lt.s32.totalorder %s125_s28, %s125_s28 }
  0x5c   :  { %p35223_p3 = scmp.ne.s32.totalorder %s125_s28, %s35222_s10  ;;  %p35228_p5 = scmp.lt.s32.totalorder %s35222_s10, %s35222_s10 }
  0x5e   :  { %p35229_p6 = por %p35228_p5, %p35227_p4 }
  0x60   :  { %p35230_p7 = pnand %p35229_p6, %p35223_p3 }
  0x62   :  { %35233 = shalt.err (!%p35230_p7)
}
  0x63   :  { %s35868_s11 = smov 128   ;;  %s35869_s15 = smov 8  }
  0x64   :  { %130 = dma.hbm_to_vmem [thread:$0]  %s35925_s17, 384, %s125_s28, [#allocation7], %s35868_s11, %s35868_s11, %s35869_s15  }
  0x65   :  { %s35234_s16 = scalar_lea.hbm %s35950_s8, 1536 }
  0x66   :  { %p35235_p8 = scmp.ne.s32.totalorder %s35950_s8, %s35234_s16  ;;  %p35238_p9 = scmp.lt.u32.totalorder %s35234_s16, %s35950_s8 }
  0x68   :  { %p35240_p10 = pnand %p35238_p9, %p35235_p8 }
  0x6a   :  { %35243 = shalt.err (!%p35240_p10)
}
  0x6b   :  { %s35244_s18 = scalar_lea.vmem %s36112_s2, 1536  ;;  %p35249_p12 = scmp.lt.s32.totalorder %s36112_s2, %s36112_s2 }
  0x6c   :  { %p35245_p11 = scmp.ne.s32.totalorder %s36112_s2, %s35244_s18  ;;  %p35250_p13 = scmp.lt.s32.totalorder %s35244_s18, %s35244_s18 }
  0x6e   :  { %p35251_p0 = por %p35250_p13, %p35249_p12 }
  0x70   :  { %p35252_p1 = pnand %p35251_p0, %p35245_p11 }
  0x72   :  { %35255 = shalt.err (!%p35252_p1)
}
  0x73   :  { %164 = dma.hbm_to_vmem [thread:$0]  %s35950_s8, 1536, %s36112_s2, [#allocation11], %s35868_s11, %s35868_s11, %s35869_s15  }
  0x74   :  { %s35870_s17 = smov [#allocation13]   ;;  %s35871_s23 = smov [#allocation16]  }
  0x75   :  { %s182_s22 = sshll.u32 %s35870_s17, 4  ;;  %s206_s26 = sshll.u32 %s35871_s23, 4  ;;  %s183_s22 = int_to_ptr.vmem [resolvable:$true] %s182_s22  ;;  %s36133_s26 = int_to_ptr.vmem [resolvable:$true] %s206_s26 }
  0x76   :  { %s35256_s0 = scalar_lea.hbm %s35960_s19, 48 }
  0x77   :  { %p35257_p2 = scmp.ne.s32.totalorder %s35960_s19, %s35256_s0  ;;  %p35260_p3 = scmp.lt.u32.totalorder %s35256_s0, %s35960_s19 }
  0x79   :  { %p35262_p4 = pnand %p35260_p3, %p35257_p2 }
  0x7b   :  { %35265 = shalt.err (!%p35262_p4)
}
  0x7c   :  { %s35266_s28 = scalar_lea.vmem %s183_s22, 48  ;;  %s35270_s1 = scalar_lea.vmem %s183_s22, 64 }
  0x7d   :  { %p35267_p5 = scmp.ne.s32.totalorder %s183_s22, %s35266_s28  ;;  %p35271_p6 = scmp.lt.s32.totalorder %s183_s22, %s183_s22 }
  0x7e   :  { %p35272_p7 = scmp.lt.s32.totalorder %s35270_s1, %s35266_s28 }
  0x80   :  { %p35273_p8 = por %p35272_p7, %p35271_p6 }
  0x82   :  { %p35274_p9 = pnand %p35273_p8, %p35267_p5 }
  0x84   :  { %35277 = shalt.err (!%p35274_p9)
}
  0x85   :  { %s35872_s8 = smov 16   ;;  %s35873_s2 = smov 1  }
  0x86   :  { %188 = dma.hbm_to_vmem [thread:$0]  %s35960_s19, 48, %s183_s22, [#allocation14], %s35872_s8, %s35872_s8, %s35873_s2  }
  0x87   :  { %s35278_s7 = scalar_lea.hbm %s35970_s30, 1536 }
  0x88   :  { %p35279_p10 = scmp.ne.s32.totalorder %s35970_s30, %s35278_s7  ;;  %p35282_p11 = scmp.lt.u32.totalorder %s35278_s7, %s35970_s30 }
  0x8a   :  { %p35284_p12 = pnand %p35282_p11, %p35279_p10 }
  0x8c   :  { %35287 = shalt.err (!%p35284_p12)
}
  0x8d   :  { %s35288_s10 = scalar_lea.vmem %s36133_s26, 1536  ;;  %p35293_p0 = scmp.lt.s32.totalorder %s36133_s26, %s36133_s26 }
  0x8e   :  { %p35289_p13 = scmp.ne.s32.totalorder %s36133_s26, %s35288_s10  ;;  %p35294_p1 = scmp.lt.s32.totalorder %s35288_s10, %s35288_s10 }
  0x90   :  { %p35295_p2 = por %p35294_p1, %p35293_p0 }
  0x92   :  { %p35296_p3 = pnand %p35295_p2, %p35289_p13 }
  0x94   :  { %35299 = shalt.err (!%p35296_p3)
}
  0x95   :  { %212 = dma.hbm_to_vmem [thread:$0]  %s35970_s30, 1536, %s36133_s26, [#allocation17], %s35868_s11, %s35868_s11, %s35869_s15  }
  0x96   :  { %s35874_s19 = smov [#allocation19]   ;;  %s35875_s18 = smov [#allocation22]  }
  0x97   :  { %s230_s16 = sshll.u32 %s35874_s19, 4  ;;  %s254_s17 = sshll.u32 %s35875_s18, 4  ;;  %s231_s16 = int_to_ptr.vmem [resolvable:$true] %s230_s16  ;;  %s36154_s17 = int_to_ptr.vmem [resolvable:$true] %s254_s17 }
  0x98   :  { %s35300_s22 = scalar_lea.hbm %s35980_s12, 48 }
  0x99   :  { %p35301_p4 = scmp.ne.s32.totalorder %s35980_s12, %s35300_s22  ;;  %p35304_p5 = scmp.lt.u32.totalorder %s35300_s22, %s35980_s12 }
  0x9b   :  { %p35306_p6 = pnand %p35304_p5, %p35301_p4 }
  0x9d   :  { %35309 = shalt.err (!%p35306_p6)
}
  0x9e   :  { %s35310_s23 = scalar_lea.vmem %s231_s16, 48  ;;  %s35314_s0 = scalar_lea.vmem %s231_s16, 64 }
  0x9f   :  { %p35311_p7 = scmp.ne.s32.totalorder %s231_s16, %s35310_s23  ;;  %p35315_p8 = scmp.lt.s32.totalorder %s231_s16, %s231_s16 }
  0xa0   :  { %p35316_p9 = scmp.lt.s32.totalorder %s35314_s0, %s35310_s23 }
  0xa2   :  { %p35317_p10 = por %p35316_p9, %p35315_p8 }
  0xa4   :  { %p35318_p11 = pnand %p35317_p10, %p35311_p7 }
  0xa6   :  { %35321 = shalt.err (!%p35318_p11)
}
  0xa7   :  { %236 = dma.hbm_to_vmem [thread:$0]  %s35980_s12, 48, %s231_s16, [#allocation20], %s35872_s8, %s35872_s8, %s35873_s2  }
  0xa8   :  { %s35322_s30 = scalar_lea.hbm %s35990_s27, 1536 }
  0xa9   :  { %p35323_p12 = scmp.ne.s32.totalorder %s35990_s27, %s35322_s30  ;;  %p35326_p13 = scmp.lt.u32.totalorder %s35322_s30, %s35990_s27 }
  0xab   :  { %p35328_p0 = pnand %p35326_p13, %p35323_p12 }
  0xad   :  { %35331 = shalt.err (!%p35328_p0)
}
  0xae   :  { %s35332_s26 = scalar_lea.vmem %s36154_s17, 1536  ;;  %p35337_p2 = scmp.lt.s32.totalorder %s36154_s17, %s36154_s17 }
  0xaf   :  { %p35333_p1 = scmp.ne.s32.totalorder %s36154_s17, %s35332_s26  ;;  %p35338_p3 = scmp.lt.s32.totalorder %s35332_s26, %s35332_s26 }
  0xb1   :  { %p35339_p4 = por %p35338_p3, %p35337_p2 }
  0xb3   :  { %p35340_p5 = pnand %p35339_p4, %p35333_p1 }
  0xb5   :  { %35343 = shalt.err (!%p35340_p5)
}
  0xb6   :  { %260 = dma.hbm_to_vmem [thread:$0]  %s35990_s27, 1536, %s36154_s17, [#allocation23], %s35868_s11, %s35868_s11, %s35869_s15  }
  0xb7   :  { %s35876_s12 = smov [#allocation25]   ;;  %s35877_s1 = smov [#allocation28]  }
  0xb8   :  { %s278_s28 = sshll.u32 %s35876_s12, 4  ;;  %s302_s7 = sshll.u32 %s35877_s1, 4  ;;  %s279_s28 = int_to_ptr.vmem [resolvable:$true] %s278_s28  ;;  %s36175_s7 = int_to_ptr.vmem [resolvable:$true] %s302_s7 }
  0xb9   :  { %s35344_s10 = scalar_lea.hbm %s36000_s21, 48 }
  0xba   :  { %p35345_p6 = scmp.ne.s32.totalorder %s36000_s21, %s35344_s10  ;;  %p35348_p7 = scmp.lt.u32.totalorder %s35344_s10, %s36000_s21 }
  0xbc   :  { %p35350_p8 = pnand %p35348_p7, %p35345_p6 }
  0xbe   :  { %35353 = shalt.err (!%p35350_p8)
}
  0xbf   :  { %s35354_s19 = scalar_lea.vmem %s279_s28, 48  ;;  %s35358_s16 = scalar_lea.vmem %s279_s28, 64 }
  0xc0   :  { %p35355_p9 = scmp.ne.s32.totalorder %s279_s28, %s35354_s19  ;;  %p35359_p10 = scmp.lt.s32.totalorder %s279_s28, %s279_s28 }
  0xc1   :  { %p35360_p11 = scmp.lt.s32.totalorder %s35358_s16, %s35354_s19 }
  0xc3   :  { %p35361_p12 = por %p35360_p11, %p35359_p10 }
  0xc5   :  { %p35362_p13 = pnand %p35361_p12, %p35355_p9 }
  0xc7   :  { %35365 = shalt.err (!%p35362_p13)
}
  0xc8   :  { %284 = dma.hbm_to_vmem [thread:$0]  %s36000_s21, 48, %s279_s28, [#allocation26], %s35872_s8, %s35872_s8, %s35873_s2  }
  0xc9   :  { %s35366_s27 = scalar_lea.hbm %s36010_s9, 1536 }
  0xca   :  { %p35367_p0 = scmp.ne.s32.totalorder %s36010_s9, %s35366_s27  ;;  %p35370_p1 = scmp.lt.u32.totalorder %s35366_s27, %s36010_s9 }
  0xcc   :  { %p35372_p2 = pnand %p35370_p1, %p35367_p0 }
  0xce   :  { %35375 = shalt.err (!%p35372_p2)
}
  0xcf   :  { %s35376_s18 = scalar_lea.vmem %s36175_s7, 1536  ;;  %p35381_p4 = scmp.lt.s32.totalorder %s36175_s7, %s36175_s7 }
  0xd0   :  { %p35377_p3 = scmp.ne.s32.totalorder %s36175_s7, %s35376_s18  ;;  %p35382_p5 = scmp.lt.s32.totalorder %s35376_s18, %s35376_s18 }
  0xd2   :  { %p35383_p6 = por %p35382_p5, %p35381_p4 }
  0xd4   :  { %p35384_p7 = pnand %p35383_p6, %p35377_p3 }
  0xd6   :  { %35387 = shalt.err (!%p35384_p7)
}
  0xd7   :  { %308 = dma.hbm_to_vmem [thread:$0]  %s36010_s9, 1536, %s36175_s7, [#allocation29], %s35868_s11, %s35868_s11, %s35869_s15  }
  0xd8   :  { %s35878_s21 = smov [#allocation31]   ;;  %s35388_s22 = scalar_lea.hbm %s36020_s4, 48 }
  0xd9   :  { %s326_s17 = sshll.u32 %s35878_s21, 4  ;;  %p35389_p8 = scmp.ne.s32.totalorder %s36020_s4, %s35388_s22  ;;  %s327_s17 = int_to_ptr.vmem [resolvable:$true] %s326_s17 }
  0xda   :  { %p35392_p9 = scmp.lt.u32.totalorder %s35388_s22, %s36020_s4 }
  0xdc   :  { %p35394_p10 = pnand %p35392_p9, %p35389_p8 }
  0xde   :  { %35397 = shalt.err (!%p35394_p10)
}
  0xdf   :  { %s35398_s23 = scalar_lea.vmem %s327_s17, 48  ;;  %s35402_s0 = scalar_lea.vmem %s327_s17, 64 }
  0xe0   :  { %p35399_p11 = scmp.ne.s32.totalorder %s327_s17, %s35398_s23  ;;  %p35403_p12 = scmp.lt.s32.totalorder %s327_s17, %s327_s17 }
  0xe1   :  { %p35404_p13 = scmp.lt.s32.totalorder %s35402_s0, %s35398_s23 }
  0xe3   :  { %p35405_p0 = por %p35404_p13, %p35403_p12 }
  0xe5   :  { %p35406_p1 = pnand %p35405_p0, %p35399_p11 }
  0xe7   :  { %35409 = shalt.err (!%p35406_p1)
}
  0xe8   :  { %332 = dma.hbm_to_vmem [thread:$0]  %s36020_s4, 48, %s327_s17, [#allocation32], %s35872_s8, %s35872_s8, %s35873_s2  }
  0xe9   :  { %s35879_s9 = smov [#allocation34]   ;;  %s35880_s26 = smov [#allocation2]  }
  0xea   :  { %s350_s30 = sshll.u32 %s35879_s9, 4  ;;  %s112_s12 = sshll.u32 %s35880_s26, 4  ;;  %s351_s30 = int_to_ptr.vmem [resolvable:$true] %s350_s30  ;;  %s113_s12 = int_to_ptr.vmem [resolvable:$true] %s112_s12 }
  0xeb   :  { %s35410_s28 = scalar_lea.hbm %s36030_s20, 64 }
  0xec   :  { %p35411_p2 = scmp.ne.s32.totalorder %s36030_s20, %s35410_s28  ;;  %p35414_p3 = scmp.lt.u32.totalorder %s35410_s28, %s36030_s20 }
  0xee   :  { %p35416_p4 = pnand %p35414_p3, %p35411_p2 }
  0xf0   :  { %35419 = shalt.err (!%p35416_p4)
}
  0xf1   :  { %s35420_s1 = scalar_lea.vmem %s351_s30, 64  ;;  %p35425_p6 = scmp.lt.s32.totalorder %s351_s30, %s351_s30 }
  0xf2   :  { %p35421_p5 = scmp.ne.s32.totalorder %s351_s30, %s35420_s1  ;;  %p35426_p7 = scmp.lt.s32.totalorder %s35420_s1, %s35420_s1 }
  0xf4   :  { %p35427_p8 = por %p35426_p7, %p35425_p6 }
  0xf6   :  { %p35428_p9 = pnand %p35427_p8, %p35421_p5 }
  0xf8   :  { %35431 = shalt.err (!%p35428_p9)
}
  0xf9   :  { %s35881_s7 = smov 32   ;;  %s35882_s4 = smov 2  }
  0xfa   :  { %356 = dma.hbm_to_vmem [thread:$0]  %s36030_s20, 64, %s351_s30, [#allocation35], %s35881_s7, %s35881_s7, %s35882_s4  }
  0xfb   :  { %s35432_s10 = scalar_lea.hbm %s35920_s13, 384 }
  0xfc   :  { %p35433_p10 = scmp.ne.s32.totalorder %s35920_s13, %s35432_s10  ;;  %p35436_p11 = scmp.lt.u32.totalorder %s35432_s10, %s35920_s13 }
  0xfe   :  { %p35438_p12 = pnand %p35436_p11, %p35433_p10 }
 0x100   :  { %35441 = shalt.err (!%p35438_p12)
}
 0x101   :  { %s35442_s19 = scalar_lea.vmem %s113_s12, 384  ;;  %p35447_p0 = scmp.lt.s32.totalorder %s113_s12, %s113_s12 }
 0x102   :  { %p35443_p13 = scmp.ne.s32.totalorder %s113_s12, %s35442_s19  ;;  %p35448_p1 = scmp.lt.s32.totalorder %s35442_s19, %s35442_s19 }
 0x104   :  { %p35449_p2 = por %p35448_p1, %p35447_p0 }
 0x106   :  { %p35450_p3 = pnand %p35449_p2, %p35443_p13 }
 0x108   :  { %35453 = shalt.err (!%p35450_p3)
}
 0x109   :  { %118 = dma.hbm_to_vmem [thread:$0]  %s35920_s13, 384, %s113_s12, [#allocation3], %s35868_s11, %s35868_s11, %s35869_s15  }
 0x10a   :  { %s35883_s20 = smov [#allocation8]   ;;  %s35454_s27 = scalar_lea.hbm %s35935_s25, 16 }
 0x10b   :  { %s139_s16 = sshll.u32 %s35883_s20, 4  ;;  %p35455_p4 = scmp.ne.s32.totalorder %s35935_s25, %s35454_s27  ;;  %s140_s16 = int_to_ptr.vmem [resolvable:$true] %s139_s16 }
 0x10c   :  { %p35458_p5 = scmp.lt.u32.totalorder %s35454_s27, %s35935_s25 }
 0x10e   :  { %p35460_p6 = pnand %p35458_p5, %p35455_p4 }
 0x110   :  { %35463 = shalt.err (!%p35460_p6)
}
 0x111   :  { %s35464_s18 = scalar_lea.vmem %s140_s16, 16  ;;  %s35468_s21 = scalar_lea.vmem %s140_s16, 32 }
 0x112   :  { %p35465_p7 = scmp.ne.s32.totalorder %s140_s16, %s35464_s18  ;;  %p35469_p8 = scmp.lt.s32.totalorder %s140_s16, %s140_s16 }
 0x113   :  { %p35470_p9 = scmp.lt.s32.totalorder %s35468_s21, %s35464_s18 }
 0x115   :  { %p35471_p10 = por %p35470_p9, %p35469_p8 }
 0x117   :  { %p35472_p11 = pnand %p35471_p10, %p35465_p7 }
 0x119   :  { %35475 = shalt.err (!%p35472_p11)
}
 0x11a   :  { %142 = dma.hbm_to_vmem [thread:$0]  %s35935_s25, 16, %s140_s16, [#allocation7]  }
 0x11b   :  { %s35476_s13 = scalar_lea.hbm %s35940_s29, 16 }
 0x11c   :  { %p35477_p12 = scmp.ne.s32.totalorder %s35940_s29, %s35476_s13  ;;  %p35480_p13 = scmp.lt.u32.totalorder %s35476_s13, %s35940_s29 }
 0x11e   :  { %p35482_p0 = pnand %p35480_p13, %p35477_p12 }
 0x120   :  { %35485 = shalt.err (!%p35482_p0)
}
 0x121   :  { %s35884_s17 = smov [#allocation9]   ;;  %s35885_s22 = smov [#allocation12]  }
 0x122   :  { %150 = dma.hbm_to_smem %s35940_s29, 16, %s35884_s17, [#allocation5]  }
 0x123   :  { %s170_s23 = sshll.u32 %s35885_s22, 4  ;;  %s35886_s0 = smov [#allocation15]   ;;  %s171_s23 = int_to_ptr.vmem [resolvable:$true] %s170_s23 }
 0x124   :  { %s194_s9 = sshll.u32 %s35886_s0, 4  ;;  %s35486_s30 = scalar_lea.hbm %s35955_s14, 48  ;;  %s195_s9 = int_to_ptr.vmem [resolvable:$true] %s194_s9 }
 0x125   :  { %p35487_p1 = scmp.ne.s32.totalorder %s35955_s14, %s35486_s30  ;;  %p35490_p2 = scmp.lt.u32.totalorder %s35486_s30, %s35955_s14 }
 0x127   :  { %p35492_p3 = pnand %p35490_p2, %p35487_p1 }
 0x129   :  { %35495 = shalt.err (!%p35492_p3)
}
 0x12a   :  { %s35496_s25 = scalar_lea.vmem %s171_s23, 48  ;;  %s35500_s26 = scalar_lea.vmem %s171_s23, 64 }
 0x12b   :  { %p35497_p4 = scmp.ne.s32.totalorder %s171_s23, %s35496_s25  ;;  %p35501_p5 = scmp.lt.s32.totalorder %s171_s23, %s171_s23 }
 0x12c   :  { %p35502_p6 = scmp.lt.s32.totalorder %s35500_s26, %s35496_s25 }
 0x12e   :  { %p35503_p7 = por %p35502_p6, %p35501_p5 }
 0x130   :  { %p35504_p8 = pnand %p35503_p7, %p35497_p4 }
 0x132   :  { %35507 = shalt.err (!%p35504_p8)
}
 0x133   :  { %s40487_s29 = sld [smem:[#allocation65_spill]] }
 0x134   :  { %176 = dma.hbm_to_vmem [thread:$0]  %s35955_s14, 48, %s171_s23, [#allocation11], %s35872_s8, %s35872_s8, %s35873_s2  }
 0x139   :  { %s35508_s12 = scalar_lea.hbm %s40487_s29, 1536 }
 0x13a   :  { %p35509_p9 = scmp.ne.s32.totalorder %s40487_s29, %s35508_s12  ;;  %p35512_p10 = scmp.lt.u32.totalorder %s35508_s12, %s40487_s29 }
 0x13c   :  { %p35514_p11 = pnand %p35512_p10, %p35509_p9 }
 0x13e   :  { %35517 = shalt.err (!%p35514_p11)
}
 0x13f   :  { %s35518_s28 = scalar_lea.vmem %s195_s9, 1536  ;;  %p35523_p13 = scmp.lt.s32.totalorder %s195_s9, %s195_s9 }
 0x140   :  { %p35519_p12 = scmp.ne.s32.totalorder %s195_s9, %s35518_s28  ;;  %p35524_p0 = scmp.lt.s32.totalorder %s35518_s28, %s35518_s28 }
 0x142   :  { %p35525_p1 = por %p35524_p0, %p35523_p13 }
 0x144   :  { %p35526_p2 = pnand %p35525_p1, %p35519_p12 }
 0x146   :  { %35529 = shalt.err (!%p35526_p2)
}
 0x147   :  { %s40488_s1 = sld [smem:[#allocation66_spill]]  ;;  %s35887_s14 = smov [#allocation18]  }
 0x148   :  { %200 = dma.hbm_to_vmem [thread:$0]  %s40487_s29, 1536, %s195_s9, [#allocation14], %s35868_s11, %s35868_s11, %s35869_s15  }
 0x149   :  { %s218_s10 = sshll.u32 %s35887_s14, 4  ;;  %s35888_s19 = smov [#allocation21]   ;;  %s219_s10 = int_to_ptr.vmem [resolvable:$true] %s218_s10 }
 0x14a   :  { %s242_s20 = sshll.u32 %s35888_s19, 4  ;;  %s243_s20 = int_to_ptr.vmem [resolvable:$true] %s242_s20 }
 0x14d   :  { %s35530_s16 = scalar_lea.hbm %s40488_s1, 48 }
 0x14e   :  { %p35531_p3 = scmp.ne.s32.totalorder %s40488_s1, %s35530_s16  ;;  %p35534_p4 = scmp.lt.u32.totalorder %s35530_s16, %s40488_s1 }
 0x150   :  { %p35536_p5 = pnand %p35534_p4, %p35531_p3 }
 0x152   :  { %35539 = shalt.err (!%p35536_p5)
}
 0x153   :  { %s35540_s27 = scalar_lea.vmem %s219_s10, 48  ;;  %s35544_s18 = scalar_lea.vmem %s219_s10, 64 }
 0x154   :  { %p35541_p6 = scmp.ne.s32.totalorder %s219_s10, %s35540_s27  ;;  %p35545_p7 = scmp.lt.s32.totalorder %s219_s10, %s219_s10 }
 0x155   :  { %p35546_p8 = scmp.lt.s32.totalorder %s35544_s18, %s35540_s27 }
 0x157   :  { %p35547_p9 = por %p35546_p8, %p35545_p7 }
 0x159   :  { %p35548_p10 = pnand %p35547_p9, %p35541_p6 }
 0x15b   :  { %35551 = shalt.err (!%p35548_p10)
}
 0x15c   :  { %s40489_s21 = sld [smem:[#allocation67_spill]] }
 0x15d   :  { %224 = dma.hbm_to_vmem [thread:$0]  %s40488_s1, 48, %s219_s10, [#allocation17], %s35872_s8, %s35872_s8, %s35873_s2  }
 0x162   :  { %s35552_s13 = scalar_lea.hbm %s40489_s21, 1536 }
 0x163   :  { %p35553_p11 = scmp.ne.s32.totalorder %s40489_s21, %s35552_s13  ;;  %p35556_p12 = scmp.lt.u32.totalorder %s35552_s13, %s40489_s21 }
 0x165   :  { %p35558_p13 = pnand %p35556_p12, %p35553_p11 }
 0x167   :  { %35561 = shalt.err (!%p35558_p13)
}
 0x168   :  { %s35562_s17 = scalar_lea.vmem %s243_s20, 1536  ;;  %p35567_p1 = scmp.lt.s32.totalorder %s243_s20, %s243_s20 }
 0x169   :  { %p35563_p0 = scmp.ne.s32.totalorder %s243_s20, %s35562_s17  ;;  %p35568_p2 = scmp.lt.s32.totalorder %s35562_s17, %s35562_s17 }
 0x16b   :  { %p35569_p3 = por %p35568_p2, %p35567_p1 }
 0x16d   :  { %p35570_p4 = pnand %p35569_p3, %p35563_p0 }
 0x16f   :  { %35573 = shalt.err (!%p35570_p4)
}
 0x170   :  { %s40490_s22 = sld [smem:[#allocation68_spill]]  ;;  %s35889_s23 = smov [#allocation24]  }
 0x171   :  { %248 = dma.hbm_to_vmem [thread:$0]  %s40489_s21, 1536, %s243_s20, [#allocation20], %s35868_s11, %s35868_s11, %s35869_s15  }
 0x172   :  { %s266_s0 = sshll.u32 %s35889_s23, 4  ;;  %s35890_s9 = smov [#allocation27]   ;;  %s267_s0 = int_to_ptr.vmem [resolvable:$true] %s266_s0 }
 0x173   :  { %s290_s30 = sshll.u32 %s35890_s9, 4  ;;  %s291_s30 = int_to_ptr.vmem [resolvable:$true] %s290_s30 }
 0x176   :  { %s35574_s25 = scalar_lea.hbm %s40490_s22, 48 }
 0x177   :  { %p35575_p5 = scmp.ne.s32.totalorder %s40490_s22, %s35574_s25  ;;  %p35578_p6 = scmp.lt.u32.totalorder %s35574_s25, %s40490_s22 }
 0x179   :  { %p35580_p7 = pnand %p35578_p6, %p35575_p5 }
 0x17b   :  { %35583 = shalt.err (!%p35580_p7)
}
 0x17c   :  { %s35584_s26 = scalar_lea.vmem %s267_s0, 48  ;;  %s35588_s29 = scalar_lea.vmem %s267_s0, 64 }
 0x17d   :  { %p35585_p8 = scmp.ne.s32.totalorder %s267_s0, %s35584_s26  ;;  %p35589_p9 = scmp.lt.s32.totalorder %s267_s0, %s267_s0 }
 0x17e   :  { %p35590_p10 = scmp.lt.s32.totalorder %s35588_s29, %s35584_s26 }
 0x180   :  { %p35591_p11 = por %p35590_p10, %p35589_p9 }
 0x182   :  { %p35592_p12 = pnand %p35591_p11, %p35585_p8 }
 0x184   :  { %35595 = shalt.err (!%p35592_p12)
}
 0x185   :  { %s40491_s12 = sld [smem:[#allocation69_spill]] }
 0x186   :  { %272 = dma.hbm_to_vmem [thread:$0]  %s40490_s22, 48, %s267_s0, [#allocation23], %s35872_s8, %s35872_s8, %s35873_s2  }
 0x18b   :  { %s35596_s28 = scalar_lea.hbm %s40491_s12, 1536 }
 0x18c   :  { %p35597_p13 = scmp.ne.s32.totalorder %s40491_s12, %s35596_s28  ;;  %p35600_p0 = scmp.lt.u32.totalorder %s35596_s28, %s40491_s12 }
 0x18e   :  { %p35602_p1 = pnand %p35600_p0, %p35597_p13 }
 0x190   :  { %35605 = shalt.err (!%p35602_p1)
}
 0x191   :  { %s35606_s1 = scalar_lea.vmem %s291_s30, 1536  ;;  %p35611_p3 = scmp.lt.s32.totalorder %s291_s30, %s291_s30 }
 0x192   :  { %p35607_p2 = scmp.ne.s32.totalorder %s291_s30, %s35606_s1  ;;  %p35612_p4 = scmp.lt.s32.totalorder %s35606_s1, %s35606_s1 }
 0x194   :  { %p35613_p5 = por %p35612_p4, %p35611_p3 }
 0x196   :  { %p35614_p6 = pnand %p35613_p5, %p35607_p2 }
 0x198   :  { %35617 = shalt.err (!%p35614_p6)
}
 0x199   :  { %s40492_s14 = sld [smem:[#allocation70_spill]]  ;;  %s35891_s10 = smov [#allocation30]  }
 0x19a   :  { %296 = dma.hbm_to_vmem [thread:$0]  %s40491_s12, 1536, %s291_s30, [#allocation26], %s35868_s11, %s35868_s11, %s35869_s15  }
 0x19b   :  { %s314_s19 = sshll.u32 %s35891_s10, 4  ;;  %s35892_s20 = smov [#allocation33]   ;;  %s315_s19 = int_to_ptr.vmem [resolvable:$true] %s314_s19 }
 0x19c   :  { %s338_s16 = sshll.u32 %s35892_s20, 4  ;;  %s339_s16 = int_to_ptr.vmem [resolvable:$true] %s338_s16 }
 0x19f   :  { %s35618_s27 = scalar_lea.hbm %s40492_s14, 48 }
 0x1a0   :  { %p35619_p7 = scmp.ne.s32.totalorder %s40492_s14, %s35618_s27  ;;  %p35622_p8 = scmp.lt.u32.totalorder %s35618_s27, %s40492_s14 }
 0x1a2   :  { %p35624_p9 = pnand %p35622_p8, %p35619_p7 }
 0x1a4   :  { %35627 = shalt.err (!%p35624_p9)
}
 0x1a5   :  { %s35628_s18 = scalar_lea.vmem %s315_s19, 48  ;;  %s35632_s21 = scalar_lea.vmem %s315_s19, 64 }
 0x1a6   :  { %p35629_p10 = scmp.ne.s32.totalorder %s315_s19, %s35628_s18  ;;  %p35633_p11 = scmp.lt.s32.totalorder %s315_s19, %s315_s19 }
 0x1a7   :  { %p35634_p12 = scmp.lt.s32.totalorder %s35632_s21, %s35628_s18 }
 0x1a9   :  { %p35635_p13 = por %p35634_p12, %p35633_p11 }
 0x1ab   :  { %p35636_p0 = pnand %p35635_p13, %p35629_p10 }
 0x1ad   :  { %35639 = shalt.err (!%p35636_p0)
}
 0x1ae   :  { %s40493_s11 = sld [smem:[#allocation71_spill]] }
 0x1af   :  { %320 = dma.hbm_to_vmem [thread:$0]  %s40492_s14, 48, %s315_s19, [#allocation29], %s35872_s8, %s35872_s8, %s35873_s2  }
 0x1b4   :  { %s35640_s15 = scalar_lea.hbm %s40493_s11, 64 }
 0x1b5   :  { %p35641_p1 = scmp.ne.s32.totalorder %s40493_s11, %s35640_s15  ;;  %p35644_p2 = scmp.lt.u32.totalorder %s35640_s15, %s40493_s11 }
 0x1b7   :  { %p35646_p3 = pnand %p35644_p2, %p35641_p1 }
 0x1b9   :  { %35649 = shalt.err (!%p35646_p3)
}
 0x1ba   :  { %s35650_s13 = scalar_lea.vmem %s339_s16, 64  ;;  %p35655_p5 = scmp.lt.s32.totalorder %s339_s16, %s339_s16 }
 0x1bb   :  { %p35651_p4 = scmp.ne.s32.totalorder %s339_s16, %s35650_s13  ;;  %p35656_p6 = scmp.lt.s32.totalorder %s35650_s13, %s35650_s13 }
 0x1bd   :  { %p35657_p7 = por %p35656_p6, %p35655_p5 }
 0x1bf   :  { %p35658_p8 = pnand %p35657_p7, %p35651_p4 }
 0x1c1   :  { %35661 = shalt.err (!%p35658_p8)
}
 0x1c2   :  { %s40494_s17 = sld [smem:[#allocation72_spill]]  ;;  %s35893_s8 = smov [#allocation36]  }
 0x1c3   :  { %344 = dma.hbm_to_vmem [thread:$0]  %s40493_s11, 64, %s339_s16, [#allocation32], %s35881_s7, %s35881_s7, %s35882_s4  }
 0x1c4   :  { %s362_s2 = sshll.u32 %s35893_s8, 4  ;;  %s35894_s22 = smov [#allocation37]   ;;  %s363_s2 = int_to_ptr.vmem [resolvable:$true] %s362_s2 }
 0x1c5   :  { %s374_s23 = sshll.u32 %s35894_s22, 4  ;;  %s375_s23 = int_to_ptr.vmem [resolvable:$true] %s374_s23 }
 0x1c8   :  { %s35662_s0 = scalar_lea.hbm %s40494_s17, 64 }
 0x1c9   :  { %p35663_p9 = scmp.ne.s32.totalorder %s40494_s17, %s35662_s0  ;;  %p35666_p10 = scmp.lt.u32.totalorder %s35662_s0, %s40494_s17 }
 0x1cb   :  { %p35668_p11 = pnand %p35666_p10, %p35663_p9 }
 0x1cd   :  { %35671 = shalt.err (!%p35668_p11)
}
 0x1ce   :  { %s35672_s9 = scalar_lea.vmem %s363_s2, 64  ;;  %p35677_p13 = scmp.lt.s32.totalorder %s363_s2, %s363_s2 }
 0x1cf   :  { %p35673_p12 = scmp.ne.s32.totalorder %s363_s2, %s35672_s9  ;;  %p35678_p0 = scmp.lt.s32.totalorder %s35672_s9, %s35672_s9 }
 0x1d1   :  { %p35679_p1 = por %p35678_p0, %p35677_p13 }
 0x1d3   :  { %p35680_p2 = pnand %p35679_p1, %p35673_p12 }
 0x1d5   :  { %35683 = shalt.err (!%p35680_p2)
}
 0x1d6   :  { %s40495_s30 = sld [smem:[#allocation73_spill]] }
 0x1d7   :  { %368 = dma.hbm_to_vmem [thread:$0]  %s40494_s17, 64, %s363_s2, [#allocation35], %s35881_s7, %s35881_s7, %s35882_s4  }
 0x1dc   :  { %s35684_s25 = scalar_lea.hbm %s40495_s30, 64 }
 0x1dd   :  { %p35685_p3 = scmp.ne.s32.totalorder %s40495_s30, %s35684_s25  ;;  %p35688_p4 = scmp.lt.u32.totalorder %s35684_s25, %s40495_s30 }
 0x1df   :  { %p35690_p5 = pnand %p35688_p4, %p35685_p3 }
 0x1e1   :  { %35693 = shalt.err (!%p35690_p5)
}
 0x1e2   :  { %s35694_s26 = scalar_lea.vmem %s375_s23, 64  ;;  %p35699_p7 = scmp.lt.s32.totalorder %s375_s23, %s375_s23 }
 0x1e3   :  { %p35695_p6 = scmp.ne.s32.totalorder %s375_s23, %s35694_s26  ;;  %p35700_p8 = scmp.lt.s32.totalorder %s35694_s26, %s35694_s26 }
 0x1e5   :  { %p35701_p9 = por %p35700_p8, %p35699_p7 }
 0x1e7   :  { %p35702_p10 = pnand %p35701_p9, %p35695_p6 }
 0x1e9   :  { %35705 = shalt.err (!%p35702_p10)
}
 0x1ea   :  { %380 = dma.hbm_to_vmem [thread:$0]  %s40495_s30, 64, %s375_s23, [#allocation38], %s35881_s7, %s35881_s7, %s35882_s4  }
 0x1eb   :  { %35794 = dma.done.wait [#allocation3], 384  }
 0x1ec   :  { %35795 = vsyncadd [#allocation3], 4294966912 }
 0x1ed   :  { %35796 = dma.done.wait [#allocation7], 400  }
 0x1ee   :  { %35797 = vsyncadd [#allocation7], 4294966896 }
 0x1ef   :  { %35798 = dma.done.wait [#allocation5], 16  }
 0x1f0   :  { %35799 = vsyncadd [#allocation5], 4294967280 }
 0x1f1   :  { %35800 = dma.done.wait [#allocation11], 1584  }
 0x1f2   :  { %35801 = vsyncadd [#allocation11], 4294965712 }
 0x1f3   :  { %35802 = dma.done.wait [#allocation14], 1584  }
 0x1f4   :  { %35803 = vsyncadd [#allocation14], 4294965712 }
 0x1f5   :  { %35804 = dma.done.wait [#allocation17], 1584  }
 0x1f6   :  { %35805 = vsyncadd [#allocation17], 4294965712 }
 0x1f7   :  { %35806 = dma.done.wait [#allocation20], 1584  }
 0x1f8   :  { %35807 = vsyncadd [#allocation20], 4294965712 }
 0x1f9   :  { %35808 = dma.done.wait [#allocation23], 1584  }
 0x1fa   :  { %35809 = vsyncadd [#allocation23], 4294965712 }
 0x1fb   :  { %35810 = dma.done.wait [#allocation26], 1584  }
 0x1fc   :  { %35811 = vsyncadd [#allocation26], 4294965712 }
 0x1fd   :  { %35812 = dma.done.wait [#allocation29], 1584  }
 0x1fe   :  { %35813 = vsyncadd [#allocation29], 4294965712 }
 0x1ff   :  { %35814 = dma.done.wait [#allocation32], 112  }
 0x200   :  { %35815 = vsyncadd [#allocation32], 4294967184 }
 0x201   :  { %35816 = dma.done.wait [#allocation35], 128  }
 0x202   :  { %35817 = vsyncadd [#allocation35], 4294967168 }
 0x203   :  { %35818 = dma.done.wait [#allocation38], 64  }
 0x204   :  { %35819 = vsyncadd [#allocation38], 4294967232 }
 0x205   :  { %466 = sfence }
 0x206   :  { %v470_v0 = vld [vmem:[#allocation2] sm:$0xff]  ;;  %s40496_s29 = sld [smem:[#allocation61_spill]]  ;;  %v471_v1 = vld [vmem:[#allocation2 + $0x8] sm:$0xff]  ;;  %v472_v2 = vld [vmem:[#allocation2 + $0x10] sm:$0x1]  ;;  %v40390_v3 = vmov 0.0|0.0  }
 0x207   :  { %32603 = vmatprep.subr.bf16.mxu0 %v40390_v3  ;;  %v489_v4 = vand.u32 4294901760, %v470_v0  ;;  %v492_v5 = vand.u32 4294901760, %v471_v1  ;;  %vm484_vm0 = vcmask 1040384   ;;  %32621 = vmatprep.subr.bf16.mxu1 %v40390_v3  ;;  %vm35896_vm1 = vmmov 0   ;;  %v965_v9 = vld [vmem:[#allocation6] sm:$0xff]  ;;  %v966_v10 = vld [vmem:[#allocation6 + $0x8] sm:$0xff] }
 0x208   :  { %v486_v7 = vsel %vm484_vm0, %v472_v2, 0  ;;  %v40392_v8 = vmov 0.0   ;;  %vm480_vm2 = vcmask 138240   ;;  %s40497_s12 = sld [smem:[#allocation62_spill]]  ;;  %v967_v11 = vld [vmem:[#allocation6 + $0x10] sm:$0x1] }
 0x209   :  { %29069 = vmatprep.mubr.msk.f32.mxu0 %vm35896_vm1, %v40392_v8  ;;  %29123 = vmatprep.mubr.msk.f32.mxu1 %vm35896_vm1, %v40392_v8  ;;  %v36303_v12 = vpack.c.bf16 %v492_v5, %v489_v4  ;;  %v36305_v13 = vsub.f32 %v470_v0, %v489_v4  ;;  %v36307_v14 = vsub.f32 %v471_v1, %v492_v5  ;;  %v36309_v15 = vand.u32 4294901760, %v486_v7  ;;  %s40498_s28 = sld [smem:[#allocation64_spill]]  ;;  %s40499_s1 = sld [smem:[#allocation63_spill]] }
 0x20a   :  { %v982_v17 = vand.u32 4294901760, %v965_v9  ;;  %v985_v18 = vand.u32 4294901760, %v966_v10  ;;  %v979_v19 = vsel %vm484_vm0, %v967_v11, 0  ;;  %s467_s14 = sld [smem:[#allocation9]]  ;;  %vm1468_vm4 = vcmask 261120   ;;  %s40660_s10 = sld [smem:[#allocation75_spill]] }
 0x20b   :  { %32605 = vmatpush3.bf16.msra.mxu0 %v36303_v12  ;;  %v36315_v20 = vsub.f32 %v486_v7, %v36309_v15  ;;  %v569_v22 = vand.u32 4294901760, %v36305_v13  ;;  %v576_v23 = vand.u32 4294901760, %v36307_v14  ;;  %v36340_v32 = vand.u32 4294901760, %v979_v19  ;;  %s40661_s19 = sld [smem:[#allocation74_spill]]  ;;  %s40662_s20 = sld [smem:[#allocation79_spill]] }
 0x20c   :  { %v469_v6 = vld [vmem:[%s40496_s29] sm:$0x3]  ;;  %29067 = vmatprep.subr.mxu0 %v40392_v8  ;;  %v36323_v25 = vpack.c.bf16 %v985_v18, %v982_v17  ;;  %v36325_v26 = vsub.f32 %v965_v9, %v982_v17  ;;  %v36327_v27 = vsub.f32 %v966_v10, %v985_v18  ;;  %v32610_v57 = vpack.c.bf16 %v36307_v14, %v36305_v13  ;;  %s40663_s16 = sld [smem:[#allocation77_spill]]  ;;  %s40664_s18 = sld [smem:[#allocation78_spill]] }
 0x20d   :  { %v482_v16 = vsel %vm480_vm2, %v469_v6, 0  ;;  %v570_v29 = vsub.f32 %v36305_v13, %v569_v22  ;;  %v577_v30 = vsub.f32 %v36307_v14, %v576_v23  ;;  %v583_v31 = vand.u32 4294901760, %v36315_v20  ;;  %s40226_s27 = sld [smem:[#allocation9 + $0x1]]  ;;  %s40665_s21 = sld [smem:[#allocation76_spill]] }
 0x20e   :  { %v36317_v21 = vand.u32 4294901760, %v482_v16  ;;  %v964_v24 = vld [vmem:[%s40497_s12] sm:$0x3]  ;;  %32623 = vmatpush3.bf16.msra.mxu1 %v36323_v25  ;;  %v1062_v34 = vand.u32 4294901760, %v36325_v26  ;;  %v36349_v38 = vsub.f32 %v979_v19, %v36340_v32  ;;  %v1069_v41 = vand.u32 4294901760, %v36327_v27  ;;  %s40666_s11 = sld [smem:[#allocation81_spill]] }
 0x20f   :  { %v976_v33 = vsel %vm480_vm2, %v964_v24, 0  ;;  %29068 = vmatpush3.msra.mxu0 %v36309_v15  ;;  %v571_v36 = vand.u32 4294901760, %v570_v29  ;;  %v578_v37 = vand.u32 4294901760, %v577_v30  ;;  %29121 = vmatprep.subr.mxu1 %v40392_v8  ;;  %v584_v44 = vsub.f32 %v36315_v20, %v583_v31  ;;  %v1457_v62 = vld [vmem:[%s40498_s28] sm:$0xff]  ;;  %v1458_v63 = vld [vmem:[%s40498_s28 + $0x8] sm:$0xff]  ;;  %v1459_v4 = vld [vmem:[%s40498_s28 + $0x10] sm:$0xff] }
 0x210   :  { %v36330_v28 = vsub.f32 %v482_v16, %v36317_v21  ;;  %32606 = vmatprep.subr.bf16.mxu0 %v40390_v3  ;;  %v36351_v39 = vand.u32 4294901760, %v976_v33  ;;  %v1063_v40 = vsub.f32 %v36325_v26, %v1062_v34  ;;  %v1070_v46 = vsub.f32 %v36327_v27, %v1069_v41  ;;  %v1460_v5 = vld [vmem:[%s40498_s28 + $0x18] sm:$0xff]  ;;  %s40667_s15 = sld [smem:[#allocation83_spill]]  ;;  %s35898_s13 = smov [#allocation40]  }
 0x211   :  { %v32607_v43 = vpack.c.bf16 %v578_v37, %v571_v36  ;;  %v1076_v49 = vand.u32 4294901760, %v36349_v38  ;;  %v585_v52 = vand.u32 4294901760, %v584_v44  ;;  %v32628_v59 = vpack.c.bf16 %v36327_v27, %v36325_v26  ;;  %s27297_s17 = sshll.u32 %s35898_s13, 4  ;;  %s35899_s8 = smov [#allocation39]   ;;  %s27298_s17 = int_to_ptr.vmem [resolvable:$true] %s27297_s17 }
 0x212   :  { %v558_v35 = vand.u32 4294901760, %v36330_v28  ;;  %29122 = vmatpush3.msra.mxu1 %v36340_v32  ;;  %v1050_v45 = vsub.f32 %v976_v33, %v36351_v39  ;;  %v1064_v48 = vand.u32 4294901760, %v1063_v40  ;;  %v1071_v51 = vand.u32 4294901760, %v1070_v46  ;;  %s27285_s2 = sshll.u32 %s35899_s8, 4  ;;  %s35706_s22 = scalar_lea.vmem %s27298_s17, 64  ;;  %s40329_s2 = int_to_ptr.vmem [resolvable:$true] %s27285_s2 }
 0x213   :  { %32624 = vmatprep.subr.bf16.mxu1 %v40390_v3  ;;  %v1077_v55 = vsub.f32 %v36349_v38, %v1076_v49  ;;  %v32616_v60 = vpack.c.bf16 %v576_v23, %v569_v22  ;;  %v32634_v61 = vpack.c.bf16 %v1069_v41, %v1062_v34  ;;  %v1473_v0 = vand.u32 4294901760, %v1457_v62  ;;  %p35707_p11 = scmp.ne.s32.totalorder %s27298_s17, %s35706_s22  ;;  %p35711_p12 = scmp.lt.s32.totalorder %s27298_s17, %s27298_s17 }
 0x214   :  { %v559_v42 = vsub.f32 %v36330_v28, %v558_v35  ;;  %v1051_v50 = vand.u32 4294901760, %v1050_v45  ;;  %v32625_v54 = vpack.c.bf16 %v1071_v51, %v1064_v48  ;;  %v1476_v1 = vand.u32 4294901760, %v1458_v63  ;;  %v27404_v51 = vld [vmem:[%s40498_s28 + $0x20] sm:$0xff]  ;;  %p35712_p13 = scmp.lt.s32.totalorder %s35706_s22, %s35706_s22 }
 0x215   :  { %v1078_v58 = vand.u32 4294901760, %v1077_v55  ;;  %v1479_v6 = vand.u32 4294901760, %v1459_v4  ;;  %v1482_v7 = vand.u32 4294901760, %v1460_v5  ;;  %v1553_v10 = vsub.f32 %v1457_v62, %v1473_v0 }
 0x216   :  { %v560_v47 = vand.u32 4294901760, %v559_v42  ;;  %v1052_v53 = vsub.f32 %v1050_v45, %v1051_v50  ;;  %v36446_v2 = vpack.c.bf16 %v1476_v1, %v1473_v0  ;;  %v1560_v11 = vsub.f32 %v1458_v63, %v1476_v1  ;;  %v27411_v63 = vld [vmem:[%s40498_s28 + $0x50] sm:$0xff]  ;;  %v27412_v0 = vld [vmem:[%s40498_s28 + $0x58] sm:$0xff]  ;;  %p35713_p0 = por %p35712_p13, %p35711_p12 }
 0x217   :  { %v36454_v9 = vpack.c.bf16 %v1482_v7, %v1479_v6  ;;  %v1567_v17 = vsub.f32 %v1459_v4, %v1479_v6  ;;  %v1574_v18 = vsub.f32 %v1460_v5, %v1482_v7  ;;  %v961_v34 = vstv %s467_s14 }
 0x218   :  { %29070 = vmatmul.mubr.f32.vlgmr.msra.gmra.mrb[0].mxu0 %v560_v47  ;;  %v1053_v56 = vand.u32 4294901760, %v1052_v53  ;;  %v1561_v13 = vand.u32 4294901760, %v1560_v11  ;;  %v36468_v30 = vpack.c.bf16 %v1560_v11, %v1553_v10  ;;  %v27406_v53 = vld [vmem:[%s40498_s28 + $0x30] sm:$0xff]  ;;  %v1971_v55 = vand.u32 4294901760, %v27404_v51  ;;  %p35714_p1 = pnand %p35713_p0, %p35707_p11 }
 0x219   :  { %32608 = vmatpush3.bf16.msra.mxu0 %v32607_v43  ;;  %29078 = vmatprep.mubr.msk.f32.mxu0 %vm35896_vm1, %v40392_v8  ;;  %v1575_v22 = vand.u32 4294901760, %v1574_v18  ;;  %v2475_v7 = vand.u32 4294901760, %v27411_v63  ;;  %vm13351_vm6 = vcmask 254976   ;;  %vm26774_vm9 = vcmask 58368  }
 0x21a   :  { %29076 = vmatprep.subr.mxu0 %v40392_v8  ;;  %29124 = vmatmul.mubr.f32.vlgmr.msra.gmra.mrb[0].mxu1 %v1053_v56  ;;  %v1562_v16 = vsub.f32 %v1560_v11, %v1561_v13  ;;  %v36511_v1 = vsub.f32 %v27404_v51, %v1971_v55 }
 0x21b   :  { %32626 = vmatpush3.bf16.msra.mxu1 %v32625_v54  ;;  %29132 = vmatprep.mubr.msk.f32.mxu1 %vm35896_vm1, %v40392_v8  ;;  %v1576_v26 = vsub.f32 %v1574_v18, %v1575_v22  ;;  %v27407_v54 = vld [vmem:[%s40498_s28 + $0x38] sm:$0xff] }
 0x21c   :  { %29130 = vmatprep.subr.mxu1 %v40392_v8 }
 0x21d   :  { %29077 = vmatpush3.msra.mxu0 %v585_v52  ;;  %v27405_v52 = vld [vmem:[%s40498_s28 + $0x28] sm:$0xff] }
 0x21e   :  { %32609 = vmatprep.subr.bf16.mxu0 %v40390_v3  ;;  %v1974_v56 = vand.u32 4294901760, %v27405_v52 }
 0x21f   :  { %29131 = vmatpush3.msra.mxu1 %v1078_v58  ;;  %v27410_v58 = vld [vmem:[%s40498_s28 + $0x48] sm:$0xff] }
 0x220   :  { %29079 = vmatmul.mubr.f32.vlgmr.msra.gmra.mrb[0].mxu0 %v36317_v21  ;;  %32627 = vmatprep.subr.bf16.mxu1 %v40390_v3  ;;  %v2472_v62 = vand.u32 4294901760, %v27410_v58  ;;  %v36513_v4 = vsub.f32 %v27405_v52, %v1974_v56 }
 0x221   :  { %32611 = vmatpush3.bf16.msra.mxu0 %v32610_v57  ;;  %29087 = vmatprep.mubr.msk.f32.mxu0 %vm35896_vm1, %v40392_v8  ;;  %v27409_v57 = vld [vmem:[%s40498_s28 + $0x40] sm:$0xff] }
 0x222   :  { %29085 = vmatprep.subr.mxu0 %v40392_v8  ;;  %29133 = vmatmul.mubr.f32.vlgmr.msra.gmra.mrb[0].mxu1 %v36351_v39 }
 0x223   :  { %32629 = vmatpush3.bf16.msra.mxu1 %v32628_v59  ;;  %29141 = vmatprep.mubr.msk.f32.mxu1 %vm35896_vm1, %v40392_v8  ;;  %v1977_v59 = vand.u32 4294901760, %v27406_v53 }
 0x224   :  { %29139 = vmatprep.subr.mxu1 %v40392_v8 }
 0x225   :  { %29086 = vmatpush3.msra.mxu0 %v36315_v20  ;;  %v1563_v20 = vand.u32 4294901760, %v1562_v16  ;;  %v36519_v5 = vsub.f32 %v27406_v53, %v1977_v59  ;;  %v2955_v53 = vld [vmem:[#allocation10 + $0x10] sm:$0xff] }
 0x226   :  { %32612 = vmatprep.subr.bf16.mxu0 %v40390_v3 }
 0x227   :  { %29140 = vmatpush3.msra.mxu1 %v36349_v38  ;;  %v27402_v38 = vld [vmem:[#allocation8] ss:$0 sm:$0xff] }
 0x228   :  { %29088 = vmatmul.mubr.f32.vlgmr.msra.gmra.mrb[0].mxu0 %v36330_v28  ;;  %32630 = vmatprep.subr.bf16.mxu1 %v40390_v3  ;;  %v1577_v28 = vand.u32 4294901760, %v1576_v26 }
 0x229   :  { %32614 = vmatpush3.bf16.msra.mxu0 %v36303_v12  ;;  %29096 = vmatprep.mubr.msk.f32.mxu0 %vm35896_vm1, %v40392_v8 }
 0x22a   :  { %29094 = vmatprep.subr.mxu0 %v40392_v8  ;;  %29142 = vmatmul.mubr.f32.vlgmr.msra.gmra.mrb[0].mxu1 %v1050_v45 }
 0x22b   :  { %32632 = vmatpush3.bf16.msra.mxu1 %v36323_v25  ;;  %29150 = vmatprep.mubr.msk.f32.mxu1 %vm35896_vm1, %v40392_v8 }
 0x22c   :  { %29148 = vmatprep.subr.mxu1 %v40392_v8 }
 0x22d   :  { %29095 = vmatpush3.msra.mxu0 %v36309_v15 }
 0x22e   :  { %32615 = vmatprep.subr.bf16.mxu0 %v40390_v3 }
 0x22f   :  { %29149 = vmatpush3.msra.mxu1 %v36340_v32 }
 0x230   :  { %29097 = vmatmul.mubr.f32.vlgmr.msra.gmra.mrb[0].mxu0 %v558_v35  ;;  %32633 = vmatprep.subr.bf16.mxu1 %v40390_v3 }
 0x231   :  { %32617 = vmatpush3.bf16.msra.mxu0 %v32616_v60  ;;  %29105 = vmatprep.mubr.msk.f32.mxu0 %vm35896_vm1, %v40392_v8  ;;  %v1980_v60 = vand.u32 4294901760, %v27407_v54 }
 0x232   :  { %29103 = vmatprep.subr.mxu0 %v40392_v8  ;;  %29151 = vmatmul.mubr.f32.vlgmr.msra.gmra.mrb[0].mxu1 %v1051_v50 }
 0x233   :  { %32635 = vmatpush3.bf16.msra.mxu1 %v32634_v61  ;;  %29159 = vmatprep.mubr.msk.f32.mxu1 %vm35896_vm1, %v40392_v8  ;;  %v2469_v61 = vand.u32 4294901760, %v27409_v57  ;;  %v36521_v6 = vsub.f32 %v27407_v54, %v1980_v60  ;;  %v2956_v54 = vld [vmem:[#allocation10 + $0x18] sm:$0xff] }
 0x234   :  { %29157 = vmatprep.subr.mxu1 %v40392_v8 }
 0x235   :  { %29104 = vmatpush3.msra.mxu0 %v583_v31  ;;  %v36470_v31 = vpack.c.bf16 %v1574_v18, %v1567_v17  ;;  %v36526_v11 = vpack.c.bf16 %v2472_v62, %v2469_v61  ;;  %v2073_v16 = vand.u32 4294901760, %v36521_v6 }
 0x236   :  { %32618 = vmatprep.subr.bf16.mxu0 %v40390_v3 }
 0x237   :  { %29158 = vmatpush3.msra.mxu1 %v1076_v49  ;;  %v2074_v26 = vsub.f32 %v36521_v6, %v2073_v16 }
 0x238   :  { %29106 = vmatmul.mubr.f32.vlgmr.msra.gmra.mrb[0].mxu0 %v36317_v21  ;;  %32636 = vmatprep.subr.bf16.mxu1 %v40390_v3 }
 0x239   :  { %32620 = vmatpush3.bf16.msra.mxu0 %v36303_v12  ;;  %29114 = vmatprep.mubr.msk.f32.mxu0 %vm35896_vm1, %v40392_v8  ;;  %v1554_v12 = vand.u32 4294901760, %v1553_v10 }
 0x23a   :  { %29112 = vmatprep.subr.mxu0 %v40392_v8  ;;  %29160 = vmatmul.mubr.f32.vlgmr.msra.gmra.mrb[0].mxu1 %v36351_v39 }
 0x23b   :  { %32638 = vmatpush3.bf16.msra.mxu1 %v36323_v25  ;;  %29168 = vmatprep.mubr.msk.f32.mxu1 %vm35896_vm1, %v40392_v8  ;;  %v36460_v14 = vpack.c.bf16 %v1561_v13, %v1554_v12  ;;  %v2059_v13 = vand.u32 4294901760, %v36513_v4 }
 0x23c   :  { %29166 = vmatprep.subr.mxu1 %v40392_v8 }
 0x23d   :  { %29113 = vmatpush3.msra.mxu0 %v36309_v15  ;;  %v1555_v15 = vsub.f32 %v1553_v10, %v1554_v12  ;;  %v2478_v10 = vand.u32 4294901760, %v27412_v0  ;;  %v2052_v12 = vand.u32 4294901760, %v36511_v1 }
 0x23e   :  { %32657 = vmatprep.subr.bf16.mxu0 %v40390_v3 }
 0x23f   :  { %29167 = vmatpush3.msra.mxu1 %v36340_v32  ;;  %v1556_v19 = vand.u32 4294901760, %v1555_v15  ;;  %v27401_v32 = vld [vmem:[%s40499_s1] ss:$0 sm:$0xff]  ;;  %v2066_v15 = vand.u32 4294901760, %v36519_v5  ;;  %v36539_v18 = vpack.c.bf16 %v2478_v10, %v2475_v7 }
 0x240   :  { %29115 = vmatmul.mubr.f32.vlgmr.msra.gmra.mrb[0].mxu0 %v36317_v21  ;;  %32639 = vmatprep.subr.bf16.mxu1 %v40390_v3  ;;  %v1568_v21 = vand.u32 4294901760, %v1567_v17 }
 0x241   :  { %29212 = vmatprep.mubr.msk.f32.mxu0 %vm35896_vm1, %v40392_v8  ;;  %32659 = vmatpush3.bf16.msra.mxu0 %v36446_v2  ;;  %v36462_v23 = vpack.c.bf16 %v1563_v20, %v1556_v19  ;;  %v36541_v19 = vsub.f32 %v27409_v57, %v2469_v61  ;;  %v36545_v20 = vsub.f32 %v27410_v58, %v2472_v62  ;;  %v2977_v61 = vand.u32 4294901760, %v2956_v54 }
 0x242   :  { %29169 = vmatmul.mubr.f32.vlgmr.msra.gmra.mrb[0].mxu1 %v36351_v39  ;;  %32660 = vmatprep.subr.bf16.mxu0 %v40390_v3  ;;  %v36464_v24 = vpack.c.bf16 %v1575_v22, %v1568_v21  ;;  %v1569_v25 = vsub.f32 %v1567_v17, %v1568_v21  ;;  %v36537_v17 = vpack.c.bf16 %v1974_v56, %v1971_v55 }
 0x243   :  { %29179 = vmatprep.mubr.msk.f32.mxu1 %vm35896_vm1, %v40392_v8  ;;  %32641 = vmatpush3.bf16.msra.mxu1 %v36446_v2  ;;  %v2053_v21 = vsub.f32 %v36511_v1, %v2052_v12  ;;  %v2060_v22 = vsub.f32 %v36513_v4, %v2059_v13 }
 0x244   :  { %32642 = vmatprep.subr.bf16.mxu1 %v40390_v3  ;;  %v1570_v27 = vand.u32 4294901760, %v1569_v25  ;;  %v2067_v25 = vsub.f32 %v36519_v5, %v2066_v15 }
 0x245   :  { %32662 = vmatpush3.bf16.msra.mxu0 %v36454_v9 }
 0x246   :  { %32663 = vmatprep.subr.bf16.mxu0 %v40390_v3  ;;  %v36466_v29 = vpack.c.bf16 %v1577_v28, %v1570_v27  ;;  %v36564_v27 = vsub.f32 %v27411_v63, %v2475_v7  ;;  %v36566_v28 = vsub.f32 %v27412_v0, %v2478_v10  ;;  %v36622_v0 = vpack.c.bf16 %v36513_v4, %v36511_v1 }
 0x247   :  { %32644 = vmatpush3.bf16.msra.mxu1 %v36454_v9  ;;  %v36719_v1 = vpack.c.bf16 %v2073_v16, %v2066_v15 }
 0x248   :  { %32645 = vmatprep.subr.bf16.mxu1 %v40390_v3  ;;  %v2564_v57 = vand.u32 4294901760, %v36564_v27  ;;  %v2571_v58 = vand.u32 4294901760, %v36566_v28 }
 0x24a   :  { %v36628_v7 = vpack.c.bf16 %v2571_v58, %v2564_v57  ;;  %v2565_v16 = vsub.f32 %v36564_v27, %v2564_v57 }
 0x313   :  { %v956_v33 = vpop.f32.mrb[0].mxu0 }
 0x314   :  { %v34511_v35 = vadd.f32 %v27401_v32, %v956_v33  ;;  %v29116_v36 = vpop.f32.mrb[1].mxu0  ;;  %v36570_v32 = vpack.c.bf16 %v1980_v60, %v1977_v59  ;;  %v36574_v33 = vpack.c.bf16 %v36545_v20, %v36541_v19  ;;  %v2974_v60 = vand.u32 4294901760, %v2955_v53 }
 0x315   :  { %v1449_v40 = vpop.f32.mrb[0].mxu1  ;;  %v2953_v36 = vld [vmem:[#allocation10] sm:$0xff] }
 0x316   :  { %vm960_vm3 = vcmp.ge.f32.partialorder %v34511_v35, 0.0  ;;  %v962_v37 = vmul.f32 %v34511_v35, %v961_v34  ;;  %v34512_v42 = vadd.f32 %v27402_v38, %v1449_v40  ;;  %v29170_v43 = vpop.f32.mrb[1].mxu1  ;;  %v1456_v38 = vld [vmem:[#allocation33] sm:$0x3]  ;;  %v2075_v40 = vand.u32 4294901760, %v2074_v26 }
 0x317   :  { %v2557_v43 = vand.u32 4294901760, %v36545_v20  ;;  %v2965_v52 = vsel %vm1468_vm4, %v1456_v38, 0  ;;  %v36639_v26 = vsub.f32 %v2956_v54, %v2977_v61 }
 0x318   :  { %v963_v39 = vsel %vm960_vm3, %v34511_v35, %v962_v37  ;;  %vm1453_vm5 = vcmp.ge.f32.partialorder %v34512_v42, 0.0  ;;  %v1454_v45 = vmul.f32 %v34512_v42, %v961_v34  ;;  %v2054_v34 = vand.u32 4294901760, %v2053_v21  ;;  %v2954_v37 = vld [vmem:[#allocation10 + $0x8] sm:$0xff] }
 0x319   :  { %v1470_v41 = vsel %vm1468_vm4, %v963_v39, 0  ;;  %v2061_v35 = vand.u32 4294901760, %v2060_v22  ;;  %v2068_v39 = vand.u32 4294901760, %v2067_v25  ;;  %v2971_v51 = vand.u32 4294901760, %v2954_v37 }
 0x31a   :  { %v36474_v44 = vand.u32 4294901760, %v1470_v41  ;;  %v36479_v47 = vsel %vm1453_vm5, %v34512_v42, %v1454_v45  ;;  %v2550_v42 = vand.u32 4294901760, %v36541_v19  ;;  %v36607_v59 = vand.u32 4294901760, %v2965_v52 }
 0x31b   :  { %v36589_v45 = vpack.c.bf16 %v2061_v35, %v2054_v34  ;;  %v36596_v55 = vpack.c.bf16 %v2075_v40, %v2068_v39  ;;  %v36613_v63 = vsub.f32 %v2954_v37, %v2971_v51  ;;  %v36637_v25 = vsub.f32 %v2955_v53, %v2974_v60 }
 0x31c   :  { %40500 = vst [vmem:[#allocation84_spill] sm:$0xff] %v36474_v44  ;;  %v36477_v46 = vsub.f32 %v1470_v41, %v36474_v44  ;;  %v36583_v41 = vpack.c.bf16 %v36566_v28, %v36564_v27  ;;  %v36603_v56 = vpack.c.bf16 %v2557_v43, %v2550_v42  ;;  %v36631_v10 = vsub.f32 %v2965_v52, %v36607_v59 }
 0x31d   :  { %v40389_v22 = vand.u32 4294901760, %v36613_v63  ;;  %v36648_v34 = vpack.c.bf16 %v36521_v6, %v36519_v5  ;;  %v3063_v39 = vand.u32 4294901760, %v36637_v25  ;;  %v3070_v40 = vand.u32 4294901760, %v36639_v26 }
 0x31e   :  { %40501 = vst [vmem:[#allocation85_spill] sm:$0xff] %v36477_v46  ;;  %v36482_v48 = vand.u32 4294901760, %v36477_v46  ;;  %v36734_v5 = vpack.c.bf16 %v36639_v26, %v36637_v25  ;;  %v2551_v6 = vsub.f32 %v36541_v19, %v2550_v42  ;;  %v2572_v19 = vsub.f32 %v36566_v28, %v2571_v58  ;;  %v3951_v58 = vld [vmem:[#allocation10 + $0x40] sm:$0xff] }
 0x31f   :  { %v3057_v38 = vsub.f32 %v36613_v63, %v40389_v22  ;;  %v3064_v54 = vsub.f32 %v36637_v25, %v3063_v39  ;;  %v3071_v22 = vsub.f32 %v36639_v26, %v3070_v40  ;;  %v2566_v27 = vand.u32 4294901760, %v2565_v16 }
 0x320   :  { %40502 = vst [vmem:[#allocation86_spill] sm:$0xff] %v36482_v48  ;;  %29213 = vmatmul.mubr.f32.vlgmr.msra.gmra.mrb[2].mxu0 %v36482_v48  ;;  %v1544_v49 = vsub.f32 %v36477_v46, %v36482_v48  ;;  %40505 = vst [vmem:[#allocation89_spill] sm:$0xff] %v36734_v5  ;;  %v2573_v42 = vand.u32 4294901760, %v2572_v19  ;;  %v40510_v16 = vmov 0.0  }
 0x321   :  { %32665 = vmatpush3.bf16.msra.mxu0 %v36460_v14  ;;  %29223 = vmatprep.mubr.msk.f32.mxu0 %vm35896_vm1, %v40392_v8  ;;  %v3058_v53 = vand.u32 4294901760, %v3057_v38  ;;  %v3072_v38 = vand.u32 4294901760, %v3071_v22 }
 0x322   :  { %32666 = vmatprep.subr.bf16.mxu0 %v40390_v3  ;;  %v36491_v50 = vand.u32 4294901760, %v1544_v49  ;;  %v2968_v49 = vand.u32 4294901760, %v2953_v36  ;;  %v36771_v28 = vpack.c.bf16 %v2573_v42, %v2566_v27 }
 0x324   :  { %40503 = vst [vmem:[#allocation87_spill] sm:$0xff] %v36491_v50  ;;  %29180 = vmatmul.mubr.f32.vlgmr.msra.gmra.mrb[2].mxu1 %v36491_v50  ;;  %v36611_v62 = vsub.f32 %v2953_v36, %v2968_v49  ;;  %v36650_v35 = vpack.c.bf16 %v2971_v51, %v2968_v49  ;;  %v36653_v36 = vand.u32 4294901760, %v36631_v10  ;;  %v36670_v49 = vpack.c.bf16 %v2977_v61, %v2974_v60 }
 0x325   :  { %32647 = vmatpush3.bf16.msra.mxu1 %v36462_v23  ;;  %32668 = vmatpush3.bf16.msra.mxu0 %v36464_v24 }
 0x326   :  { %32648 = vmatprep.subr.bf16.mxu1 %v40390_v3  ;;  %32669 = vmatprep.subr.bf16.mxu0 %v40390_v3  ;;  %v3049_v21 = vand.u32 4294901760, %v36611_v62  ;;  %v3039_v51 = vsub.f32 %v36631_v10, %v36653_v36  ;;  %v36723_v4 = vpack.c.bf16 %v36613_v63, %v36611_v62 }
 0x327   :  { %29190 = vmatprep.mubr.msk.f32.mxu1 %vm35896_vm1, %v40392_v8 }
 0x328   :  { %29224 = vmatmul.mubr.f32.vlgmr.msra.gmra.mrb[2].mxu0 %v36474_v44  ;;  %v3050_v37 = vsub.f32 %v36611_v62, %v3049_v21  ;;  %v36687_v60 = vand.u32 4294901760, %v3039_v51  ;;  %v36704_v51 = vpack.c.bf16 %v2059_v13, %v2052_v12  ;;  %40504 = vst [vmem:[#allocation88_spill] sm:$0xff] %v36723_v4  ;;  %v2558_v12 = vsub.f32 %v36545_v20, %v2557_v43 }
 0x329   :  { %32650 = vmatpush3.bf16.msra.mxu1 %v36466_v29  ;;  %32671 = vmatpush3.bf16.msra.mxu0 %v36446_v2  ;;  %v2552_v13 = vand.u32 4294901760, %v2551_v6  ;;  %v40506_v43 = vand.u32 4294901760, %v36613_v63  ;;  %v36790_v62 = vpack.c.bf16 %v3070_v40, %v3063_v39  ;;  %v3453_v63 = vld [vmem:[#allocation10 + $0x20] sm:$0xff] }
 0x32a   :  { %32651 = vmatprep.subr.bf16.mxu1 %v40390_v3  ;;  %32672 = vmatprep.subr.bf16.mxu0 %v40390_v3  ;;  %v3051_v52 = vand.u32 4294901760, %v3050_v37  ;;  %v3065_v37 = vand.u32 4294901760, %v3064_v54  ;;  %v2559_v15 = vand.u32 4294901760, %v2558_v12  ;;  %v3466_v6 = vand.u32 4294901760, %v3453_v63 }
 0x32b   :  { %29234 = vmatprep.mubr.msk.f32.mxu0 %vm35896_vm1, %v40392_v8  ;;  %v36777_v57 = vpack.c.bf16 %v40506_v43, %v3049_v21  ;;  %40508 = vst [vmem:[#allocation91_spill] sm:$0xff] %v36790_v62  ;;  %v3454_v21 = vld [vmem:[#allocation10 + $0x28] sm:$0xff] }
 0x32c   :  { %29191 = vmatmul.mubr.f32.vlgmr.msra.gmra.mrb[2].mxu1 %v36474_v44  ;;  %v36691_v61 = vpack.c.bf16 %v3058_v53, %v3051_v52  ;;  %v36706_v22 = vpack.c.bf16 %v3072_v38, %v3065_v37  ;;  %v36762_v20 = vpack.c.bf16 %v2559_v15, %v2552_v13  ;;  %v3952_v52 = vld [vmem:[#allocation10 + $0x48] sm:$0xff]  ;;  %v3964_v53 = vand.u32 4294901760, %v3951_v58  ;;  %v3953_v37 = vld [vmem:[#allocation10 + $0x50] sm:$0xff]  ;;  %v3954_v38 = vld [vmem:[#allocation10 + $0x58] sm:$0xff] }
 0x32d   :  { %32653 = vmatpush3.bf16.msra.mxu1 %v36468_v30  ;;  %32674 = vmatpush3.bf16.msra.mxu0 %v36454_v9  ;;  %40507 = vst [vmem:[#allocation90_spill] sm:$0xff] %v36777_v57  ;;  %v3967_v54 = vand.u32 4294901760, %v3952_v52  ;;  %v3469_v12 = vand.u32 4294901760, %v3454_v21  ;;  %v3970_v39 = vand.u32 4294901760, %v3953_v37  ;;  %v3973_v40 = vand.u32 4294901760, %v3954_v38  ;;  %v3455_v13 = vld [vmem:[#allocation10 + $0x30] sm:$0xff] }
 0x32e   :  { %32654 = vmatprep.subr.bf16.mxu1 %v40390_v3  ;;  %32711 = vmatprep.subr.bf16.mxu0 %v40390_v3  ;;  %v36797_v25 = vsub.f32 %v3951_v58, %v3964_v53  ;;  %v3456_v15 = vld [vmem:[#allocation10 + $0x38] sm:$0xff]  ;;  %v36810_v27 = vsub.f32 %v3453_v63, %v3466_v6  ;;  %v3472_v43 = vand.u32 4294901760, %v3455_v13 }
 0x32f   :  { %29201 = vmatprep.mubr.msk.f32.mxu1 %vm35896_vm1, %v40392_v8  ;;  %v36799_v26 = vsub.f32 %v3952_v52, %v3967_v54  ;;  %v36812_v42 = vsub.f32 %v3454_v21, %v3469_v12  ;;  %v3475_v58 = vand.u32 4294901760, %v3456_v15  ;;  %v36816_v52 = vsub.f32 %v3953_v37, %v3970_v39 }
 0x330   :  { %29235 = vmatmul.mubr.f32.vlgmr.msra.gmra.mrb[2].mxu0 %v36474_v44  ;;  %v36824_v63 = vpack.c.bf16 %v3967_v54, %v3964_v53  ;;  %v40511_v21 = vand.u32 4294901760, %v36797_v25 }
 0x331   :  { %32656 = vmatpush3.bf16.msra.mxu1 %v36470_v31  ;;  %32713 = vmatpush3.bf16.msra.mxu0 %v36526_v11  ;;  %v40512_v37 = vand.u32 4294901760, %v36799_v26 }
 0x332   :  { %32675 = vmatprep.subr.bf16.mxu1 %v40390_v3  ;;  %32714 = vmatprep.subr.bf16.mxu0 %v40390_v3  ;;  %v4046_v19 = vsub.f32 %v36797_v25, %v40511_v21  ;;  %v36847_v21 = vpack.c.bf16 %v3469_v12, %v3466_v6  ;;  %v40514_v6 = vand.u32 4294901760, %v36816_v52 }
 0x333   :  { %29311 = vmatprep.mubr.msk.f32.mxu0 %vm35896_vm1, %v40392_v8 }
 0x334   :  { %29202 = vmatmul.mubr.f32.vlgmr.msra.gmra.mrb[2].mxu1 %v36477_v46  ;;  %v4047_v53 = vand.u32 4294901760, %v4046_v19  ;;  %v4060_v12 = vsub.f32 %v36816_v52, %v40514_v6 }
 0x335   :  { %32677 = vmatpush3.bf16.msra.mxu1 %v36537_v17  ;;  %32716 = vmatpush3.bf16.msra.mxu0 %v36539_v18 }
 0x336   :  { %32678 = vmatprep.subr.bf16.mxu1 %v40390_v3  ;;  %32723 = vmatprep.subr.bf16.mxu0 %v40390_v3 }
 0x337   :  { %29245 = vmatprep.mubr.msk.f32.mxu1 %vm35896_vm1, %v40392_v8 }
 0x338   :  { %29312 = vmatmul.mubr.f32.vlgmr.msra.gmra.mrb[4].mxu0 %v36491_v50 }
 0x339   :  { %32680 = vmatpush3.bf16.msra.mxu1 %v36570_v32  ;;  %32725 = vmatpush3.bf16.msra.mxu0 %v36574_v33 }
 0x33a   :  { %32681 = vmatprep.subr.bf16.mxu1 %v40390_v3  ;;  %32726 = vmatprep.subr.bf16.mxu0 %v40390_v3 }
 0x33b   :  { %29333 = vmatprep.mubr.msk.f32.mxu0 %vm35896_vm1, %v40392_v8 }
 0x33c   :  { %29246 = vmatmul.mubr.f32.vlgmr.msra.gmra.mrb[4].mxu1 %v36491_v50 }
 0x33d   :  { %32683 = vmatpush3.bf16.msra.mxu1 %v36589_v45  ;;  %32728 = vmatpush3.bf16.msra.mxu0 %v36583_v41 }
 0x33e   :  { %32684 = vmatprep.subr.bf16.mxu1 %v40390_v3  ;;  %32735 = vmatprep.subr.bf16.mxu0 %v40390_v3 }
 0x33f   :  { %29256 = vmatprep.mubr.msk.f32.mxu1 %vm35896_vm1, %v40392_v8 }
 0x340   :  { %29334 = vmatmul.mubr.f32.vlgmr.msra.gmra.mrb[6].mxu0 %v36477_v46 }
 0x341   :  { %32686 = vmatpush3.bf16.msra.mxu1 %v36596_v55  ;;  %32737 = vmatpush3.bf16.msra.mxu0 %v36603_v56 }
 0x342   :  { %32687 = vmatprep.subr.bf16.mxu1 %v40390_v3  ;;  %32738 = vmatprep.subr.bf16.mxu0 %v40390_v3 }
 0x343   :  { %29355 = vmatprep.mubr.msk.f32.mxu0 %vm35896_vm1, %v40392_v8 }
 0x344   :  { %29257 = vmatmul.mubr.f32.vlgmr.msra.gmra.mrb[4].mxu1 %v36474_v44 }
 0x345   :  { %32689 = vmatpush3.bf16.msra.mxu1 %v36622_v0  ;;  %32740 = vmatpush3.bf16.msra.mxu0 %v36628_v7 }
 0x346   :  { %32690 = vmatprep.subr.bf16.mxu1 %v40390_v3  ;;  %32747 = vmatprep.subr.bf16.mxu0 %v40390_v3 }
 0x347   :  { %29267 = vmatprep.mubr.msk.f32.mxu1 %vm35896_vm1, %v40392_v8 }
 0x348   :  { %29356 = vmatmul.mubr.f32.vlgmr.msra.gmra.mrb[8].mxu0 %v36474_v44 }
 0x349   :  { %32692 = vmatpush3.bf16.msra.mxu1 %v36648_v34  ;;  %32749 = vmatpush3.bf16.msra.mxu0 %v36650_v35 }
 0x34a   :  { %32693 = vmatprep.subr.bf16.mxu1 %v40390_v3  ;;  %32750 = vmatprep.subr.bf16.mxu0 %v40390_v3 }
 0x34b   :  { %29377 = vmatprep.mubr.msk.f32.mxu0 %vm35896_vm1, %v40392_v8 }
 0x34c   :  { %29268 = vmatmul.mubr.f32.vlgmr.msra.gmra.mrb[4].mxu1 %v36477_v46  ;;  %v40401_v46 = vand.u32 4294901760, %v36810_v27 }
 0x34d   :  { %32695 = vmatpush3.bf16.msra.mxu1 %v36537_v17  ;;  %32752 = vmatpush3.bf16.msra.mxu0 %v36670_v49 }
 0x34e   :  { %32696 = vmatprep.subr.bf16.mxu1 %v40390_v3  ;;  %32753 = vmatprep.subr.bf16.mxu0 %v40390_v3 }
 0x34f   :  { %29278 = vmatprep.mubr.msk.f32.mxu1 %vm35896_vm1, %v40392_v8 }
 0x350   :  { %29378 = vmatmul.mubr.f32.vlgmr.msra.gmra.mrb[2].mxu0 %v36687_v60 }
 0x351   :  { %32698 = vmatpush3.bf16.msra.mxu1 %v36570_v32  ;;  %32755 = vmatpush3.bf16.msra.mxu0 %v36691_v61 }
 0x352   :  { %32699 = vmatprep.subr.bf16.mxu1 %v40390_v3  ;;  %32756 = vmatprep.subr.bf16.mxu0 %v40390_v3 }
 0x353   :  { %29388 = vmatprep.mubr.msk.f32.mxu0 %vm35896_vm1, %v40392_v8 }
 0x354   :  { %29279 = vmatmul.mubr.f32.vlgmr.msra.gmra.mrb[4].mxu1 %v36482_v48 }
 0x355   :  { %32701 = vmatpush3.bf16.msra.mxu1 %v36704_v51  ;;  %32758 = vmatpush3.bf16.msra.mxu0 %v36706_v22 }
 0x356   :  { %32702 = vmatprep.subr.bf16.mxu1 %v40390_v3  ;;  %32759 = vmatprep.subr.bf16.mxu0 %v40390_v3 }
 0x357   :  { %29289 = vmatprep.mubr.msk.f32.mxu1 %vm35896_vm1, %v40392_v8 }
 0x358   :  { %29389 = vmatmul.mubr.f32.vlgmr.msra.gmra.mrb[2].mxu0 %v36607_v59 }
 0x359   :  { %32704 = vmatpush3.bf16.msra.mxu1 %v36719_v1  ;;  %32761 = vmatpush3.bf16.msra.mxu0 %v36723_v4 }
 0x35a   :  { %32705 = vmatprep.subr.bf16.mxu1 %v40390_v3  ;;  %32762 = vmatprep.subr.bf16.mxu0 %v40390_v3 }
 0x35b   :  { %29399 = vmatprep.mubr.msk.f32.mxu0 %vm35896_vm1, %v40392_v8 }
 0x35c   :  { %29290 = vmatmul.mubr.f32.vlgmr.msra.gmra.mrb[4].mxu1 %v36474_v44 }
 0x35d   :  { %32707 = vmatpush3.bf16.msra.mxu1 %v36537_v17  ;;  %32764 = vmatpush3.bf16.msra.mxu0 %v36734_v5 }
 0x35e   :  { %32708 = vmatprep.subr.bf16.mxu1 %v40390_v3  ;;  %32765 = vmatprep.subr.bf16.mxu0 %v40390_v3 }
 0x35f   :  { %29300 = vmatprep.mubr.msk.f32.mxu1 %vm35896_vm1, %v40392_v8 }
 0x360   :  { %29400 = vmatmul.mubr.f32.vlgmr.msra.gmra.mrb[2].mxu0 %v36631_v10 }
 0x361   :  { %32710 = vmatpush3.bf16.msra.mxu1 %v36570_v32  ;;  %32767 = vmatpush3.bf16.msra.mxu0 %v36650_v35 }
 0x362   :  { %32717 = vmatprep.subr.bf16.mxu1 %v40390_v3  ;;  %32768 = vmatprep.subr.bf16.mxu0 %v40390_v3 }
 0x363   :  { %29410 = vmatprep.mubr.msk.f32.mxu0 %vm35896_vm1, %v40392_v8 }
 0x364   :  { %29301 = vmatmul.mubr.f32.vlgmr.msra.gmra.mrb[4].mxu1 %v36474_v44 }
 0x365   :  { %32719 = vmatpush3.bf16.msra.mxu1 %v36762_v20  ;;  %32770 = vmatpush3.bf16.msra.mxu0 %v36670_v49 }
 0x366   :  { %32720 = vmatprep.subr.bf16.mxu1 %v40390_v3  ;;  %32771 = vmatprep.subr.bf16.mxu0 %v40390_v3 }
 0x367   :  { %29322 = vmatprep.mubr.msk.f32.mxu1 %vm35896_vm1, %v40392_v8 }
 0x368   :  { %29411 = vmatmul.mubr.f32.vlgmr.msra.gmra.mrb[2].mxu0 %v36653_v36 }
 0x369   :  { %32722 = vmatpush3.bf16.msra.mxu1 %v36771_v28  ;;  %32773 = vmatpush3.bf16.msra.mxu0 %v36777_v57 }
 0x36a   :  { %32729 = vmatprep.subr.bf16.mxu1 %v40390_v3  ;;  %32774 = vmatprep.subr.bf16.mxu0 %v40390_v3 }
 0x36b   :  { %29421 = vmatprep.mubr.msk.f32.mxu0 %vm35896_vm1, %v40392_v8 }
 0x36c   :  { %29323 = vmatmul.mubr.f32.vlgmr.msra.gmra.mrb[6].mxu1 %v36474_v44 }
 0x36d   :  { %32731 = vmatpush3.bf16.msra.mxu1 %v36526_v11  ;;  %32776 = vmatpush3.bf16.msra.mxu0 %v36790_v62  ;;  %v36841_v62 = vsub.f32 %v3456_v15, %v3475_v58  ;;  %v40513_v15 = vand.u32 4294901760, %v36812_v42 }
 0x36e   :  { %32732 = vmatprep.subr.bf16.mxu1 %v40390_v3  ;;  %32777 = vmatprep.subr.bf16.mxu0 %v40390_v3  ;;  %v36818_v3 = vsub.f32 %v3954_v38, %v3973_v40  ;;  %v4053_v38 = vsub.f32 %v36799_v26, %v40512_v37  ;;  %v36849_v37 = vpack.c.bf16 %v3973_v40, %v3970_v39 }
 0x36f   :  { %29344 = vmatprep.mubr.msk.f32.mxu1 %vm35896_vm1, %v40392_v8  ;;  %v40509_v8 = vmov 0.0|0.0   ;;  %v3555_v54 = vsub.f32 %v36812_v42, %v40513_v15  ;;  %v36873_v15 = vpack.c.bf16 %v3475_v58, %v3472_v43  ;;  %v40516_v4 = vand.u32 4294901760, %v36841_v62 }
 0x370   :  { %29422 = vmatmul.mubr.f32.vlgmr.msra.gmra.mrb[2].mxu0 %v36607_v59  ;;  %v4054_v50 = vand.u32 4294901760, %v4053_v38  ;;  %v40515_v39 = vand.u32 4294901760, %v36818_v3 }
 0x371   :  { %32734 = vmatpush3.bf16.msra.mxu1 %v36539_v18  ;;  %32779 = vmatpush3.bf16.msra.mxu0 %v36650_v35  ;;  %v3556_v57 = vand.u32 4294901760, %v3555_v54  ;;  %v40518_v54 = vand.u32 4294901760, %v36799_v26 }
 0x372   :  { %32741 = vmatprep.subr.bf16.mxu1 %v40509_v8  ;;  %32780 = vmatprep.subr.bf16.mxu0 %v40509_v8  ;;  %v4067_v40 = vsub.f32 %v36818_v3, %v40515_v39  ;;  %v36875_v6 = vpack.c.bf16 %v4054_v50, %v4047_v53  ;;  %v4061_v39 = vand.u32 4294901760, %v4060_v12  ;;  %v40521_v12 = vand.u32 4294901760, %v36816_v52 }
 0x373   :  { %29432 = vmatprep.mubr.msk.f32.mxu0 %vm35896_vm1, %v40510_v16 }
 0x374   :  { %29345 = vmatmul.mubr.f32.vlgmr.msra.gmra.mrb[8].mxu1 %v36482_v48  ;;  %v36839_v48 = vsub.f32 %v3455_v13, %v3472_v43  ;;  %v3548_v13 = vsub.f32 %v36810_v27, %v40401_v46  ;;  %v4068_v38 = vand.u32 4294901760, %v4067_v40  ;;  %v40522_v40 = vand.u32 4294901760, %v36818_v3 }
 0x375   :  { %32743 = vmatpush3.bf16.msra.mxu1 %v36526_v11  ;;  %32782 = vmatpush3.bf16.msra.mxu0 %v36670_v49 }
 0x376   :  { %32744 = vmatprep.subr.bf16.mxu1 %v40509_v8  ;;  %32819 = vmatprep.subr.bf16.mxu0 %v40509_v8  ;;  %v3561_v19 = vand.u32 4294901760, %v36839_v48  ;;  %v3549_v46 = vand.u32 4294901760, %v3548_v13  ;;  %v36894_v43 = vpack.c.bf16 %v4068_v38, %v4061_v39  ;;  %v36972_v38 = vpack.c.bf16 %v40522_v40, %v40521_v12 }
 0x377   :  { %29366 = vmatprep.mubr.msk.f32.mxu1 %vm35896_vm1, %v40510_v16  ;;  %v4471_v39 = vsel %vm1468_vm4, %v36479_v47, 0 }
 0x378   :  { %29433 = vmatmul.mubr.f32.vlgmr.msra.gmra.mrb[2].mxu0 %v36607_v59  ;;  %v3562_v5 = vsub.f32 %v36839_v48, %v3561_v19  ;;  %v36892_v50 = vpack.c.bf16 %v3556_v57, %v3549_v46  ;;  %v36907_v46 = vpack.c.bf16 %v36799_v26, %v36797_v25  ;;  %v40517_v57 = vand.u32 4294901760, %v36797_v25 }
 0x379   :  { %32746 = vmatpush3.bf16.msra.mxu1 %v36539_v18  ;;  %32821 = vmatpush3.bf16.msra.mxu0 %v36824_v63  ;;  %v40520_v25 = vand.u32 4294901760, %v36812_v42 }
 0x37a   :  { %32783 = vmatprep.subr.bf16.mxu1 %v40509_v8  ;;  %32822 = vmatprep.subr.bf16.mxu0 %v40509_v8  ;;  %v3563_v58 = vand.u32 4294901760, %v3562_v5  ;;  %v36933_v5 = vpack.c.bf16 %v36841_v62, %v36839_v48  ;;  %v36953_v13 = vpack.c.bf16 %v40518_v54, %v40517_v57 }
 0x37b   :  { %29509 = vmatprep.mubr.msk.f32.mxu0 %vm35896_vm1, %v40510_v16 }
 0x37c   :  { %29367 = vmatmul.mubr.f32.vlgmr.msra.gmra.mrb[10].mxu1 %v36474_v44  ;;  %v3569_v44 = vsub.f32 %v36841_v62, %v40516_v4 }
 0x37d   :  { %32785 = vmatpush3.bf16.msra.mxu1 %v36847_v21  ;;  %32824 = vmatpush3.bf16.msra.mxu0 %v36849_v37 }
 0x37e   :  { %32786 = vmatprep.subr.bf16.mxu1 %v40509_v8  ;;  %32825 = vmatprep.subr.bf16.mxu0 %v40509_v8  ;;  %v3570_v53 = vand.u32 4294901760, %v3569_v44  ;;  %v36918_v44 = vpack.c.bf16 %v36812_v42, %v36810_v27  ;;  %v36989_v42 = vand.u32 4294901760, %v4471_v39 }
 0x37f   :  { %29443 = vmatprep.mubr.msk.f32.mxu1 %vm35896_vm1, %v40510_v16 }
 0x380   :  { %29510 = vmatmul.mubr.f32.vlgmr.msra.gmra.mrb[10].mxu0 %v36687_v60  ;;  %v36903_v4 = vpack.c.bf16 %v3570_v53, %v3563_v58  ;;  %v36999_v47 = vsub.f32 %v4471_v39, %v36989_v42 }
 0x381   :  { %32788 = vmatpush3.bf16.msra.mxu1 %v36873_v15  ;;  %32827 = vmatpush3.bf16.msra.mxu0 %v36875_v6 }
 0x382   :  { %32789 = vmatprep.subr.bf16.mxu1 %v40509_v8  ;;  %32828 = vmatprep.subr.bf16.mxu0 %v40509_v8  ;;  %v37009_v48 = vand.u32 4294901760, %v36999_v47 }
 0x383   :  { %29520 = vmatprep.mubr.msk.f32.mxu0 %vm35896_vm1, %v40510_v16 }
 0x384   :  { %29444 = vmatmul.mubr.f32.vlgmr.msra.gmra.mrb[4].mxu1 %v36687_v60  ;;  %v36922_v60 = vpack.c.bf16 %v36818_v3, %v36816_v52  ;;  %v40523_v3 = vand.u32 4294901760, %v36841_v62 }
 0x385   :  { %32791 = vmatpush3.bf16.msra.mxu1 %v36892_v50  ;;  %32830 = vmatpush3.bf16.msra.mxu0 %v36894_v43 }
 0x386   :  { %32792 = vmatprep.subr.bf16.mxu1 %v40509_v8  ;;  %32831 = vmatprep.subr.bf16.mxu0 %v40509_v8 }
 0x387   :  { %29454 = vmatprep.mubr.msk.f32.mxu1 %vm35896_vm1, %v40510_v16 }
 0x388   :  { %29521 = vmatmul.mubr.f32.vlgmr.msra.gmra.mrb[10].mxu0 %v36607_v59 }
 0x389   :  { %32794 = vmatpush3.bf16.msra.mxu1 %v36903_v4  ;;  %32833 = vmatpush3.bf16.msra.mxu0 %v36907_v46 }
 0x38a   :  { %32795 = vmatprep.subr.bf16.mxu1 %v40509_v8  ;;  %32834 = vmatprep.subr.bf16.mxu0 %v40509_v8 }
 0x38b   :  { %29531 = vmatprep.mubr.msk.f32.mxu0 %vm35896_vm1, %v40510_v16 }
 0x38c   :  { %29455 = vmatmul.mubr.f32.vlgmr.msra.gmra.mrb[4].mxu1 %v36607_v59 }
 0x38d   :  { %32797 = vmatpush3.bf16.msra.mxu1 %v36918_v44  ;;  %32836 = vmatpush3.bf16.msra.mxu0 %v36922_v60 }
 0x38e   :  { %32798 = vmatprep.subr.bf16.mxu1 %v40509_v8  ;;  %32837 = vmatprep.subr.bf16.mxu0 %v40509_v8 }
 0x38f   :  { %29465 = vmatprep.mubr.msk.f32.mxu1 %vm35896_vm1, %v40510_v16 }
 0x390   :  { %29532 = vmatmul.mubr.f32.vlgmr.msra.gmra.mrb[10].mxu0 %v36631_v10 }
 0x391   :  { %32800 = vmatpush3.bf16.msra.mxu1 %v36933_v5  ;;  %32839 = vmatpush3.bf16.msra.mxu0 %v36824_v63 }
 0x392   :  { %32801 = vmatprep.subr.bf16.mxu1 %v40509_v8  ;;  %32840 = vmatprep.subr.bf16.mxu0 %v40509_v8 }
 0x393   :  { %29542 = vmatprep.mubr.msk.f32.mxu0 %vm35896_vm1, %v40510_v16 }
 0x394   :  { %29466 = vmatmul.mubr.f32.vlgmr.msra.gmra.mrb[4].mxu1 %v36631_v10  ;;  %v40519_v10 = vand.u32 4294901760, %v36810_v27  ;;  %v36987_v27 = vpack.c.bf16 %v40523_v3, %v3561_v19  ;;  %v40526_v19 = vld [vmem:[#allocation90_spill] sm:$0xff] }
 0x395   :  { %32803 = vmatpush3.bf16.msra.mxu1 %v36847_v21  ;;  %32842 = vmatpush3.bf16.msra.mxu0 %v36849_v37 }
 0x396   :  { %32804 = vmatprep.subr.bf16.mxu1 %v40509_v8  ;;  %32843 = vmatprep.subr.bf16.mxu0 %v40509_v8  ;;  %v36966_v26 = vpack.c.bf16 %v40520_v25, %v40519_v10 }
 0x397   :  { %29476 = vmatprep.mubr.msk.f32.mxu1 %vm35896_vm1, %v40510_v16 }
 0x398   :  { %29543 = vmatmul.mubr.f32.vlgmr.msra.gmra.mrb[10].mxu0 %v36653_v36 }
 0x399   :  { %32806 = vmatpush3.bf16.msra.mxu1 %v36873_v15  ;;  %32845 = vmatpush3.bf16.msra.mxu0 %v36953_v13 }
 0x39a   :  { %32807 = vmatprep.subr.bf16.mxu1 %v40509_v8  ;;  %32846 = vmatprep.subr.bf16.mxu0 %v40509_v8 }
 0x39b   :  { %29553 = vmatprep.mubr.msk.f32.mxu0 %vm35896_vm1, %v40510_v16 }
 0x39c   :  { %29477 = vmatmul.mubr.f32.vlgmr.msra.gmra.mrb[4].mxu1 %v36653_v36  ;;  %v4545_v36 = vsub.f32 %v36999_v47, %v37009_v48 }
 0x39d   :  { %32809 = vmatpush3.bf16.msra.mxu1 %v36966_v26  ;;  %32848 = vmatpush3.bf16.msra.mxu0 %v36972_v38 }
 0x39e   :  { %32810 = vmatprep.subr.bf16.mxu1 %v40509_v8  ;;  %32849 = vmatprep.subr.bf16.mxu0 %v40509_v8  ;;  %v37028_v62 = vand.u32 4294901760, %v4545_v36 }
 0x39f   :  { %29487 = vmatprep.mubr.msk.f32.mxu1 %vm35896_vm1, %v40510_v16 }
 0x3a0   :  { %29554 = vmatmul.mubr.f32.vlgmr.msra.gmra.mrb[10].mxu0 %v36607_v59 }
 0x3a1   :  { %32812 = vmatpush3.bf16.msra.mxu1 %v36987_v27  ;;  %32851 = vmatpush3.bf16.msra.mxu0 %v36824_v63 }
 0x3a2   :  { %32813 = vmatprep.subr.bf16.mxu1 %v40509_v8  ;;  %32852 = vmatprep.subr.bf16.mxu0 %v40509_v8 }
 0x3a3   :  { %29564 = vmatprep.mubr.msk.f32.mxu0 %vm35896_vm1, %v40510_v16 }
 0x3a4   :  { %29488 = vmatmul.mubr.f32.vlgmr.msra.gmra.mrb[4].mxu1 %v36607_v59 }
 0x3a5   :  { %32815 = vmatpush3.bf16.msra.mxu1 %v36847_v21  ;;  %32854 = vmatpush3.bf16.msra.mxu0 %v36849_v37 }
 0x3a6   :  { %32816 = vmatprep.subr.bf16.mxu1 %v40509_v8  ;;  %32891 = vmatprep.subr.bf16.mxu0 %v40509_v8 }
 0x3a7   :  { %29498 = vmatprep.mubr.msk.f32.mxu1 %vm35896_vm1, %v40510_v16 }
 0x3a8   :  { %29565 = vmatmul.mubr.f32.vlgmr.msra.gmra.mrb[10].mxu0 %v36607_v59 }
 0x3a9   :  { %32818 = vmatpush3.bf16.msra.mxu1 %v36873_v15  ;;  %32893 = vmatpush3.bf16.msra.mxu0 %v36537_v17 }
 0x3aa   :  { %32855 = vmatprep.subr.bf16.mxu1 %v40509_v8  ;;  %32894 = vmatprep.subr.bf16.mxu0 %v40509_v8 }
 0x3ab   :  { %29641 = vmatprep.mubr.msk.f32.mxu0 %vm35896_vm1, %v40510_v16 }
 0x3ac   :  { %29499 = vmatmul.mubr.f32.vlgmr.msra.gmra.mrb[4].mxu1 %v36607_v59  ;;  %v7905_v59 = vld [vmem:[#allocation15 + $0x20] sm:$0xff] }
 0x3ad   :  { %32857 = vmatpush3.bf16.msra.mxu1 %v36446_v2  ;;  %32896 = vmatpush3.bf16.msra.mxu0 %v36570_v32 }
 0x3ae   :  { %32858 = vmatprep.subr.bf16.mxu1 %v40509_v8  ;;  %32897 = vmatprep.subr.bf16.mxu0 %v40509_v8 }
 0x3af   :  { %29575 = vmatprep.mubr.msk.f32.mxu1 %vm35896_vm1, %v40510_v16 }
 0x3b0   :  { %29642 = vmatmul.mubr.f32.vlgmr.msra.gmra.mrb[12].mxu0 %v37028_v62 }
 0x3b1   :  { %32860 = vmatpush3.bf16.msra.mxu1 %v36454_v9  ;;  %32899 = vmatpush3.bf16.msra.mxu0 %v36589_v45 }
 0x3b2   :  { %32861 = vmatprep.subr.bf16.mxu1 %v40509_v8  ;;  %32900 = vmatprep.subr.bf16.mxu0 %v40509_v8 }
 0x3b3   :  { %29652 = vmatprep.mubr.msk.f32.mxu0 %vm35896_vm1, %v40510_v16 }
 0x3b4   :  { %29576 = vmatmul.mubr.f32.vlgmr.msra.gmra.mrb[12].mxu1 %v37028_v62 }
 0x3b5   :  { %32863 = vmatpush3.bf16.msra.mxu1 %v36462_v23  ;;  %32902 = vmatpush3.bf16.msra.mxu0 %v36596_v55  ;;  %v4469_v23 = vld [vmem:[#allocation34] sm:$0x3] }
 0x3b6   :  { %32864 = vmatprep.subr.bf16.mxu1 %v40509_v8  ;;  %32903 = vmatprep.subr.bf16.mxu0 %v40509_v8  ;;  %v40524_v55 = vld [vmem:[#allocation88_spill] sm:$0xff] }
 0x3b7   :  { %29586 = vmatprep.mubr.msk.f32.mxu1 %vm35896_vm1, %v40510_v16 }
 0x3b8   :  { %29653 = vmatmul.mubr.f32.vlgmr.msra.gmra.mrb[12].mxu0 %v36989_v42 }
 0x3b9   :  { %32866 = vmatpush3.bf16.msra.mxu1 %v36466_v29  ;;  %32905 = vmatpush3.bf16.msra.mxu0 %v36622_v0  ;;  %v5929_v29 = vsel %vm1468_vm4, %v4469_v23, 0  ;;  %v7906_v0 = vld [vmem:[#allocation15 + $0x28] sm:$0xff] }
 0x3ba   :  { %32867 = vmatprep.subr.bf16.mxu1 %v40509_v8  ;;  %32906 = vmatprep.subr.bf16.mxu0 %v40509_v8 }
 0x3bb   :  { %29663 = vmatprep.mubr.msk.f32.mxu0 %vm35896_vm1, %v40510_v16 }
 0x3bc   :  { %29587 = vmatmul.mubr.f32.vlgmr.msra.gmra.mrb[12].mxu1 %v36989_v42 }
 0x3bd   :  { %32869 = vmatpush3.bf16.msra.mxu1 %v36468_v30  ;;  %32908 = vmatpush3.bf16.msra.mxu0 %v36648_v34  ;;  %v37084_v30 = vand.u32 4294901760, %v5929_v29  ;;  %v7921_v34 = vand.u32 4294901760, %v7906_v0 }
 0x3be   :  { %32870 = vmatprep.subr.bf16.mxu1 %v40509_v8  ;;  %32909 = vmatprep.subr.bf16.mxu0 %v40509_v8 }
 0x3bf   :  { %29597 = vmatprep.mubr.msk.f32.mxu1 %vm35896_vm1, %v40510_v16 }
 0x3c0   :  { %29664 = vmatmul.mubr.f32.vlgmr.msra.gmra.mrb[12].mxu0 %v36999_v47 }
 0x3c1   :  { %32872 = vmatpush3.bf16.msra.mxu1 %v36470_v31  ;;  %32911 = vmatpush3.bf16.msra.mxu0 %v36537_v17  ;;  %v37094_v31 = vsub.f32 %v5929_v29, %v37084_v30 }
 0x3c2   :  { %32873 = vmatprep.subr.bf16.mxu1 %v40509_v8  ;;  %32912 = vmatprep.subr.bf16.mxu0 %v40509_v8 }
 0x3c3   :  { %29674 = vmatprep.mubr.msk.f32.mxu0 %vm35896_vm1, %v40510_v16 }
 0x3c4   :  { %29598 = vmatmul.mubr.f32.vlgmr.msra.gmra.mrb[12].mxu1 %v36999_v47 }
 0x3c5   :  { %32875 = vmatpush3.bf16.msra.mxu1 %v36446_v2  ;;  %32914 = vmatpush3.bf16.msra.mxu0 %v36570_v32 }
 0x3c6   :  { %32876 = vmatprep.subr.bf16.mxu1 %v40509_v8  ;;  %32915 = vmatprep.subr.bf16.mxu0 %v40509_v8 }
 0x3c7   :  { %29608 = vmatprep.mubr.msk.f32.mxu1 %vm35896_vm1, %v40510_v16 }
 0x3c8   :  { %29675 = vmatmul.mubr.f32.vlgmr.msra.gmra.mrb[12].mxu0 %v37009_v48 }
 0x3c9   :  { %32878 = vmatpush3.bf16.msra.mxu1 %v36454_v9  ;;  %32917 = vmatpush3.bf16.msra.mxu0 %v36704_v51  ;;  %v7409_v51 = vld [vmem:[#allocation15 + $0x8] sm:$0xff] }
 0x3ca   :  { %32879 = vmatprep.subr.bf16.mxu1 %v40509_v8  ;;  %32918 = vmatprep.subr.bf16.mxu0 %v40509_v8 }
 0x3cb   :  { %29685 = vmatprep.mubr.msk.f32.mxu0 %vm35896_vm1, %v40510_v16 }
 0x3cc   :  { %29609 = vmatmul.mubr.f32.vlgmr.msra.gmra.mrb[12].mxu1 %v37009_v48 }
 0x3cd   :  { %32881 = vmatpush3.bf16.msra.mxu1 %v36460_v14  ;;  %32920 = vmatpush3.bf16.msra.mxu0 %v36719_v1  ;;  %v37104_v14 = vand.u32 4294901760, %v37094_v31  ;;  %v7908_v1 = vld [vmem:[#allocation15 + $0x38] sm:$0xff] }
 0x3ce   :  { %32882 = vmatprep.subr.bf16.mxu1 %v40509_v8  ;;  %32921 = vmatprep.subr.bf16.mxu0 %v40509_v8 }
 0x3cf   :  { %29619 = vmatprep.mubr.msk.f32.mxu1 %vm35896_vm1, %v40510_v16 }
 0x3d0   :  { %29686 = vmatmul.mubr.f32.vlgmr.msra.gmra.mrb[12].mxu0 %v36989_v42 }
 0x3d1   :  { %32884 = vmatpush3.bf16.msra.mxu1 %v36464_v24  ;;  %32923 = vmatpush3.bf16.msra.mxu0 %v36537_v17  ;;  %v6003_v24 = vsub.f32 %v37094_v31, %v37104_v14 }
 0x3d2   :  { %32885 = vmatprep.subr.bf16.mxu1 %v40509_v8  ;;  %32924 = vmatprep.subr.bf16.mxu0 %v40509_v8 }
 0x3d3   :  { %29696 = vmatprep.mubr.msk.f32.mxu0 %vm35896_vm1, %v40510_v16 }
 0x3d4   :  { %29620 = vmatmul.mubr.f32.vlgmr.msra.gmra.mrb[12].mxu1 %v36989_v42 }
 0x3d5   :  { %32887 = vmatpush3.bf16.msra.mxu1 %v36446_v2  ;;  %32926 = vmatpush3.bf16.msra.mxu0 %v36570_v32  ;;  %v37122_v2 = vand.u32 4294901760, %v6003_v24 }
 0x3d6   :  { %32888 = vmatprep.subr.bf16.mxu1 %v40509_v8  ;;  %32999 = vmatprep.subr.bf16.mxu0 %v40509_v8 }
 0x3d7   :  { %29630 = vmatprep.mubr.msk.f32.mxu1 %vm35896_vm1, %v40510_v16 }
 0x3d8   :  { %29697 = vmatmul.mubr.f32.vlgmr.msra.gmra.mrb[12].mxu0 %v36989_v42 }
 0x3d9   :  { %32890 = vmatpush3.bf16.msra.mxu1 %v36454_v9  ;;  %33001 = vmatpush3.bf16.msra.mxu0 %v36847_v21 }
 0x3da   :  { %32927 = vmatprep.subr.bf16.mxu1 %v40509_v8  ;;  %33002 = vmatprep.subr.bf16.mxu0 %v40509_v8 }
 0x3db   :  { %29839 = vmatprep.mubr.msk.f32.mxu0 %vm35896_vm1, %v40510_v16 }
 0x3dc   :  { %29631 = vmatmul.mubr.f32.vlgmr.msra.gmra.mrb[12].mxu1 %v36989_v42 }
 0x3dd   :  { %32929 = vmatpush3.bf16.msra.mxu1 %v36526_v11  ;;  %33004 = vmatpush3.bf16.msra.mxu0 %v36873_v15 }
 0x3de   :  { %32930 = vmatprep.subr.bf16.mxu1 %v40509_v8  ;;  %33005 = vmatprep.subr.bf16.mxu0 %v40509_v8 }
 0x3df   :  { %29707 = vmatprep.mubr.msk.f32.mxu1 %vm35896_vm1, %v40510_v16 }
 0x3e0   :  { %29840 = vmatmul.mubr.f32.vlgmr.msra.gmra.mrb[12].mxu0 %v37122_v2 }
 0x3e1   :  { %32932 = vmatpush3.bf16.msra.mxu1 %v36539_v18  ;;  %33007 = vmatpush3.bf16.msra.mxu0 %v36892_v50  ;;  %v7410_v50 = vld [vmem:[#allocation15 + $0x10] sm:$0xff] }
 0x3e2   :  { %32933 = vmatprep.subr.bf16.mxu1 %v40509_v8  ;;  %33008 = vmatprep.subr.bf16.mxu0 %v40509_v8 }
 0x3e3   :  { %29850 = vmatprep.mubr.msk.f32.mxu0 %vm35896_vm1, %v40510_v16 }
 0x3e4   :  { %29708 = vmatmul.mubr.f32.vlgmr.msra.gmra.mrb[14].mxu1 %v37028_v62 }
 0x3e5   :  { %32935 = vmatpush3.bf16.msra.mxu1 %v36762_v20  ;;  %33010 = vmatpush3.bf16.msra.mxu0 %v36903_v4 }
 0x3e6   :  { %32936 = vmatprep.subr.bf16.mxu1 %v40509_v8  ;;  %33011 = vmatprep.subr.bf16.mxu0 %v40509_v8 }
 0x3e7   :  { %29718 = vmatprep.mubr.msk.f32.mxu1 %vm35896_vm1, %v40510_v16 }
 0x3e8   :  { %29851 = vmatmul.mubr.f32.vlgmr.msra.gmra.mrb[12].mxu0 %v37084_v30 }
 0x3e9   :  { %32938 = vmatpush3.bf16.msra.mxu1 %v36771_v28  ;;  %33013 = vmatpush3.bf16.msra.mxu0 %v36918_v44  ;;  %v7423_v28 = vand.u32 4294901760, %v7409_v51  ;;  %v40527_v44 = vld [vmem:[#allocation91_spill] sm:$0xff] }
 0x3ea   :  { %32939 = vmatprep.subr.bf16.mxu1 %v40509_v8  ;;  %33014 = vmatprep.subr.bf16.mxu0 %v40509_v8 }
 0x3eb   :  { %29861 = vmatprep.mubr.msk.f32.mxu0 %vm35896_vm1, %v40510_v16 }
 0x3ec   :  { %29719 = vmatmul.mubr.f32.vlgmr.msra.gmra.mrb[16].mxu1 %v36989_v42 }
 0x3ed   :  { %32941 = vmatpush3.bf16.msra.mxu1 %v36574_v33  ;;  %33016 = vmatpush3.bf16.msra.mxu0 %v36933_v5 }
 0x3ee   :  { %32942 = vmatprep.subr.bf16.mxu1 %v40509_v8  ;;  %33017 = vmatprep.subr.bf16.mxu0 %v40509_v8 }
 0x3ef   :  { %29729 = vmatprep.mubr.msk.f32.mxu1 %vm35896_vm1, %v40510_v16 }
 0x3f0   :  { %29862 = vmatmul.mubr.f32.vlgmr.msra.gmra.mrb[12].mxu0 %v37094_v31 }
 0x3f1   :  { %32944 = vmatpush3.bf16.msra.mxu1 %v36583_v41  ;;  %33019 = vmatpush3.bf16.msra.mxu0 %v36847_v21 }
 0x3f2   :  { %32945 = vmatprep.subr.bf16.mxu1 %v40509_v8  ;;  %33020 = vmatprep.subr.bf16.mxu0 %v40509_v8 }
 0x3f3   :  { %29872 = vmatprep.mubr.msk.f32.mxu0 %vm35896_vm1, %v40510_v16 }
 0x3f4   :  { %29730 = vmatmul.mubr.f32.vlgmr.msra.gmra.mrb[18].mxu1 %v36999_v47 }
 0x3f5   :  { %32947 = vmatpush3.bf16.msra.mxu1 %v36526_v11  ;;  %33022 = vmatpush3.bf16.msra.mxu0 %v36873_v15 }
 0x3f6   :  { %32948 = vmatprep.subr.bf16.mxu1 %v40509_v8  ;;  %33023 = vmatprep.subr.bf16.mxu0 %v40509_v8 }
 0x3f7   :  { %29740 = vmatprep.mubr.msk.f32.mxu1 %vm35896_vm1, %v40510_v16 }
 0x3f8   :  { %29873 = vmatmul.mubr.f32.vlgmr.msra.gmra.mrb[12].mxu0 %v37104_v14 }
 0x3f9   :  { %32950 = vmatpush3.bf16.msra.mxu1 %v36539_v18  ;;  %33025 = vmatpush3.bf16.msra.mxu0 %v36966_v26 }
 0x3fa   :  { %32951 = vmatprep.subr.bf16.mxu1 %v40509_v8  ;;  %33026 = vmatprep.subr.bf16.mxu0 %v40509_v8 }
 0x3fb   :  { %29883 = vmatprep.mubr.msk.f32.mxu0 %vm35896_vm1, %v40510_v16 }
 0x3fc   :  { %29741 = vmatmul.mubr.f32.vlgmr.msra.gmra.mrb[20].mxu1 %v37009_v48 }
 0x3fd   :  { %32953 = vmatpush3.bf16.msra.mxu1 %v36603_v56  ;;  %33028 = vmatpush3.bf16.msra.mxu0 %v36987_v27  ;;  %v40525_v56 = vld [vmem:[#allocation89_spill] sm:$0xff] }
 0x3fe   :  { %32954 = vmatprep.subr.bf16.mxu1 %v40509_v8  ;;  %33029 = vmatprep.subr.bf16.mxu0 %v40509_v8 }
 0x3ff   :  { %29751 = vmatprep.mubr.msk.f32.mxu1 %vm35896_vm1, %v40510_v16 }
 0x400   :  { %29884 = vmatmul.mubr.f32.vlgmr.msra.gmra.mrb[12].mxu0 %v37084_v30 }
 0x401   :  { %32956 = vmatpush3.bf16.msra.mxu1 %v36628_v7  ;;  %33031 = vmatpush3.bf16.msra.mxu0 %v36847_v21  ;;  %v7918_v7 = vand.u32 4294901760, %v7905_v59  ;;  %v37274_v21 = vsub.f32 %v7906_v0, %v7921_v34 }
 0x402   :  { %32957 = vmatprep.subr.bf16.mxu1 %v40509_v8  ;;  %33032 = vmatprep.subr.bf16.mxu0 %v40509_v8 }
 0x403   :  { %29894 = vmatprep.mubr.msk.f32.mxu0 %vm35896_vm1, %v40510_v16  ;;  %v37272_v52 = vsub.f32 %v7905_v59, %v7918_v7  ;;  %v8006_v53 = vand.u32 4294901760, %v37274_v21 }
 0x404   :  { %29752 = vmatmul.mubr.f32.vlgmr.msra.gmra.mrb[22].mxu1 %v36989_v42 }
 0x405   :  { %32959 = vmatpush3.bf16.msra.mxu1 %v36526_v11  ;;  %33034 = vmatpush3.bf16.msra.mxu0 %v36873_v15  ;;  %v7999_v58 = vand.u32 4294901760, %v37272_v52  ;;  %v8007_v10 = vsub.f32 %v37274_v21, %v8006_v53 }
 0x406   :  { %32960 = vmatprep.subr.bf16.mxu1 %v40509_v8  ;;  %33035 = vmatprep.subr.bf16.mxu0 %v40509_v8 }
 0x407   :  { %v37198_v9 = vpop.f32.mrb[2].mxu1  ;;  %29762 = vmatprep.mubr.msk.f32.mxu1 %vm35896_vm1, %v40510_v16  ;;  %v8008_v27 = vand.u32 4294901760, %v8007_v10 }
 0x408   :  { %29895 = vmatmul.mubr.f32.vlgmr.msra.gmra.mrb[12].mxu0 %v37084_v30  ;;  %v29203_v17 = vpop.f32.mrb[3].mxu1 }
 0x409   :  { %32962 = vmatpush3.bf16.msra.mxu1 %v36539_v18  ;;  %33037 = vmatpush3.bf16.msra.mxu0 %v36824_v63 }
 0x40a   :  { %32963 = vmatprep.subr.bf16.mxu1 %v40509_v8  ;;  %33038 = vmatprep.subr.bf16.mxu0 %v40509_v8 }
 0x40b   :  { %v37207_v11 = vpop.f32.mrb[4].mxu0  ;;  %29905 = vmatprep.mubr.msk.f32.mxu0 %vm35896_vm1, %v40510_v16 }
 0x40c   :  { %v29313_v32 = vpop.f32.mrb[5].mxu0  ;;  %29763 = vmatmul.mubr.f32.vlgmr.msra.gmra.mrb[24].mxu1 %v36989_v42 }
 0x40d   :  { %32965 = vmatpush3.bf16.msra.mxu1 %v36650_v35  ;;  %33040 = vmatpush3.bf16.msra.mxu0 %v36849_v37 }
 0x40e   :  { %32966 = vmatprep.subr.bf16.mxu1 %v40509_v8  ;;  %33041 = vmatprep.subr.bf16.mxu0 %v40509_v8 }
 0x40f   :  { %29773 = vmatprep.mubr.msk.f32.mxu1 %vm35896_vm1, %v40510_v16 }
 0x410   :  { %29906 = vmatmul.mubr.f32.vlgmr.msra.gmra.mrb[14].mxu0 %v37122_v2 }
 0x411   :  { %32968 = vmatpush3.bf16.msra.mxu1 %v36670_v49  ;;  %33043 = vmatpush3.bf16.msra.mxu0 %v36875_v6  ;;  %v7927_v6 = vand.u32 4294901760, %v7908_v1 }
 0x412   :  { %32969 = vmatprep.subr.bf16.mxu1 %v40509_v8  ;;  %33044 = vmatprep.subr.bf16.mxu0 %v40509_v8 }
 0x413   :  { %v37223_v18 = vpop.f32.mrb[6].mxu0  ;;  %29916 = vmatprep.mubr.msk.f32.mxu0 %vm35896_vm1, %v40510_v16  ;;  %v37293_v54 = vsub.f32 %v7908_v1, %v7927_v6 }
 0x414   :  { %v29335_v33 = vpop.f32.mrb[7].mxu0  ;;  %29774 = vmatmul.mubr.f32.vlgmr.msra.gmra.mrb[12].mxu1 %v37122_v2  ;;  %v37345_v2 = vld [vmem:[#allocation12 + $0x2] ss:$0 sm:$0xff] }
 0x415   :  { %32971 = vmatpush3.bf16.msra.mxu1 %v36691_v61  ;;  %33046 = vmatpush3.bf16.msra.mxu0 %v36894_v43  ;;  %v7408_v61 = vld [vmem:[#allocation15] sm:$0xff]  ;;  %v7411_v43 = vld [vmem:[#allocation15 + $0x18] sm:$0xff]  ;;  %v8020_v40 = vand.u32 4294901760, %v37293_v54  ;;  %v2544_v59 = vadd.f32 %v37345_v2, %v37207_v11 }
 0x416   :  { %32972 = vmatprep.subr.bf16.mxu1 %v40509_v8  ;;  %33047 = vmatprep.subr.bf16.mxu0 %v40509_v8  ;;  %v7420_v20 = vand.u32 4294901760, %v7408_v61  ;;  %v7429_v5 = vand.u32 4294901760, %v7411_v43 }
 0x417   :  { %29784 = vmatprep.mubr.msk.f32.mxu1 %vm35896_vm1, %v40510_v16 }
 0x418   :  { %29917 = vmatmul.mubr.f32.vlgmr.msra.gmra.mrb[14].mxu0 %v37084_v30  ;;  %v37285_v4 = vsub.f32 %v7408_v61, %v7420_v20  ;;  %v37316_v39 = vsub.f32 %v7411_v43, %v7429_v5  ;;  %v37322_v3 = vpack.c.bf16 %v7423_v28, %v7420_v20  ;;  %v40528_v61 = vld [vmem:[#allocation87_spill] sm:$0xff] }
 0x419   :  { %32974 = vmatpush3.bf16.msra.mxu1 %v36706_v22  ;;  %33049 = vmatpush3.bf16.msra.mxu0 %v36907_v46  ;;  %v7907_v22 = vld [vmem:[#allocation15 + $0x30] sm:$0xff]  ;;  %v37287_v46 = vsub.f32 %v7409_v51, %v7423_v28  ;;  %v27403_v28 = vld [vmem:[#allocation12] ss:$0 sm:$0xff] }
 0x41a   :  { %32975 = vmatprep.subr.bf16.mxu1 %v40509_v8  ;;  %33050 = vmatprep.subr.bf16.mxu0 %v40509_v8  ;;  %v7924_v15 = vand.u32 4294901760, %v7907_v22  ;;  %v7501_v25 = vand.u32 4294901760, %v37285_v4  ;;  %v7522_v24 = vand.u32 4294901760, %v37316_v39 }
 0x41b   :  { %v37239_v41 = vpop.f32.mrb[8].mxu0  ;;  %29927 = vmatprep.mubr.msk.f32.mxu0 %vm35896_vm1, %v40510_v16  ;;  %v7508_v26 = vand.u32 4294901760, %v37287_v46 }
 0x41c   :  { %v29357_v45 = vpop.f32.mrb[9].mxu0  ;;  %29785 = vmatmul.mubr.f32.vlgmr.msra.gmra.mrb[12].mxu1 %v37084_v30  ;;  %v37291_v57 = vsub.f32 %v7907_v22, %v7924_v15  ;;  %v7502_v36 = vsub.f32 %v37285_v4, %v7501_v25 }
 0x41d   :  { %32977 = vmatpush3.bf16.msra.mxu1 %v40524_v55  ;;  %33052 = vmatpush3.bf16.msra.mxu0 %v36922_v60  ;;  %v7426_v60 = vand.u32 4294901760, %v7410_v50  ;;  %v7509_v23 = vsub.f32 %v37287_v46, %v7508_v26 }
 0x41e   :  { %32978 = vmatprep.subr.bf16.mxu1 %v40509_v8  ;;  %33053 = vmatprep.subr.bf16.mxu0 %v40509_v8  ;;  %v8013_v12 = vand.u32 4294901760, %v37291_v57  ;;  %v7503_v32 = vand.u32 4294901760, %v7502_v36 }
 0x41f   :  { %29795 = vmatprep.mubr.msk.f32.mxu1 %vm35896_vm1, %v40510_v16  ;;  %v7510_v33 = vand.u32 4294901760, %v7509_v23 }
 0x420   :  { %29928 = vmatmul.mubr.f32.vlgmr.msra.gmra.mrb[14].mxu0 %v37094_v31  ;;  %v8014_v29 = vsub.f32 %v37291_v57, %v8013_v12 }
 0x421   :  { %32980 = vmatpush3.bf16.msra.mxu1 %v40525_v56  ;;  %33055 = vmatpush3.bf16.msra.mxu0 %v36824_v63  ;;  %v37371_v51 = vpack.c.bf16 %v7510_v33, %v7503_v32  ;;  %v40531_v32 = vld [vmem:[#allocation85_spill] sm:$0xff]  ;;  %v37440_v33 = vpack.c.bf16 %v8006_v53, %v7999_v58 }
 0x422   :  { %32981 = vmatprep.subr.bf16.mxu1 %v40509_v8  ;;  %33056 = vmatprep.subr.bf16.mxu0 %v40509_v8  ;;  %v8015_v45 = vand.u32 4294901760, %v8014_v29  ;;  %v8403_v53 = vld [vmem:[#allocation15 + $0x40] sm:$0xff] }
 0x423   :  { %29938 = vmatprep.mubr.msk.f32.mxu0 %vm35896_vm1, %v40510_v16 }
 0x424   :  { %29796 = vmatmul.mubr.f32.vlgmr.msra.gmra.mrb[12].mxu1 %v37094_v31  ;;  %v8021_v31 = vsub.f32 %v37293_v54, %v8020_v40 }
 0x425   :  { %32983 = vmatpush3.bf16.msra.mxu1 %v36650_v35  ;;  %33058 = vmatpush3.bf16.msra.mxu0 %v36849_v37 }
 0x426   :  { %32984 = vmatprep.subr.bf16.mxu1 %v40509_v8  ;;  %33059 = vmatprep.subr.bf16.mxu0 %v40509_v8  ;;  %v8022_v55 = vand.u32 4294901760, %v8021_v31 }
 0x427   :  { %29806 = vmatprep.mubr.msk.f32.mxu1 %vm35896_vm1, %v40510_v16 }
 0x428   :  { %29939 = vmatmul.mubr.f32.vlgmr.msra.gmra.mrb[14].mxu0 %v37104_v14  ;;  %v37373_v22 = vpack.c.bf16 %v8022_v55, %v8015_v45  ;;  %v9400_v45 = vld [vmem:[#allocation16 + $0x20] sm:$0xff]  ;;  %v9401_v55 = vld [vmem:[#allocation16 + $0x28] sm:$0xff] }
 0x429   :  { %32986 = vmatpush3.bf16.msra.mxu1 %v36670_v49  ;;  %33061 = vmatpush3.bf16.msra.mxu0 %v36953_v13  ;;  %v37299_v13 = vpack.c.bf16 %v7921_v34, %v7918_v7 }
 0x42a   :  { %32987 = vmatprep.subr.bf16.mxu1 %v40509_v8  ;;  %33062 = vmatprep.subr.bf16.mxu0 %v40509_v8 }
 0x42b   :  { %29949 = vmatprep.mubr.msk.f32.mxu0 %vm35896_vm1, %v40510_v16 }
 0x42c   :  { %29807 = vmatmul.mubr.f32.vlgmr.msra.gmra.mrb[12].mxu1 %v37104_v14 }
 0x42d   :  { %32989 = vmatpush3.bf16.msra.mxu1 %v40526_v19  ;;  %33064 = vmatpush3.bf16.msra.mxu0 %v36972_v38  ;;  %v37314_v38 = vsub.f32 %v7410_v50, %v7426_v60  ;;  %v37392_v50 = vld [vmem:[#allocation13] ss:$0 sm:$0xff] }
 0x42e   :  { %32990 = vmatprep.subr.bf16.mxu1 %v40509_v8  ;;  %33065 = vmatprep.subr.bf16.mxu0 %v40509_v8  ;;  %40529 = vst [vmem:[#allocation88_spill] sm:$0xff] %v37392_v50 }
 0x42f   :  { %29817 = vmatprep.mubr.msk.f32.mxu1 %vm35896_vm1, %v40510_v16  ;;  %v7515_v14 = vand.u32 4294901760, %v37314_v38  ;;  %v37418_v23 = vpack.c.bf16 %v37316_v39, %v37314_v38 }
 0x430   :  { %29950 = vmatmul.mubr.f32.vlgmr.msra.gmra.mrb[14].mxu0 %v37084_v30 }
 0x431   :  { %32992 = vmatpush3.bf16.msra.mxu1 %v40527_v44  ;;  %33067 = vmatpush3.bf16.msra.mxu0 %v36824_v63  ;;  %v8000_v63 = vsub.f32 %v37272_v52, %v7999_v58  ;;  %v7516_v56 = vsub.f32 %v37314_v38, %v7515_v14  ;;  %v37460_v58 = vpack.c.bf16 %v8020_v40, %v8013_v12 }
 0x432   :  { %32993 = vmatprep.subr.bf16.mxu1 %v40509_v8  ;;  %33068 = vmatprep.subr.bf16.mxu0 %v40509_v8 }
 0x433   :  { %29960 = vmatprep.mubr.msk.f32.mxu0 %vm35896_vm1, %v40510_v16  ;;  %v7517_v11 = vand.u32 4294901760, %v7516_v56  ;;  %v7407_v56 = vld [vmem:[#allocation36] sm:$0x3] }
 0x434   :  { %29818 = vmatmul.mubr.f32.vlgmr.msra.gmra.mrb[12].mxu1 %v37084_v30 }
 0x435   :  { %32995 = vmatpush3.bf16.msra.mxu1 %v36650_v35  ;;  %33070 = vmatpush3.bf16.msra.mxu0 %v36849_v37  ;;  %v37324_v35 = vpack.c.bf16 %v7927_v6, %v7924_v15  ;;  %v8001_v37 = vand.u32 4294901760, %v8000_v63  ;;  %v37387_v15 = vpack.c.bf16 %v37274_v21, %v37272_v52  ;;  %v34513_v6 = vadd.f32 %v27403_v28, %v37198_v9  ;;  %v8406_v28 = vld [vmem:[#allocation15 + $0x58] sm:$0xff] }
 0x436   :  { %32996 = vmatprep.subr.bf16.mxu1 %v40509_v8  ;;  %33107 = vmatprep.subr.bf16.mxu0 %v40509_v8  ;;  %v37401_v9 = vpack.c.bf16 %v37287_v46, %v37285_v4  ;;  %v8912_v52 = vsel %vm1468_vm4, %v7407_v56, 0  ;;  %v37454_v21 = vpack.c.bf16 %v7508_v26, %v7501_v25  ;;  %v8416_v46 = vand.u32 4294901760, %v8403_v53 }
 0x437   :  { %29828 = vmatprep.mubr.msk.f32.mxu1 %vm35896_vm1, %v40510_v16  ;;  %v37352_v17 = vpack.c.bf16 %v8008_v27, %v8001_v37  ;;  %v34514_v63 = vadd.f32 %v34513_v6, %v37392_v50  ;;  %v37466_v4 = vand.u32 4294901760, %v8912_v52  ;;  %v37479_v26 = vpack.c.bf16 %v7522_v24, %v7515_v14 }
 0x438   :  { %29961 = vmatmul.mubr.f32.vlgmr.msra.gmra.mrb[14].mxu0 %v37084_v30  ;;  %v37491_v14 = vsub.f32 %v8403_v53, %v8416_v46 }
 0x439   :  { %32998 = vmatpush3.bf16.msra.mxu1 %v36670_v49  ;;  %33109 = vmatpush3.bf16.msra.mxu0 %v37299_v13  ;;  %v37350_v49 = vpack.c.bf16 %v7429_v5, %v7426_v60  ;;  %v40530_v60 = vld [vmem:[#allocation84_spill] sm:$0xff]  ;;  %v37405_v5 = vpack.c.bf16 %v37293_v54, %v37291_v57  ;;  %v37486_v6 = vsub.f32 %v8912_v52, %v37466_v4 }
 0x43a   :  { %33071 = vmatprep.subr.bf16.mxu1 %v40509_v8  ;;  %33110 = vmatprep.subr.bf16.mxu0 %v40509_v8 }
 0x43b   :  { %30037 = vmatprep.mubr.msk.f32.mxu0 %vm35896_vm1, %v40510_v16 }
 0x43c   :  { %29829 = vmatmul.mubr.f32.vlgmr.msra.gmra.mrb[12].mxu1 %v37084_v30  ;;  %v7523_v30 = vsub.f32 %v37316_v39, %v7522_v24 }
 0x43d   :  { %33073 = vmatpush3.bf16.msra.mxu1 %v37322_v3  ;;  %33112 = vmatpush3.bf16.msra.mxu0 %v37324_v35 }
 0x43e   :  { %33074 = vmatprep.subr.bf16.mxu1 %v40509_v8  ;;  %33113 = vmatprep.subr.bf16.mxu0 %v40509_v8  ;;  %v7524_v1 = vand.u32 4294901760, %v7523_v30  ;;  %v40532_v30 = vld [vmem:[#allocation86_spill] sm:$0xff] }
 0x43f   :  { %v2634_v0 = vpop.f32.mrb[6].mxu1  ;;  %29971 = vmatprep.mubr.msk.f32.mxu1 %vm35896_vm1, %v40510_v16 }
 0x440   :  { %v2635_v7 = vadd.f32 %v2634_v0, %v2544_v59  ;;  %v29324_v34 = vpop.f32.mrb[7].mxu1  ;;  %30038 = vmatmul.mubr.f32.vlgmr.msra.gmra.mrb[16].mxu0 %v40528_v61  ;;  %v37383_v19 = vpack.c.bf16 %v7524_v1, %v7517_v11  ;;  %v9413_v59 = vand.u32 4294901760, %v9400_v45  ;;  %v9416_v0 = vand.u32 4294901760, %v9401_v55  ;;  %v9403_v11 = vld [vmem:[#allocation16 + $0x38] sm:$0xff] }
 0x441   :  { %33076 = vmatpush3.bf16.msra.mxu1 %v37350_v49  ;;  %33115 = vmatpush3.bf16.msra.mxu0 %v37352_v17  ;;  %v9402_v34 = vld [vmem:[#allocation16 + $0x30] sm:$0xff]  ;;  %v9422_v40 = vand.u32 4294901760, %v9403_v11 }
 0x442   :  { %33077 = vmatprep.subr.bf16.mxu1 %v40509_v8  ;;  %33116 = vmatprep.subr.bf16.mxu0 %v40509_v8  ;;  %v2715_v20 = vadd.f32 %v37223_v18, %v2635_v7  ;;  %v8404_v7 = vld [vmem:[#allocation15 + $0x48] sm:$0xff]  ;;  %v37469_v54 = vsub.f32 %v9400_v45, %v9413_v59  ;;  %v37471_v25 = vsub.f32 %v9401_v55, %v9416_v0  ;;  %v9419_v12 = vand.u32 4294901760, %v9402_v34 }
 0x443   :  { %30048 = vmatprep.mubr.msk.f32.mxu0 %vm35896_vm1, %v40510_v16  ;;  %v8419_v57 = vand.u32 4294901760, %v8404_v7 }
 0x444   :  { %29972 = vmatmul.mubr.f32.vlgmr.msra.gmra.mrb[26].mxu1 %v40528_v61  ;;  %v9494_v38 = vand.u32 4294901760, %v37469_v54  ;;  %v40411_v39 = vand.u32 4294901760, %v37471_v25  ;;  %v37533_v52 = vpack.c.bf16 %v9422_v40, %v9419_v12 }
 0x445   :  { %33079 = vmatpush3.bf16.msra.mxu1 %v37371_v51  ;;  %33118 = vmatpush3.bf16.msra.mxu0 %v37373_v22  ;;  %v37493_v24 = vsub.f32 %v8404_v7, %v8419_v57 }
 0x446   :  { %33080 = vmatprep.subr.bf16.mxu1 %v40509_v8  ;;  %33119 = vmatprep.subr.bf16.mxu0 %v40509_v8 }
 0x447   :  { %v2791_v18 = vpop.f32.mrb[8].mxu1  ;;  %29982 = vmatprep.mubr.msk.f32.mxu1 %vm35896_vm1, %v40510_v16 }
 0x448   :  { %v2792_v43 = vadd.f32 %v2791_v18, %v2715_v20  ;;  %v29346_v44 = vpop.f32.mrb[9].mxu1  ;;  %30049 = vmatmul.mubr.f32.vlgmr.msra.gmra.mrb[16].mxu0 %v40530_v60  ;;  %v8405_v20 = vld [vmem:[#allocation15 + $0x50] sm:$0xff] }
 0x449   :  { %33082 = vmatpush3.bf16.msra.mxu1 %v37383_v19  ;;  %33121 = vmatpush3.bf16.msra.mxu0 %v37387_v15  ;;  %v8422_v18 = vand.u32 4294901760, %v8405_v20  ;;  %v37497_v44 = vsub.f32 %v9402_v34, %v9419_v12 }
 0x44a   :  { %33083 = vmatprep.subr.bf16.mxu1 %v40509_v8  ;;  %33122 = vmatprep.subr.bf16.mxu0 %v40509_v8  ;;  %v2875_v10 = vadd.f32 %v37239_v41, %v2792_v43  ;;  %v8425_v43 = vand.u32 4294901760, %v8406_v28 }
 0x44b   :  { %v3448_v37 = vpop.f32.mrb[2].mxu0  ;;  %30059 = vmatprep.mubr.msk.f32.mxu0 %vm35896_vm1, %v40510_v16  ;;  %v40408_v45 = vand.u32 4294901760, %v37497_v44  ;;  %v37523_v56 = vsub.f32 %v8405_v20, %v8422_v18 }
 0x44c   :  { %v34515_v27 = vadd.f32 %v34514_v63, %v3448_v37  ;;  %v29434_v36 = vpop.f32.mrb[3].mxu0  ;;  %29983 = vmatmul.mubr.f32.vlgmr.msra.gmra.mrb[26].mxu1 %v40530_v60  ;;  %v37499_v63 = vsub.f32 %v9403_v11, %v9422_v40  ;;  %v37508_v37 = vand.u32 4294901760, %v37486_v6 }
 0x44d   :  { %33085 = vmatpush3.bf16.msra.mxu1 %v37401_v9  ;;  %33124 = vmatpush3.bf16.msra.mxu0 %v37405_v5  ;;  %v9502_v36 = vsub.f32 %v37471_v25, %v40411_v39  ;;  %v40413_v12 = vand.u32 4294901760, %v37523_v56 }
 0x44e   :  { %33086 = vmatprep.subr.bf16.mxu1 %v40509_v8  ;;  %33125 = vmatprep.subr.bf16.mxu0 %v40509_v8  ;;  %v27417_v1 = vmul.f32 -1.442695, %v34515_v27  ;;  %v9495_v27 = vsub.f32 %v37469_v54, %v9494_v38  ;;  %v40407_v55 = vand.u32 4294901760, %v37499_v63  ;;  %v8986_v53 = vsub.f32 %v37486_v6, %v37508_v37 }
 0x44f   :  { %v2949_v41 = vpop.f32.mrb[10].mxu1  ;;  %29993 = vmatprep.mubr.msk.f32.mxu1 %vm35896_vm1, %v40510_v16  ;;  %v9503_v34 = vand.u32 4294901760, %v9502_v36 }
 0x450   :  { %v37424_v29 = vadd.f32 %v2949_v41, %v2875_v10  ;;  %v29368_v31 = vpop.f32.mrb[11].mxu1  ;;  %30060 = vmatmul.mubr.f32.vlgmr.msra.gmra.mrb[16].mxu0 %v40531_v32  ;;  %35124 = vpow2.f32 %v27417_v1  ;;  %v37505_v10 = vpack.c.bf16 %v9416_v0, %v9413_v59  ;;  %v40410_v41 = vand.u32 4294901760, %v37491_v14 }
 0x451   :  { %33088 = vmatpush3.bf16.msra.mxu1 %v37418_v23  ;;  %33127 = vmatpush3.bf16.msra.mxu0 %v37299_v13  ;;  %v40409_v31 = vand.u32 4294901760, %v37493_v24  ;;  %v37525_v59 = vsub.f32 %v8406_v28, %v8425_v43  ;;  %v37531_v0 = vpack.c.bf16 %v8419_v57, %v8416_v46  ;;  %v9496_v7 = vand.u32 4294901760, %v9495_v27 }
 0x452   :  { %33089 = vmatprep.subr.bf16.mxu1 %v40509_v8  ;;  %33128 = vmatprep.subr.bf16.mxu0 %v40509_v8  ;;  %v8498_v11 = vsub.f32 %v37491_v14, %v40410_v41  ;;  %v9509_v46 = vsub.f32 %v37497_v44, %v40408_v45  ;;  %v9516_v57 = vsub.f32 %v37499_v63, %v40407_v55  ;;  %v37558_v20 = vand.u32 4294901760, %v8986_v53 }
 0x453   :  { %30070 = vmatprep.mubr.msk.f32.mxu0 %vm35896_vm1, %v40510_v16  ;;  %v8505_v1 = vsub.f32 %v37493_v24, %v40409_v31  ;;  %v40412_v40 = vand.u32 4294901760, %v37525_v59  ;;  %v37561_v27 = vpack.c.bf16 %v8425_v43, %v8422_v18  ;;  %v37563_v36 = vpack.c.bf16 %v9503_v34, %v9496_v7 }
 0x454   :  { %29994 = vmatmul.mubr.f32.vlgmr.msra.gmra.mrb[26].mxu1 %v40531_v32  ;;  %v8499_v55 = vand.u32 4294901760, %v8498_v11  ;;  %v9510_v31 = vand.u32 4294901760, %v9509_v46  ;;  %v9517_v41 = vand.u32 4294901760, %v9516_v57  ;;  %v8512_v53 = vsub.f32 %v37523_v56, %v40413_v12  ;;  %v8901_v12 = vld [vmem:[#allocation16 + $0x8] sm:$0xff] }
 0x455   :  { %33091 = vmatpush3.bf16.msra.mxu1 %v37322_v3  ;;  %33130 = vmatpush3.bf16.msra.mxu0 %v37324_v35  ;;  %v8506_v45 = vand.u32 4294901760, %v8505_v1  ;;  %v8519_v39 = vsub.f32 %v37525_v59, %v40412_v40  ;;  %v27415_v1 = vld [vmem:[#allocation13 + $0x1] ss:$0 sm:$0xff]  ;;  %v8900_v40 = vld [vmem:[#allocation16] sm:$0xff] }
 0x456   :  { %33092 = vmatprep.subr.bf16.mxu1 %v40509_v8  ;;  %33131 = vmatprep.subr.bf16.mxu0 %v40509_v8  ;;  %v37582_v7 = vpack.c.bf16 %v9517_v41, %v9510_v31  ;;  %v8513_v34 = vand.u32 4294901760, %v8512_v53  ;;  %v37595_v41 = vpack.c.bf16 %v37471_v25, %v37469_v54  ;;  %v37612_v31 = vpack.c.bf16 %v37499_v63, %v37497_v44 }
 0x457   :  { %30004 = vmatprep.mubr.msk.f32.mxu1 %vm35896_vm1, %v40510_v16  ;;  %v37580_v43 = vpack.c.bf16 %v8506_v45, %v8499_v55  ;;  %v8520_v11 = vand.u32 4294901760, %v8519_v39  ;;  %v37608_v39 = vpack.c.bf16 %v37493_v24, %v37491_v14  ;;  %v27408_v55 = vld [vmem:[#allocation12 + $0x1] ss:$0 sm:$0xff]  ;;  %v40543_v54 = vand.u32 4294901760, %v37491_v14 }
 0x458   :  { %30071 = vmatmul.mubr.f32.vlgmr.msra.gmra.mrb[16].mxu0 %v40532_v30  ;;  %40533 = vst [vmem:[#allocation89_spill] sm:$0xff] %v37582_v7  ;;  %40535 = vst [vmem:[#allocation91_spill] sm:$0xff] %v37595_v41  ;;  %v37620_v53 = vadd.f32 %v27415_v1, %v27408_v55 }
 0x459   :  { %33094 = vmatpush3.bf16.msra.mxu1 %v37350_v49  ;;  %33133 = vmatpush3.bf16.msra.mxu0 %v37440_v33  ;;  %v37591_v45 = vpack.c.bf16 %v8520_v11, %v8513_v34  ;;  %40537 = vst [vmem:[#allocation84_spill] sm:$0xff] %v37608_v39  ;;  %40538 = vst [vmem:[#allocation85_spill] sm:$0xff] %v37612_v31  ;;  %v37626_v34 = vpack.c.bf16 %v37525_v59, %v37523_v56 }
 0x45a   :  { %33095 = vmatprep.subr.bf16.mxu1 %v40509_v8  ;;  %33134 = vmatprep.subr.bf16.mxu0 %v40509_v8  ;;  %v35125_v28 = vpop.eup %35124  ;;  %40539 = vst [vmem:[#allocation86_spill] sm:$0xff] %v37620_v53 }
 0x45b   :  { %30081 = vmatprep.mubr.msk.f32.mxu0 %vm35896_vm1, %v40510_v16  ;;  %v4452_v18 = vadd.f32 1.0, %v35125_v28  ;;  %40534 = vst [vmem:[#allocation90_spill] sm:$0xff] %v37591_v45  ;;  %40540 = vst [vmem:[#allocation92_spill] sm:$0xff] %v37626_v34 }
 0x45c   :  { %30005 = vmatmul.mubr.f32.vlgmr.msra.gmra.mrb[26].mxu1 %v40532_v30 }
 0x45d   :  { %33097 = vmatpush3.bf16.msra.mxu1 %v37454_v21  ;;  %33136 = vmatpush3.bf16.msra.mxu0 %v37460_v58  ;;  %35126 = vrcp.f32 %v4452_v18 }
 0x45e   :  { %33098 = vmatprep.subr.bf16.mxu1 %v40509_v8  ;;  %33137 = vmatprep.subr.bf16.mxu0 %v40509_v8 }
 0x45f   :  { %30015 = vmatprep.mubr.msk.f32.mxu1 %vm35896_vm1, %v40510_v16 }
 0x460   :  { %30082 = vmatmul.mubr.f32.vlgmr.msra.gmra.mrb[16].mxu0 %v40530_v60 }
 0x461   :  { %33100 = vmatpush3.bf16.msra.mxu1 %v37479_v26  ;;  %33139 = vmatpush3.bf16.msra.mxu0 %v37299_v13 }
 0x462   :  { %33101 = vmatprep.subr.bf16.mxu1 %v40509_v8  ;;  %33140 = vmatprep.subr.bf16.mxu0 %v40509_v8 }
 0x463   :  { %30092 = vmatprep.mubr.msk.f32.mxu0 %vm35896_vm1, %v40510_v16 }
 0x464   :  { %30016 = vmatmul.mubr.f32.vlgmr.msra.gmra.mrb[26].mxu1 %v40530_v60 }
 0x465   :  { %33103 = vmatpush3.bf16.msra.mxu1 %v37322_v3  ;;  %33142 = vmatpush3.bf16.msra.mxu0 %v37324_v35 }
 0x466   :  { %33104 = vmatprep.subr.bf16.mxu1 %v40509_v8  ;;  %33215 = vmatprep.subr.bf16.mxu0 %v40509_v8 }
 0x467   :  { %30026 = vmatprep.mubr.msk.f32.mxu1 %vm35896_vm1, %v40510_v16  ;;  %v35127_v18 = vpop.eup %35126 }
 0x468   :  { %30093 = vmatmul.mubr.f32.vlgmr.msra.gmra.mrb[16].mxu0 %v40530_v60 }
 0x469   :  { %33106 = vmatpush3.bf16.msra.mxu1 %v37350_v49  ;;  %33217 = vmatpush3.bf16.msra.mxu0 %v37505_v10 }
 0x46a   :  { %33143 = vmatprep.subr.bf16.mxu1 %v40509_v8  ;;  %33218 = vmatprep.subr.bf16.mxu0 %v40509_v8 }
 0x46b   :  { %30235 = vmatprep.mubr.msk.f32.mxu0 %vm35896_vm1, %v40510_v16 }
 0x46c   :  { %30027 = vmatmul.mubr.f32.vlgmr.msra.gmra.mrb[26].mxu1 %v40530_v60 }
 0x46d   :  { %33145 = vmatpush3.bf16.msra.mxu1 %v37531_v0  ;;  %33220 = vmatpush3.bf16.msra.mxu0 %v37533_v52 }
 0x46e   :  { %33146 = vmatprep.subr.bf16.mxu1 %v40509_v8  ;;  %33221 = vmatprep.subr.bf16.mxu0 %v40509_v8 }
 0x46f   :  { %30103 = vmatprep.mubr.msk.f32.mxu1 %vm35896_vm1, %v40510_v16 }
 0x470   :  { %30236 = vmatmul.mubr.f32.vlgmr.msra.gmra.mrb[16].mxu0 %v37558_v20 }
 0x471   :  { %33148 = vmatpush3.bf16.msra.mxu1 %v37561_v27  ;;  %33223 = vmatpush3.bf16.msra.mxu0 %v37563_v36 }
 0x472   :  { %33149 = vmatprep.subr.bf16.mxu1 %v40509_v8  ;;  %33224 = vmatprep.subr.bf16.mxu0 %v40509_v8 }
 0x473   :  { %30246 = vmatprep.mubr.msk.f32.mxu0 %vm35896_vm1, %v40510_v16 }
 0x474   :  { %30104 = vmatmul.mubr.f32.vlgmr.msra.gmra.mrb[28].mxu1 %v40528_v61  ;;  %v37604_v61 = vld [vmem:[#allocation13 + $0x2] ss:$0 sm:$0xff] }
 0x475   :  { %33151 = vmatpush3.bf16.msra.mxu1 %v37580_v43  ;;  %33226 = vmatpush3.bf16.msra.mxu0 %v37582_v7  ;;  %40536 = vst [vmem:[#allocation87_spill] sm:$0xff] %v37604_v61 }
 0x476   :  { %33152 = vmatprep.subr.bf16.mxu1 %v40509_v8  ;;  %33227 = vmatprep.subr.bf16.mxu0 %v40509_v8 }
 0x477   :  { %30114 = vmatprep.mubr.msk.f32.mxu1 %vm35896_vm1, %v40510_v16 }
 0x478   :  { %30247 = vmatmul.mubr.f32.vlgmr.msra.gmra.mrb[16].mxu0 %v37466_v4 }
 0x479   :  { %33154 = vmatpush3.bf16.msra.mxu1 %v37591_v45  ;;  %33229 = vmatpush3.bf16.msra.mxu0 %v37595_v41 }
 0x47a   :  { %33155 = vmatprep.subr.bf16.mxu1 %v40509_v8  ;;  %33230 = vmatprep.subr.bf16.mxu0 %v40509_v8 }
 0x47b   :  { %v4444_v46 = vpop.f32.mrb[10].mxu0  ;;  %30257 = vmatprep.mubr.msk.f32.mxu0 %vm35896_vm1, %v40510_v16 }
 0x47c   :  { %v34518_v57 = vadd.f32 %v37604_v61, %v4444_v46  ;;  %v29566_v28 = vpop.f32.mrb[11].mxu0  ;;  %30115 = vmatmul.mubr.f32.vlgmr.msra.gmra.mrb[30].mxu1 %v40530_v60  ;;  %v9900_v61 = vld [vmem:[#allocation16 + $0x50] sm:$0xff] }
 0x47d   :  { %33157 = vmatpush3.bf16.msra.mxu1 %v37608_v39  ;;  %33232 = vmatpush3.bf16.msra.mxu0 %v37612_v31 }
 0x47e   :  { %v4462_v11 = vmul.f32 %v35127_v18, %v34518_v57  ;;  %33158 = vmatprep.subr.bf16.mxu1 %v40509_v8  ;;  %33233 = vmatprep.subr.bf16.mxu0 %v40509_v8  ;;  %v40541_v18 = vand.u32 4294901760, %v37471_v25  ;;  %v40544_v25 = vand.u32 4294901760, %v37493_v24  ;;  %v8915_v24 = vand.u32 4294901760, %v8900_v40 }
 0x47f   :  { %v3946_v46 = vpop.f32.mrb[4].mxu1  ;;  %30125 = vmatprep.mubr.msk.f32.mxu1 %vm35896_vm1, %v40510_v16 }
 0x480   :  { %v37633_v55 = vadd.f32 %v4462_v11, %v37424_v29  ;;  %v34517_v1 = vadd.f32 %v37620_v53, %v3946_v46  ;;  %v29500_v28 = vpop.f32.mrb[5].mxu1  ;;  %30258 = vmatmul.mubr.f32.vlgmr.msra.gmra.mrb[16].mxu0 %v37486_v6  ;;  %v9898_v29 = vld [vmem:[#allocation16 + $0x40] sm:$0xff]  ;;  %v37650_v11 = vpack.c.bf16 %v40541_v18, %v9494_v38  ;;  %v9899_v46 = vld [vmem:[#allocation16 + $0x48] sm:$0xff]  ;;  %v37663_v38 = vpack.c.bf16 %v40544_v25, %v40543_v54 }
 0x481   :  { %33160 = vmatpush3.bf16.msra.mxu1 %v37626_v34  ;;  %33235 = vmatpush3.bf16.msra.mxu0 %v37505_v10  ;;  %v40546_v28 = vand.u32 4294901760, %v37497_v44  ;;  %v8918_v44 = vand.u32 4294901760, %v8901_v12  ;;  %v40549_v25 = vand.u32 4294901760, %v37523_v56  ;;  %v8903_v34 = vld [vmem:[#allocation16 + $0x18] sm:$0xff] }
 0x482   :  { %v27418_v57 = vmul.f32 -1.442695, %v34517_v1  ;;  %33161 = vmatprep.subr.bf16.mxu1 %v40509_v8  ;;  %33236 = vmatprep.subr.bf16.mxu0 %v40509_v8  ;;  %40542 = vst [vmem:[#allocation93_spill] sm:$0xff] %v37650_v11  ;;  %v9914_v1 = vand.u32 4294901760, %v9899_v46  ;;  %40545 = vst [vmem:[#allocation94_spill] sm:$0xff] %v37663_v38 }
 0x483   :  { %30268 = vmatprep.mubr.msk.f32.mxu0 %vm35896_vm1, %v40510_v16 }
 0x484   :  { %35128 = vpow2.f32 %v27418_v57  ;;  %30126 = vmatmul.mubr.f32.vlgmr.msra.gmra.mrb[32].mxu1 %v40531_v32  ;;  %v9911_v32 = vand.u32 4294901760, %v9898_v29  ;;  %v40547_v57 = vand.u32 4294901760, %v37499_v63  ;;  %v9917_v63 = vand.u32 4294901760, %v9900_v61 }
 0x485   :  { %33163 = vmatpush3.bf16.msra.mxu1 %v37531_v0  ;;  %33238 = vmatpush3.bf16.msra.mxu0 %v37533_v52  ;;  %v37678_v54 = vsub.f32 %v9899_v46, %v9914_v1 }
 0x486   :  { %33164 = vmatprep.subr.bf16.mxu1 %v40509_v8  ;;  %33239 = vmatprep.subr.bf16.mxu0 %v40509_v8  ;;  %v37669_v18 = vpack.c.bf16 %v40547_v57, %v40546_v28  ;;  %v37675_v14 = vsub.f32 %v9898_v29, %v9911_v32  ;;  %v40550_v28 = vand.u32 4294901760, %v37525_v59  ;;  %v37695_v59 = vsub.f32 %v8900_v40, %v8915_v24 }
 0x487   :  { %30136 = vmatprep.mubr.msk.f32.mxu1 %vm35896_vm1, %v40510_v16  ;;  %v40422_v56 = vand.u32 4294901760, %v37678_v54 }
 0x488   :  { %30269 = vmatmul.mubr.f32.vlgmr.msra.gmra.mrb[16].mxu0 %v37508_v37  ;;  %40548 = vst [vmem:[#allocation95_spill] sm:$0xff] %v37669_v18  ;;  %v37686_v57 = vpack.c.bf16 %v40550_v28, %v40549_v25  ;;  %v37697_v25 = vsub.f32 %v8901_v12, %v8918_v44  ;;  %v37699_v28 = vsub.f32 %v9900_v61, %v9917_v63 }
 0x489   :  { %33166 = vmatpush3.bf16.msra.mxu1 %v37561_v27  ;;  %33241 = vmatpush3.bf16.msra.mxu0 %v37650_v11  ;;  %v9901_v11 = vld [vmem:[#allocation16 + $0x58] sm:$0xff]  ;;  %v37710_v12 = vpack.c.bf16 %v9914_v1, %v9911_v32  ;;  %v10000_v61 = vsub.f32 %v37678_v54, %v40422_v56  ;;  %v37733_v56 = vpack.c.bf16 %v8918_v44, %v8915_v24 }
 0x48a   :  { %33167 = vmatprep.subr.bf16.mxu1 %v40509_v8  ;;  %33242 = vmatprep.subr.bf16.mxu0 %v40509_v8  ;;  %40551 = vst [vmem:[#allocation96_spill] sm:$0xff] %v37686_v57  ;;  %v9920_v53 = vand.u32 4294901760, %v9901_v11  ;;  %v40553_v24 = vand.u32 4294901760, %v37699_v28 }
 0x48b   :  { %30279 = vmatprep.mubr.msk.f32.mxu0 %vm35896_vm1, %v40510_v16 }
 0x48c   :  { %30137 = vmatmul.mubr.f32.vlgmr.msra.gmra.mrb[34].mxu1 %v40532_v30  ;;  %v8902_v30 = vld [vmem:[#allocation16 + $0x10] sm:$0xff]  ;;  %v37703_v31 = vsub.f32 %v9901_v11, %v9920_v53  ;;  %v40424_v11 = vand.u32 4294901760, %v37695_v59 }
 0x48d   :  { %33169 = vmatpush3.bf16.msra.mxu1 %v37663_v38  ;;  %33244 = vmatpush3.bf16.msra.mxu0 %v37669_v18  ;;  %v40423_v18 = vand.u32 4294901760, %v37675_v14  ;;  %v8924_v38 = vand.u32 4294901760, %v8903_v34 }
 0x48e   :  { %v35129_v29 = vpop.eup %35128  ;;  %33170 = vmatprep.subr.bf16.mxu1 %v40509_v8  ;;  %33245 = vmatprep.subr.bf16.mxu0 %v40509_v8  ;;  %v40554_v44 = vand.u32 4294901760, %v37703_v31 }
 0x48f   :  { %v4459_v46 = vadd.f32 1.0, %v35129_v29  ;;  %30147 = vmatprep.mubr.msk.f32.mxu1 %vm35896_vm1, %v40510_v16  ;;  %v8921_v29 = vand.u32 4294901760, %v8902_v30  ;;  %v9993_v40 = vsub.f32 %v37675_v14, %v40423_v18  ;;  %v37735_v18 = vpack.c.bf16 %v9920_v53, %v9917_v63 }
 0x490   :  { %30280 = vmatmul.mubr.f32.vlgmr.msra.gmra.mrb[16].mxu0 %v37466_v4  ;;  %v10007_v53 = vsub.f32 %v37699_v28, %v40553_v24  ;;  %v10014_v63 = vsub.f32 %v37703_v31, %v40554_v44 }
 0x491   :  { %35130 = vrcp.f32 %v4459_v46  ;;  %33172 = vmatpush3.bf16.msra.mxu1 %v37686_v57  ;;  %33247 = vmatpush3.bf16.msra.mxu0 %v37505_v10  ;;  %v37725_v1 = vsub.f32 %v8902_v30, %v8921_v29  ;;  %v37727_v57 = vsub.f32 %v8903_v34, %v8924_v38  ;;  %v10001_v46 = vand.u32 4294901760, %v10000_v61 }
 0x492   :  { %33173 = vmatprep.subr.bf16.mxu1 %v40509_v8  ;;  %33248 = vmatprep.subr.bf16.mxu0 %v40509_v8  ;;  %35132 = vtanh.f32 %v37633_v55  ;;  %v9994_v55 = vand.u32 4294901760, %v9993_v40  ;;  %v8997_v34 = vsub.f32 %v37695_v59, %v40424_v11  ;;  %v40552_v30 = vand.u32 4294901760, %v37697_v25 }
 0x493   :  { %30290 = vmatprep.mubr.msk.f32.mxu0 %vm35896_vm1, %v40510_v16  ;;  %v37758_v11 = vpack.c.bf16 %v8924_v38, %v8921_v29  ;;  %v10008_v61 = vand.u32 4294901760, %v10007_v53  ;;  %v10015_v41 = vand.u32 4294901760, %v10014_v63  ;;  %v40555_v45 = vand.u32 4294901760, %v37725_v1 }
 0x494   :  { %30148 = vmatmul.mubr.f32.vlgmr.msra.gmra.mrb[36].mxu1 %v40530_v60  ;;  %v9004_v32 = vsub.f32 %v37697_v25, %v40552_v30  ;;  %v37761_v24 = vpack.c.bf16 %v10001_v46, %v9994_v55  ;;  %v8998_v44 = vand.u32 4294901760, %v8997_v34  ;;  %v40556_v38 = vand.u32 4294901760, %v37727_v57  ;;  %v35204_v46 = vld [vmem:[#allocation33] sm:$0x3] }
 0x495   :  { %33175 = vmatpush3.bf16.msra.mxu1 %v37531_v0  ;;  %33250 = vmatpush3.bf16.msra.mxu0 %v37533_v52  ;;  %v9011_v7 = vsub.f32 %v37725_v1, %v40555_v45  ;;  %v37823_v63 = vpack.c.bf16 %v37727_v57, %v37725_v1 }
 0x496   :  { %33176 = vmatprep.subr.bf16.mxu1 %v40509_v8  ;;  %33251 = vmatprep.subr.bf16.mxu0 %v40509_v8  ;;  %v9005_v50 = vand.u32 4294901760, %v9004_v32  ;;  %v9018_v29 = vsub.f32 %v37727_v57, %v40556_v38 }
 0x497   :  { %30158 = vmatprep.mubr.msk.f32.mxu1 %vm35896_vm1, %v40510_v16  ;;  %v9012_v34 = vand.u32 4294901760, %v9011_v7  ;;  %v37797_v7 = vpack.c.bf16 %v37678_v54, %v37675_v14 }
 0x498   :  { %30291 = vmatmul.mubr.f32.vlgmr.msra.gmra.mrb[16].mxu0 %v37466_v4  ;;  %v37780_v45 = vpack.c.bf16 %v9005_v50, %v8998_v44  ;;  %v9019_v53 = vand.u32 4294901760, %v9018_v29  ;;  %v40561_v29 = vand.u32 4294901760, %v37699_v28 }
 0x499   :  { %33178 = vmatpush3.bf16.msra.mxu1 %v37561_v27  ;;  %33253 = vmatpush3.bf16.msra.mxu0 %v37710_v12 }
 0x49a   :  { %33179 = vmatprep.subr.bf16.mxu1 %v40509_v8  ;;  %33254 = vmatprep.subr.bf16.mxu0 %v40509_v8  ;;  %v37793_v50 = vpack.c.bf16 %v9019_v53, %v9012_v34 }
 0x49b   :  { %v35131_v30 = vpop.eup %35130  ;;  %30301 = vmatprep.mubr.msk.f32.mxu0 %vm35896_vm1, %v40510_v16 }
 0x49c   :  { %v4465_v39 = vsub.f32 1.0, %v35131_v30  ;;  %30159 = vmatmul.mubr.f32.vlgmr.msra.gmra.mrb[38].mxu1 %v40530_v60  ;;  %v35133_v40 = vpop.eup %35132  ;;  %v4467_v55 = vmul.f32 %v35204_v46, %v35131_v30 }
 0x49d   :  { %33181 = vmatpush3.bf16.msra.mxu1 %v37733_v56  ;;  %33256 = vmatpush3.bf16.msra.mxu0 %v37735_v18 }
 0x49e   :  { %v4466_v60 = vmul.f32 %v35133_v40, %v4465_v39  ;;  %33182 = vmatprep.subr.bf16.mxu1 %v40509_v8  ;;  %33257 = vmatprep.subr.bf16.mxu0 %v40509_v8  ;;  %v37782_v39 = vpack.c.bf16 %v10015_v41, %v10008_v61  ;;  %v37812_v41 = vpack.c.bf16 %v37703_v31, %v37699_v28  ;;  %v40557_v40 = vand.u32 4294901760, %v37675_v14 }
 0x49f   :  { %30169 = vmatprep.mubr.msk.f32.mxu1 %vm35896_vm1, %v40510_v16  ;;  %v40558_v61 = vand.u32 4294901760, %v37678_v54  ;;  %v40560_v14 = vand.u32 4294901760, %v37697_v25 }
 0x4a0   :  { %v37775_v32 = vadd.f32 %v4467_v55, %v4466_v60  ;;  %30302 = vmatmul.mubr.f32.vlgmr.msra.gmra.mrb[18].mxu0 %v37558_v20  ;;  %v40562_v60 = vand.u32 4294901760, %v37703_v31 }
 0x4a1   :  { %33184 = vmatpush3.bf16.msra.mxu1 %v37758_v11  ;;  %33259 = vmatpush3.bf16.msra.mxu0 %v37761_v24  ;;  %v37843_v30 = vpack.c.bf16 %v40558_v61, %v40557_v40 }
 0x4a2   :  { %33185 = vmatprep.subr.bf16.mxu1 %v40509_v8  ;;  %33260 = vmatprep.subr.bf16.mxu0 %v40509_v8  ;;  %13352 = vst.msk [vmem:[#allocation39] sm:$0x3] %vm13351_vm6, %v37775_v32  ;;  %v37862_v46 = vpack.c.bf16 %v40562_v60, %v40561_v29  ;;  %v40570_v29 = vld [vmem:[#allocation85_spill] sm:$0xff] }
 0x4a3   :  { %30312 = vmatprep.mubr.msk.f32.mxu0 %vm35896_vm1, %v40510_v16 }
 0x4a4   :  { %30170 = vmatmul.mubr.f32.vlgmr.msra.gmra.mrb[26].mxu1 %v37558_v20  ;;  %v37808_v20 = vpack.c.bf16 %v37697_v25, %v37695_v59  ;;  %v40564_v25 = vand.u32 4294901760, %v37727_v57 }
 0x4a5   :  { %33187 = vmatpush3.bf16.msra.mxu1 %v37780_v45  ;;  %33262 = vmatpush3.bf16.msra.mxu0 %v37782_v39 }
 0x4a6   :  { %33188 = vmatprep.subr.bf16.mxu1 %v40509_v8  ;;  %33263 = vmatprep.subr.bf16.mxu0 %v40509_v8 }
 0x4a7   :  { %30180 = vmatprep.mubr.msk.f32.mxu1 %vm35896_vm1, %v40510_v16 }
 0x4a8   :  { %30313 = vmatmul.mubr.f32.vlgmr.msra.gmra.mrb[18].mxu0 %v37466_v4 }
 0x4a9   :  { %33190 = vmatpush3.bf16.msra.mxu1 %v37793_v50  ;;  %33265 = vmatpush3.bf16.msra.mxu0 %v37797_v7 }
 0x4aa   :  { %33191 = vmatprep.subr.bf16.mxu1 %v40509_v8  ;;  %33266 = vmatprep.subr.bf16.mxu0 %v40509_v8 }
 0x4ab   :  { %30323 = vmatprep.mubr.msk.f32.mxu0 %vm35896_vm1, %v40510_v16 }
 0x4ac   :  { %30181 = vmatmul.mubr.f32.vlgmr.msra.gmra.mrb[26].mxu1 %v37466_v4 }
 0x4ad   :  { %33193 = vmatpush3.bf16.msra.mxu1 %v37808_v20  ;;  %33268 = vmatpush3.bf16.msra.mxu0 %v37812_v41 }
 0x4ae   :  { %33194 = vmatprep.subr.bf16.mxu1 %v40509_v8  ;;  %33269 = vmatprep.subr.bf16.mxu0 %v40509_v8 }
 0x4af   :  { %30191 = vmatprep.mubr.msk.f32.mxu1 %vm35896_vm1, %v40510_v16 }
 0x4b0   :  { %30324 = vmatmul.mubr.f32.vlgmr.msra.gmra.mrb[18].mxu0 %v37486_v6 }
 0x4b1   :  { %33196 = vmatpush3.bf16.msra.mxu1 %v37823_v63  ;;  %33271 = vmatpush3.bf16.msra.mxu0 %v37710_v12 }
 0x4b2   :  { %33197 = vmatprep.subr.bf16.mxu1 %v40509_v8  ;;  %33272 = vmatprep.subr.bf16.mxu0 %v40509_v8 }
 0x4b3   :  { %30334 = vmatprep.mubr.msk.f32.mxu0 %vm35896_vm1, %v40510_v16 }
 0x4b4   :  { %30192 = vmatmul.mubr.f32.vlgmr.msra.gmra.mrb[26].mxu1 %v37486_v6  ;;  %v40559_v6 = vand.u32 4294901760, %v37695_v59  ;;  %v40563_v59 = vand.u32 4294901760, %v37725_v1 }
 0x4b5   :  { %33199 = vmatpush3.bf16.msra.mxu1 %v37733_v56  ;;  %33274 = vmatpush3.bf16.msra.mxu0 %v37735_v18 }
 0x4b6   :  { %33200 = vmatprep.subr.bf16.mxu1 %v40509_v8  ;;  %33275 = vmatprep.subr.bf16.mxu0 %v40509_v8  ;;  %v37856_v54 = vpack.c.bf16 %v40560_v14, %v40559_v6  ;;  %v37875_v31 = vpack.c.bf16 %v40564_v25, %v40563_v59  ;;  %v40569_v14 = vld [vmem:[#allocation84_spill] sm:$0xff] }
 0x4b7   :  { %v5518_v44 = vpop.f32.mrb[14].mxu1  ;;  %30202 = vmatprep.mubr.msk.f32.mxu1 %vm35896_vm1, %v40510_v16 }
 0x4b8   :  { %v29709_v38 = vpop.f32.mrb[15].mxu1  ;;  %30335 = vmatmul.mubr.f32.vlgmr.msra.gmra.mrb[18].mxu0 %v37508_v37  ;;  %v5519_v28 = vadd.f32 %v37345_v2, %v5518_v44 }
 0x4b9   :  { %33202 = vmatpush3.bf16.msra.mxu1 %v37758_v11  ;;  %33277 = vmatpush3.bf16.msra.mxu0 %v37843_v30 }
 0x4ba   :  { %33203 = vmatprep.subr.bf16.mxu1 %v40509_v8  ;;  %33278 = vmatprep.subr.bf16.mxu0 %v40509_v8 }
 0x4bb   :  { %30345 = vmatprep.mubr.msk.f32.mxu0 %vm35896_vm1, %v40510_v16 }
 0x4bc   :  { %30203 = vmatmul.mubr.f32.vlgmr.msra.gmra.mrb[26].mxu1 %v37508_v37 }
 0x4bd   :  { %33205 = vmatpush3.bf16.msra.mxu1 %v37856_v54  ;;  %33280 = vmatpush3.bf16.msra.mxu0 %v37862_v46 }
 0x4be   :  { %33206 = vmatprep.subr.bf16.mxu1 %v40509_v8  ;;  %33281 = vmatprep.subr.bf16.mxu0 %v40509_v8 }
 0x4bf   :  { %v5609_v55 = vpop.f32.mrb[16].mxu1  ;;  %30213 = vmatprep.mubr.msk.f32.mxu1 %vm35896_vm1, %v40510_v16 }
 0x4c0   :  { %v5610_v37 = vadd.f32 %v5609_v55, %v5519_v28  ;;  %v29720_v34 = vpop.f32.mrb[17].mxu1  ;;  %30346 = vmatmul.mubr.f32.vlgmr.msra.gmra.mrb[18].mxu0 %v37466_v4  ;;  %v40571_v28 = vld [vmem:[#allocation92_spill] sm:$0xff] }
 0x4c1   :  { %33208 = vmatpush3.bf16.msra.mxu1 %v37875_v31  ;;  %33283 = vmatpush3.bf16.msra.mxu0 %v37710_v12 }
 0x4c2   :  { %33209 = vmatprep.subr.bf16.mxu1 %v40509_v8  ;;  %33284 = vmatprep.subr.bf16.mxu0 %v40509_v8 }
 0x4c3   :  { %30356 = vmatprep.mubr.msk.f32.mxu0 %vm35896_vm1, %v40510_v16 }
 0x4c4   :  { %30214 = vmatmul.mubr.f32.vlgmr.msra.gmra.mrb[26].mxu1 %v37466_v4 }
 0x4c5   :  { %33211 = vmatpush3.bf16.msra.mxu1 %v37733_v56  ;;  %33286 = vmatpush3.bf16.msra.mxu0 %v37735_v18 }
 0x4c6   :  { %33212 = vmatprep.subr.bf16.mxu1 %v40509_v8  ;;  %33323 = vmatprep.subr.bf16.mxu0 %v40509_v8 }
 0x4c7   :  { %v5689_v2 = vpop.f32.mrb[18].mxu1  ;;  %30224 = vmatprep.mubr.msk.f32.mxu1 %vm35896_vm1, %v40510_v16 }
 0x4c8   :  { %v5690_v57 = vadd.f32 %v5689_v2, %v5610_v37  ;;  %v29731_v1 = vpop.f32.mrb[19].mxu1  ;;  %30357 = vmatmul.mubr.f32.vlgmr.msra.gmra.mrb[18].mxu0 %v37466_v4  ;;  %v40572_v37 = vld [vmem:[#allocation86_spill] sm:$0xff]  ;;  %v40573_v2 = vld [vmem:[#allocation93_spill] sm:$0xff] }
 0x4c9   :  { %33214 = vmatpush3.bf16.msra.mxu1 %v37758_v11  ;;  %33325 = vmatpush3.bf16.msra.mxu0 %v37299_v13  ;;  %v40575_v1 = vld [vmem:[#allocation95_spill] sm:$0xff] }
 0x4ca   :  { %33287 = vmatprep.subr.bf16.mxu1 %v40509_v8  ;;  %33326 = vmatprep.subr.bf16.mxu0 %v40509_v8 }
 0x4cb   :  { %30433 = vmatprep.mubr.msk.f32.mxu0 %vm35896_vm1, %v40510_v16 }
 0x4cc   :  { %30225 = vmatmul.mubr.f32.vlgmr.msra.gmra.mrb[26].mxu1 %v37466_v4 }
 0x4cd   :  { %33289 = vmatpush3.bf16.msra.mxu1 %v37322_v3  ;;  %33328 = vmatpush3.bf16.msra.mxu0 %v37324_v35 }
 0x4ce   :  { %33290 = vmatprep.subr.bf16.mxu1 %v40509_v8  ;;  %33329 = vmatprep.subr.bf16.mxu0 %v40509_v8 }
 0x4cf   :  { %v5766_v53 = vpop.f32.mrb[20].mxu1  ;;  %30367 = vmatprep.mubr.msk.f32.mxu1 %vm35896_vm1, %v40510_v16 }
 0x4d0   :  { %v5767_v40 = vadd.f32 %v5766_v53, %v5690_v57  ;;  %v29742_v61 = vpop.f32.mrb[21].mxu1  ;;  %30434 = vmatmul.mubr.f32.vlgmr.msra.gmra.mrb[20].mxu0 %v37028_v62  ;;  %v40574_v57 = vld [vmem:[#allocation94_spill] sm:$0xff] }
 0x4d1   :  { %33292 = vmatpush3.bf16.msra.mxu1 %v37350_v49  ;;  %33331 = vmatpush3.bf16.msra.mxu0 %v37352_v17  ;;  %v40576_v61 = vld [vmem:[#allocation96_spill] sm:$0xff] }
 0x4d2   :  { %33293 = vmatprep.subr.bf16.mxu1 %v40509_v8  ;;  %33332 = vmatprep.subr.bf16.mxu0 %v40509_v8 }
 0x4d3   :  { %30444 = vmatprep.mubr.msk.f32.mxu0 %vm35896_vm1, %v40510_v16 }
 0x4d4   :  { %30368 = vmatmul.mubr.f32.vlgmr.msra.gmra.mrb[40].mxu1 %v37028_v62 }
 0x4d5   :  { %33295 = vmatpush3.bf16.msra.mxu1 %v37371_v51  ;;  %33334 = vmatpush3.bf16.msra.mxu0 %v37373_v22 }
 0x4d6   :  { %33296 = vmatprep.subr.bf16.mxu1 %v40509_v8  ;;  %33335 = vmatprep.subr.bf16.mxu0 %v40509_v8 }
 0x4d7   :  { %v5849_v4 = vpop.f32.mrb[22].mxu1  ;;  %30378 = vmatprep.mubr.msk.f32.mxu1 %vm35896_vm1, %v40510_v16 }
 0x4d8   :  { %v5850_v17 = vadd.f32 %v5849_v4, %v5767_v40  ;;  %v29753_v44 = vpop.f32.mrb[23].mxu1  ;;  %30445 = vmatmul.mubr.f32.vlgmr.msra.gmra.mrb[20].mxu0 %v36989_v42 }
 0x4d9   :  { %33298 = vmatpush3.bf16.msra.mxu1 %v37383_v19  ;;  %33337 = vmatpush3.bf16.msra.mxu0 %v37387_v15 }
 0x4da   :  { %33299 = vmatprep.subr.bf16.mxu1 %v40509_v8  ;;  %33338 = vmatprep.subr.bf16.mxu0 %v40509_v8 }
 0x4db   :  { %v37929_v51 = vpop.f32.mrb[12].mxu0  ;;  %30455 = vmatprep.mubr.msk.f32.mxu0 %vm35896_vm1, %v40510_v16 }
 0x4dc   :  { %v29896_v22 = vpop.f32.mrb[13].mxu0  ;;  %30379 = vmatmul.mubr.f32.vlgmr.msra.gmra.mrb[40].mxu1 %v36989_v42  ;;  %v34522_v34 = vadd.f32 %v40572_v37, %v37929_v51 }
 0x4dd   :  { %33301 = vmatpush3.bf16.msra.mxu1 %v37401_v9  ;;  %33340 = vmatpush3.bf16.msra.mxu0 %v37405_v5  ;;  %v10416_v9 = vld [vmem:[#allocation37] sm:$0x3] }
 0x4de   :  { %33302 = vmatprep.subr.bf16.mxu1 %v40509_v8  ;;  %33341 = vmatprep.subr.bf16.mxu0 %v40509_v8  ;;  %v11873_v5 = vsel %vm1468_vm4, %v10416_v9, 0  ;;  %v13860_v9 = vld [vmem:[#allocation21 + $0x30] sm:$0xff] }
 0x4df   :  { %v5924_v19 = vpop.f32.mrb[24].mxu1  ;;  %30389 = vmatprep.mubr.msk.f32.mxu1 %vm35896_vm1, %v40510_v16 }
 0x4e0   :  { %v37940_v15 = vadd.f32 %v5924_v19, %v5850_v17  ;;  %v29764_v38 = vpop.f32.mrb[25].mxu1  ;;  %30456 = vmatmul.mubr.f32.vlgmr.msra.gmra.mrb[20].mxu0 %v36999_v47 }
 0x4e1   :  { %33304 = vmatpush3.bf16.msra.mxu1 %v37418_v23  ;;  %33343 = vmatpush3.bf16.msra.mxu0 %v37299_v13  ;;  %v37965_v23 = vand.u32 4294901760, %v11873_v5  ;;  %v13359_v38 = vld [vmem:[#allocation21 + $0x8] sm:$0xff] }
 0x4e2   :  { %33305 = vmatprep.subr.bf16.mxu1 %v40509_v8  ;;  %33344 = vmatprep.subr.bf16.mxu0 %v40509_v8 }
 0x4e3   :  { %30466 = vmatprep.mubr.msk.f32.mxu0 %vm35896_vm1, %v40510_v16 }
 0x4e4   :  { %30390 = vmatmul.mubr.f32.vlgmr.msra.gmra.mrb[40].mxu1 %v36999_v47 }
 0x4e5   :  { %33307 = vmatpush3.bf16.msra.mxu1 %v37322_v3  ;;  %33346 = vmatpush3.bf16.msra.mxu0 %v37324_v35 }
 0x4e6   :  { %33308 = vmatprep.subr.bf16.mxu1 %v40509_v8  ;;  %33347 = vmatprep.subr.bf16.mxu0 %v40509_v8 }
 0x4e7   :  { %30400 = vmatprep.mubr.msk.f32.mxu1 %vm35896_vm1, %v40510_v16 }
 0x4e8   :  { %30467 = vmatmul.mubr.f32.vlgmr.msra.gmra.mrb[20].mxu0 %v37009_v48 }
 0x4e9   :  { %33310 = vmatpush3.bf16.msra.mxu1 %v37350_v49  ;;  %33349 = vmatpush3.bf16.msra.mxu0 %v37440_v33  ;;  %v37975_v33 = vsub.f32 %v11873_v5, %v37965_v23  ;;  %v13861_v5 = vld [vmem:[#allocation21 + $0x38] sm:$0xff] }
 0x4ea   :  { %33311 = vmatprep.subr.bf16.mxu1 %v40509_v8  ;;  %33350 = vmatprep.subr.bf16.mxu0 %v40509_v8 }
 0x4eb   :  { %30477 = vmatprep.mubr.msk.f32.mxu0 %vm35896_vm1, %v40510_v16 }
 0x4ec   :  { %30401 = vmatmul.mubr.f32.vlgmr.msra.gmra.mrb[40].mxu1 %v37009_v48 }
 0x4ed   :  { %33313 = vmatpush3.bf16.msra.mxu1 %v37454_v21  ;;  %33352 = vmatpush3.bf16.msra.mxu0 %v37460_v58  ;;  %v37985_v21 = vand.u32 4294901760, %v37975_v33  ;;  %v40567_v58 = vld [vmem:[#allocation91_spill] sm:$0xff] }
 0x4ee   :  { %33314 = vmatprep.subr.bf16.mxu1 %v40509_v8  ;;  %33353 = vmatprep.subr.bf16.mxu0 %v40509_v8 }
 0x4ef   :  { %30411 = vmatprep.mubr.msk.f32.mxu1 %vm35896_vm1, %v40510_v16 }
 0x4f0   :  { %30478 = vmatmul.mubr.f32.vlgmr.msra.gmra.mrb[20].mxu0 %v36989_v42 }
 0x4f1   :  { %33316 = vmatpush3.bf16.msra.mxu1 %v37479_v26  ;;  %33355 = vmatpush3.bf16.msra.mxu0 %v37299_v13  ;;  %v11947_v13 = vsub.f32 %v37975_v33, %v37985_v21 }
 0x4f2   :  { %33317 = vmatprep.subr.bf16.mxu1 %v40509_v8  ;;  %33356 = vmatprep.subr.bf16.mxu0 %v40509_v8 }
 0x4f3   :  { %30488 = vmatprep.mubr.msk.f32.mxu0 %vm35896_vm1, %v40510_v16 }
 0x4f4   :  { %30412 = vmatmul.mubr.f32.vlgmr.msra.gmra.mrb[40].mxu1 %v36989_v42 }
 0x4f5   :  { %33319 = vmatpush3.bf16.msra.mxu1 %v37322_v3  ;;  %33358 = vmatpush3.bf16.msra.mxu0 %v37324_v35  ;;  %v38003_v3 = vand.u32 4294901760, %v11947_v13  ;;  %v40565_v35 = vld [vmem:[#allocation89_spill] sm:$0xff] }
 0x4f6   :  { %33320 = vmatprep.subr.bf16.mxu1 %v40509_v8  ;;  %33431 = vmatprep.subr.bf16.mxu0 %v40509_v8  ;;  %v38153_v13 = vld [vmem:[#allocation18 + $0x2] ss:$0 sm:$0xff] }
 0x4f7   :  { %30422 = vmatprep.mubr.msk.f32.mxu1 %vm35896_vm1, %v40510_v16 }
 0x4f8   :  { %30489 = vmatmul.mubr.f32.vlgmr.msra.gmra.mrb[20].mxu0 %v36989_v42 }
 0x4f9   :  { %33322 = vmatpush3.bf16.msra.mxu1 %v37350_v49  ;;  %33433 = vmatpush3.bf16.msra.mxu0 %v37505_v10  ;;  %v40566_v49 = vld [vmem:[#allocation90_spill] sm:$0xff] }
 0x4fa   :  { %33359 = vmatprep.subr.bf16.mxu1 %v40509_v8  ;;  %33434 = vmatprep.subr.bf16.mxu0 %v40509_v8 }
 0x4fb   :  { %30631 = vmatprep.mubr.msk.f32.mxu0 %vm35896_vm1, %v40510_v16 }
 0x4fc   :  { %30423 = vmatmul.mubr.f32.vlgmr.msra.gmra.mrb[40].mxu1 %v36989_v42 }
 0x4fd   :  { %33361 = vmatpush3.bf16.msra.mxu1 %v37531_v0  ;;  %33436 = vmatpush3.bf16.msra.mxu0 %v37533_v52 }
 0x4fe   :  { %33362 = vmatprep.subr.bf16.mxu1 %v40509_v8  ;;  %33437 = vmatprep.subr.bf16.mxu0 %v40509_v8 }
 0x4ff   :  { %30499 = vmatprep.mubr.msk.f32.mxu1 %vm35896_vm1, %v40510_v16 }
 0x500   :  { %30632 = vmatmul.mubr.f32.vlgmr.msra.gmra.mrb[20].mxu0 %v38003_v3 }
 0x501   :  { %33364 = vmatpush3.bf16.msra.mxu1 %v37561_v27  ;;  %33439 = vmatpush3.bf16.msra.mxu0 %v37563_v36  ;;  %v35205_v36 = vld [vmem:[#allocation12] ss:$0 sm:$0xff] }
 0x502   :  { %33365 = vmatprep.subr.bf16.mxu1 %v40509_v8  ;;  %33440 = vmatprep.subr.bf16.mxu0 %v40509_v8 }
 0x503   :  { %30642 = vmatprep.mubr.msk.f32.mxu0 %vm35896_vm1, %v40510_v16 }
 0x504   :  { %30500 = vmatmul.mubr.f32.vlgmr.msra.gmra.mrb[42].mxu1 %v37028_v62 }
 0x505   :  { %33367 = vmatpush3.bf16.msra.mxu1 %v37580_v43  ;;  %33442 = vmatpush3.bf16.msra.mxu0 %v40565_v35  ;;  %v40568_v43 = vld [vmem:[#allocation88_spill] sm:$0xff]  ;;  %v13376_v35 = vand.u32 4294901760, %v13359_v38 }
 0x506   :  { %33368 = vmatprep.subr.bf16.mxu1 %v40509_v8  ;;  %33443 = vmatprep.subr.bf16.mxu0 %v40509_v8  ;;  %v34519_v6 = vadd.f32 %v35205_v36, %v40568_v43  ;;  %v13360_v36 = vld [vmem:[#allocation21 + $0x10] sm:$0xff] }
 0x507   :  { %30510 = vmatprep.mubr.msk.f32.mxu1 %vm35896_vm1, %v40510_v16 }
 0x508   :  { %30643 = vmatmul.mubr.f32.vlgmr.msra.gmra.mrb[20].mxu0 %v37965_v23 }
 0x509   :  { %33370 = vmatpush3.bf16.msra.mxu1 %v40566_v49  ;;  %33445 = vmatpush3.bf16.msra.mxu0 %v40567_v58  ;;  %v13877_v58 = vand.u32 4294901760, %v13860_v9 }
 0x50a   :  { %33371 = vmatprep.subr.bf16.mxu1 %v40509_v8  ;;  %33446 = vmatprep.subr.bf16.mxu0 %v40509_v8 }
 0x50b   :  { %v7382_v62 = vpop.f32.mrb[14].mxu0  ;;  %30653 = vmatprep.mubr.msk.f32.mxu0 %vm35896_vm1, %v40510_v16 }
 0x50c   :  { %v29962_v26 = vpop.f32.mrb[15].mxu0  ;;  %30511 = vmatmul.mubr.f32.vlgmr.msra.gmra.mrb[44].mxu1 %v36989_v42 }
 0x50d   :  { %33373 = vmatpush3.bf16.msra.mxu1 %v40569_v14  ;;  %33448 = vmatpush3.bf16.msra.mxu0 %v40570_v29 }
 0x50e   :  { %33374 = vmatprep.subr.bf16.mxu1 %v40509_v8  ;;  %33449 = vmatprep.subr.bf16.mxu0 %v40509_v8 }
 0x50f   :  { %v6412_v60 = vpop.f32.mrb[12].mxu1  ;;  %30521 = vmatprep.mubr.msk.f32.mxu1 %vm35896_vm1, %v40510_v16 }
 0x510   :  { %v34520_v59 = vadd.f32 %v34519_v6, %v6412_v60  ;;  %v29830_v25 = vpop.f32.mrb[13].mxu1  ;;  %30654 = vmatmul.mubr.f32.vlgmr.msra.gmra.mrb[20].mxu0 %v37975_v33  ;;  %v38176_v60 = vsub.f32 %v13359_v38, %v13376_v35 }
 0x511   :  { %33376 = vmatpush3.bf16.msra.mxu1 %v40571_v28  ;;  %33451 = vmatpush3.bf16.msra.mxu0 %v37505_v10  ;;  %v38180_v28 = vsub.f32 %v13860_v9, %v13877_v58 }
 0x512   :  { %v27419_v55 = vmul.f32 -1.442695, %v34520_v59  ;;  %33377 = vmatprep.subr.bf16.mxu1 %v40509_v8  ;;  %33452 = vmatprep.subr.bf16.mxu0 %v40509_v8  ;;  %v13379_v59 = vand.u32 4294901760, %v13360_v36 }
 0x513   :  { %30664 = vmatprep.mubr.msk.f32.mxu0 %vm35896_vm1, %v40510_v16 }
 0x514   :  { %35134 = vpow2.f32 %v27419_v55  ;;  %30522 = vmatmul.mubr.f32.vlgmr.msra.gmra.mrb[46].mxu1 %v36999_v47  ;;  %v27420_v47 = vmul.f32 -1.442695, %v34522_v34 }
 0x515   :  { %33379 = vmatpush3.bf16.msra.mxu1 %v37531_v0  ;;  %33454 = vmatpush3.bf16.msra.mxu0 %v37533_v52 }
 0x516   :  { %33380 = vmatprep.subr.bf16.mxu1 %v40509_v8  ;;  %33455 = vmatprep.subr.bf16.mxu0 %v40509_v8  ;;  %35136 = vpow2.f32 %v27420_v47  ;;  %v13461_v47 = vand.u32 4294901760, %v38176_v60 }
 0x517   :  { %30532 = vmatprep.mubr.msk.f32.mxu1 %vm35896_vm1, %v40510_v16 }
 0x518   :  { %30665 = vmatmul.mubr.f32.vlgmr.msra.gmra.mrb[20].mxu0 %v37985_v21 }
 0x519   :  { %33382 = vmatpush3.bf16.msra.mxu1 %v37561_v27  ;;  %33457 = vmatpush3.bf16.msra.mxu0 %v40573_v2 }
 0x51a   :  { %33383 = vmatprep.subr.bf16.mxu1 %v40509_v8  ;;  %33458 = vmatprep.subr.bf16.mxu0 %v40509_v8 }
 0x51b   :  { %30675 = vmatprep.mubr.msk.f32.mxu0 %vm35896_vm1, %v40510_v16 }
 0x51c   :  { %30533 = vmatmul.mubr.f32.vlgmr.msra.gmra.mrb[48].mxu1 %v37009_v48 }
 0x51d   :  { %33385 = vmatpush3.bf16.msra.mxu1 %v40574_v57  ;;  %33460 = vmatpush3.bf16.msra.mxu0 %v40575_v1  ;;  %v13966_v57 = vand.u32 4294901760, %v38180_v28 }
 0x51e   :  { %v35135_v53 = vpop.eup %35134  ;;  %33386 = vmatprep.subr.bf16.mxu1 %v40509_v8  ;;  %33461 = vmatprep.subr.bf16.mxu0 %v40509_v8 }
 0x51f   :  { %v7390_v40 = vadd.f32 1.0, %v35135_v53  ;;  %30543 = vmatprep.mubr.msk.f32.mxu1 %vm35896_vm1, %v40510_v16  ;;  %v38206_v53 = vsub.f32 %v13360_v36, %v13379_v59 }
 0x520   :  { %30676 = vmatmul.mubr.f32.vlgmr.msra.gmra.mrb[20].mxu0 %v37965_v23  ;;  %v35137_v48 = vpop.eup %35136 }
 0x521   :  { %35138 = vrcp.f32 %v7390_v40  ;;  %33388 = vmatpush3.bf16.msra.mxu1 %v40576_v61  ;;  %33463 = vmatpush3.bf16.msra.mxu0 %v37505_v10  ;;  %v40577_v10 = vld [vmem:[#allocation87_spill] sm:$0xff] }
 0x522   :  { %33389 = vmatprep.subr.bf16.mxu1 %v40509_v8  ;;  %33464 = vmatprep.subr.bf16.mxu0 %v40509_v8  ;;  %v34523_v4 = vadd.f32 %v40577_v10, %v7382_v62  ;;  %v13880_v62 = vand.u32 4294901760, %v13861_v5 }
 0x523   :  { %30686 = vmatprep.mubr.msk.f32.mxu0 %vm35896_vm1, %v40510_v16 }
 0x524   :  { %30544 = vmatmul.mubr.f32.vlgmr.msra.gmra.mrb[50].mxu1 %v36989_v42  ;;  %v38182_v55 = vsub.f32 %v13861_v5, %v13880_v62 }
 0x525   :  { %33391 = vmatpush3.bf16.msra.mxu1 %v37531_v0  ;;  %33466 = vmatpush3.bf16.msra.mxu0 %v37533_v52 }
 0x526   :  { %33392 = vmatprep.subr.bf16.mxu1 %v40509_v8  ;;  %33467 = vmatprep.subr.bf16.mxu0 %v40509_v8  ;;  %v13973_v1 = vand.u32 4294901760, %v38182_v55 }
 0x527   :  { %30554 = vmatprep.mubr.msk.f32.mxu1 %vm35896_vm1, %v40510_v16 }
 0x528   :  { %30687 = vmatmul.mubr.f32.vlgmr.msra.gmra.mrb[20].mxu0 %v37965_v23 }
 0x529   :  { %33394 = vmatpush3.bf16.msra.mxu1 %v37561_v27  ;;  %33469 = vmatpush3.bf16.msra.mxu0 %v37710_v12  ;;  %v7397_v27 = vadd.f32 1.0, %v35137_v48 }
 0x52a   :  { %33395 = vmatprep.subr.bf16.mxu1 %v40509_v8  ;;  %33470 = vmatprep.subr.bf16.mxu0 %v40509_v8 }
 0x52b   :  { %v35139_v0 = vpop.eup %35138  ;;  %30697 = vmatprep.mubr.msk.f32.mxu0 %vm35896_vm1, %v40510_v16  ;;  %35140 = vrcp.f32 %v7397_v27 }
 0x52c   :  { %v7400_v52 = vmul.f32 %v35139_v0, %v34523_v4  ;;  %30555 = vmatmul.mubr.f32.vlgmr.msra.gmra.mrb[52].mxu1 %v36989_v42 }
 0x52d   :  { %33397 = vmatpush3.bf16.msra.mxu1 %v37733_v56  ;;  %33472 = vmatpush3.bf16.msra.mxu0 %v37735_v18 }
 0x52e   :  { %v7401_v17 = vadd.f32 %v7400_v52, %v37940_v15  ;;  %33398 = vmatprep.subr.bf16.mxu1 %v40509_v8  ;;  %33473 = vmatprep.subr.bf16.mxu0 %v40509_v8  ;;  %v13358_v15 = vld [vmem:[#allocation21] sm:$0xff] }
 0x52f   :  { %30565 = vmatprep.mubr.msk.f32.mxu1 %vm35896_vm1, %v40510_v16 }
 0x530   :  { %30698 = vmatmul.mubr.f32.vlgmr.msra.gmra.mrb[22].mxu0 %v38003_v3  ;;  %35142 = vtanh.f32 %v7401_v17  ;;  %v13462_v17 = vsub.f32 %v38176_v60, %v13461_v47 }
 0x531   :  { %33400 = vmatpush3.bf16.msra.mxu1 %v37758_v11  ;;  %33475 = vmatpush3.bf16.msra.mxu0 %v37761_v24 }
 0x532   :  { %33401 = vmatprep.subr.bf16.mxu1 %v40509_v8  ;;  %33476 = vmatprep.subr.bf16.mxu0 %v40509_v8 }
 0x533   :  { %30708 = vmatprep.mubr.msk.f32.mxu0 %vm35896_vm1, %v40510_v16 }
 0x534   :  { %30566 = vmatmul.mubr.f32.vlgmr.msra.gmra.mrb[40].mxu1 %v38003_v3 }
 0x535   :  { %33403 = vmatpush3.bf16.msra.mxu1 %v37780_v45  ;;  %33478 = vmatpush3.bf16.msra.mxu0 %v37782_v39  ;;  %v35141_v42 = vpop.eup %35140  ;;  %v35206_v39 = vld [vmem:[#allocation34] sm:$0x3] }
 0x536   :  { %33404 = vmatprep.subr.bf16.mxu1 %v40509_v8  ;;  %33479 = vmatprep.subr.bf16.mxu0 %v40509_v8  ;;  %v7403_v45 = vsub.f32 1.0, %v35141_v42 }
 0x537   :  { %30576 = vmatprep.mubr.msk.f32.mxu1 %vm35896_vm1, %v40510_v16 }
 0x538   :  { %30709 = vmatmul.mubr.f32.vlgmr.msra.gmra.mrb[22].mxu0 %v37965_v23 }
 0x539   :  { %33406 = vmatpush3.bf16.msra.mxu1 %v37793_v50  ;;  %33481 = vmatpush3.bf16.msra.mxu0 %v37797_v7  ;;  %v7405_v50 = vmul.f32 %v35206_v39, %v35141_v42  ;;  %v13967_v42 = vsub.f32 %v38180_v28, %v13966_v57 }
 0x53a   :  { %33407 = vmatprep.subr.bf16.mxu1 %v40509_v8  ;;  %33482 = vmatprep.subr.bf16.mxu0 %v40509_v8  ;;  %v35143_v24 = vpop.eup %35142 }
 0x53b   :  { %30719 = vmatprep.mubr.msk.f32.mxu0 %vm35896_vm1, %v40510_v16  ;;  %v7404_v7 = vmul.f32 %v35143_v24, %v7403_v45  ;;  %v13974_v24 = vsub.f32 %v38182_v55, %v13973_v1  ;;  %v13468_v45 = vand.u32 4294901760, %v38206_v53 }
 0x53c   :  { %30577 = vmatmul.mubr.f32.vlgmr.msra.gmra.mrb[40].mxu1 %v37965_v23 }
 0x53d   :  { %33409 = vmatpush3.bf16.msra.mxu1 %v37808_v20  ;;  %33484 = vmatpush3.bf16.msra.mxu0 %v37812_v41  ;;  %v38135_v20 = vadd.f32 %v7405_v50, %v7404_v7  ;;  %v13858_v41 = vld [vmem:[#allocation21 + $0x20] sm:$0xff] }
 0x53e   :  { %33410 = vmatprep.subr.bf16.mxu1 %v40509_v8  ;;  %33485 = vmatprep.subr.bf16.mxu0 %v40509_v8  ;;  %v13871_v51 = vand.u32 4294901760, %v13858_v41 }
 0x53f   :  { %30587 = vmatprep.mubr.msk.f32.mxu1 %vm35896_vm1, %v40510_v16  ;;  %13353 = vst.msk [vmem:[#allocation40] sm:$0x3] %vm13351_vm6, %v38135_v20 }
 0x540   :  { %30720 = vmatmul.mubr.f32.vlgmr.msra.gmra.mrb[22].mxu0 %v37975_v33  ;;  %v38157_v3 = vsub.f32 %v13858_v41, %v13871_v51 }
 0x541   :  { %33412 = vmatpush3.bf16.msra.mxu1 %v37823_v63  ;;  %33487 = vmatpush3.bf16.msra.mxu0 %v37710_v12  ;;  %v13859_v63 = vld [vmem:[#allocation21 + $0x28] sm:$0xff] }
 0x542   :  { %33413 = vmatprep.subr.bf16.mxu1 %v40509_v8  ;;  %33488 = vmatprep.subr.bf16.mxu0 %v40509_v8  ;;  %v13874_v19 = vand.u32 4294901760, %v13859_v63 }
 0x543   :  { %30730 = vmatprep.mubr.msk.f32.mxu0 %vm35896_vm1, %v40510_v16 }
 0x544   :  { %30588 = vmatmul.mubr.f32.vlgmr.msra.gmra.mrb[40].mxu1 %v37975_v33  ;;  %v13370_v33 = vsel %vm1468_vm4, %v37775_v32, 0  ;;  %v38160_v49 = vsub.f32 %v13859_v63, %v13874_v19  ;;  %v13463_v63 = vand.u32 4294901760, %v13462_v17 }
 0x545   :  { %33415 = vmatpush3.bf16.msra.mxu1 %v37733_v56  ;;  %33490 = vmatpush3.bf16.msra.mxu0 %v37735_v18  ;;  %v38164_v32 = vand.u32 4294901760, %v13370_v33 }
 0x546   :  { %33416 = vmatprep.subr.bf16.mxu1 %v40509_v8  ;;  %33491 = vmatprep.subr.bf16.mxu0 %v40509_v8  ;;  %v13959_v14 = vand.u32 4294901760, %v38160_v49 }
 0x547   :  { %v8490_v44 = vpop.f32.mrb[28].mxu1  ;;  %30598 = vmatprep.mubr.msk.f32.mxu1 %vm35896_vm1, %v40510_v16  ;;  %v38187_v37 = vsub.f32 %v13370_v33, %v38164_v32 }
 0x548   :  { %v30105_v22 = vpop.f32.mrb[29].mxu1  ;;  %30731 = vmatmul.mubr.f32.vlgmr.msra.gmra.mrb[22].mxu0 %v37985_v21  ;;  %v8491_v26 = vadd.f32 %v38153_v13, %v8490_v44  ;;  %v13960_v34 = vsub.f32 %v38160_v49, %v13959_v14  ;;  %v13968_v44 = vand.u32 4294901760, %v13967_v42  ;;  %v14357_v42 = vld [vmem:[#allocation21 + $0x48] sm:$0xff] }
 0x549   :  { %33418 = vmatpush3.bf16.msra.mxu1 %v37758_v11  ;;  %33493 = vmatpush3.bf16.msra.mxu0 %v37843_v30  ;;  %v13373_v30 = vand.u32 4294901760, %v13358_v15  ;;  %v38213_v61 = vand.u32 4294901760, %v38187_v37  ;;  %v13469_v22 = vsub.f32 %v38206_v53, %v13468_v45 }
 0x54a   :  { %33419 = vmatprep.subr.bf16.mxu1 %v40509_v8  ;;  %33494 = vmatprep.subr.bf16.mxu0 %v40509_v8  ;;  %v13961_v52 = vand.u32 4294901760, %v13960_v34 }
 0x54b   :  { %30741 = vmatprep.mubr.msk.f32.mxu0 %vm35896_vm1, %v40510_v16  ;;  %v38174_v29 = vsub.f32 %v13358_v15, %v13373_v30 }
 0x54c   :  { %30599 = vmatmul.mubr.f32.vlgmr.msra.gmra.mrb[40].mxu1 %v37985_v21  ;;  %v13361_v21 = vld [vmem:[#allocation21 + $0x18] sm:$0xff] }
 0x54d   :  { %33421 = vmatpush3.bf16.msra.mxu1 %v37856_v54  ;;  %33496 = vmatpush3.bf16.msra.mxu0 %v37862_v46  ;;  %v13952_v54 = vand.u32 4294901760, %v38157_v3  ;;  %v13382_v25 = vand.u32 4294901760, %v13361_v21  ;;  %v13454_v2 = vand.u32 4294901760, %v38174_v29 }
 0x54e   :  { %33422 = vmatprep.subr.bf16.mxu1 %v40509_v8  ;;  %33497 = vmatprep.subr.bf16.mxu0 %v40509_v8 }
 0x54f   :  { %v8581_v43 = vpop.f32.mrb[30].mxu1  ;;  %30609 = vmatprep.mubr.msk.f32.mxu1 %vm35896_vm1, %v40510_v16  ;;  %v38208_v40 = vsub.f32 %v13361_v21, %v13382_v25  ;;  %v13455_v27 = vsub.f32 %v38174_v29, %v13454_v2  ;;  %v38245_v50 = vpack.c.bf16 %v13382_v25, %v13379_v59 }
 0x550   :  { %v8582_v6 = vadd.f32 %v8581_v43, %v8491_v26  ;;  %v30116_v46 = vpop.f32.mrb[31].mxu1  ;;  %30742 = vmatmul.mubr.f32.vlgmr.msra.gmra.mrb[22].mxu0 %v37965_v23  ;;  %v38292_v43 = vpack.c.bf16 %v38176_v60, %v38174_v29 }
 0x551   :  { %33424 = vmatpush3.bf16.msra.mxu1 %v37875_v31  ;;  %33499 = vmatpush3.bf16.msra.mxu0 %v37710_v12  ;;  %v13953_v12 = vsub.f32 %v38157_v3, %v13952_v54  ;;  %v38195_v31 = vpack.c.bf16 %v13874_v19, %v13871_v51  ;;  %v13475_v39 = vand.u32 4294901760, %v38208_v40  ;;  %v13456_v41 = vand.u32 4294901760, %v13455_v27 }
 0x552   :  { %33425 = vmatprep.subr.bf16.mxu1 %v40509_v8  ;;  %33500 = vmatprep.subr.bf16.mxu0 %v40509_v8  ;;  %v13975_v51 = vand.u32 4294901760, %v13974_v24  ;;  %v38309_v25 = vpack.c.bf16 %v38208_v40, %v38206_v53  ;;  %v15355_v24 = vld [vmem:[#allocation22 + $0x30] sm:$0xff] }
 0x553   :  { %30752 = vmatprep.mubr.msk.f32.mxu0 %vm35896_vm1, %v40510_v16  ;;  %v13954_v10 = vand.u32 4294901760, %v13953_v12  ;;  %v38266_v5 = vpack.c.bf16 %v13463_v63, %v13456_v41  ;;  %v14358_v41 = vld [vmem:[#allocation21 + $0x50] sm:$0xff]  ;;  %v14359_v63 = vld [vmem:[#allocation21 + $0x58] sm:$0xff] }
 0x554   :  { %30610 = vmatmul.mubr.f32.vlgmr.msra.gmra.mrb[40].mxu1 %v37965_v23  ;;  %v38268_v33 = vpack.c.bf16 %v13975_v51, %v13968_v44  ;;  %v14375_v51 = vand.u32 4294901760, %v14358_v41 }
 0x555   :  { %33427 = vmatpush3.bf16.msra.mxu1 %v37733_v56  ;;  %33502 = vmatpush3.bf16.msra.mxu0 %v37735_v18  ;;  %v38217_v18 = vpack.c.bf16 %v13376_v35, %v13373_v30  ;;  %v38219_v56 = vpack.c.bf16 %v13880_v62, %v13877_v58  ;;  %v38247_v7 = vpack.c.bf16 %v13961_v52, %v13954_v10  ;;  %v13470_v30 = vand.u32 4294901760, %v13469_v22  ;;  %v13357_v52 = vld [vmem:[#allocation33 + $0x2] sm:$0x3] }
 0x556   :  { %33428 = vmatprep.subr.bf16.mxu1 %v40509_v8  ;;  %33539 = vmatprep.subr.bf16.mxu0 %v40509_v8  ;;  %v38281_v62 = vpack.c.bf16 %v38160_v49, %v38157_v3  ;;  %v38331_v10 = vpack.c.bf16 %v13959_v14, %v13952_v54  ;;  %v14865_v3 = vsel %vm1468_vm4, %v13357_v52, 0  ;;  %v38345_v49 = vpack.c.bf16 %v13461_v47, %v13454_v2  ;;  %v14356_v14 = vld [vmem:[#allocation21 + $0x40] sm:$0xff] }
 0x557   :  { %v8661_v48 = vpop.f32.mrb[32].mxu1  ;;  %30620 = vmatprep.mubr.msk.f32.mxu1 %vm35896_vm1, %v40510_v16  ;;  %v38351_v54 = vpack.c.bf16 %v13973_v1, %v13966_v57  ;;  %v38357_v29 = vand.u32 4294901760, %v14865_v3  ;;  %v14369_v60 = vand.u32 4294901760, %v14356_v14  ;;  %v38370_v47 = vpack.c.bf16 %v13475_v39, %v13468_v45 }
 0x558   :  { %v8662_v4 = vadd.f32 %v8661_v48, %v8582_v6  ;;  %v30127_v0 = vpop.f32.mrb[33].mxu1  ;;  %30753 = vmatmul.mubr.f32.vlgmr.msra.gmra.mrb[22].mxu0 %v37965_v23  ;;  %v38296_v6 = vpack.c.bf16 %v38182_v55, %v38180_v28  ;;  %v14372_v28 = vand.u32 4294901760, %v14357_v42  ;;  %v15372_v57 = vand.u32 4294901760, %v15355_v24 }
 0x559   :  { %33430 = vmatpush3.bf16.msra.mxu1 %v37758_v11  ;;  %33541 = vmatpush3.bf16.msra.mxu0 %v38195_v31  ;;  %v13444_v11 = vsub.f32 %v38187_v37, %v38213_v61  ;;  %v15354_v0 = vld [vmem:[#allocation22 + $0x28] sm:$0xff]  ;;  %v38377_v44 = vsub.f32 %v14865_v3, %v38357_v29  ;;  %v38382_v45 = vsub.f32 %v14356_v14, %v14369_v60  ;;  %v14378_v22 = vand.u32 4294901760, %v14359_v63 }
 0x55a   :  { %33503 = vmatprep.subr.bf16.mxu1 %v40509_v8  ;;  %33542 = vmatprep.subr.bf16.mxu0 %v40509_v8  ;;  %v15369_v17 = vand.u32 4294901760, %v15354_v0 }
 0x55b   :  { %30829 = vmatprep.mubr.msk.f32.mxu0 %vm35896_vm1, %v40510_v16  ;;  %v38258_v19 = vand.u32 4294901760, %v13444_v11  ;;  %v15356_v11 = vld [vmem:[#allocation22 + $0x38] sm:$0xff] }
 0x55c   :  { %30621 = vmatmul.mubr.f32.vlgmr.msra.gmra.mrb[40].mxu1 %v37965_v23  ;;  %v13476_v23 = vsub.f32 %v38208_v40, %v13475_v39  ;;  %v38362_v2 = vsub.f32 %v15354_v0, %v15369_v17  ;;  %v15375_v1 = vand.u32 4294901760, %v15356_v11  ;;  %v38384_v39 = vsub.f32 %v14357_v42, %v14372_v28 }
 0x55d   :  { %33505 = vmatpush3.bf16.msra.mxu1 %v38217_v18  ;;  %33544 = vmatpush3.bf16.msra.mxu0 %v38219_v56 }
 0x55e   :  { %33506 = vmatprep.subr.bf16.mxu1 %v40509_v8  ;;  %33545 = vmatprep.subr.bf16.mxu0 %v40509_v8  ;;  %v13477_v35 = vand.u32 4294901760, %v13476_v23  ;;  %v15454_v40 = vand.u32 4294901760, %v38362_v2  ;;  %v38388_v23 = vsub.f32 %v15355_v24, %v15372_v57  ;;  %v38424_v0 = vpack.c.bf16 %v15375_v1, %v15372_v57 }
 0x55f   :  { %v8738_v15 = vpop.f32.mrb[34].mxu1  ;;  %30763 = vmatprep.mubr.msk.f32.mxu1 %vm35896_vm1, %v40510_v16  ;;  %v38452_v57 = vpack.c.bf16 %v14378_v22, %v14375_v51 }
 0x560   :  { %v8739_v38 = vadd.f32 %v8738_v15, %v8662_v4  ;;  %v30138_v9 = vpop.f32.mrb[35].mxu1  ;;  %30830 = vmatmul.mubr.f32.vlgmr.msra.gmra.mrb[24].mxu0 %v38258_v19  ;;  %v38277_v58 = vpack.c.bf16 %v13477_v35, %v13470_v30  ;;  %v15353_v4 = vld [vmem:[#allocation22 + $0x20] sm:$0xff]  ;;  %v38390_v15 = vsub.f32 %v15356_v11, %v15375_v1  ;;  %v15455_v35 = vsub.f32 %v38362_v2, %v15454_v40 }
 0x561   :  { %33508 = vmatpush3.bf16.msra.mxu1 %v38245_v50  ;;  %33547 = vmatpush3.bf16.msra.mxu0 %v38247_v7  ;;  %v15366_v27 = vand.u32 4294901760, %v15353_v4  ;;  %v38399_v9 = vand.u32 4294901760, %v38377_v44 }
 0x562   :  { %33509 = vmatprep.subr.bf16.mxu1 %v40509_v8  ;;  %33548 = vmatprep.subr.bf16.mxu0 %v40509_v8 }
 0x563   :  { %30840 = vmatprep.mubr.msk.f32.mxu0 %vm35896_vm1, %v40510_v16  ;;  %v38360_v55 = vsub.f32 %v15353_v4, %v15366_v27  ;;  %v38422_v4 = vpack.c.bf16 %v14372_v28, %v14369_v60  ;;  %v14939_v52 = vsub.f32 %v38377_v44, %v38399_v9 }
 0x564   :  { %30764 = vmatmul.mubr.f32.vlgmr.msra.gmra.mrb[54].mxu1 %v38258_v19 }
 0x565   :  { %33511 = vmatpush3.bf16.msra.mxu1 %v38266_v5  ;;  %33550 = vmatpush3.bf16.msra.mxu0 %v38268_v33  ;;  %v15447_v53 = vand.u32 4294901760, %v38360_v55  ;;  %v38449_v28 = vand.u32 4294901760, %v14939_v52 }
 0x566   :  { %33512 = vmatprep.subr.bf16.mxu1 %v40509_v8  ;;  %33551 = vmatprep.subr.bf16.mxu0 %v40509_v8 }
 0x567   :  { %v8821_v26 = vpop.f32.mrb[36].mxu1  ;;  %30774 = vmatprep.mubr.msk.f32.mxu1 %vm35896_vm1, %v40510_v16  ;;  %v15448_v30 = vsub.f32 %v38360_v55, %v15447_v53 }
 0x568   :  { %v8822_v36 = vadd.f32 %v8821_v26, %v8739_v38  ;;  %v30149_v21 = vpop.f32.mrb[37].mxu1  ;;  %30841 = vmatmul.mubr.f32.vlgmr.msra.gmra.mrb[24].mxu0 %v38164_v32  ;;  %v38396_v38 = vpack.c.bf16 %v15369_v17, %v15366_v27  ;;  %v14450_v26 = vand.u32 4294901760, %v38382_v45  ;;  %v15456_v17 = vand.u32 4294901760, %v15455_v35 }
 0x569   :  { %33514 = vmatpush3.bf16.msra.mxu1 %v38277_v58  ;;  %33553 = vmatpush3.bf16.msra.mxu0 %v38281_v62  ;;  %v15461_v21 = vand.u32 4294901760, %v38388_v23  ;;  %v15449_v27 = vand.u32 4294901760, %v15448_v30 }
 0x56a   :  { %33515 = vmatprep.subr.bf16.mxu1 %v40509_v8  ;;  %33554 = vmatprep.subr.bf16.mxu0 %v40509_v8  ;;  %v14451_v3 = vsub.f32 %v38382_v45, %v14450_v26 }
 0x56b   :  { %v38300_v46 = vpop.f32.mrb[16].mxu0  ;;  %30851 = vmatprep.mubr.msk.f32.mxu0 %vm35896_vm1, %v40510_v16  ;;  %v15462_v42 = vsub.f32 %v38388_v23, %v15461_v21  ;;  %v38454_v1 = vpack.c.bf16 %v15456_v17, %v15449_v27 }
 0x56c   :  { %v30292_v59 = vpop.f32.mrb[17].mxu0  ;;  %30775 = vmatmul.mubr.f32.vlgmr.msra.gmra.mrb[54].mxu1 %v38164_v32 }
 0x56d   :  { %33517 = vmatpush3.bf16.msra.mxu1 %v38292_v43  ;;  %33556 = vmatpush3.bf16.msra.mxu0 %v38296_v6  ;;  %v40430_v59 = vand.u32 4294901760, %v38390_v15  ;;  %v15463_v30 = vand.u32 4294901760, %v15462_v42  ;;  %v27421_v42 = vld [vmem:[#allocation18] ss:$0 sm:$0xff] }
 0x56e   :  { %33518 = vmatprep.subr.bf16.mxu1 %v40509_v8  ;;  %33557 = vmatprep.subr.bf16.mxu0 %v40509_v8 }
 0x56f   :  { %v8896_v12 = vpop.f32.mrb[38].mxu1  ;;  %30785 = vmatprep.mubr.msk.f32.mxu1 %vm35896_vm1, %v40510_v16  ;;  %v15469_v24 = vsub.f32 %v38390_v15, %v40430_v59 }
 0x570   :  { %v38315_v34 = vadd.f32 %v8896_v12, %v8822_v36  ;;  %v30160_v48 = vpop.f32.mrb[39].mxu1  ;;  %30852 = vmatmul.mubr.f32.vlgmr.msra.gmra.mrb[24].mxu0 %v38187_v37  ;;  %v14457_v36 = vand.u32 4294901760, %v38384_v39  ;;  %v38414_v12 = vsub.f32 %v14358_v41, %v14375_v51  ;;  %v14452_v41 = vand.u32 4294901760, %v14451_v3 }
 0x571   :  { %33520 = vmatpush3.bf16.msra.mxu1 %v38309_v25  ;;  %33559 = vmatpush3.bf16.msra.mxu0 %v38195_v31  ;;  %v38416_v48 = vsub.f32 %v14359_v63, %v14378_v22  ;;  %v15470_v35 = vand.u32 4294901760, %v15469_v24  ;;  %v27424_v24 = vld [vmem:[#allocation19] ss:$0 sm:$0xff] }
 0x572   :  { %33521 = vmatprep.subr.bf16.mxu1 %v40509_v8  ;;  %33560 = vmatprep.subr.bf16.mxu0 %v40509_v8  ;;  %v14458_v14 = vsub.f32 %v38384_v39, %v14457_v36  ;;  %v40432_v11 = vand.u32 4294901760, %v38414_v12 }
 0x573   :  { %30862 = vmatprep.mubr.msk.f32.mxu0 %vm35896_vm1, %v40510_v16  ;;  %v40431_v60 = vand.u32 4294901760, %v38416_v48  ;;  %v38473_v22 = vpack.c.bf16 %v15470_v35, %v15463_v30  ;;  %v27425_v30 = vld [vmem:[#allocation19 + $0x1] ss:$0 sm:$0xff] }
 0x574   :  { %30786 = vmatmul.mubr.f32.vlgmr.msra.gmra.mrb[54].mxu1 %v38187_v37  ;;  %v14459_v63 = vand.u32 4294901760, %v14458_v14  ;;  %v14465_v59 = vsub.f32 %v38414_v12, %v40432_v11  ;;  %v38486_v14 = vpack.c.bf16 %v38362_v2, %v38360_v55  ;;  %v38554_v55 = vpack.c.bf16 %v14457_v36, %v14450_v26  ;;  %v15854_v11 = vld [vmem:[#allocation22 + $0x58] sm:$0xff] }
 0x575   :  { %33523 = vmatpush3.bf16.msra.mxu1 %v38217_v18  ;;  %33562 = vmatpush3.bf16.msra.mxu0 %v38219_v56  ;;  %v14472_v52 = vsub.f32 %v38416_v48, %v40431_v60  ;;  %v40587_v2 = vand.u32 4294901760, %v38390_v15  ;;  %v40589_v36 = vand.u32 4294901760, %v38414_v12 }
 0x576   :  { %33524 = vmatprep.subr.bf16.mxu1 %v40509_v8  ;;  %33563 = vmatprep.subr.bf16.mxu0 %v40509_v8  ;;  %v38471_v51 = vpack.c.bf16 %v14459_v63, %v14452_v41  ;;  %v14466_v27 = vand.u32 4294901760, %v14465_v59  ;;  %40579 = vst [vmem:[#allocation90_spill] sm:$0xff] %v38486_v14  ;;  %v38501_v59 = vpack.c.bf16 %v38390_v15, %v38388_v23  ;;  %v27422_v63 = vld [vmem:[#allocation18 + $0x1] ss:$0 sm:$0xff]  ;;  %40586 = vst [vmem:[#allocation93_spill] sm:$0xff] %v38554_v55 }
 0x577   :  { %30796 = vmatprep.mubr.msk.f32.mxu1 %vm35896_vm1, %v40510_v16  ;;  %v14473_v17 = vand.u32 4294901760, %v14472_v52  ;;  %v38510_v52 = vadd.f32 %v27424_v24, %v27421_v42 }
 0x578   :  { %30863 = vmatmul.mubr.f32.vlgmr.msra.gmra.mrb[24].mxu0 %v38213_v61  ;;  %40581 = vst [vmem:[#allocation88_spill] sm:$0xff] %v38501_v59 }
 0x579   :  { %33526 = vmatpush3.bf16.msra.mxu1 %v38245_v50  ;;  %33565 = vmatpush3.bf16.msra.mxu0 %v38331_v10  ;;  %v38482_v3 = vpack.c.bf16 %v14473_v17, %v14466_v27  ;;  %40582 = vst [vmem:[#allocation84_spill] sm:$0xff] %v38510_v52  ;;  %v38516_v27 = vpack.c.bf16 %v38416_v48, %v38414_v12 }
 0x57a   :  { %33527 = vmatprep.subr.bf16.mxu1 %v40509_v8  ;;  %33566 = vmatprep.subr.bf16.mxu0 %v40509_v8  ;;  %v38520_v17 = vadd.f32 %v27425_v30, %v27422_v63  ;;  %v15852_v30 = vld [vmem:[#allocation22 + $0x48] sm:$0xff] }
 0x57b   :  { %30873 = vmatprep.mubr.msk.f32.mxu0 %vm35896_vm1, %v40510_v16  ;;  %40578 = vst [vmem:[#allocation89_spill] sm:$0xff] %v38482_v3  ;;  %40583 = vst [vmem:[#allocation85_spill] sm:$0xff] %v38516_v27 }
 0x57c   :  { %30797 = vmatmul.mubr.f32.vlgmr.msra.gmra.mrb[54].mxu1 %v38213_v61  ;;  %40584 = vst [vmem:[#allocation92_spill] sm:$0xff] %v38520_v17  ;;  %v34527_v63 = vadd.f32 %v38520_v17, %v38300_v46 }
 0x57d   :  { %33529 = vmatpush3.bf16.msra.mxu1 %v38345_v49  ;;  %33568 = vmatpush3.bf16.msra.mxu0 %v38351_v54 }
 0x57e   :  { %33530 = vmatprep.subr.bf16.mxu1 %v40509_v8  ;;  %33569 = vmatprep.subr.bf16.mxu0 %v40509_v8  ;;  %v27428_v46 = vmul.f32 -1.442695, %v34527_v63  ;;  %v15853_v63 = vld [vmem:[#allocation22 + $0x50] sm:$0xff] }
 0x57f   :  { %30807 = vmatprep.mubr.msk.f32.mxu1 %vm35896_vm1, %v40510_v16  ;;  %v15870_v26 = vand.u32 4294901760, %v15853_v63 }
 0x580   :  { %30874 = vmatmul.mubr.f32.vlgmr.msra.gmra.mrb[24].mxu0 %v38164_v32 }
 0x581   :  { %33532 = vmatpush3.bf16.msra.mxu1 %v38370_v47  ;;  %33571 = vmatpush3.bf16.msra.mxu0 %v38195_v31 }
 0x582   :  { %33533 = vmatprep.subr.bf16.mxu1 %v40509_v8  ;;  %33572 = vmatprep.subr.bf16.mxu0 %v40509_v8 }
 0x583   :  { %30884 = vmatprep.mubr.msk.f32.mxu0 %vm35896_vm1, %v40510_v16 }
 0x584   :  { %30808 = vmatmul.mubr.f32.vlgmr.msra.gmra.mrb[54].mxu1 %v38164_v32 }
 0x585   :  { %33535 = vmatpush3.bf16.msra.mxu1 %v38217_v18  ;;  %33574 = vmatpush3.bf16.msra.mxu0 %v38219_v56 }
 0x586   :  { %33536 = vmatprep.subr.bf16.mxu1 %v40509_v8  ;;  %33647 = vmatprep.subr.bf16.mxu0 %v40509_v8 }
 0x587   :  { %30818 = vmatprep.mubr.msk.f32.mxu1 %vm35896_vm1, %v40510_v16 }
 0x588   :  { %30885 = vmatmul.mubr.f32.vlgmr.msra.gmra.mrb[24].mxu0 %v38164_v32 }
 0x589   :  { %33538 = vmatpush3.bf16.msra.mxu1 %v38245_v50  ;;  %33649 = vmatpush3.bf16.msra.mxu0 %v38396_v38 }
 0x58a   :  { %33575 = vmatprep.subr.bf16.mxu1 %v40509_v8  ;;  %33650 = vmatprep.subr.bf16.mxu0 %v40509_v8 }
 0x58b   :  { %31027 = vmatprep.mubr.msk.f32.mxu0 %vm35896_vm1, %v40510_v16 }
 0x58c   :  { %30819 = vmatmul.mubr.f32.vlgmr.msra.gmra.mrb[54].mxu1 %v38164_v32 }
 0x58d   :  { %33577 = vmatpush3.bf16.msra.mxu1 %v38422_v4  ;;  %33652 = vmatpush3.bf16.msra.mxu0 %v38424_v0 }
 0x58e   :  { %33578 = vmatprep.subr.bf16.mxu1 %v40509_v8  ;;  %33653 = vmatprep.subr.bf16.mxu0 %v40509_v8 }
 0x58f   :  { %30895 = vmatprep.mubr.msk.f32.mxu1 %vm35896_vm1, %v40510_v16 }
 0x590   :  { %31028 = vmatmul.mubr.f32.vlgmr.msra.gmra.mrb[24].mxu0 %v38449_v28 }
 0x591   :  { %33580 = vmatpush3.bf16.msra.mxu1 %v38452_v57  ;;  %33655 = vmatpush3.bf16.msra.mxu0 %v38454_v1 }
 0x592   :  { %33581 = vmatprep.subr.bf16.mxu1 %v40509_v8  ;;  %33656 = vmatprep.subr.bf16.mxu0 %v40509_v8 }
 0x593   :  { %31038 = vmatprep.mubr.msk.f32.mxu0 %vm35896_vm1, %v40510_v16 }
 0x594   :  { %30896 = vmatmul.mubr.f32.vlgmr.msra.gmra.mrb[56].mxu1 %v38258_v19  ;;  %v38497_v19 = vpack.c.bf16 %v38384_v39, %v38382_v45 }
 0x595   :  { %33583 = vmatpush3.bf16.msra.mxu1 %v38471_v51  ;;  %33658 = vmatpush3.bf16.msra.mxu0 %v38473_v22 }
 0x596   :  { %33584 = vmatprep.subr.bf16.mxu1 %v40509_v8  ;;  %33659 = vmatprep.subr.bf16.mxu0 %v40509_v8  ;;  %40580 = vst [vmem:[#allocation91_spill] sm:$0xff] %v38497_v19 }
 0x597   :  { %30906 = vmatprep.mubr.msk.f32.mxu1 %vm35896_vm1, %v40510_v16 }
 0x598   :  { %31039 = vmatmul.mubr.f32.vlgmr.msra.gmra.mrb[24].mxu0 %v38357_v29 }
 0x599   :  { %33586 = vmatpush3.bf16.msra.mxu1 %v38482_v3  ;;  %33661 = vmatpush3.bf16.msra.mxu0 %v38486_v14 }
 0x59a   :  { %33587 = vmatprep.subr.bf16.mxu1 %v40509_v8  ;;  %33662 = vmatprep.subr.bf16.mxu0 %v40509_v8 }
 0x59b   :  { %v38505_v41 = vpop.f32.mrb[18].mxu0  ;;  %31049 = vmatprep.mubr.msk.f32.mxu0 %vm35896_vm1, %v40510_v16 }
 0x59c   :  { %v30358_v35 = vpop.f32.mrb[19].mxu0  ;;  %30907 = vmatmul.mubr.f32.vlgmr.msra.gmra.mrb[58].mxu1 %v38164_v32 }
 0x59d   :  { %33589 = vmatpush3.bf16.msra.mxu1 %v38497_v19  ;;  %33664 = vmatpush3.bf16.msra.mxu0 %v38501_v59 }
 0x59e   :  { %33590 = vmatprep.subr.bf16.mxu1 %v40509_v8  ;;  %33665 = vmatprep.subr.bf16.mxu0 %v40509_v8 }
 0x59f   :  { %v9395_v60 = vpop.f32.mrb[26].mxu1  ;;  %30917 = vmatprep.mubr.msk.f32.mxu1 %vm35896_vm1, %v40510_v16 }
 0x5a0   :  { %v34525_v42 = vadd.f32 %v38510_v52, %v9395_v60  ;;  %v30226_v24 = vpop.f32.mrb[27].mxu1  ;;  %31050 = vmatmul.mubr.f32.vlgmr.msra.gmra.mrb[24].mxu0 %v38377_v44  ;;  %v15851_v60 = vld [vmem:[#allocation22 + $0x40] sm:$0xff] }
 0x5a1   :  { %33592 = vmatpush3.bf16.msra.mxu1 %v38516_v27  ;;  %33667 = vmatpush3.bf16.msra.mxu0 %v38396_v38  ;;  %v15867_v24 = vand.u32 4294901760, %v15852_v30 }
 0x5a2   :  { %v27427_v35 = vmul.f32 -1.442695, %v34525_v42  ;;  %33593 = vmatprep.subr.bf16.mxu1 %v40509_v8  ;;  %33668 = vmatprep.subr.bf16.mxu0 %v40509_v8  ;;  %v38541_v42 = vpack.c.bf16 %v15454_v40, %v15447_v53  ;;  %v38560_v53 = vpack.c.bf16 %v40587_v2, %v15461_v21  ;;  %v14853_v40 = vld [vmem:[#allocation22] sm:$0xff]  ;;  %v40590_v21 = vand.u32 4294901760, %v38416_v48 }
 0x5a3   :  { %31060 = vmatprep.mubr.msk.f32.mxu0 %vm35896_vm1, %v40510_v16  ;;  %v38568_v39 = vsub.f32 %v15852_v30, %v15867_v24  ;;  %v14868_v23 = vand.u32 4294901760, %v14853_v40  ;;  %v15873_v2 = vand.u32 4294901760, %v15854_v11  ;;  %v14856_v30 = vld [vmem:[#allocation22 + $0x18] sm:$0xff] }
 0x5a4   :  { %35144 = vpow2.f32 %v27427_v35  ;;  %30918 = vmatmul.mubr.f32.vlgmr.msra.gmra.mrb[60].mxu1 %v38187_v37  ;;  %40585 = vst [vmem:[#allocation86_spill] sm:$0xff] %v38541_v42  ;;  %v15864_v37 = vand.u32 4294901760, %v15851_v60  ;;  %40588 = vst [vmem:[#allocation94_spill] sm:$0xff] %v38560_v53  ;;  %v14854_v35 = vld [vmem:[#allocation22 + $0x8] sm:$0xff] }
 0x5a5   :  { %33595 = vmatpush3.bf16.msra.mxu1 %v38422_v4  ;;  %33670 = vmatpush3.bf16.msra.mxu0 %v38424_v0  ;;  %35146 = vpow2.f32 %v27428_v46  ;;  %v14871_v15 = vand.u32 4294901760, %v14854_v35  ;;  %v38577_v46 = vpack.c.bf16 %v40590_v21, %v40589_v36  ;;  %v40441_v12 = vand.u32 4294901760, %v38568_v39 }
 0x5a6   :  { %33596 = vmatprep.subr.bf16.mxu1 %v40509_v8  ;;  %33671 = vmatprep.subr.bf16.mxu0 %v40509_v8  ;;  %v38566_v45 = vsub.f32 %v15851_v60, %v15864_v37  ;;  %v38586_v48 = vsub.f32 %v14853_v40, %v14868_v23  ;;  %v38590_v21 = vsub.f32 %v15853_v63, %v15870_v26 }
 0x5a7   :  { %30928 = vmatprep.mubr.msk.f32.mxu1 %vm35896_vm1, %v40510_v16  ;;  %40591 = vst [vmem:[#allocation95_spill] sm:$0xff] %v38577_v46  ;;  %v38588_v36 = vsub.f32 %v14854_v35, %v14871_v15  ;;  %v38594_v17 = vsub.f32 %v15854_v11, %v15873_v2  ;;  %v38607_v35 = vpack.c.bf16 %v15867_v24, %v15864_v37  ;;  %v38621_v37 = vld [vmem:[#allocation19 + $0x2] ss:$0 sm:$0xff] }
 0x5a8   :  { %31061 = vmatmul.mubr.f32.vlgmr.msra.gmra.mrb[24].mxu0 %v38399_v9  ;;  %40592 = vst [vmem:[#allocation96_spill] sm:$0xff] %v38621_v37  ;;  %v38625_v24 = vpack.c.bf16 %v14871_v15, %v14868_v23  ;;  %v40595_v23 = vand.u32 4294901760, %v38590_v21 }
 0x5a9   :  { %33598 = vmatpush3.bf16.msra.mxu1 %v38452_v57  ;;  %33673 = vmatpush3.bf16.msra.mxu0 %v38541_v42  ;;  %v40594_v59 = vand.u32 4294901760, %v38588_v36 }
 0x5aa   :  { %33599 = vmatprep.subr.bf16.mxu1 %v40509_v8  ;;  %33674 = vmatprep.subr.bf16.mxu0 %v40509_v8  ;;  %v15960_v15 = vsub.f32 %v38590_v21, %v40595_v23 }
 0x5ab   :  { %31071 = vmatprep.mubr.msk.f32.mxu0 %vm35896_vm1, %v40510_v16  ;;  %v14957_v19 = vsub.f32 %v38588_v36, %v40594_v59 }
 0x5ac   :  { %30929 = vmatmul.mubr.f32.vlgmr.msra.gmra.mrb[62].mxu1 %v38213_v61  ;;  %v14855_v61 = vld [vmem:[#allocation22 + $0x10] sm:$0xff] }
 0x5ad   :  { %33601 = vmatpush3.bf16.msra.mxu1 %v38554_v55  ;;  %33676 = vmatpush3.bf16.msra.mxu0 %v38560_v53  ;;  %v40439_v53 = vand.u32 4294901760, %v38566_v45  ;;  %v14877_v55 = vand.u32 4294901760, %v14856_v30 }
 0x5ae   :  { %v35145_v60 = vpop.eup %35144  ;;  %33602 = vmatprep.subr.bf16.mxu1 %v40509_v8  ;;  %33677 = vmatprep.subr.bf16.mxu0 %v40509_v8 }
 0x5af   :  { %v10399_v42 = vadd.f32 1.0, %v35145_v60  ;;  %30939 = vmatprep.mubr.msk.f32.mxu1 %vm35896_vm1, %v40510_v16  ;;  %v14874_v60 = vand.u32 4294901760, %v14855_v61  ;;  %v15946_v40 = vsub.f32 %v38566_v45, %v40439_v53 }
 0x5b0   :  { %31072 = vmatmul.mubr.f32.vlgmr.msra.gmra.mrb[24].mxu0 %v38357_v29 }
 0x5b1   :  { %35148 = vrcp.f32 %v10399_v42  ;;  %33604 = vmatpush3.bf16.msra.mxu1 %v38577_v46  ;;  %33679 = vmatpush3.bf16.msra.mxu0 %v38396_v38  ;;  %v15953_v42 = vsub.f32 %v38568_v39, %v40441_v12  ;;  %v35147_v46 = vpop.eup %35146  ;;  %v38615_v52 = vsub.f32 %v14855_v61, %v14874_v60  ;;  %v38617_v12 = vsub.f32 %v14856_v30, %v14877_v55 }
 0x5b2   :  { %33605 = vmatprep.subr.bf16.mxu1 %v40509_v8  ;;  %33680 = vmatprep.subr.bf16.mxu0 %v40509_v8  ;;  %v15947_v63 = vand.u32 4294901760, %v15946_v40  ;;  %v10406_v27 = vadd.f32 1.0, %v35147_v46  ;;  %v38628_v61 = vpack.c.bf16 %v15873_v2, %v15870_v26  ;;  %v40593_v30 = vand.u32 4294901760, %v38586_v48 }
 0x5b3   :  { %31082 = vmatprep.mubr.msk.f32.mxu0 %vm35896_vm1, %v40510_v16  ;;  %v15954_v11 = vand.u32 4294901760, %v15953_v42  ;;  %v40596_v46 = vand.u32 4294901760, %v38594_v17  ;;  %v34528_v42 = vadd.f32 %v38621_v37, %v38505_v41  ;;  %v14958_v2 = vand.u32 4294901760, %v14957_v19 }
 0x5b4   :  { %30940 = vmatmul.mubr.f32.vlgmr.msra.gmra.mrb[64].mxu1 %v38164_v32  ;;  %v14950_v53 = vsub.f32 %v38586_v48, %v40593_v30  ;;  %v38652_v30 = vpack.c.bf16 %v14877_v55, %v14874_v60  ;;  %35150 = vrcp.f32 %v10406_v27  ;;  %v15961_v41 = vand.u32 4294901760, %v15960_v15 }
 0x5b5   :  { %33607 = vmatpush3.bf16.msra.mxu1 %v38422_v4  ;;  %33682 = vmatpush3.bf16.msra.mxu0 %v38424_v0  ;;  %v15967_v26 = vsub.f32 %v38594_v17, %v40596_v46  ;;  %v38654_v23 = vpack.c.bf16 %v15954_v11, %v15947_v63  ;;  %v40597_v14 = vand.u32 4294901760, %v38615_v52  ;;  %v40598_v55 = vand.u32 4294901760, %v38617_v12 }
 0x5b6   :  { %33608 = vmatprep.subr.bf16.mxu1 %v40509_v8  ;;  %33683 = vmatprep.subr.bf16.mxu0 %v40509_v8  ;;  %v14951_v40 = vand.u32 4294901760, %v14950_v53  ;;  %v38688_v11 = vpack.c.bf16 %v38568_v39, %v38566_v45  ;;  %v38699_v63 = vpack.c.bf16 %v38588_v36, %v38586_v48 }
 0x5b7   :  { %30950 = vmatprep.mubr.msk.f32.mxu1 %vm35896_vm1, %v40510_v16  ;;  %v15968_v37 = vand.u32 4294901760, %v15967_v26  ;;  %v14964_v3 = vsub.f32 %v38615_v52, %v40597_v14  ;;  %v14971_v60 = vsub.f32 %v38617_v12, %v40598_v55  ;;  %v35207_v26 = vld [vmem:[#allocation36] sm:$0x3] }
 0x5b8   :  { %31083 = vmatmul.mubr.f32.vlgmr.msra.gmra.mrb[24].mxu0 %v38357_v29 }
 0x5b9   :  { %33610 = vmatpush3.bf16.msra.mxu1 %v38452_v57  ;;  %33685 = vmatpush3.bf16.msra.mxu0 %v38607_v35  ;;  %v38675_v14 = vpack.c.bf16 %v15968_v37, %v15961_v41  ;;  %v14965_v19 = vand.u32 4294901760, %v14964_v3  ;;  %v38703_v37 = vpack.c.bf16 %v38594_v17, %v38590_v21  ;;  %v40600_v41 = vand.u32 4294901760, %v38568_v39 }
 0x5ba   :  { %33611 = vmatprep.subr.bf16.mxu1 %v40509_v8  ;;  %33686 = vmatprep.subr.bf16.mxu0 %v40509_v8 }
 0x5bb   :  { %v35149_v59 = vpop.eup %35148  ;;  %31093 = vmatprep.mubr.msk.f32.mxu0 %vm35896_vm1, %v40510_v16 }
 0x5bc   :  { %v10409_v46 = vmul.f32 %v35149_v59, %v34528_v42  ;;  %30951 = vmatmul.mubr.f32.vlgmr.msra.gmra.mrb[66].mxu1 %v38164_v32  ;;  %v38673_v32 = vpack.c.bf16 %v14958_v2, %v14951_v40  ;;  %v38714_v42 = vpack.c.bf16 %v38617_v12, %v38615_v52 }
 0x5bd   :  { %33613 = vmatpush3.bf16.msra.mxu1 %v38625_v24  ;;  %33688 = vmatpush3.bf16.msra.mxu0 %v38628_v61 }
 0x5be   :  { %v10410_v27 = vadd.f32 %v10409_v46, %v38315_v34  ;;  %33614 = vmatprep.subr.bf16.mxu1 %v40509_v8  ;;  %33689 = vmatprep.subr.bf16.mxu0 %v40509_v8  ;;  %v14972_v34 = vand.u32 4294901760, %v14971_v60  ;;  %v35151_v3 = vpop.eup %35150  ;;  %v40599_v46 = vand.u32 4294901760, %v38566_v45  ;;  %v40602_v45 = vand.u32 4294901760, %v38588_v36 }
 0x5bf   :  { %30961 = vmatprep.mubr.msk.f32.mxu1 %vm35896_vm1, %v40510_v16  ;;  %v10414_v2 = vmul.f32 %v35207_v26, %v35151_v3  ;;  %v40606_v36 = vand.u32 4294901760, %v38617_v12 }
 0x5c0   :  { %35152 = vtanh.f32 %v10410_v27  ;;  %31094 = vmatmul.mubr.f32.vlgmr.msra.gmra.mrb[26].mxu0 %v38449_v28  ;;  %v38684_v53 = vpack.c.bf16 %v14972_v34, %v14965_v19  ;;  %v38738_v55 = vpack.c.bf16 %v40600_v41, %v40599_v46  ;;  %v40603_v19 = vand.u32 4294901760, %v38590_v21 }
 0x5c1   :  { %33616 = vmatpush3.bf16.msra.mxu1 %v38652_v30  ;;  %33691 = vmatpush3.bf16.msra.mxu0 %v38654_v23  ;;  %v40604_v34 = vand.u32 4294901760, %v38594_v17  ;;  %v40605_v17 = vand.u32 4294901760, %v38615_v52 }
 0x5c2   :  { %33617 = vmatprep.subr.bf16.mxu1 %v40509_v8  ;;  %33692 = vmatprep.subr.bf16.mxu0 %v40509_v8 }
 0x5c3   :  { %31104 = vmatprep.mubr.msk.f32.mxu0 %vm35896_vm1, %v40510_v16  ;;  %v38772_v21 = vpack.c.bf16 %v40606_v36, %v40605_v17  ;;  %v40612_v36 = vld [vmem:[#allocation85_spill] sm:$0xff] }
 0x5c4   :  { %30962 = vmatmul.mubr.f32.vlgmr.msra.gmra.mrb[54].mxu1 %v38449_v28  ;;  %v10412_v28 = vsub.f32 1.0, %v35151_v3  ;;  %v38757_v3 = vpack.c.bf16 %v40604_v34, %v40603_v19  ;;  %v40611_v34 = vld [vmem:[#allocation84_spill] sm:$0xff] }
 0x5c5   :  { %33619 = vmatpush3.bf16.msra.mxu1 %v38673_v32  ;;  %33694 = vmatpush3.bf16.msra.mxu0 %v38675_v14 }
 0x5c6   :  { %33620 = vmatprep.subr.bf16.mxu1 %v40509_v8  ;;  %33695 = vmatprep.subr.bf16.mxu0 %v40509_v8 }
 0x5c7   :  { %30972 = vmatprep.mubr.msk.f32.mxu1 %vm35896_vm1, %v40510_v16 }
 0x5c8   :  { %31105 = vmatmul.mubr.f32.vlgmr.msra.gmra.mrb[26].mxu0 %v38357_v29 }
 0x5c9   :  { %33622 = vmatpush3.bf16.msra.mxu1 %v38684_v53  ;;  %33697 = vmatpush3.bf16.msra.mxu0 %v38688_v11 }
 0x5ca   :  { %v35153_v15 = vpop.eup %35152  ;;  %33623 = vmatprep.subr.bf16.mxu1 %v40509_v8  ;;  %33698 = vmatprep.subr.bf16.mxu0 %v40509_v8 }
 0x5cb   :  { %31115 = vmatprep.mubr.msk.f32.mxu0 %vm35896_vm1, %v40510_v16  ;;  %v10413_v40 = vmul.f32 %v35153_v15, %v10412_v28 }
 0x5cc   :  { %30973 = vmatmul.mubr.f32.vlgmr.msra.gmra.mrb[54].mxu1 %v38357_v29 }
 0x5cd   :  { %33625 = vmatpush3.bf16.msra.mxu1 %v38699_v63  ;;  %33700 = vmatpush3.bf16.msra.mxu0 %v38703_v37  ;;  %v38716_v59 = vadd.f32 %v10414_v2, %v10413_v40 }
 0x5ce   :  { %33626 = vmatprep.subr.bf16.mxu1 %v40509_v8  ;;  %33701 = vmatprep.subr.bf16.mxu0 %v40509_v8 }
 0x5cf   :  { %30983 = vmatprep.mubr.msk.f32.mxu1 %vm35896_vm1, %v40510_v16  ;;  %13354 = vst.msk [vmem:[#allocation42] sm:$0x3] %vm13351_vm6, %v38716_v59 }
 0x5d0   :  { %31116 = vmatmul.mubr.f32.vlgmr.msra.gmra.mrb[26].mxu0 %v38377_v44 }
 0x5d1   :  { %33628 = vmatpush3.bf16.msra.mxu1 %v38714_v42  ;;  %33703 = vmatpush3.bf16.msra.mxu0 %v38607_v35 }
 0x5d2   :  { %33629 = vmatprep.subr.bf16.mxu1 %v40509_v8  ;;  %33704 = vmatprep.subr.bf16.mxu0 %v40509_v8 }
 0x5d3   :  { %31126 = vmatprep.mubr.msk.f32.mxu0 %vm35896_vm1, %v40510_v16 }
 0x5d4   :  { %30984 = vmatmul.mubr.f32.vlgmr.msra.gmra.mrb[54].mxu1 %v38377_v44  ;;  %v40601_v44 = vand.u32 4294901760, %v38586_v48  ;;  %v16372_v48 = vsel %vm1468_vm4, %v38135_v20, 0 }
 0x5d5   :  { %33631 = vmatpush3.bf16.msra.mxu1 %v38625_v24  ;;  %33706 = vmatpush3.bf16.msra.mxu0 %v38628_v61  ;;  %v38777_v15 = vand.u32 4294901760, %v16372_v48 }
 0x5d6   :  { %33632 = vmatprep.subr.bf16.mxu1 %v40509_v8  ;;  %33707 = vmatprep.subr.bf16.mxu0 %v40509_v8  ;;  %v38751_v39 = vpack.c.bf16 %v40602_v45, %v40601_v44 }
 0x5d7   :  { %v11462_v60 = vpop.f32.mrb[42].mxu1  ;;  %30994 = vmatprep.mubr.msk.f32.mxu1 %vm35896_vm1, %v40510_v16 }
 0x5d8   :  { %v30501_v27 = vpop.f32.mrb[43].mxu1  ;;  %31127 = vmatmul.mubr.f32.vlgmr.msra.gmra.mrb[26].mxu0 %v38399_v9  ;;  %v11463_v28 = vadd.f32 %v38153_v13, %v11462_v60  ;;  %v38787_v13 = vsub.f32 %v16372_v48, %v38777_v15 }
 0x5d9   :  { %33634 = vmatpush3.bf16.msra.mxu1 %v38652_v30  ;;  %33709 = vmatpush3.bf16.msra.mxu0 %v38738_v55 }
 0x5da   :  { %33635 = vmatprep.subr.bf16.mxu1 %v40509_v8  ;;  %33710 = vmatprep.subr.bf16.mxu0 %v40509_v8  ;;  %v38797_v52 = vand.u32 4294901760, %v38787_v13 }
 0x5db   :  { %31137 = vmatprep.mubr.msk.f32.mxu0 %vm35896_vm1, %v40510_v16 }
 0x5dc   :  { %30995 = vmatmul.mubr.f32.vlgmr.msra.gmra.mrb[54].mxu1 %v38399_v9  ;;  %v16446_v46 = vsub.f32 %v38787_v13, %v38797_v52 }
 0x5dd   :  { %33637 = vmatpush3.bf16.msra.mxu1 %v38751_v39  ;;  %33712 = vmatpush3.bf16.msra.mxu0 %v38757_v3 }
 0x5de   :  { %33638 = vmatprep.subr.bf16.mxu1 %v40509_v8  ;;  %33713 = vmatprep.subr.bf16.mxu0 %v40509_v8  ;;  %v38814_v41 = vand.u32 4294901760, %v16446_v46 }
 0x5df   :  { %v11553_v20 = vpop.f32.mrb[44].mxu1  ;;  %31005 = vmatprep.mubr.msk.f32.mxu1 %vm35896_vm1, %v40510_v16 }
 0x5e0   :  { %v11554_v9 = vadd.f32 %v11553_v20, %v11463_v28  ;;  %v30512_v26 = vpop.f32.mrb[45].mxu1  ;;  %31138 = vmatmul.mubr.f32.vlgmr.msra.gmra.mrb[26].mxu0 %v38357_v29  ;;  %v40613_v20 = vld [vmem:[#allocation92_spill] sm:$0xff] }
 0x5e1   :  { %33640 = vmatpush3.bf16.msra.mxu1 %v38772_v21  ;;  %33715 = vmatpush3.bf16.msra.mxu0 %v38607_v35 }
 0x5e2   :  { %33641 = vmatprep.subr.bf16.mxu1 %v40509_v8  ;;  %33716 = vmatprep.subr.bf16.mxu0 %v40509_v8 }
 0x5e3   :  { %31148 = vmatprep.mubr.msk.f32.mxu0 %vm35896_vm1, %v40510_v16 }
 0x5e4   :  { %31006 = vmatmul.mubr.f32.vlgmr.msra.gmra.mrb[54].mxu1 %v38357_v29 }
 0x5e5   :  { %33643 = vmatpush3.bf16.msra.mxu1 %v38625_v24  ;;  %33718 = vmatpush3.bf16.msra.mxu0 %v38628_v61 }
 0x5e6   :  { %33644 = vmatprep.subr.bf16.mxu1 %v40509_v8  ;;  %33755 = vmatprep.subr.bf16.mxu0 %v40509_v8 }
 0x5e7   :  { %v11633_v12 = vpop.f32.mrb[46].mxu1  ;;  %31016 = vmatprep.mubr.msk.f32.mxu1 %vm35896_vm1, %v40510_v16 }
 0x5e8   :  { %v11634_v2 = vadd.f32 %v11633_v12, %v11554_v9  ;;  %v30523_v40 = vpop.f32.mrb[47].mxu1  ;;  %31149 = vmatmul.mubr.f32.vlgmr.msra.gmra.mrb[26].mxu0 %v38357_v29  ;;  %v40614_v12 = vld [vmem:[#allocation86_spill] sm:$0xff] }
 0x5e9   :  { %33646 = vmatpush3.bf16.msra.mxu1 %v38652_v30  ;;  %33757 = vmatpush3.bf16.msra.mxu0 %v38195_v31 }
 0x5ea   :  { %33719 = vmatprep.subr.bf16.mxu1 %v40509_v8  ;;  %33758 = vmatprep.subr.bf16.mxu0 %v40509_v8 }
 0x5eb   :  { %31225 = vmatprep.mubr.msk.f32.mxu0 %vm35896_vm1, %v40510_v16 }
 0x5ec   :  { %31017 = vmatmul.mubr.f32.vlgmr.msra.gmra.mrb[54].mxu1 %v38357_v29 }
 0x5ed   :  { %33721 = vmatpush3.bf16.msra.mxu1 %v38217_v18  ;;  %33760 = vmatpush3.bf16.msra.mxu0 %v38219_v56 }
 0x5ee   :  { %33722 = vmatprep.subr.bf16.mxu1 %v40509_v8  ;;  %33761 = vmatprep.subr.bf16.mxu0 %v40509_v8 }
 0x5ef   :  { %v11710_v60 = vpop.f32.mrb[48].mxu1  ;;  %31159 = vmatprep.mubr.msk.f32.mxu1 %vm35896_vm1, %v40510_v16 }
 0x5f0   :  { %v11711_v27 = vadd.f32 %v11710_v60, %v11634_v2  ;;  %v30534_v44 = vpop.f32.mrb[49].mxu1  ;;  %31226 = vmatmul.mubr.f32.vlgmr.msra.gmra.mrb[28].mxu0 %v38814_v41  ;;  %v40616_v2 = vld [vmem:[#allocation94_spill] sm:$0xff]  ;;  %v40618_v60 = vld [vmem:[#allocation96_spill] sm:$0xff] }
 0x5f1   :  { %33724 = vmatpush3.bf16.msra.mxu1 %v38245_v50  ;;  %33763 = vmatpush3.bf16.msra.mxu0 %v38247_v7 }
 0x5f2   :  { %33725 = vmatprep.subr.bf16.mxu1 %v40509_v8  ;;  %33764 = vmatprep.subr.bf16.mxu0 %v40509_v8 }
 0x5f3   :  { %31236 = vmatprep.mubr.msk.f32.mxu0 %vm35896_vm1, %v40510_v16 }
 0x5f4   :  { %31160 = vmatmul.mubr.f32.vlgmr.msra.gmra.mrb[68].mxu1 %v38814_v41 }
 0x5f5   :  { %33727 = vmatpush3.bf16.msra.mxu1 %v38266_v5  ;;  %33766 = vmatpush3.bf16.msra.mxu0 %v38268_v33 }
 0x5f6   :  { %33728 = vmatprep.subr.bf16.mxu1 %v40509_v8  ;;  %33767 = vmatprep.subr.bf16.mxu0 %v40509_v8 }
 0x5f7   :  { %v11793_v29 = vpop.f32.mrb[50].mxu1  ;;  %31170 = vmatprep.mubr.msk.f32.mxu1 %vm35896_vm1, %v40510_v16 }
 0x5f8   :  { %v11794_v7 = vadd.f32 %v11793_v29, %v11711_v27  ;;  %v30545_v45 = vpop.f32.mrb[51].mxu1  ;;  %31237 = vmatmul.mubr.f32.vlgmr.msra.gmra.mrb[28].mxu0 %v38777_v15 }
 0x5f9   :  { %33730 = vmatpush3.bf16.msra.mxu1 %v38277_v58  ;;  %33769 = vmatpush3.bf16.msra.mxu0 %v38281_v62 }
 0x5fa   :  { %33731 = vmatprep.subr.bf16.mxu1 %v40509_v8  ;;  %33770 = vmatprep.subr.bf16.mxu0 %v40509_v8 }
 0x5fb   :  { %v38838_v5 = vpop.f32.mrb[20].mxu0  ;;  %31247 = vmatprep.mubr.msk.f32.mxu0 %vm35896_vm1, %v40510_v16 }
 0x5fc   :  { %v30688_v33 = vpop.f32.mrb[21].mxu0  ;;  %31171 = vmatmul.mubr.f32.vlgmr.msra.gmra.mrb[68].mxu1 %v38777_v15  ;;  %v34532_v9 = vadd.f32 %v40613_v20, %v38838_v5  ;;  %v19310_v5 = vld [vmem:[#allocation27] sm:$0xff] }
 0x5fd   :  { %33733 = vmatpush3.bf16.msra.mxu1 %v38292_v43  ;;  %33772 = vmatpush3.bf16.msra.mxu0 %v38296_v6  ;;  %v16370_v43 = vld [vmem:[#allocation34 + $0x2] sm:$0x3] }
 0x5fe   :  { %33734 = vmatprep.subr.bf16.mxu1 %v40509_v8  ;;  %33773 = vmatprep.subr.bf16.mxu0 %v40509_v8  ;;  %v17830_v6 = vsel %vm1468_vm4, %v16370_v43, 0  ;;  %v27430_v26 = vmul.f32 -1.442695, %v34532_v9  ;;  %v19311_v33 = vld [vmem:[#allocation27 + $0x8] sm:$0xff]  ;;  %v19322_v43 = vsel %vm1468_vm4, %v38716_v59, 0 }
 0x5ff   :  { %v11868_v58 = vpop.f32.mrb[52].mxu1  ;;  %31181 = vmatprep.mubr.msk.f32.mxu1 %vm35896_vm1, %v40510_v16  ;;  %v39076_v59 = vand.u32 4294901760, %v19322_v43 }
 0x600   :  { %v38849_v62 = vadd.f32 %v11868_v58, %v11794_v7  ;;  %v30556_v19 = vpop.f32.mrb[53].mxu1  ;;  %31248 = vmatmul.mubr.f32.vlgmr.msra.gmra.mrb[28].mxu0 %v38787_v13  ;;  %v19812_v58 = vld [vmem:[#allocation27 + $0x30] sm:$0xff] }
 0x601   :  { %33736 = vmatpush3.bf16.msra.mxu1 %v38309_v25  ;;  %33775 = vmatpush3.bf16.msra.mxu0 %v38195_v31  ;;  %v38874_v25 = vand.u32 4294901760, %v17830_v6  ;;  %v39060_v19 = vld [vmem:[#allocation24 + $0x2] ss:$0 sm:$0xff]  ;;  %v39096_v20 = vsub.f32 %v19322_v43, %v39076_v59 }
 0x602   :  { %33737 = vmatprep.subr.bf16.mxu1 %v40509_v8  ;;  %33776 = vmatprep.subr.bf16.mxu0 %v40509_v8 }
 0x603   :  { %31258 = vmatprep.mubr.msk.f32.mxu0 %vm35896_vm1, %v40510_v16 }
 0x604   :  { %31182 = vmatmul.mubr.f32.vlgmr.msra.gmra.mrb[68].mxu1 %v38787_v13 }
 0x605   :  { %33739 = vmatpush3.bf16.msra.mxu1 %v38217_v18  ;;  %33778 = vmatpush3.bf16.msra.mxu0 %v38219_v56 }
 0x606   :  { %33740 = vmatprep.subr.bf16.mxu1 %v40509_v8  ;;  %33779 = vmatprep.subr.bf16.mxu0 %v40509_v8 }
 0x607   :  { %31192 = vmatprep.mubr.msk.f32.mxu1 %vm35896_vm1, %v40510_v16 }
 0x608   :  { %31259 = vmatmul.mubr.f32.vlgmr.msra.gmra.mrb[28].mxu0 %v38797_v52 }
 0x609   :  { %33742 = vmatpush3.bf16.msra.mxu1 %v38245_v50  ;;  %33781 = vmatpush3.bf16.msra.mxu0 %v38331_v10  ;;  %v38884_v10 = vsub.f32 %v17830_v6, %v38874_v25 }
 0x60a   :  { %33743 = vmatprep.subr.bf16.mxu1 %v40509_v8  ;;  %33782 = vmatprep.subr.bf16.mxu0 %v40509_v8 }
 0x60b   :  { %31269 = vmatprep.mubr.msk.f32.mxu0 %vm35896_vm1, %v40510_v16 }
 0x60c   :  { %31193 = vmatmul.mubr.f32.vlgmr.msra.gmra.mrb[68].mxu1 %v38797_v52 }
 0x60d   :  { %33745 = vmatpush3.bf16.msra.mxu1 %v38345_v49  ;;  %33784 = vmatpush3.bf16.msra.mxu0 %v38351_v54  ;;  %v38894_v49 = vand.u32 4294901760, %v38884_v10 }
 0x60e   :  { %33746 = vmatprep.subr.bf16.mxu1 %v40509_v8  ;;  %33785 = vmatprep.subr.bf16.mxu0 %v40509_v8 }
 0x60f   :  { %31203 = vmatprep.mubr.msk.f32.mxu1 %vm35896_vm1, %v40510_v16 }
 0x610   :  { %31270 = vmatmul.mubr.f32.vlgmr.msra.gmra.mrb[28].mxu0 %v38777_v15 }
 0x611   :  { %33748 = vmatpush3.bf16.msra.mxu1 %v38370_v47  ;;  %33787 = vmatpush3.bf16.msra.mxu0 %v38195_v31  ;;  %v17904_v31 = vsub.f32 %v38884_v10, %v38894_v49 }
 0x612   :  { %33749 = vmatprep.subr.bf16.mxu1 %v40509_v8  ;;  %33788 = vmatprep.subr.bf16.mxu0 %v40509_v8 }
 0x613   :  { %31280 = vmatprep.mubr.msk.f32.mxu0 %vm35896_vm1, %v40510_v16 }
 0x614   :  { %31204 = vmatmul.mubr.f32.vlgmr.msra.gmra.mrb[68].mxu1 %v38777_v15 }
 0x615   :  { %33751 = vmatpush3.bf16.msra.mxu1 %v38217_v18  ;;  %33790 = vmatpush3.bf16.msra.mxu0 %v38219_v56  ;;  %v38912_v18 = vand.u32 4294901760, %v17904_v31  ;;  %v40607_v56 = vld [vmem:[#allocation89_spill] sm:$0xff] }
 0x616   :  { %33752 = vmatprep.subr.bf16.mxu1 %v40509_v8  ;;  %33863 = vmatprep.subr.bf16.mxu0 %v40509_v8 }
 0x617   :  { %31214 = vmatprep.mubr.msk.f32.mxu1 %vm35896_vm1, %v40510_v16 }
 0x618   :  { %31281 = vmatmul.mubr.f32.vlgmr.msra.gmra.mrb[28].mxu0 %v38777_v15 }
 0x619   :  { %33754 = vmatpush3.bf16.msra.mxu1 %v38245_v50  ;;  %33865 = vmatpush3.bf16.msra.mxu0 %v38396_v38  ;;  %v40608_v50 = vld [vmem:[#allocation90_spill] sm:$0xff] }
 0x61a   :  { %33791 = vmatprep.subr.bf16.mxu1 %v40509_v8  ;;  %33866 = vmatprep.subr.bf16.mxu0 %v40509_v8 }
 0x61b   :  { %31423 = vmatprep.mubr.msk.f32.mxu0 %vm35896_vm1, %v40510_v16 }
 0x61c   :  { %31215 = vmatmul.mubr.f32.vlgmr.msra.gmra.mrb[68].mxu1 %v38777_v15 }
 0x61d   :  { %33793 = vmatpush3.bf16.msra.mxu1 %v38422_v4  ;;  %33868 = vmatpush3.bf16.msra.mxu0 %v38424_v0 }
 0x61e   :  { %33794 = vmatprep.subr.bf16.mxu1 %v40509_v8  ;;  %33869 = vmatprep.subr.bf16.mxu0 %v40509_v8 }
 0x61f   :  { %31291 = vmatprep.mubr.msk.f32.mxu1 %vm35896_vm1, %v40510_v16 }
 0x620   :  { %31424 = vmatmul.mubr.f32.vlgmr.msra.gmra.mrb[28].mxu0 %v38912_v18 }
 0x621   :  { %33796 = vmatpush3.bf16.msra.mxu1 %v38452_v57  ;;  %33871 = vmatpush3.bf16.msra.mxu0 %v38454_v1  ;;  %v40609_v1 = vld [vmem:[#allocation91_spill] sm:$0xff] }
 0x622   :  { %33797 = vmatprep.subr.bf16.mxu1 %v40509_v8  ;;  %33872 = vmatprep.subr.bf16.mxu0 %v40509_v8 }
 0x623   :  { %31434 = vmatprep.mubr.msk.f32.mxu0 %vm35896_vm1, %v40510_v16 }
 0x624   :  { %31292 = vmatmul.mubr.f32.vlgmr.msra.gmra.mrb[70].mxu1 %v38814_v41  ;;  %v40617_v41 = vld [vmem:[#allocation95_spill] sm:$0xff] }
 0x625   :  { %33799 = vmatpush3.bf16.msra.mxu1 %v38471_v51  ;;  %33874 = vmatpush3.bf16.msra.mxu0 %v38473_v22  ;;  %v40610_v51 = vld [vmem:[#allocation88_spill] sm:$0xff] }
 0x626   :  { %33800 = vmatprep.subr.bf16.mxu1 %v40509_v8  ;;  %33875 = vmatprep.subr.bf16.mxu0 %v40509_v8 }
 0x627   :  { %31302 = vmatprep.mubr.msk.f32.mxu1 %vm35896_vm1, %v40510_v16 }
 0x628   :  { %31435 = vmatmul.mubr.f32.vlgmr.msra.gmra.mrb[28].mxu0 %v38874_v25 }
 0x629   :  { %33802 = vmatpush3.bf16.msra.mxu1 %v40607_v56  ;;  %33877 = vmatpush3.bf16.msra.mxu0 %v40608_v50 }
 0x62a   :  { %33803 = vmatprep.subr.bf16.mxu1 %v40509_v8  ;;  %33878 = vmatprep.subr.bf16.mxu0 %v40509_v8 }
 0x62b   :  { %v13326_v54 = vpop.f32.mrb[22].mxu0  ;;  %31445 = vmatprep.mubr.msk.f32.mxu0 %vm35896_vm1, %v40510_v16 }
 0x62c   :  { %v30754_v47 = vpop.f32.mrb[23].mxu0  ;;  %31303 = vmatmul.mubr.f32.vlgmr.msra.gmra.mrb[72].mxu1 %v38777_v15  ;;  %v34533_v27 = vadd.f32 %v40618_v60, %v13326_v54  ;;  %v19312_v54 = vld [vmem:[#allocation27 + $0x10] sm:$0xff] }
 0x62d   :  { %33805 = vmatpush3.bf16.msra.mxu1 %v40609_v1  ;;  %33880 = vmatpush3.bf16.msra.mxu0 %v40610_v51 }
 0x62e   :  { %33806 = vmatprep.subr.bf16.mxu1 %v40509_v8  ;;  %33881 = vmatprep.subr.bf16.mxu0 %v40509_v8 }
 0x62f   :  { %v12356_v22 = vpop.f32.mrb[40].mxu1  ;;  %31313 = vmatprep.mubr.msk.f32.mxu1 %vm35896_vm1, %v40510_v16 }
 0x630   :  { %v34530_v48 = vadd.f32 %v40611_v34, %v12356_v22  ;;  %v30622_v17 = vpop.f32.mrb[41].mxu1  ;;  %31446 = vmatmul.mubr.f32.vlgmr.msra.gmra.mrb[28].mxu0 %v38884_v10 }
 0x631   :  { %33808 = vmatpush3.bf16.msra.mxu1 %v40612_v36  ;;  %33883 = vmatpush3.bf16.msra.mxu0 %v38396_v38 }
 0x632   :  { %v27429_v28 = vmul.f32 -1.442695, %v34530_v48  ;;  %33809 = vmatprep.subr.bf16.mxu1 %v40509_v8  ;;  %33884 = vmatprep.subr.bf16.mxu0 %v40509_v8  ;;  %v19331_v48 = vand.u32 4294901760, %v19312_v54 }
 0x633   :  { %31456 = vmatprep.mubr.msk.f32.mxu0 %vm35896_vm1, %v40510_v16 }
 0x634   :  { %35154 = vpow2.f32 %v27429_v28  ;;  %31314 = vmatmul.mubr.f32.vlgmr.msra.gmra.mrb[74].mxu1 %v38787_v13  ;;  %v40615_v13 = vld [vmem:[#allocation93_spill] sm:$0xff] }
 0x635   :  { %33811 = vmatpush3.bf16.msra.mxu1 %v38422_v4  ;;  %33886 = vmatpush3.bf16.msra.mxu0 %v38424_v0  ;;  %35156 = vpow2.f32 %v27430_v26 }
 0x636   :  { %33812 = vmatprep.subr.bf16.mxu1 %v40509_v8  ;;  %33887 = vmatprep.subr.bf16.mxu0 %v40509_v8 }
 0x637   :  { %31324 = vmatprep.mubr.msk.f32.mxu1 %vm35896_vm1, %v40510_v16 }
 0x638   :  { %31457 = vmatmul.mubr.f32.vlgmr.msra.gmra.mrb[28].mxu0 %v38894_v49 }
 0x639   :  { %33814 = vmatpush3.bf16.msra.mxu1 %v38452_v57  ;;  %33889 = vmatpush3.bf16.msra.mxu0 %v40614_v12 }
 0x63a   :  { %33815 = vmatprep.subr.bf16.mxu1 %v40509_v8  ;;  %33890 = vmatprep.subr.bf16.mxu0 %v40509_v8 }
 0x63b   :  { %31467 = vmatprep.mubr.msk.f32.mxu0 %vm35896_vm1, %v40510_v16 }
 0x63c   :  { %31325 = vmatmul.mubr.f32.vlgmr.msra.gmra.mrb[76].mxu1 %v38797_v52 }
 0x63d   :  { %33817 = vmatpush3.bf16.msra.mxu1 %v40615_v13  ;;  %33892 = vmatpush3.bf16.msra.mxu0 %v40616_v2 }
 0x63e   :  { %v35155_v40 = vpop.eup %35154  ;;  %33818 = vmatprep.subr.bf16.mxu1 %v40509_v8  ;;  %33893 = vmatprep.subr.bf16.mxu0 %v40509_v8 }
 0x63f   :  { %v13334_v46 = vadd.f32 1.0, %v35155_v40  ;;  %31335 = vmatprep.mubr.msk.f32.mxu1 %vm35896_vm1, %v40510_v16  ;;  %v35157_v52 = vpop.eup %35156  ;;  %v39115_v40 = vsub.f32 %v19312_v54, %v19331_v48 }
 0x640   :  { %31468 = vmatmul.mubr.f32.vlgmr.msra.gmra.mrb[28].mxu0 %v38874_v25 }
 0x641   :  { %35158 = vrcp.f32 %v13334_v46  ;;  %33820 = vmatpush3.bf16.msra.mxu1 %v40617_v41  ;;  %33895 = vmatpush3.bf16.msra.mxu0 %v38396_v38  ;;  %v13341_v38 = vadd.f32 1.0, %v35157_v52  ;;  %v39122_v41 = vand.u32 4294901760, %v39096_v20 }
 0x642   :  { %33821 = vmatprep.subr.bf16.mxu1 %v40509_v8  ;;  %33896 = vmatprep.subr.bf16.mxu0 %v40509_v8 }
 0x643   :  { %31478 = vmatprep.mubr.msk.f32.mxu0 %vm35896_vm1, %v40510_v16  ;;  %35160 = vrcp.f32 %v13341_v38 }
 0x644   :  { %31336 = vmatmul.mubr.f32.vlgmr.msra.gmra.mrb[78].mxu1 %v38777_v15 }
 0x645   :  { %33823 = vmatpush3.bf16.msra.mxu1 %v38422_v4  ;;  %33898 = vmatpush3.bf16.msra.mxu0 %v38424_v0 }
 0x646   :  { %33824 = vmatprep.subr.bf16.mxu1 %v40509_v8  ;;  %33899 = vmatprep.subr.bf16.mxu0 %v40509_v8 }
 0x647   :  { %31346 = vmatprep.mubr.msk.f32.mxu1 %vm35896_vm1, %v40510_v16 }
 0x648   :  { %31479 = vmatmul.mubr.f32.vlgmr.msra.gmra.mrb[28].mxu0 %v38874_v25 }
 0x649   :  { %33826 = vmatpush3.bf16.msra.mxu1 %v38452_v57  ;;  %33901 = vmatpush3.bf16.msra.mxu0 %v38607_v35 }
 0x64a   :  { %33827 = vmatprep.subr.bf16.mxu1 %v40509_v8  ;;  %33902 = vmatprep.subr.bf16.mxu0 %v40509_v8 }
 0x64b   :  { %v35159_v4 = vpop.eup %35158  ;;  %31489 = vmatprep.mubr.msk.f32.mxu0 %vm35896_vm1, %v40510_v16 }
 0x64c   :  { %v13344_v0 = vmul.f32 %v35159_v4, %v34533_v27  ;;  %31347 = vmatmul.mubr.f32.vlgmr.msra.gmra.mrb[80].mxu1 %v38777_v15 }
 0x64d   :  { %33829 = vmatpush3.bf16.msra.mxu1 %v38625_v24  ;;  %33904 = vmatpush3.bf16.msra.mxu0 %v38628_v61  ;;  %v35161_v15 = vpop.eup %35160 }
 0x64e   :  { %v13345_v57 = vadd.f32 %v13344_v0, %v38849_v62  ;;  %33830 = vmatprep.subr.bf16.mxu1 %v40509_v8  ;;  %33905 = vmatprep.subr.bf16.mxu0 %v40509_v8  ;;  %v19813_v62 = vld [vmem:[#allocation27 + $0x38] sm:$0xff] }
 0x64f   :  { %31357 = vmatprep.mubr.msk.f32.mxu1 %vm35896_vm1, %v40510_v16  ;;  %v19832_v56 = vand.u32 4294901760, %v19813_v62 }
 0x650   :  { %35162 = vtanh.f32 %v13345_v57  ;;  %31490 = vmatmul.mubr.f32.vlgmr.msra.gmra.mrb[30].mxu0 %v38912_v18 }
 0x651   :  { %33832 = vmatpush3.bf16.msra.mxu1 %v38652_v30  ;;  %33907 = vmatpush3.bf16.msra.mxu0 %v38654_v23  ;;  %v13347_v23 = vsub.f32 1.0, %v35161_v15  ;;  %v39091_v28 = vsub.f32 %v19813_v62, %v19832_v56 }
 0x652   :  { %33833 = vmatprep.subr.bf16.mxu1 %v40509_v8  ;;  %33908 = vmatprep.subr.bf16.mxu0 %v40509_v8 }
 0x653   :  { %31500 = vmatprep.mubr.msk.f32.mxu0 %vm35896_vm1, %v40510_v16  ;;  %v19925_v2 = vand.u32 4294901760, %v39091_v28 }
 0x654   :  { %31358 = vmatmul.mubr.f32.vlgmr.msra.gmra.mrb[68].mxu1 %v38912_v18  ;;  %v19829_v18 = vand.u32 4294901760, %v19812_v58 }
 0x655   :  { %33835 = vmatpush3.bf16.msra.mxu1 %v38673_v32  ;;  %33910 = vmatpush3.bf16.msra.mxu0 %v38675_v14  ;;  %v35208_v14 = vld [vmem:[#allocation37] sm:$0x3] }
 0x656   :  { %33836 = vmatprep.subr.bf16.mxu1 %v40509_v8  ;;  %33911 = vmatprep.subr.bf16.mxu0 %v40509_v8  ;;  %v13349_v29 = vmul.f32 %v35208_v14, %v35161_v15  ;;  %v39089_v36 = vsub.f32 %v19812_v58, %v19829_v18 }
 0x657   :  { %31368 = vmatprep.mubr.msk.f32.mxu1 %vm35896_vm1, %v40510_v16 }
 0x658   :  { %31501 = vmatmul.mubr.f32.vlgmr.msra.gmra.mrb[30].mxu0 %v38874_v25  ;;  %v19918_v13 = vand.u32 4294901760, %v39089_v36 }
 0x659   :  { %33838 = vmatpush3.bf16.msra.mxu1 %v38684_v53  ;;  %33913 = vmatpush3.bf16.msra.mxu0 %v38688_v11  ;;  %v19810_v11 = vld [vmem:[#allocation27 + $0x20] sm:$0xff] }
 0x65a   :  { %v35163_v44 = vpop.eup %35162  ;;  %33839 = vmatprep.subr.bf16.mxu1 %v40509_v8  ;;  %33914 = vmatprep.subr.bf16.mxu0 %v40509_v8  ;;  %v19919_v15 = vsub.f32 %v39089_v36, %v19918_v13 }
 0x65b   :  { %31511 = vmatprep.mubr.msk.f32.mxu0 %vm35896_vm1, %v40510_v16  ;;  %v13348_v32 = vmul.f32 %v35163_v44, %v13347_v23  ;;  %v19926_v23 = vsub.f32 %v39091_v28, %v19925_v2  ;;  %v19420_v44 = vand.u32 4294901760, %v39115_v40 }
 0x65c   :  { %31369 = vmatmul.mubr.f32.vlgmr.msra.gmra.mrb[68].mxu1 %v38874_v25 }
 0x65d   :  { %33841 = vmatpush3.bf16.msra.mxu1 %v38699_v63  ;;  %33916 = vmatpush3.bf16.msra.mxu0 %v38703_v37  ;;  %v39035_v53 = vadd.f32 %v13349_v29, %v13348_v32  ;;  %v19811_v63 = vld [vmem:[#allocation27 + $0x28] sm:$0xff] }
 0x65e   :  { %33842 = vmatprep.subr.bf16.mxu1 %v40509_v8  ;;  %33917 = vmatprep.subr.bf16.mxu0 %v40509_v8  ;;  %v19826_v45 = vand.u32 4294901760, %v19811_v63 }
 0x65f   :  { %31379 = vmatprep.mubr.msk.f32.mxu1 %vm35896_vm1, %v40510_v16  ;;  %13355 = vst.msk [vmem:[#allocation43] sm:$0x3] %vm13351_vm6, %v39035_v53 }
 0x660   :  { %31512 = vmatmul.mubr.f32.vlgmr.msra.gmra.mrb[30].mxu0 %v38884_v10  ;;  %v39069_v31 = vsub.f32 %v19811_v63, %v19826_v45 }
 0x661   :  { %33844 = vmatpush3.bf16.msra.mxu1 %v38714_v42  ;;  %33919 = vmatpush3.bf16.msra.mxu0 %v38607_v35  ;;  %v19823_v42 = vand.u32 4294901760, %v19810_v11 }
 0x662   :  { %33845 = vmatprep.subr.bf16.mxu1 %v40509_v8  ;;  %33920 = vmatprep.subr.bf16.mxu0 %v40509_v8  ;;  %v19911_v51 = vand.u32 4294901760, %v39069_v31 }
 0x663   :  { %31522 = vmatprep.mubr.msk.f32.mxu0 %vm35896_vm1, %v40510_v16  ;;  %v39066_v6 = vsub.f32 %v19810_v11, %v19823_v42 }
 0x664   :  { %31380 = vmatmul.mubr.f32.vlgmr.msra.gmra.mrb[68].mxu1 %v38884_v10  ;;  %v19328_v10 = vand.u32 4294901760, %v19311_v33  ;;  %v19912_v9 = vsub.f32 %v39069_v31, %v19911_v51 }
 0x665   :  { %33847 = vmatpush3.bf16.msra.mxu1 %v38625_v24  ;;  %33922 = vmatpush3.bf16.msra.mxu0 %v38628_v61 }
 0x666   :  { %33848 = vmatprep.subr.bf16.mxu1 %v40509_v8  ;;  %33923 = vmatprep.subr.bf16.mxu0 %v40509_v8  ;;  %v39085_v34 = vsub.f32 %v19311_v33, %v19328_v10  ;;  %v19913_v4 = vand.u32 4294901760, %v19912_v9 }
 0x667   :  { %v14443_v37 = vpop.f32.mrb[56].mxu1  ;;  %31390 = vmatprep.mubr.msk.f32.mxu1 %vm35896_vm1, %v40510_v16 }
 0x668   :  { %v30897_v7 = vpop.f32.mrb[57].mxu1  ;;  %31523 = vmatmul.mubr.f32.vlgmr.msra.gmra.mrb[30].mxu0 %v38894_v49  ;;  %v14444_v50 = vadd.f32 %v39060_v19, %v14443_v37  ;;  %v19413_v12 = vand.u32 4294901760, %v39085_v34  ;;  %v19920_v37 = vand.u32 4294901760, %v19919_v15  ;;  %v20309_v15 = vld [vmem:[#allocation27 + $0x48] sm:$0xff] }
 0x669   :  { %33850 = vmatpush3.bf16.msra.mxu1 %v38652_v30  ;;  %33925 = vmatpush3.bf16.msra.mxu0 %v38738_v55  ;;  %v19325_v55 = vand.u32 4294901760, %v19310_v5  ;;  %v19421_v7 = vsub.f32 %v39115_v40, %v19420_v44 }
 0x66a   :  { %33851 = vmatprep.subr.bf16.mxu1 %v40509_v8  ;;  %33926 = vmatprep.subr.bf16.mxu0 %v40509_v8  ;;  %v19414_v57 = vsub.f32 %v39085_v34, %v19413_v12 }
 0x66b   :  { %31533 = vmatprep.mubr.msk.f32.mxu0 %vm35896_vm1, %v40510_v16  ;;  %v39083_v22 = vsub.f32 %v19310_v5, %v19325_v55 }
 0x66c   :  { %31391 = vmatmul.mubr.f32.vlgmr.msra.gmra.mrb[68].mxu1 %v38894_v49  ;;  %v19313_v49 = vld [vmem:[#allocation27 + $0x18] sm:$0xff]  ;;  %v19415_v63 = vand.u32 4294901760, %v19414_v57 }
 0x66d   :  { %33853 = vmatpush3.bf16.msra.mxu1 %v38751_v39  ;;  %33928 = vmatpush3.bf16.msra.mxu0 %v38757_v3  ;;  %v19904_v39 = vand.u32 4294901760, %v39066_v6  ;;  %v19334_v17 = vand.u32 4294901760, %v19313_v49  ;;  %v19406_v26 = vand.u32 4294901760, %v39083_v22 }
 0x66e   :  { %33854 = vmatprep.subr.bf16.mxu1 %v40509_v8  ;;  %33929 = vmatprep.subr.bf16.mxu0 %v40509_v8 }
 0x66f   :  { %v14534_v47 = vpop.f32.mrb[58].mxu1  ;;  %31401 = vmatprep.mubr.msk.f32.mxu1 %vm35896_vm1, %v40510_v16  ;;  %v39117_v46 = vsub.f32 %v19313_v49, %v19334_v17  ;;  %v19407_v0 = vsub.f32 %v39083_v22, %v19406_v26  ;;  %v39154_v14 = vpack.c.bf16 %v19334_v17, %v19331_v48 }
 0x670   :  { %v14535_v1 = vadd.f32 %v14534_v47, %v14444_v50  ;;  %v30908_v3 = vpop.f32.mrb[59].mxu1  ;;  %31534 = vmatmul.mubr.f32.vlgmr.msra.gmra.mrb[30].mxu0 %v38874_v25  ;;  %v39201_v47 = vpack.c.bf16 %v39085_v34, %v39083_v22 }
 0x671   :  { %33856 = vmatpush3.bf16.msra.mxu1 %v38772_v21  ;;  %33931 = vmatpush3.bf16.msra.mxu0 %v38607_v35  ;;  %v19905_v35 = vsub.f32 %v39066_v6, %v19904_v39  ;;  %v39104_v21 = vpack.c.bf16 %v19826_v45, %v19823_v42  ;;  %v19427_v32 = vand.u32 4294901760, %v39117_v46  ;;  %v19408_v11 = vand.u32 4294901760, %v19407_v0 }
 0x672   :  { %33857 = vmatprep.subr.bf16.mxu1 %v40509_v8  ;;  %33932 = vmatprep.subr.bf16.mxu0 %v40509_v8  ;;  %v19927_v42 = vand.u32 4294901760, %v19926_v23  ;;  %v39218_v17 = vpack.c.bf16 %v39117_v46, %v39115_v40  ;;  %v21307_v23 = vld [vmem:[#allocation28 + $0x30] sm:$0xff] }
 0x673   :  { %31544 = vmatprep.mubr.msk.f32.mxu0 %vm35896_vm1, %v40510_v16  ;;  %v19906_v38 = vand.u32 4294901760, %v19905_v35  ;;  %v39175_v62 = vpack.c.bf16 %v19415_v63, %v19408_v11  ;;  %v20310_v11 = vld [vmem:[#allocation27 + $0x50] sm:$0xff]  ;;  %v20311_v63 = vld [vmem:[#allocation27 + $0x58] sm:$0xff] }
 0x674   :  { %31402 = vmatmul.mubr.f32.vlgmr.msra.gmra.mrb[68].mxu1 %v38874_v25  ;;  %v39177_v43 = vpack.c.bf16 %v19927_v42, %v19920_v37  ;;  %v20327_v42 = vand.u32 4294901760, %v20310_v11 }
 0x675   :  { %33859 = vmatpush3.bf16.msra.mxu1 %v38625_v24  ;;  %33934 = vmatpush3.bf16.msra.mxu0 %v38628_v61  ;;  %v39126_v24 = vpack.c.bf16 %v19328_v10, %v19325_v55  ;;  %v39128_v61 = vpack.c.bf16 %v19832_v56, %v19829_v18  ;;  %v39156_v29 = vpack.c.bf16 %v19913_v4, %v19906_v38  ;;  %v19422_v55 = vand.u32 4294901760, %v19421_v7  ;;  %v19309_v4 = vld [vmem:[#allocation36 + $0x2] sm:$0x3] }
 0x676   :  { %33860 = vmatprep.subr.bf16.mxu1 %v40509_v8  ;;  %33971 = vmatprep.subr.bf16.mxu0 %v40509_v8  ;;  %v39190_v56 = vpack.c.bf16 %v39069_v31, %v39066_v6  ;;  %v39240_v38 = vpack.c.bf16 %v19911_v51, %v19904_v39  ;;  %v20817_v6 = vsel %vm1468_vm4, %v19309_v4, 0  ;;  %v39254_v31 = vpack.c.bf16 %v19413_v12, %v19406_v26  ;;  %v20308_v51 = vld [vmem:[#allocation27 + $0x40] sm:$0xff] }
 0x677   :  { %v14614_v52 = vpop.f32.mrb[60].mxu1  ;;  %31412 = vmatprep.mubr.msk.f32.mxu1 %vm35896_vm1, %v40510_v16  ;;  %v39260_v39 = vpack.c.bf16 %v19925_v2, %v19918_v13  ;;  %v39266_v22 = vand.u32 4294901760, %v20817_v6  ;;  %v20321_v34 = vand.u32 4294901760, %v20308_v51  ;;  %v39279_v12 = vpack.c.bf16 %v19427_v32, %v19420_v44 }
 0x678   :  { %v14615_v60 = vadd.f32 %v14614_v52, %v14535_v1  ;;  %v30919_v27 = vpop.f32.mrb[61].mxu1  ;;  %31545 = vmatmul.mubr.f32.vlgmr.msra.gmra.mrb[30].mxu0 %v38874_v25  ;;  %v39205_v1 = vpack.c.bf16 %v39091_v28, %v39089_v36  ;;  %v20324_v36 = vand.u32 4294901760, %v20309_v15  ;;  %v21324_v13 = vand.u32 4294901760, %v21307_v23 }
 0x679   :  { %33862 = vmatpush3.bf16.msra.mxu1 %v38652_v30  ;;  %33973 = vmatpush3.bf16.msra.mxu0 %v39104_v21  ;;  %v19396_v30 = vsub.f32 %v39096_v20, %v39122_v41  ;;  %v21306_v27 = vld [vmem:[#allocation28 + $0x28] sm:$0xff]  ;;  %v39286_v37 = vsub.f32 %v20817_v6, %v39266_v22  ;;  %v39291_v44 = vsub.f32 %v20308_v51, %v20321_v34  ;;  %v20330_v7 = vand.u32 4294901760, %v20311_v63 }
 0x67a   :  { %33935 = vmatprep.subr.bf16.mxu1 %v40509_v8  ;;  %33974 = vmatprep.subr.bf16.mxu0 %v40509_v8  ;;  %v21321_v57 = vand.u32 4294901760, %v21306_v27 }
 0x67b   :  { %31621 = vmatprep.mubr.msk.f32.mxu0 %vm35896_vm1, %v40510_v16  ;;  %v39167_v45 = vand.u32 4294901760, %v19396_v30  ;;  %v21308_v30 = vld [vmem:[#allocation28 + $0x38] sm:$0xff] }
 0x67c   :  { %31413 = vmatmul.mubr.f32.vlgmr.msra.gmra.mrb[68].mxu1 %v38874_v25  ;;  %v19428_v25 = vsub.f32 %v39117_v46, %v19427_v32  ;;  %v39271_v26 = vsub.f32 %v21306_v27, %v21321_v57  ;;  %v21327_v2 = vand.u32 4294901760, %v21308_v30  ;;  %v39293_v32 = vsub.f32 %v20309_v15, %v20324_v36 }
 0x67d   :  { %33937 = vmatpush3.bf16.msra.mxu1 %v39126_v24  ;;  %33976 = vmatpush3.bf16.msra.mxu0 %v39128_v61 }
 0x67e   :  { %33938 = vmatprep.subr.bf16.mxu1 %v40509_v8  ;;  %33977 = vmatprep.subr.bf16.mxu0 %v40509_v8  ;;  %v19429_v10 = vand.u32 4294901760, %v19428_v25  ;;  %v21406_v46 = vand.u32 4294901760, %v39271_v26  ;;  %v39297_v25 = vsub.f32 %v21307_v23, %v21324_v13  ;;  %v39333_v27 = vpack.c.bf16 %v21327_v2, %v21324_v13 }
 0x67f   :  { %v14691_v5 = vpop.f32.mrb[62].mxu1  ;;  %31555 = vmatprep.mubr.msk.f32.mxu1 %vm35896_vm1, %v40510_v16 }
 0x680   :  { %v14692_v33 = vadd.f32 %v14691_v5, %v14615_v60  ;;  %v30930_v58 = vpop.f32.mrb[63].mxu1  ;;  %31622 = vmatmul.mubr.f32.vlgmr.msra.gmra.mrb[32].mxu0 %v39167_v45  ;;  %v39186_v18 = vpack.c.bf16 %v19429_v10, %v19422_v55  ;;  %v21305_v60 = vld [vmem:[#allocation28 + $0x20] sm:$0xff]  ;;  %v39299_v5 = vsub.f32 %v21308_v30, %v21327_v2  ;;  %v21407_v10 = vsub.f32 %v39271_v26, %v21406_v46 }
 0x681   :  { %33940 = vmatpush3.bf16.msra.mxu1 %v39154_v14  ;;  %33979 = vmatpush3.bf16.msra.mxu0 %v39156_v29  ;;  %v21318_v0 = vand.u32 4294901760, %v21305_v60  ;;  %v39308_v58 = vand.u32 4294901760, %v39286_v37 }
 0x682   :  { %33941 = vmatprep.subr.bf16.mxu1 %v40509_v8  ;;  %33980 = vmatprep.subr.bf16.mxu0 %v40509_v8 }
 0x683   :  { %31632 = vmatprep.mubr.msk.f32.mxu0 %vm35896_vm1, %v40510_v16  ;;  %v39269_v28 = vsub.f32 %v21305_v60, %v21318_v0  ;;  %v39331_v60 = vpack.c.bf16 %v20324_v36, %v20321_v34  ;;  %v20891_v4 = vsub.f32 %v39286_v37, %v39308_v58  ;;  %v39358_v36 = vpack.c.bf16 %v20330_v7, %v20327_v42 }
 0x684   :  { %31556 = vmatmul.mubr.f32.vlgmr.msra.gmra.mrb[82].mxu1 %v39167_v45 }
 0x685   :  { %33943 = vmatpush3.bf16.msra.mxu1 %v39175_v62  ;;  %33982 = vmatpush3.bf16.msra.mxu0 %v39177_v43  ;;  %v21399_v40 = vand.u32 4294901760, %v39269_v28  ;;  %v39361_v13 = vand.u32 4294901760, %v20891_v4 }
 0x686   :  { %33944 = vmatprep.subr.bf16.mxu1 %v40509_v8  ;;  %33983 = vmatprep.subr.bf16.mxu0 %v40509_v8 }
 0x687   :  { %v14774_v50 = vpop.f32.mrb[64].mxu1  ;;  %31566 = vmatprep.mubr.msk.f32.mxu1 %vm35896_vm1, %v40510_v16  ;;  %v21400_v55 = vsub.f32 %v39269_v28, %v21399_v40 }
 0x688   :  { %v14775_v54 = vadd.f32 %v14774_v50, %v14692_v33  ;;  %v30941_v49 = vpop.f32.mrb[65].mxu1  ;;  %31633 = vmatmul.mubr.f32.vlgmr.msra.gmra.mrb[32].mxu0 %v39076_v59  ;;  %v39305_v33 = vpack.c.bf16 %v21321_v57, %v21318_v0  ;;  %v20402_v50 = vand.u32 4294901760, %v39291_v44  ;;  %v21408_v57 = vand.u32 4294901760, %v21407_v10 }
 0x689   :  { %33946 = vmatpush3.bf16.msra.mxu1 %v39186_v18  ;;  %33985 = vmatpush3.bf16.msra.mxu0 %v39190_v56  ;;  %v21413_v49 = vand.u32 4294901760, %v39297_v25  ;;  %v21401_v0 = vand.u32 4294901760, %v21400_v55 }
 0x68a   :  { %33947 = vmatprep.subr.bf16.mxu1 %v40509_v8  ;;  %33986 = vmatprep.subr.bf16.mxu0 %v40509_v8  ;;  %v20403_v6 = vsub.f32 %v39291_v44, %v20402_v50 }
 0x68b   :  { %v39209_v3 = vpop.f32.mrb[24].mxu0  ;;  %31643 = vmatprep.mubr.msk.f32.mxu0 %vm35896_vm1, %v40510_v16  ;;  %v21414_v15 = vsub.f32 %v39297_v25, %v21413_v49  ;;  %v39363_v2 = vpack.c.bf16 %v21408_v57, %v21401_v0 }
 0x68c   :  { %v31084_v48 = vpop.f32.mrb[25].mxu0  ;;  %31567 = vmatmul.mubr.f32.vlgmr.msra.gmra.mrb[82].mxu1 %v39076_v59 }
 0x68d   :  { %33949 = vmatpush3.bf16.msra.mxu1 %v39201_v47  ;;  %33988 = vmatpush3.bf16.msra.mxu0 %v39205_v1  ;;  %v40447_v48 = vand.u32 4294901760, %v39299_v5  ;;  %v21415_v55 = vand.u32 4294901760, %v21414_v15  ;;  %v27431_v15 = vld [vmem:[#allocation24] ss:$0 sm:$0xff] }
 0x68e   :  { %33950 = vmatprep.subr.bf16.mxu1 %v40509_v8  ;;  %33989 = vmatprep.subr.bf16.mxu0 %v40509_v8 }
 0x68f   :  { %v14849_v35 = vpop.f32.mrb[66].mxu1  ;;  %31577 = vmatprep.mubr.msk.f32.mxu1 %vm35896_vm1, %v40510_v16  ;;  %v21421_v23 = vsub.f32 %v39299_v5, %v40447_v48 }
 0x690   :  { %v39224_v9 = vadd.f32 %v14849_v35, %v14775_v54  ;;  %v30952_v52 = vpop.f32.mrb[67].mxu1  ;;  %31644 = vmatmul.mubr.f32.vlgmr.msra.gmra.mrb[32].mxu0 %v39096_v20  ;;  %v20409_v54 = vand.u32 4294901760, %v39293_v32  ;;  %v39323_v35 = vsub.f32 %v20310_v11, %v20327_v42  ;;  %v20404_v11 = vand.u32 4294901760, %v20403_v6 }
 0x691   :  { %33952 = vmatpush3.bf16.msra.mxu1 %v39218_v17  ;;  %33991 = vmatpush3.bf16.msra.mxu0 %v39104_v21  ;;  %v39325_v52 = vsub.f32 %v20311_v63, %v20330_v7  ;;  %v21422_v10 = vand.u32 4294901760, %v21421_v23  ;;  %v27434_v23 = vld [vmem:[#allocation25] ss:$0 sm:$0xff] }
 0x692   :  { %33953 = vmatprep.subr.bf16.mxu1 %v40509_v8  ;;  %33992 = vmatprep.subr.bf16.mxu0 %v40509_v8  ;;  %v20410_v51 = vsub.f32 %v39293_v32, %v20409_v54  ;;  %v40449_v30 = vand.u32 4294901760, %v39323_v35 }
 0x693   :  { %31654 = vmatprep.mubr.msk.f32.mxu0 %vm35896_vm1, %v40510_v16  ;;  %v40448_v34 = vand.u32 4294901760, %v39325_v52  ;;  %v39382_v4 = vpack.c.bf16 %v21422_v10, %v21415_v55  ;;  %v27435_v55 = vld [vmem:[#allocation25 + $0x1] ss:$0 sm:$0xff] }
 0x694   :  { %31578 = vmatmul.mubr.f32.vlgmr.msra.gmra.mrb[82].mxu1 %v39096_v20  ;;  %v20411_v63 = vand.u32 4294901760, %v20410_v51  ;;  %v20417_v48 = vsub.f32 %v39323_v35, %v40449_v30  ;;  %v39395_v51 = vpack.c.bf16 %v39271_v26, %v39269_v28  ;;  %v39463_v28 = vpack.c.bf16 %v20409_v54, %v20402_v50  ;;  %v21806_v30 = vld [vmem:[#allocation28 + $0x58] sm:$0xff] }
 0x695   :  { %33955 = vmatpush3.bf16.msra.mxu1 %v39126_v24  ;;  %33994 = vmatpush3.bf16.msra.mxu0 %v39128_v61  ;;  %v20424_v42 = vsub.f32 %v39325_v52, %v40448_v34  ;;  %v40628_v26 = vand.u32 4294901760, %v39299_v5  ;;  %v40630_v50 = vand.u32 4294901760, %v39323_v35  ;;  %v40631_v54 = vand.u32 4294901760, %v39325_v52 }
 0x696   :  { %33956 = vmatprep.subr.bf16.mxu1 %v40509_v8  ;;  %33995 = vmatprep.subr.bf16.mxu0 %v40509_v8  ;;  %v39380_v7 = vpack.c.bf16 %v20411_v63, %v20404_v11  ;;  %v20418_v0 = vand.u32 4294901760, %v20417_v48  ;;  %40620 = vst [vmem:[#allocation89_spill] sm:$0xff] %v39395_v51  ;;  %v39410_v48 = vpack.c.bf16 %v39299_v5, %v39297_v25  ;;  %v27432_v63 = vld [vmem:[#allocation24 + $0x1] ss:$0 sm:$0xff]  ;;  %40627 = vst [vmem:[#allocation86_spill] sm:$0xff] %v39463_v28 }
 0x697   :  { %31588 = vmatprep.mubr.msk.f32.mxu1 %vm35896_vm1, %v40510_v16  ;;  %v20425_v57 = vand.u32 4294901760, %v20424_v42  ;;  %v39419_v42 = vadd.f32 %v27434_v23, %v27431_v15 }
 0x698   :  { %31655 = vmatmul.mubr.f32.vlgmr.msra.gmra.mrb[32].mxu0 %v39122_v41  ;;  %40622 = vst [vmem:[#allocation91_spill] sm:$0xff] %v39410_v48 }
 0x699   :  { %33958 = vmatpush3.bf16.msra.mxu1 %v39154_v14  ;;  %33997 = vmatpush3.bf16.msra.mxu0 %v39240_v38  ;;  %v39391_v6 = vpack.c.bf16 %v20425_v57, %v20418_v0  ;;  %40623 = vst [vmem:[#allocation88_spill] sm:$0xff] %v39419_v42  ;;  %v39425_v0 = vpack.c.bf16 %v39325_v52, %v39323_v35 }
 0x69a   :  { %33959 = vmatprep.subr.bf16.mxu1 %v40509_v8  ;;  %33998 = vmatprep.subr.bf16.mxu0 %v40509_v8  ;;  %v39429_v57 = vadd.f32 %v27435_v55, %v27432_v63  ;;  %v21804_v55 = vld [vmem:[#allocation28 + $0x48] sm:$0xff] }
 0x69b   :  { %31665 = vmatprep.mubr.msk.f32.mxu0 %vm35896_vm1, %v40510_v16  ;;  %40619 = vst [vmem:[#allocation87_spill] sm:$0xff] %v39391_v6  ;;  %40624 = vst [vmem:[#allocation84_spill] sm:$0xff] %v39425_v0 }
 0x69c   :  { %31589 = vmatmul.mubr.f32.vlgmr.msra.gmra.mrb[82].mxu1 %v39122_v41  ;;  %40625 = vst [vmem:[#allocation85_spill] sm:$0xff] %v39429_v57  ;;  %v34537_v63 = vadd.f32 %v39429_v57, %v39209_v3 }
 0x69d   :  { %33961 = vmatpush3.bf16.msra.mxu1 %v39254_v31  ;;  %34000 = vmatpush3.bf16.msra.mxu0 %v39260_v39 }
 0x69e   :  { %33962 = vmatprep.subr.bf16.mxu1 %v40509_v8  ;;  %34001 = vmatprep.subr.bf16.mxu0 %v40509_v8  ;;  %v27438_v3 = vmul.f32 -1.442695, %v34537_v63  ;;  %v21805_v63 = vld [vmem:[#allocation28 + $0x50] sm:$0xff] }
 0x69f   :  { %31599 = vmatprep.mubr.msk.f32.mxu1 %vm35896_vm1, %v40510_v16 }
 0x6a0   :  { %31666 = vmatmul.mubr.f32.vlgmr.msra.gmra.mrb[32].mxu0 %v39076_v59 }
 0x6a1   :  { %33964 = vmatpush3.bf16.msra.mxu1 %v39279_v12  ;;  %34003 = vmatpush3.bf16.msra.mxu0 %v39104_v21 }
 0x6a2   :  { %33965 = vmatprep.subr.bf16.mxu1 %v40509_v8  ;;  %34004 = vmatprep.subr.bf16.mxu0 %v40509_v8 }
 0x6a3   :  { %31676 = vmatprep.mubr.msk.f32.mxu0 %vm35896_vm1, %v40510_v16 }
 0x6a4   :  { %31600 = vmatmul.mubr.f32.vlgmr.msra.gmra.mrb[82].mxu1 %v39076_v59 }
 0x6a5   :  { %33967 = vmatpush3.bf16.msra.mxu1 %v39126_v24  ;;  %34006 = vmatpush3.bf16.msra.mxu0 %v39128_v61 }
 0x6a6   :  { %33968 = vmatprep.subr.bf16.mxu1 %v40509_v8  ;;  %34079 = vmatprep.subr.bf16.mxu0 %v40509_v8 }
 0x6a7   :  { %31610 = vmatprep.mubr.msk.f32.mxu1 %vm35896_vm1, %v40510_v16 }
 0x6a8   :  { %31677 = vmatmul.mubr.f32.vlgmr.msra.gmra.mrb[32].mxu0 %v39076_v59 }
 0x6a9   :  { %33970 = vmatpush3.bf16.msra.mxu1 %v39154_v14  ;;  %34081 = vmatpush3.bf16.msra.mxu0 %v39305_v33 }
 0x6aa   :  { %34007 = vmatprep.subr.bf16.mxu1 %v40509_v8  ;;  %34082 = vmatprep.subr.bf16.mxu0 %v40509_v8 }
 0x6ab   :  { %31819 = vmatprep.mubr.msk.f32.mxu0 %vm35896_vm1, %v40510_v16 }
 0x6ac   :  { %31611 = vmatmul.mubr.f32.vlgmr.msra.gmra.mrb[82].mxu1 %v39076_v59 }
 0x6ad   :  { %34009 = vmatpush3.bf16.msra.mxu1 %v39331_v60  ;;  %34084 = vmatpush3.bf16.msra.mxu0 %v39333_v27 }
 0x6ae   :  { %34010 = vmatprep.subr.bf16.mxu1 %v40509_v8  ;;  %34085 = vmatprep.subr.bf16.mxu0 %v40509_v8 }
 0x6af   :  { %31687 = vmatprep.mubr.msk.f32.mxu1 %vm35896_vm1, %v40510_v16 }
 0x6b0   :  { %31820 = vmatmul.mubr.f32.vlgmr.msra.gmra.mrb[32].mxu0 %v39361_v13 }
 0x6b1   :  { %34012 = vmatpush3.bf16.msra.mxu1 %v39358_v36  ;;  %34087 = vmatpush3.bf16.msra.mxu0 %v39363_v2 }
 0x6b2   :  { %34013 = vmatprep.subr.bf16.mxu1 %v40509_v8  ;;  %34088 = vmatprep.subr.bf16.mxu0 %v40509_v8 }
 0x6b3   :  { %31830 = vmatprep.mubr.msk.f32.mxu0 %vm35896_vm1, %v40510_v16 }
 0x6b4   :  { %31688 = vmatmul.mubr.f32.vlgmr.msra.gmra.mrb[84].mxu1 %v39167_v45  ;;  %v39406_v45 = vpack.c.bf16 %v39293_v32, %v39291_v44 }
 0x6b5   :  { %34015 = vmatpush3.bf16.msra.mxu1 %v39380_v7  ;;  %34090 = vmatpush3.bf16.msra.mxu0 %v39382_v4 }
 0x6b6   :  { %34016 = vmatprep.subr.bf16.mxu1 %v40509_v8  ;;  %34091 = vmatprep.subr.bf16.mxu0 %v40509_v8  ;;  %40621 = vst [vmem:[#allocation90_spill] sm:$0xff] %v39406_v45 }
 0x6b7   :  { %31698 = vmatprep.mubr.msk.f32.mxu1 %vm35896_vm1, %v40510_v16 }
 0x6b8   :  { %31831 = vmatmul.mubr.f32.vlgmr.msra.gmra.mrb[32].mxu0 %v39266_v22 }
 0x6b9   :  { %34018 = vmatpush3.bf16.msra.mxu1 %v39391_v6  ;;  %34093 = vmatpush3.bf16.msra.mxu0 %v39395_v51 }
 0x6ba   :  { %34019 = vmatprep.subr.bf16.mxu1 %v40509_v8  ;;  %34094 = vmatprep.subr.bf16.mxu0 %v40509_v8 }
 0x6bb   :  { %v39414_v11 = vpop.f32.mrb[26].mxu0  ;;  %31841 = vmatprep.mubr.msk.f32.mxu0 %vm35896_vm1, %v40510_v16 }
 0x6bc   :  { %v31150_v10 = vpop.f32.mrb[27].mxu0  ;;  %31699 = vmatmul.mubr.f32.vlgmr.msra.gmra.mrb[86].mxu1 %v39076_v59 }
 0x6bd   :  { %34021 = vmatpush3.bf16.msra.mxu1 %v39406_v45  ;;  %34096 = vmatpush3.bf16.msra.mxu0 %v39410_v48 }
 0x6be   :  { %34022 = vmatprep.subr.bf16.mxu1 %v40509_v8  ;;  %34097 = vmatprep.subr.bf16.mxu0 %v40509_v8 }
 0x6bf   :  { %v15348_v34 = vpop.f32.mrb[54].mxu1  ;;  %31709 = vmatprep.mubr.msk.f32.mxu1 %vm35896_vm1, %v40510_v16 }
 0x6c0   :  { %v34535_v15 = vadd.f32 %v39419_v42, %v15348_v34  ;;  %v31018_v23 = vpop.f32.mrb[55].mxu1  ;;  %31842 = vmatmul.mubr.f32.vlgmr.msra.gmra.mrb[32].mxu0 %v39286_v37  ;;  %v21803_v34 = vld [vmem:[#allocation28 + $0x40] sm:$0xff] }
 0x6c1   :  { %34024 = vmatpush3.bf16.msra.mxu1 %v39425_v0  ;;  %34099 = vmatpush3.bf16.msra.mxu0 %v39305_v33  ;;  %v21819_v23 = vand.u32 4294901760, %v21804_v55 }
 0x6c2   :  { %v27437_v10 = vmul.f32 -1.442695, %v34535_v15  ;;  %34025 = vmatprep.subr.bf16.mxu1 %v40509_v8  ;;  %34100 = vmatprep.subr.bf16.mxu0 %v40509_v8  ;;  %v39450_v15 = vpack.c.bf16 %v21406_v46, %v21399_v40  ;;  %v39469_v40 = vpack.c.bf16 %v40628_v26, %v21413_v49  ;;  %v20805_v46 = vld [vmem:[#allocation28] sm:$0xff]  ;;  %v39486_v49 = vpack.c.bf16 %v40631_v54, %v40630_v50 }
 0x6c3   :  { %31852 = vmatprep.mubr.msk.f32.mxu0 %vm35896_vm1, %v40510_v16  ;;  %v39477_v32 = vsub.f32 %v21804_v55, %v21819_v23  ;;  %v20820_v25 = vand.u32 4294901760, %v20805_v46  ;;  %v21825_v26 = vand.u32 4294901760, %v21806_v30 }
 0x6c4   :  { %35164 = vpow2.f32 %v27437_v10  ;;  %31710 = vmatmul.mubr.f32.vlgmr.msra.gmra.mrb[88].mxu1 %v39096_v20  ;;  %40626 = vst [vmem:[#allocation92_spill] sm:$0xff] %v39450_v15  ;;  %v21816_v20 = vand.u32 4294901760, %v21803_v34  ;;  %40629 = vst [vmem:[#allocation93_spill] sm:$0xff] %v39469_v40  ;;  %v20806_v10 = vld [vmem:[#allocation28 + $0x8] sm:$0xff] }
 0x6c5   :  { %34027 = vmatpush3.bf16.msra.mxu1 %v39331_v60  ;;  %34102 = vmatpush3.bf16.msra.mxu0 %v39333_v27  ;;  %35166 = vpow2.f32 %v27438_v3  ;;  %v20823_v5 = vand.u32 4294901760, %v20806_v10  ;;  %40632 = vst [vmem:[#allocation94_spill] sm:$0xff] %v39486_v49  ;;  %v21822_v3 = vand.u32 4294901760, %v21805_v63  ;;  %v40458_v35 = vand.u32 4294901760, %v39477_v32 }
 0x6c6   :  { %34028 = vmatprep.subr.bf16.mxu1 %v40509_v8  ;;  %34103 = vmatprep.subr.bf16.mxu0 %v40509_v8  ;;  %v39475_v44 = vsub.f32 %v21803_v34, %v21816_v20  ;;  %v20807_v34 = vld [vmem:[#allocation28 + $0x10] sm:$0xff]  ;;  %v39495_v50 = vsub.f32 %v20805_v46, %v20820_v25  ;;  %v39503_v57 = vsub.f32 %v21806_v30, %v21825_v26 }
 0x6c7   :  { %31720 = vmatprep.mubr.msk.f32.mxu1 %vm35896_vm1, %v40510_v16  ;;  %v20826_v52 = vand.u32 4294901760, %v20807_v34  ;;  %v39497_v54 = vsub.f32 %v20806_v10, %v20823_v5  ;;  %v21905_v10 = vsub.f32 %v39477_v32, %v40458_v35 }
 0x6c8   :  { %31853 = vmatmul.mubr.f32.vlgmr.msra.gmra.mrb[32].mxu0 %v39308_v58 }
 0x6c9   :  { %34030 = vmatpush3.bf16.msra.mxu1 %v39358_v36  ;;  %34105 = vmatpush3.bf16.msra.mxu0 %v39450_v15  ;;  %v39524_v42 = vsub.f32 %v20807_v34, %v20826_v52  ;;  %v21906_v30 = vand.u32 4294901760, %v21905_v10  ;;  %v39537_v34 = vpack.c.bf16 %v21825_v26, %v21822_v3  ;;  %v40635_v48 = vand.u32 4294901760, %v39497_v54 }
 0x6ca   :  { %34031 = vmatprep.subr.bf16.mxu1 %v40509_v8  ;;  %34106 = vmatprep.subr.bf16.mxu0 %v40509_v8 }
 0x6cb   :  { %31863 = vmatprep.mubr.msk.f32.mxu0 %vm35896_vm1, %v40510_v16  ;;  %v20909_v45 = vsub.f32 %v39497_v54, %v40635_v48  ;;  %v40638_v51 = vand.u32 4294901760, %v39524_v42 }
 0x6cc   :  { %31721 = vmatmul.mubr.f32.vlgmr.msra.gmra.mrb[90].mxu1 %v39122_v41  ;;  %v20808_v41 = vld [vmem:[#allocation28 + $0x18] sm:$0xff] }
 0x6cd   :  { %34033 = vmatpush3.bf16.msra.mxu1 %v39463_v28  ;;  %34108 = vmatpush3.bf16.msra.mxu0 %v39469_v40  ;;  %v40456_v40 = vand.u32 4294901760, %v39475_v44  ;;  %v39501_v28 = vsub.f32 %v21805_v63, %v21822_v3  ;;  %v39516_v63 = vpack.c.bf16 %v21819_v23, %v21816_v20  ;;  %v39530_v20 = vld [vmem:[#allocation25 + $0x2] ss:$0 sm:$0xff]  ;;  %v39534_v23 = vpack.c.bf16 %v20823_v5, %v20820_v25 }
 0x6ce   :  { %v35165_v15 = vpop.eup %35164  ;;  %34034 = vmatprep.subr.bf16.mxu1 %v40509_v8  ;;  %34109 = vmatprep.subr.bf16.mxu0 %v40509_v8  ;;  %40633 = vst [vmem:[#allocation95_spill] sm:$0xff] %v39530_v20  ;;  %v34538_v10 = vadd.f32 %v39530_v20, %v39414_v11  ;;  %v20910_v26 = vand.u32 4294901760, %v20909_v45  ;;  %v20916_v6 = vsub.f32 %v39524_v42, %v40638_v51 }
 0x6cf   :  { %v16352_v55 = vadd.f32 1.0, %v35165_v15  ;;  %31731 = vmatprep.mubr.msk.f32.mxu1 %vm35896_vm1, %v40510_v16  ;;  %v20829_v15 = vand.u32 4294901760, %v20808_v41  ;;  %v21898_v46 = vsub.f32 %v39475_v44, %v40456_v40  ;;  %v40636_v25 = vand.u32 4294901760, %v39501_v28 }
 0x6d0   :  { %31864 = vmatmul.mubr.f32.vlgmr.msra.gmra.mrb[32].mxu0 %v39266_v22  ;;  %v20917_v45 = vand.u32 4294901760, %v20916_v6 }
 0x6d1   :  { %35168 = vrcp.f32 %v16352_v55  ;;  %34036 = vmatpush3.bf16.msra.mxu1 %v39486_v49  ;;  %34111 = vmatpush3.bf16.msra.mxu0 %v39305_v33  ;;  %v35167_v49 = vpop.eup %35166  ;;  %v39526_v35 = vsub.f32 %v20808_v41, %v20829_v15  ;;  %v21899_v55 = vand.u32 4294901760, %v21898_v46  ;;  %v40634_v41 = vand.u32 4294901760, %v39495_v50 }
 0x6d2   :  { %34037 = vmatprep.subr.bf16.mxu1 %v40509_v8  ;;  %34112 = vmatprep.subr.bf16.mxu0 %v40509_v8  ;;  %v16359_v0 = vadd.f32 1.0, %v35167_v49  ;;  %v21912_v5 = vsub.f32 %v39501_v28, %v40636_v25  ;;  %v40637_v49 = vand.u32 4294901760, %v39503_v57 }
 0x6d3   :  { %31874 = vmatprep.mubr.msk.f32.mxu0 %vm35896_vm1, %v40510_v16  ;;  %v20902_v40 = vsub.f32 %v39495_v50, %v40634_v41  ;;  %v39561_v41 = vpack.c.bf16 %v20829_v15, %v20826_v52  ;;  %v39563_v25 = vpack.c.bf16 %v21906_v30, %v21899_v55  ;;  %v40639_v52 = vand.u32 4294901760, %v39526_v35 }
 0x6d4   :  { %31732 = vmatmul.mubr.f32.vlgmr.msra.gmra.mrb[92].mxu1 %v39076_v59  ;;  %v21919_v3 = vsub.f32 %v39503_v57, %v40637_v49  ;;  %35170 = vrcp.f32 %v16359_v0  ;;  %v21913_v11 = vand.u32 4294901760, %v21912_v5  ;;  %v39597_v30 = vpack.c.bf16 %v39477_v32, %v39475_v44 }
 0x6d5   :  { %34039 = vmatpush3.bf16.msra.mxu1 %v39331_v60  ;;  %34114 = vmatpush3.bf16.msra.mxu0 %v39333_v27  ;;  %v20903_v46 = vand.u32 4294901760, %v20902_v40  ;;  %v20923_v15 = vsub.f32 %v39526_v35, %v40639_v52  ;;  %v39608_v55 = vpack.c.bf16 %v39497_v54, %v39495_v50 }
 0x6d6   :  { %34040 = vmatprep.subr.bf16.mxu1 %v40509_v8  ;;  %34115 = vmatprep.subr.bf16.mxu0 %v40509_v8  ;;  %v21920_v20 = vand.u32 4294901760, %v21919_v3  ;;  %v35209_v3 = vld [vmem:[#allocation33 + $0x2] sm:$0x3] }
 0x6d7   :  { %31742 = vmatprep.mubr.msk.f32.mxu1 %vm35896_vm1, %v40510_v16 }
 0x6d8   :  { %31875 = vmatmul.mubr.f32.vlgmr.msra.gmra.mrb[32].mxu0 %v39266_v22  ;;  %v39584_v51 = vpack.c.bf16 %v21920_v20, %v21913_v11  ;;  %v39612_v20 = vpack.c.bf16 %v39503_v57, %v39501_v28  ;;  %v40641_v11 = vand.u32 4294901760, %v39477_v32 }
 0x6d9   :  { %34042 = vmatpush3.bf16.msra.mxu1 %v39358_v36  ;;  %34117 = vmatpush3.bf16.msra.mxu0 %v39516_v63 }
 0x6da   :  { %34043 = vmatprep.subr.bf16.mxu1 %v40509_v8  ;;  %34118 = vmatprep.subr.bf16.mxu0 %v40509_v8 }
 0x6db   :  { %v35169_v48 = vpop.eup %35168  ;;  %31885 = vmatprep.mubr.msk.f32.mxu0 %vm35896_vm1, %v40510_v16 }
 0x6dc   :  { %v16362_v49 = vmul.f32 %v35169_v48, %v34538_v10  ;;  %31743 = vmatmul.mubr.f32.vlgmr.msra.gmra.mrb[94].mxu1 %v39076_v59  ;;  %v39582_v59 = vpack.c.bf16 %v20910_v26, %v20903_v46  ;;  %v39623_v10 = vpack.c.bf16 %v39526_v35, %v39524_v42 }
 0x6dd   :  { %34045 = vmatpush3.bf16.msra.mxu1 %v39534_v23  ;;  %34120 = vmatpush3.bf16.msra.mxu0 %v39537_v34 }
 0x6de   :  { %v16363_v0 = vadd.f32 %v16362_v49, %v39224_v9  ;;  %34046 = vmatprep.subr.bf16.mxu1 %v40509_v8  ;;  %34121 = vmatprep.subr.bf16.mxu0 %v40509_v8  ;;  %v20924_v9 = vand.u32 4294901760, %v20923_v15  ;;  %v35171_v6 = vpop.eup %35170  ;;  %v40640_v49 = vand.u32 4294901760, %v39475_v44  ;;  %v40643_v44 = vand.u32 4294901760, %v39497_v54 }
 0x6df   :  { %31753 = vmatprep.mubr.msk.f32.mxu1 %vm35896_vm1, %v40510_v16  ;;  %v16367_v26 = vmul.f32 %v35209_v3, %v35171_v6 }
 0x6e0   :  { %35172 = vtanh.f32 %v16363_v0  ;;  %31886 = vmatmul.mubr.f32.vlgmr.msra.gmra.mrb[34].mxu0 %v39361_v13  ;;  %v39593_v40 = vpack.c.bf16 %v20924_v9, %v20917_v45  ;;  %v39647_v52 = vpack.c.bf16 %v40641_v11, %v40640_v49  ;;  %v40644_v45 = vand.u32 4294901760, %v39501_v28 }
 0x6e1   :  { %34048 = vmatpush3.bf16.msra.mxu1 %v39561_v41  ;;  %34123 = vmatpush3.bf16.msra.mxu0 %v39563_v25  ;;  %v40645_v9 = vand.u32 4294901760, %v39503_v57  ;;  %v40646_v57 = vand.u32 4294901760, %v39524_v42  ;;  %v40647_v28 = vand.u32 4294901760, %v39526_v35 }
 0x6e2   :  { %34049 = vmatprep.subr.bf16.mxu1 %v40509_v8  ;;  %34124 = vmatprep.subr.bf16.mxu0 %v40509_v8 }
 0x6e3   :  { %31896 = vmatprep.mubr.msk.f32.mxu0 %vm35896_vm1, %v40510_v16  ;;  %v39681_v54 = vpack.c.bf16 %v40647_v28, %v40646_v57  ;;  %v40653_v28 = vld [vmem:[#allocation84_spill] sm:$0xff] }
 0x6e4   :  { %31754 = vmatmul.mubr.f32.vlgmr.msra.gmra.mrb[82].mxu1 %v39361_v13  ;;  %v16365_v13 = vsub.f32 1.0, %v35171_v6  ;;  %v39666_v6 = vpack.c.bf16 %v40645_v9, %v40644_v45  ;;  %v40652_v9 = vld [vmem:[#allocation88_spill] sm:$0xff] }
 0x6e5   :  { %34051 = vmatpush3.bf16.msra.mxu1 %v39582_v59  ;;  %34126 = vmatpush3.bf16.msra.mxu0 %v39584_v51 }
 0x6e6   :  { %34052 = vmatprep.subr.bf16.mxu1 %v40509_v8  ;;  %34127 = vmatprep.subr.bf16.mxu0 %v40509_v8 }
 0x6e7   :  { %31764 = vmatprep.mubr.msk.f32.mxu1 %vm35896_vm1, %v40510_v16 }
 0x6e8   :  { %31897 = vmatmul.mubr.f32.vlgmr.msra.gmra.mrb[34].mxu0 %v39266_v22 }
 0x6e9   :  { %34054 = vmatpush3.bf16.msra.mxu1 %v39593_v40  ;;  %34129 = vmatpush3.bf16.msra.mxu0 %v39597_v30 }
 0x6ea   :  { %v35173_v5 = vpop.eup %35172  ;;  %34055 = vmatprep.subr.bf16.mxu1 %v40509_v8  ;;  %34130 = vmatprep.subr.bf16.mxu0 %v40509_v8 }
 0x6eb   :  { %31907 = vmatprep.mubr.msk.f32.mxu0 %vm35896_vm1, %v40510_v16  ;;  %v16366_v46 = vmul.f32 %v35173_v5, %v16365_v13 }
 0x6ec   :  { %31765 = vmatmul.mubr.f32.vlgmr.msra.gmra.mrb[82].mxu1 %v39266_v22 }
 0x6ed   :  { %34057 = vmatpush3.bf16.msra.mxu1 %v39608_v55  ;;  %34132 = vmatpush3.bf16.msra.mxu0 %v39612_v20  ;;  %v39625_v48 = vadd.f32 %v16367_v26, %v16366_v46 }
 0x6ee   :  { %34058 = vmatprep.subr.bf16.mxu1 %v40509_v8  ;;  %34133 = vmatprep.subr.bf16.mxu0 %v40509_v8 }
 0x6ef   :  { %31775 = vmatprep.mubr.msk.f32.mxu1 %vm35896_vm1, %v40510_v16  ;;  %25261 = vst.msk [vmem:[#allocation39 + $0x2] sm:$0x3] %vm13351_vm6, %v39625_v48 }
 0x6f0   :  { %31908 = vmatmul.mubr.f32.vlgmr.msra.gmra.mrb[34].mxu0 %v39286_v37 }
 0x6f1   :  { %34060 = vmatpush3.bf16.msra.mxu1 %v39623_v10  ;;  %34135 = vmatpush3.bf16.msra.mxu0 %v39516_v63 }
 0x6f2   :  { %34061 = vmatprep.subr.bf16.mxu1 %v40509_v8  ;;  %34136 = vmatprep.subr.bf16.mxu0 %v40509_v8 }
 0x6f3   :  { %31918 = vmatprep.mubr.msk.f32.mxu0 %vm35896_vm1, %v40510_v16 }
 0x6f4   :  { %31776 = vmatmul.mubr.f32.vlgmr.msra.gmra.mrb[82].mxu1 %v39286_v37  ;;  %v40642_v37 = vand.u32 4294901760, %v39495_v50  ;;  %v22324_v50 = vsel %vm1468_vm4, %v39035_v53, 0 }
 0x6f5   :  { %34063 = vmatpush3.bf16.msra.mxu1 %v39534_v23  ;;  %34138 = vmatpush3.bf16.msra.mxu0 %v39537_v34  ;;  %v39686_v5 = vand.u32 4294901760, %v22324_v50 }
 0x6f6   :  { %34064 = vmatprep.subr.bf16.mxu1 %v40509_v8  ;;  %34139 = vmatprep.subr.bf16.mxu0 %v40509_v8  ;;  %v39660_v32 = vpack.c.bf16 %v40643_v44, %v40642_v37 }
 0x6f7   :  { %v17419_v15 = vpop.f32.mrb[70].mxu1  ;;  %31786 = vmatprep.mubr.msk.f32.mxu1 %vm35896_vm1, %v40510_v16 }
 0x6f8   :  { %v31293_v0 = vpop.f32.mrb[71].mxu1  ;;  %31919 = vmatmul.mubr.f32.vlgmr.msra.gmra.mrb[34].mxu0 %v39308_v58  ;;  %v17420_v13 = vadd.f32 %v39060_v19, %v17419_v15  ;;  %v39696_v19 = vsub.f32 %v22324_v50, %v39686_v5 }
 0x6f9   :  { %34066 = vmatpush3.bf16.msra.mxu1 %v39561_v41  ;;  %34141 = vmatpush3.bf16.msra.mxu0 %v39647_v52 }
 0x6fa   :  { %34067 = vmatprep.subr.bf16.mxu1 %v40509_v8  ;;  %34142 = vmatprep.subr.bf16.mxu0 %v40509_v8  ;;  %v39706_v42 = vand.u32 4294901760, %v39696_v19 }
 0x6fb   :  { %31929 = vmatprep.mubr.msk.f32.mxu0 %vm35896_vm1, %v40510_v16 }
 0x6fc   :  { %31787 = vmatmul.mubr.f32.vlgmr.msra.gmra.mrb[82].mxu1 %v39308_v58  ;;  %v22398_v49 = vsub.f32 %v39696_v19, %v39706_v42 }
 0x6fd   :  { %34069 = vmatpush3.bf16.msra.mxu1 %v39660_v32  ;;  %34144 = vmatpush3.bf16.msra.mxu0 %v39666_v6 }
 0x6fe   :  { %34070 = vmatprep.subr.bf16.mxu1 %v40509_v8  ;;  %34145 = vmatprep.subr.bf16.mxu0 %v40509_v8  ;;  %v39723_v11 = vand.u32 4294901760, %v22398_v49 }
 0x6ff   :  { %v17510_v53 = vpop.f32.mrb[72].mxu1  ;;  %31797 = vmatprep.mubr.msk.f32.mxu1 %vm35896_vm1, %v40510_v16 }
 0x700   :  { %v17511_v58 = vadd.f32 %v17510_v53, %v17420_v13  ;;  %v31304_v3 = vpop.f32.mrb[73].mxu1  ;;  %31930 = vmatmul.mubr.f32.vlgmr.msra.gmra.mrb[34].mxu0 %v39266_v22  ;;  %v40654_v53 = vld [vmem:[#allocation85_spill] sm:$0xff] }
 0x701   :  { %34072 = vmatpush3.bf16.msra.mxu1 %v39681_v54  ;;  %34147 = vmatpush3.bf16.msra.mxu0 %v39516_v63 }
 0x702   :  { %34073 = vmatprep.subr.bf16.mxu1 %v40509_v8  ;;  %34148 = vmatprep.subr.bf16.mxu0 %v40509_v8 }
 0x703   :  { %31940 = vmatprep.mubr.msk.f32.mxu0 %vm35896_vm1, %v40510_v16 }
 0x704   :  { %31798 = vmatmul.mubr.f32.vlgmr.msra.gmra.mrb[82].mxu1 %v39266_v22 }
 0x705   :  { %34075 = vmatpush3.bf16.msra.mxu1 %v39534_v23  ;;  %34150 = vmatpush3.bf16.msra.mxu0 %v39537_v34 }
 0x706   :  { %34076 = vmatprep.subr.bf16.mxu1 %v40509_v8  ;;  %34187 = vmatprep.subr.bf16.mxu0 %v40509_v8 }
 0x707   :  { %v17590_v35 = vpop.f32.mrb[74].mxu1  ;;  %31808 = vmatprep.mubr.msk.f32.mxu1 %vm35896_vm1, %v40510_v16 }
 0x708   :  { %v17591_v26 = vadd.f32 %v17590_v35, %v17511_v58  ;;  %v31315_v46 = vpop.f32.mrb[75].mxu1  ;;  %31941 = vmatmul.mubr.f32.vlgmr.msra.gmra.mrb[34].mxu0 %v39266_v22  ;;  %v40655_v35 = vld [vmem:[#allocation92_spill] sm:$0xff] }
 0x709   :  { %34078 = vmatpush3.bf16.msra.mxu1 %v39561_v41  ;;  %34189 = vmatpush3.bf16.msra.mxu0 %v39104_v21 }
 0x70a   :  { %34151 = vmatprep.subr.bf16.mxu1 %v40509_v8  ;;  %34190 = vmatprep.subr.bf16.mxu0 %v40509_v8 }
 0x70b   :  { %32017 = vmatprep.mubr.msk.f32.mxu0 %vm35896_vm1, %v40510_v16 }
 0x70c   :  { %31809 = vmatmul.mubr.f32.vlgmr.msra.gmra.mrb[82].mxu1 %v39266_v22 }
 0x70d   :  { %34153 = vmatpush3.bf16.msra.mxu1 %v39126_v24  ;;  %34192 = vmatpush3.bf16.msra.mxu0 %v39128_v61 }
 0x70e   :  { %34154 = vmatprep.subr.bf16.mxu1 %v40509_v8  ;;  %34193 = vmatprep.subr.bf16.mxu0 %v40509_v8 }
 0x70f   :  { %v17667_v15 = vpop.f32.mrb[76].mxu1  ;;  %31951 = vmatprep.mubr.msk.f32.mxu1 %vm35896_vm1, %v40510_v16 }
 0x710   :  { %v17668_v0 = vadd.f32 %v17667_v15, %v17591_v26  ;;  %v31326_v37 = vpop.f32.mrb[77].mxu1  ;;  %32018 = vmatmul.mubr.f32.vlgmr.msra.gmra.mrb[36].mxu0 %v39723_v11  ;;  %v40657_v26 = vld [vmem:[#allocation93_spill] sm:$0xff]  ;;  %v40659_v15 = vld [vmem:[#allocation95_spill] sm:$0xff] }
 0x711   :  { %34156 = vmatpush3.bf16.msra.mxu1 %v39154_v14  ;;  %34195 = vmatpush3.bf16.msra.mxu0 %v39156_v29 }
 0x712   :  { %34157 = vmatprep.subr.bf16.mxu1 %v40509_v8  ;;  %34196 = vmatprep.subr.bf16.mxu0 %v40509_v8 }
 0x713   :  { %32028 = vmatprep.mubr.msk.f32.mxu0 %vm35896_vm1, %v40510_v16 }
 0x714   :  { %31952 = vmatmul.mubr.f32.vlgmr.msra.gmra.mrb[96].mxu1 %v39723_v11 }
 0x715   :  { %34159 = vmatpush3.bf16.msra.mxu1 %v39175_v62  ;;  %34198 = vmatpush3.bf16.msra.mxu0 %v39177_v43 }
 0x716   :  { %34160 = vmatprep.subr.bf16.mxu1 %v40509_v8  ;;  %34199 = vmatprep.subr.bf16.mxu0 %v40509_v8 }
 0x717   :  { %v17750_v22 = vpop.f32.mrb[78].mxu1  ;;  %31962 = vmatprep.mubr.msk.f32.mxu1 %vm35896_vm1, %v40510_v16 }
 0x718   :  { %v17751_v29 = vadd.f32 %v17750_v22, %v17668_v0  ;;  %v31337_v44 = vpop.f32.mrb[79].mxu1  ;;  %32029 = vmatmul.mubr.f32.vlgmr.msra.gmra.mrb[36].mxu0 %v39686_v5 }
 0x719   :  { %34162 = vmatpush3.bf16.msra.mxu1 %v39186_v18  ;;  %34201 = vmatpush3.bf16.msra.mxu0 %v39190_v56 }
 0x71a   :  { %34163 = vmatprep.subr.bf16.mxu1 %v40509_v8  ;;  %34202 = vmatprep.subr.bf16.mxu0 %v40509_v8 }
 0x71b   :  { %v39747_v62 = vpop.f32.mrb[28].mxu0  ;;  %32039 = vmatprep.mubr.msk.f32.mxu0 %vm35896_vm1, %v40510_v16 }
 0x71c   :  { %v31480_v43 = vpop.f32.mrb[29].mxu0  ;;  %31963 = vmatmul.mubr.f32.vlgmr.msra.gmra.mrb[96].mxu1 %v39686_v5  ;;  %v34542_v58 = vadd.f32 %v40654_v53, %v39747_v62 }
 0x71d   :  { %34165 = vmatpush3.bf16.msra.mxu1 %v39201_v47  ;;  %34204 = vmatpush3.bf16.msra.mxu0 %v39205_v1  ;;  %v39772_v47 = vld [vmem:[#allocation37 + $0x2] sm:$0x3] }
 0x71e   :  { %34166 = vmatprep.subr.bf16.mxu1 %v40509_v8  ;;  %34205 = vmatprep.subr.bf16.mxu0 %v40509_v8  ;;  %v23782_v1 = vsel %vm1468_vm4, %v39772_v47, 0  ;;  %v27440_v3 = vmul.f32 -1.442695, %v34542_v58 }
 0x71f   :  { %v17825_v18 = vpop.f32.mrb[80].mxu1  ;;  %31973 = vmatprep.mubr.msk.f32.mxu1 %vm35896_vm1, %v40510_v16 }
 0x720   :  { %v39758_v56 = vadd.f32 %v17825_v18, %v17751_v29  ;;  %v31348_v45 = vpop.f32.mrb[81].mxu1  ;;  %32040 = vmatmul.mubr.f32.vlgmr.msra.gmra.mrb[36].mxu0 %v39696_v19  ;;  %v25774_v29 = vld [vmem:[%s40660_s10 + $0x8] sm:$0xff] }
 0x721   :  { %34168 = vmatpush3.bf16.msra.mxu1 %v39218_v17  ;;  %34207 = vmatpush3.bf16.msra.mxu0 %v39104_v21  ;;  %v39786_v17 = vand.u32 4294901760, %v23782_v1  ;;  %v39978_v18 = vld [vmem:[#allocation30 + $0x2] ss:$0 sm:$0xff] }
 0x722   :  { %34169 = vmatprep.subr.bf16.mxu1 %v40509_v8  ;;  %34208 = vmatprep.subr.bf16.mxu0 %v40509_v8 }
 0x723   :  { %32050 = vmatprep.mubr.msk.f32.mxu0 %vm35896_vm1, %v40510_v16 }
 0x724   :  { %31974 = vmatmul.mubr.f32.vlgmr.msra.gmra.mrb[96].mxu1 %v39696_v19 }
 0x725   :  { %34171 = vmatpush3.bf16.msra.mxu1 %v39126_v24  ;;  %34210 = vmatpush3.bf16.msra.mxu0 %v39128_v61 }
 0x726   :  { %34172 = vmatprep.subr.bf16.mxu1 %v40509_v8  ;;  %34211 = vmatprep.subr.bf16.mxu0 %v40509_v8 }
 0x727   :  { %31984 = vmatprep.mubr.msk.f32.mxu1 %vm35896_vm1, %v40510_v16 }
 0x728   :  { %32051 = vmatmul.mubr.f32.vlgmr.msra.gmra.mrb[36].mxu0 %v39706_v42 }
 0x729   :  { %34174 = vmatpush3.bf16.msra.mxu1 %v39154_v14  ;;  %34213 = vmatpush3.bf16.msra.mxu0 %v39240_v38  ;;  %v39796_v38 = vsub.f32 %v23782_v1, %v39786_v17 }
 0x72a   :  { %34175 = vmatprep.subr.bf16.mxu1 %v40509_v8  ;;  %34214 = vmatprep.subr.bf16.mxu0 %v40509_v8 }
 0x72b   :  { %32061 = vmatprep.mubr.msk.f32.mxu0 %vm35896_vm1, %v40510_v16 }
 0x72c   :  { %31985 = vmatmul.mubr.f32.vlgmr.msra.gmra.mrb[96].mxu1 %v39706_v42 }
 0x72d   :  { %34177 = vmatpush3.bf16.msra.mxu1 %v39254_v31  ;;  %34216 = vmatpush3.bf16.msra.mxu0 %v39260_v39  ;;  %v39806_v31 = vand.u32 4294901760, %v39796_v38 }
 0x72e   :  { %34178 = vmatprep.subr.bf16.mxu1 %v40509_v8  ;;  %34217 = vmatprep.subr.bf16.mxu0 %v40509_v8 }
 0x72f   :  { %31995 = vmatprep.mubr.msk.f32.mxu1 %vm35896_vm1, %v40510_v16 }
 0x730   :  { %32062 = vmatmul.mubr.f32.vlgmr.msra.gmra.mrb[36].mxu0 %v39686_v5 }
 0x731   :  { %34180 = vmatpush3.bf16.msra.mxu1 %v39279_v12  ;;  %34219 = vmatpush3.bf16.msra.mxu0 %v39104_v21  ;;  %v23856_v21 = vsub.f32 %v39796_v38, %v39806_v31 }
 0x732   :  { %34181 = vmatprep.subr.bf16.mxu1 %v40509_v8  ;;  %34220 = vmatprep.subr.bf16.mxu0 %v40509_v8 }
 0x733   :  { %32072 = vmatprep.mubr.msk.f32.mxu0 %vm35896_vm1, %v40510_v16 }
 0x734   :  { %31996 = vmatmul.mubr.f32.vlgmr.msra.gmra.mrb[96].mxu1 %v39686_v5 }
 0x735   :  { %34183 = vmatpush3.bf16.msra.mxu1 %v39126_v24  ;;  %34222 = vmatpush3.bf16.msra.mxu0 %v39128_v61  ;;  %v39824_v24 = vand.u32 4294901760, %v23856_v21  ;;  %v40648_v61 = vld [vmem:[#allocation87_spill] sm:$0xff] }
 0x736   :  { %34184 = vmatprep.subr.bf16.mxu1 %v40509_v8  ;;  %34295 = vmatprep.subr.bf16.mxu0 %v40509_v8 }
 0x737   :  { %32006 = vmatprep.mubr.msk.f32.mxu1 %vm35896_vm1, %v40510_v16 }
 0x738   :  { %32073 = vmatmul.mubr.f32.vlgmr.msra.gmra.mrb[36].mxu0 %v39686_v5 }
 0x739   :  { %34186 = vmatpush3.bf16.msra.mxu1 %v39154_v14  ;;  %34297 = vmatpush3.bf16.msra.mxu0 %v39305_v33  ;;  %v40649_v14 = vld [vmem:[#allocation89_spill] sm:$0xff] }
 0x73a   :  { %34223 = vmatprep.subr.bf16.mxu1 %v40509_v8  ;;  %34298 = vmatprep.subr.bf16.mxu0 %v40509_v8 }
 0x73b   :  { %32215 = vmatprep.mubr.msk.f32.mxu0 %vm35896_vm1, %v40510_v16 }
 0x73c   :  { %32007 = vmatmul.mubr.f32.vlgmr.msra.gmra.mrb[96].mxu1 %v39686_v5 }
 0x73d   :  { %34225 = vmatpush3.bf16.msra.mxu1 %v39331_v60  ;;  %34300 = vmatpush3.bf16.msra.mxu0 %v39333_v27 }
 0x73e   :  { %34226 = vmatprep.subr.bf16.mxu1 %v40509_v8  ;;  %34301 = vmatprep.subr.bf16.mxu0 %v40509_v8 }
 0x73f   :  { %32083 = vmatprep.mubr.msk.f32.mxu1 %vm35896_vm1, %v40510_v16 }
 0x740   :  { %32216 = vmatmul.mubr.f32.vlgmr.msra.gmra.mrb[36].mxu0 %v39824_v24 }
 0x741   :  { %34228 = vmatpush3.bf16.msra.mxu1 %v39358_v36  ;;  %34303 = vmatpush3.bf16.msra.mxu0 %v39363_v2  ;;  %v40650_v2 = vld [vmem:[#allocation90_spill] sm:$0xff] }
 0x742   :  { %34229 = vmatprep.subr.bf16.mxu1 %v40509_v8  ;;  %34304 = vmatprep.subr.bf16.mxu0 %v40509_v8 }
 0x743   :  { %32226 = vmatprep.mubr.msk.f32.mxu0 %vm35896_vm1, %v40510_v16 }
 0x744   :  { %32084 = vmatmul.mubr.f32.vlgmr.msra.gmra.mrb[98].mxu1 %v39723_v11  ;;  %v40658_v11 = vld [vmem:[#allocation94_spill] sm:$0xff] }
 0x745   :  { %34231 = vmatpush3.bf16.msra.mxu1 %v39380_v7  ;;  %34306 = vmatpush3.bf16.msra.mxu0 %v39382_v4  ;;  %v40651_v7 = vld [vmem:[#allocation91_spill] sm:$0xff] }
 0x746   :  { %34232 = vmatprep.subr.bf16.mxu1 %v40509_v8  ;;  %34307 = vmatprep.subr.bf16.mxu0 %v40509_v8 }
 0x747   :  { %32094 = vmatprep.mubr.msk.f32.mxu1 %vm35896_vm1, %v40510_v16 }
 0x748   :  { %32227 = vmatmul.mubr.f32.vlgmr.msra.gmra.mrb[36].mxu0 %v39786_v17 }
 0x749   :  { %34234 = vmatpush3.bf16.msra.mxu1 %v40648_v61  ;;  %34309 = vmatpush3.bf16.msra.mxu0 %v40649_v14 }
 0x74a   :  { %34235 = vmatprep.subr.bf16.mxu1 %v40509_v8  ;;  %34310 = vmatprep.subr.bf16.mxu0 %v40509_v8 }
 0x74b   :  { %v19283_v39 = vpop.f32.mrb[30].mxu0  ;;  %32237 = vmatprep.mubr.msk.f32.mxu0 %vm35896_vm1, %v40510_v16 }
 0x74c   :  { %v31546_v12 = vpop.f32.mrb[31].mxu0  ;;  %32095 = vmatmul.mubr.f32.vlgmr.msra.gmra.mrb[100].mxu1 %v39686_v5  ;;  %v34543_v0 = vadd.f32 %v40659_v15, %v19283_v39 }
 0x74d   :  { %34237 = vmatpush3.bf16.msra.mxu1 %v40650_v2  ;;  %34312 = vmatpush3.bf16.msra.mxu0 %v40651_v7 }
 0x74e   :  { %34238 = vmatprep.subr.bf16.mxu1 %v40509_v8  ;;  %34313 = vmatprep.subr.bf16.mxu0 %v40509_v8 }
 0x74f   :  { %v18313_v4 = vpop.f32.mrb[68].mxu1  ;;  %32105 = vmatprep.mubr.msk.f32.mxu1 %vm35896_vm1, %v40510_v16 }
 0x750   :  { %v34540_v50 = vadd.f32 %v40652_v9, %v18313_v4  ;;  %v31414_v57 = vpop.f32.mrb[69].mxu1  ;;  %32238 = vmatmul.mubr.f32.vlgmr.msra.gmra.mrb[36].mxu0 %v39796_v38 }
 0x751   :  { %34240 = vmatpush3.bf16.msra.mxu1 %v40653_v28  ;;  %34315 = vmatpush3.bf16.msra.mxu0 %v39305_v33 }
 0x752   :  { %v27439_v13 = vmul.f32 -1.442695, %v34540_v50  ;;  %34241 = vmatprep.subr.bf16.mxu1 %v40509_v8  ;;  %34316 = vmatprep.subr.bf16.mxu0 %v40509_v8 }
 0x753   :  { %32248 = vmatprep.mubr.msk.f32.mxu0 %vm35896_vm1, %v40510_v16 }
 0x754   :  { %35174 = vpow2.f32 %v27439_v13  ;;  %32106 = vmatmul.mubr.f32.vlgmr.msra.gmra.mrb[102].mxu1 %v39696_v19  ;;  %v40656_v19 = vld [vmem:[#allocation86_spill] sm:$0xff] }
 0x755   :  { %34243 = vmatpush3.bf16.msra.mxu1 %v39331_v60  ;;  %34318 = vmatpush3.bf16.msra.mxu0 %v39333_v27  ;;  %35176 = vpow2.f32 %v27440_v3 }
 0x756   :  { %34244 = vmatprep.subr.bf16.mxu1 %v40509_v8  ;;  %34319 = vmatprep.subr.bf16.mxu0 %v40509_v8 }
 0x757   :  { %32116 = vmatprep.mubr.msk.f32.mxu1 %vm35896_vm1, %v40510_v16 }
 0x758   :  { %32249 = vmatmul.mubr.f32.vlgmr.msra.gmra.mrb[36].mxu0 %v39806_v31 }
 0x759   :  { %34246 = vmatpush3.bf16.msra.mxu1 %v39358_v36  ;;  %34321 = vmatpush3.bf16.msra.mxu0 %v40655_v35 }
 0x75a   :  { %34247 = vmatprep.subr.bf16.mxu1 %v40509_v8  ;;  %34322 = vmatprep.subr.bf16.mxu0 %v40509_v8 }
 0x75b   :  { %32259 = vmatprep.mubr.msk.f32.mxu0 %vm35896_vm1, %v40510_v16 }
 0x75c   :  { %32117 = vmatmul.mubr.f32.vlgmr.msra.gmra.mrb[104].mxu1 %v39706_v42 }
 0x75d   :  { %34249 = vmatpush3.bf16.msra.mxu1 %v40656_v19  ;;  %34324 = vmatpush3.bf16.msra.mxu0 %v40657_v26 }
 0x75e   :  { %v35175_v46 = vpop.eup %35174  ;;  %34250 = vmatprep.subr.bf16.mxu1 %v40509_v8  ;;  %34325 = vmatprep.subr.bf16.mxu0 %v40509_v8 }
 0x75f   :  { %v19291_v49 = vadd.f32 1.0, %v35175_v46  ;;  %32127 = vmatprep.mubr.msk.f32.mxu1 %vm35896_vm1, %v40510_v16  ;;  %v35177_v42 = vpop.eup %35176 }
 0x760   :  { %32260 = vmatmul.mubr.f32.vlgmr.msra.gmra.mrb[36].mxu0 %v39786_v17 }
 0x761   :  { %35178 = vrcp.f32 %v19291_v49  ;;  %34252 = vmatpush3.bf16.msra.mxu1 %v40658_v11  ;;  %34327 = vmatpush3.bf16.msra.mxu0 %v39305_v33  ;;  %v19298_v33 = vadd.f32 1.0, %v35177_v42 }
 0x762   :  { %34253 = vmatprep.subr.bf16.mxu1 %v40509_v8  ;;  %34328 = vmatprep.subr.bf16.mxu0 %v40509_v8 }
 0x763   :  { %32270 = vmatprep.mubr.msk.f32.mxu0 %vm35896_vm1, %v40510_v16  ;;  %35180 = vrcp.f32 %v19298_v33 }
 0x764   :  { %32128 = vmatmul.mubr.f32.vlgmr.msra.gmra.mrb[106].mxu1 %v39686_v5 }
 0x765   :  { %34255 = vmatpush3.bf16.msra.mxu1 %v39331_v60  ;;  %34330 = vmatpush3.bf16.msra.mxu0 %v39333_v27 }
 0x766   :  { %34256 = vmatprep.subr.bf16.mxu1 %v40509_v8  ;;  %34331 = vmatprep.subr.bf16.mxu0 %v40509_v8 }
 0x767   :  { %32138 = vmatprep.mubr.msk.f32.mxu1 %vm35896_vm1, %v40510_v16 }
 0x768   :  { %32271 = vmatmul.mubr.f32.vlgmr.msra.gmra.mrb[36].mxu0 %v39786_v17 }
 0x769   :  { %34258 = vmatpush3.bf16.msra.mxu1 %v39358_v36  ;;  %34333 = vmatpush3.bf16.msra.mxu0 %v39516_v63 }
 0x76a   :  { %34259 = vmatprep.subr.bf16.mxu1 %v40509_v8  ;;  %34334 = vmatprep.subr.bf16.mxu0 %v40509_v8 }
 0x76b   :  { %v35179_v60 = vpop.eup %35178  ;;  %32281 = vmatprep.mubr.msk.f32.mxu0 %vm35896_vm1, %v40510_v16 }
 0x76c   :  { %v19301_v27 = vmul.f32 %v35179_v60, %v34543_v0  ;;  %32139 = vmatmul.mubr.f32.vlgmr.msra.gmra.mrb[108].mxu1 %v39686_v5 }
 0x76d   :  { %34261 = vmatpush3.bf16.msra.mxu1 %v39534_v23  ;;  %34336 = vmatpush3.bf16.msra.mxu0 %v39537_v34  ;;  %v35181_v5 = vpop.eup %35180 }
 0x76e   :  { %v19302_v36 = vadd.f32 %v19301_v27, %v39758_v56  ;;  %34262 = vmatprep.subr.bf16.mxu1 %v40509_v8  ;;  %34337 = vmatprep.subr.bf16.mxu0 %v40509_v8 }
 0x76f   :  { %32149 = vmatprep.mubr.msk.f32.mxu1 %vm35896_vm1, %v40510_v16 }
 0x770   :  { %35182 = vtanh.f32 %v19302_v36  ;;  %32282 = vmatmul.mubr.f32.vlgmr.msra.gmra.mrb[38].mxu0 %v39824_v24 }
 0x771   :  { %34264 = vmatpush3.bf16.msra.mxu1 %v39561_v41  ;;  %34339 = vmatpush3.bf16.msra.mxu0 %v39563_v25  ;;  %v19304_v25 = vsub.f32 1.0, %v35181_v5 }
 0x772   :  { %34265 = vmatprep.subr.bf16.mxu1 %v40509_v8  ;;  %34340 = vmatprep.subr.bf16.mxu0 %v40509_v8 }
 0x773   :  { %32292 = vmatprep.mubr.msk.f32.mxu0 %vm35896_vm1, %v40510_v16 }
 0x774   :  { %32150 = vmatmul.mubr.f32.vlgmr.msra.gmra.mrb[96].mxu1 %v39824_v24 }
 0x775   :  { %34267 = vmatpush3.bf16.msra.mxu1 %v39582_v59  ;;  %34342 = vmatpush3.bf16.msra.mxu0 %v39584_v51  ;;  %v35210_v59 = vld [vmem:[#allocation34 + $0x2] sm:$0x3] }
 0x776   :  { %34268 = vmatprep.subr.bf16.mxu1 %v40509_v8  ;;  %34343 = vmatprep.subr.bf16.mxu0 %v40509_v8  ;;  %v19306_v51 = vmul.f32 %v35210_v59, %v35181_v5  ;;  %v27441_v5 = vld [vmem:[#allocation30] ss:$0 sm:$0xff]  ;;  %v27442_v59 = vld [vmem:[#allocation30 + $0x1] ss:$0 sm:$0xff] }
 0x777   :  { %32160 = vmatprep.mubr.msk.f32.mxu1 %vm35896_vm1, %v40510_v16 }
 0x778   :  { %32293 = vmatmul.mubr.f32.vlgmr.msra.gmra.mrb[38].mxu0 %v39786_v17 }
 0x779   :  { %34270 = vmatpush3.bf16.msra.mxu1 %v39593_v40  ;;  %34345 = vmatpush3.bf16.msra.mxu0 %v39597_v30  ;;  %v25773_v30 = vld [vmem:[%s40660_s10] sm:$0xff] }
 0x77a   :  { %v35183_v37 = vpop.eup %35182  ;;  %34271 = vmatprep.subr.bf16.mxu1 %v40509_v8  ;;  %34346 = vmatprep.subr.bf16.mxu0 %v40509_v8 }
 0x77b   :  { %32303 = vmatprep.mubr.msk.f32.mxu0 %vm35896_vm1, %v40510_v16  ;;  %v19305_v22 = vmul.f32 %v35183_v37, %v19304_v25  ;;  %v27444_v25 = vld [vmem:[#allocation31] ss:$0 sm:$0xff] }
 0x77c   :  { %32161 = vmatmul.mubr.f32.vlgmr.msra.gmra.mrb[96].mxu1 %v39786_v17 }
 0x77d   :  { %34273 = vmatpush3.bf16.msra.mxu1 %v39608_v55  ;;  %34348 = vmatpush3.bf16.msra.mxu0 %v39612_v20  ;;  %v39945_v40 = vadd.f32 %v19306_v51, %v19305_v22  ;;  %v25788_v55 = vand.u32 4294901760, %v25773_v30  ;;  %v25791_v20 = vand.u32 4294901760, %v25774_v29  ;;  %v27445_v51 = vld [vmem:[#allocation31 + $0x1] ss:$0 sm:$0xff] }
 0x77e   :  { %34274 = vmatprep.subr.bf16.mxu1 %v40509_v8  ;;  %34349 = vmatprep.subr.bf16.mxu0 %v40509_v8 }
 0x77f   :  { %32171 = vmatprep.mubr.msk.f32.mxu1 %vm35896_vm1, %v40510_v16  ;;  %25263 = vst.msk [vmem:[#allocation40 + $0x2] sm:$0x3] %vm13351_vm6, %v39945_v40  ;;  %v39962_v44 = vsub.f32 %v25773_v30, %v25788_v55  ;;  %v39964_v62 = vsub.f32 %v25774_v29, %v25791_v20  ;;  %v40046_v30 = vadd.f32 %v27444_v25, %v27441_v5 }
 0x780   :  { %32304 = vmatmul.mubr.f32.vlgmr.msra.gmra.mrb[38].mxu0 %v39796_v38  ;;  %v40048_v29 = vadd.f32 %v27445_v51, %v27442_v59 }
 0x781   :  { %34276 = vmatpush3.bf16.msra.mxu1 %v39623_v10  ;;  %34351 = vmatpush3.bf16.msra.mxu0 %v39516_v63  ;;  %v25869_v14 = vand.u32 4294901760, %v39962_v44  ;;  %v34416_v35 = vpack.c.bf16 %v39964_v62, %v39962_v44 }
 0x782   :  { %34277 = vmatprep.subr.bf16.mxu1 %v40509_v8  ;;  %34352 = vmatprep.subr.bf16.mxu0 %v40509_v8 }
 0x783   :  { %32314 = vmatprep.mubr.msk.f32.mxu0 %vm35896_vm1, %v40510_v16  ;;  %v25870_v39 = vsub.f32 %v39962_v44, %v25869_v14 }
 0x784   :  { %32172 = vmatmul.mubr.f32.vlgmr.msra.gmra.mrb[96].mxu1 %v39796_v38  ;;  %v25775_v38 = vld [vmem:[%s40660_s10 + $0x10] sm:$0xff] }
 0x785   :  { %34279 = vmatpush3.bf16.msra.mxu1 %v39534_v23  ;;  %34354 = vmatpush3.bf16.msra.mxu0 %v39537_v34  ;;  %v25871_v7 = vand.u32 4294901760, %v25870_v39 }
 0x786   :  { %34280 = vmatprep.subr.bf16.mxu1 %v40509_v8  ;;  %34355 = vmatprep.subr.bf16.mxu0 %v40509_v8 }
 0x787   :  { %v20395_v10 = vpop.f32.mrb[84].mxu1  ;;  %32182 = vmatprep.mubr.msk.f32.mxu1 %vm35896_vm1, %v40510_v16 }
 0x788   :  { %v31689_v43 = vpop.f32.mrb[85].mxu1  ;;  %32315 = vmatmul.mubr.f32.vlgmr.msra.gmra.mrb[38].mxu0 %v39806_v31  ;;  %v20396_v56 = vadd.f32 %v39978_v18, %v20395_v10 }
 0x789   :  { %34282 = vmatpush3.bf16.msra.mxu1 %v39561_v41  ;;  %34357 = vmatpush3.bf16.msra.mxu0 %v39647_v52 }
 0x78a   :  { %34283 = vmatprep.subr.bf16.mxu1 %v40509_v8  ;;  %34358 = vmatprep.subr.bf16.mxu0 %v40509_v8 }
 0x78b   :  { %32325 = vmatprep.mubr.msk.f32.mxu0 %vm35896_vm1, %v40510_v16 }
 0x78c   :  { %32183 = vmatmul.mubr.f32.vlgmr.msra.gmra.mrb[96].mxu1 %v39806_v31  ;;  %v25776_v31 = vld [vmem:[%s40660_s10 + $0x18] sm:$0xff] }
 0x78d   :  { %34285 = vmatpush3.bf16.msra.mxu1 %v39660_v32  ;;  %34360 = vmatpush3.bf16.msra.mxu0 %v39666_v6  ;;  %v40000_v32 = vpack.c.bf16 %v25791_v20, %v25788_v55 }
 0x78e   :  { %34286 = vmatprep.subr.bf16.mxu1 %v40509_v8  ;;  %34361 = vmatprep.subr.bf16.mxu0 %v40509_v8 }
 0x78f   :  { %v20486_v52 = vpop.f32.mrb[86].mxu1  ;;  %32193 = vmatprep.mubr.msk.f32.mxu1 %vm35896_vm1, %v40510_v16 }
 0x790   :  { %v20487_v45 = vadd.f32 %v20486_v52, %v20396_v56  ;;  %v31700_v1 = vpop.f32.mrb[87].mxu1  ;;  %32326 = vmatmul.mubr.f32.vlgmr.msra.gmra.mrb[38].mxu0 %v39786_v17 }
 0x791   :  { %34288 = vmatpush3.bf16.msra.mxu1 %v39681_v54  ;;  %34363 = vmatpush3.bf16.msra.mxu0 %v39516_v63 }
 0x792   :  { %34289 = vmatprep.subr.bf16.mxu1 %v40509_v8  ;;  %34364 = vmatprep.subr.bf16.mxu0 %v40509_v8 }
 0x793   :  { %32336 = vmatprep.mubr.msk.f32.mxu0 %vm35896_vm1, %v40510_v16 }
 0x794   :  { %32194 = vmatmul.mubr.f32.vlgmr.msra.gmra.mrb[96].mxu1 %v39786_v17 }
 0x795   :  { %34291 = vmatpush3.bf16.msra.mxu1 %v39534_v23  ;;  %34366 = vmatpush3.bf16.msra.mxu0 %v39537_v34  ;;  %v25794_v23 = vand.u32 4294901760, %v25775_v38  ;;  %v25797_v34 = vand.u32 4294901760, %v25776_v31 }
 0x796   :  { %34292 = vmatprep.subr.bf16.mxu1 %v40509_v8  ;;  %32204 = vmatprep.mubr.msk.f32.mxu1 %vm35896_vm1, %v40510_v16 }
 0x797   :  { %v20566_v63 = vpop.f32.mrb[88].mxu1  ;;  %34403 = vmatprep.subr.bf16.mxu0 %v40509_v8  ;;  %v40014_v21 = vpack.c.bf16 %v25797_v34, %v25794_v23  ;;  %v40016_v24 = vsub.f32 %v25775_v38, %v25794_v23  ;;  %v40018_v61 = vsub.f32 %v25776_v31, %v25797_v34 }
 0x798   :  { %v20567_v6 = vadd.f32 %v20566_v63, %v20487_v45  ;;  %v31711_v54 = vpop.f32.mrb[89].mxu1  ;;  %32337 = vmatmul.mubr.f32.vlgmr.msra.gmra.mrb[38].mxu0 %v39786_v17 }
 0x799   :  { %34294 = vmatpush3.bf16.msra.mxu1 %v39561_v41  ;;  %34405 = vmatpush3.bf16.msra.mxu0 %v40000_v32  ;;  %v25876_v41 = vand.u32 4294901760, %v39964_v62  ;;  %v25883_v4 = vand.u32 4294901760, %v40016_v24  ;;  %v25890_v9 = vand.u32 4294901760, %v40018_v61  ;;  %v34419_v11 = vpack.c.bf16 %v40018_v61, %v40016_v24 }
 0x79a   :  { %34406 = vmatprep.subr.bf16.mxu0 %v40509_v8  ;;  %32413 = vmatprep.mubr.msk.f32.mxu0 %vm35896_vm1, %v40510_v16 }
 0x79b   :  { %34367 = vmatprep.subr.bf16.mxu1 %v40509_v8  ;;  %v25877_v12 = vsub.f32 %v39964_v62, %v25876_v41  ;;  %v25884_v28 = vsub.f32 %v40016_v24, %v25883_v4  ;;  %v25891_v13 = vsub.f32 %v40018_v61, %v25890_v9  ;;  %v40042_v27 = vpack.c.bf16 %v25876_v41, %v25869_v14 }
 0x79c   :  { %32205 = vmatmul.mubr.f32.vlgmr.msra.gmra.mrb[96].mxu1 %v39786_v17  ;;  %v40044_v36 = vpack.c.bf16 %v25890_v9, %v25883_v4 }
 0x79d   :  { %34408 = vmatpush3.bf16.msra.mxu0 %v40014_v21  ;;  %32347 = vmatprep.mubr.msk.f32.mxu1 %vm35896_vm1, %v40510_v16  ;;  %v25878_v57 = vand.u32 4294901760, %v25877_v12  ;;  %v25885_v58 = vand.u32 4294901760, %v25884_v28  ;;  %v25892_v3 = vand.u32 4294901760, %v25891_v13  ;;  %v35211_v12 = vld [vmem:[#allocation36 + $0x2] sm:$0x3] }
 0x79e   :  { %34409 = vmatprep.subr.bf16.mxu0 %v40509_v8 }
 0x79f   :  { %v20643_v2 = vpop.f32.mrb[90].mxu1  ;;  %v40034_v53 = vpack.c.bf16 %v25878_v57, %v25871_v7  ;;  %v40038_v19 = vpack.c.bf16 %v25892_v3, %v25885_v58  ;;  %v25272_v57 = vld [vmem:[%s40661_s19 + $0x10] sm:$0xff]  ;;  %v25273_v3 = vld [vmem:[%s40661_s19 + $0x18] sm:$0xff] }
 0x7a0   :  { %v20644_v17 = vadd.f32 %v20643_v2, %v20567_v6  ;;  %v31722_v50 = vpop.f32.mrb[91].mxu1  ;;  %v40052_v6 = vld [vmem:[#allocation31 + $0x2] ss:$0 sm:$0xff] }
 0x7a1   :  { %v25271_v50 = vld [vmem:[%s40661_s19 + $0x8] sm:$0xff] }
 0x7a2   :  { %v25288_v58 = vand.u32 4294901760, %v25271_v50 }
 0x7a7   :  { %v20726_v26 = vpop.f32.mrb[92].mxu1 }
 0x7a8   :  { %v20727_v46 = vadd.f32 %v20726_v26, %v20644_v17  ;;  %v31733_v49 = vpop.f32.mrb[93].mxu1  ;;  %v25270_v17 = vld [vmem:[%s40661_s19] sm:$0xff]  ;;  %v25291_v26 = vand.u32 4294901760, %v25272_v57 }
 0x7a9   :  { %v25285_v13 = vand.u32 4294901760, %v25270_v17  ;;  %v25294_v49 = vand.u32 4294901760, %v25273_v3 }
 0x7ab   :  { %v21798_v42 = vpop.f32.mrb[32].mxu0  ;;  %v40076_v5 = vpack.c.bf16 %v25294_v49, %v25291_v26 }
 0x7ac   :  { %v31876_v33 = vpop.f32.mrb[33].mxu0  ;;  %v34547_v56 = vadd.f32 %v40048_v29, %v21798_v42  ;;  %v40064_v42 = vpack.c.bf16 %v25288_v58, %v25285_v13 }
 0x7ad   :  { %v40066_v33 = vsub.f32 %v25270_v17, %v25285_v13 }
 0x7ae   :  { %v27448_v52 = vmul.f32 -1.442695, %v34547_v56  ;;  %34369 = vmatpush3.bf16.msra.mxu1 %v40064_v42 }
 0x7af   :  { %v20801_v15 = vpop.f32.mrb[94].mxu1  ;;  %34370 = vmatprep.subr.bf16.mxu1 %v40509_v8 }
 0x7b0   :  { %v20802_v0 = vadd.f32 %v20801_v15, %v20727_v46  ;;  %v31744_v60 = vpop.f32.mrb[95].mxu1  ;;  %v40068_v15 = vsub.f32 %v25271_v50, %v25288_v58 }
 0x7b1   :  { %v40073_v60 = vsub.f32 %v25273_v3, %v25294_v49 }
 0x7b2   :  { %34372 = vmatpush3.bf16.msra.mxu1 %v40076_v5 }
 0x7b3   :  { %34373 = vmatprep.subr.bf16.mxu1 %v40509_v8  ;;  %v25387_v61 = vand.u32 4294901760, %v40073_v60 }
 0x7db   :  { %v22296_v37 = vpop.f32.mrb[34].mxu0 }
 0x7dc   :  { %v31942_v22 = vpop.f32.mrb[35].mxu0  ;;  %v34548_v38 = vadd.f32 %v40052_v6, %v22296_v37 }
 0x7df   :  { %v21300_v55 = vpop.f32.mrb[82].mxu1 }
 0x7e0   :  { %v34545_v20 = vadd.f32 %v40046_v30, %v21300_v55  ;;  %v31810_v10 = vpop.f32.mrb[83].mxu1 }
 0x7e2   :  { %v27447_v43 = vmul.f32 -1.442695, %v34545_v20 }
 0x7e4   :  { %35184 = vpow2.f32 %v27447_v43 }
 0x7e5   :  { %35186 = vpow2.f32 %v27448_v52  ;;  %v25373_v52 = vand.u32 4294901760, %v40068_v15 }
 0x7e7   :  { %v25374_v62 = vsub.f32 %v40068_v15, %v25373_v52 }
 0x7ee   :  { %v35185_v45 = vpop.eup %35184 }
 0x7ef   :  { %v22304_v1 = vadd.f32 1.0, %v35185_v45  ;;  %v35187_v63 = vpop.eup %35186  ;;  %v25375_v45 = vand.u32 4294901760, %v25374_v62 }
 0x7f0   :  { %v22311_v54 = vadd.f32 1.0, %v35187_v63 }
 0x7f1   :  { %35188 = vrcp.f32 %v22304_v1 }
 0x7f2   :  { %35190 = vrcp.f32 %v22311_v54 }
 0x7fb   :  { %v35189_v31 = vpop.eup %35188 }
 0x7fc   :  { %v22314_v23 = vmul.f32 %v35189_v31, %v34548_v38  ;;  %v35191_v14 = vpop.eup %35190  ;;  %v25388_v38 = vsub.f32 %v40073_v60, %v25387_v61 }
 0x7fd   :  { %v22317_v41 = vsub.f32 1.0, %v35191_v14  ;;  %v22319_v2 = vmul.f32 %v35211_v12, %v35191_v14 }
 0x7fe   :  { %v22315_v34 = vadd.f32 %v22314_v23, %v20802_v0 }
 0x800   :  { %35192 = vtanh.f32 %v22315_v34  ;;  %v25389_v34 = vand.u32 4294901760, %v25388_v38 }
 0x80a   :  { %v35193_v39 = vpop.eup %35192 }
 0x80b   :  { %v22318_v7 = vmul.f32 %v35193_v39, %v22317_v41  ;;  %v34380_v41 = vpack.c.bf16 %v40068_v15, %v40066_v33 }
 0x80d   :  { %v22320_v4 = vadd.f32 %v22319_v2, %v22318_v7 }
 0x80f   :  { %v25269_v9 = vadd.f32 %v22320_v4, %v39945_v40  ;;  %25265 = vst.msk [vmem:[#allocation42 + $0x2] sm:$0x3] %vm13351_vm6, %v22320_v4  ;;  %v40070_v40 = vsub.f32 %v25272_v57, %v25291_v26 }
 0x811   :  { %v25785_v28 = vsel %vm1468_vm4, %v25269_v9, 0  ;;  %v25380_v24 = vand.u32 4294901760, %v40070_v40  ;;  %v34383_v39 = vpack.c.bf16 %v40073_v60, %v40070_v40 }
 0x812   :  { %v40062_v46 = vand.u32 4294901760, %v25785_v28 }
 0x813   :  { %v25381_v54 = vsub.f32 %v40070_v40, %v25380_v24  ;;  %v27452_v40 = vld [vmem:[%s40663_s16] ss:$0 sm:$0xff] }
 0x814   :  { %v25857_v0 = vsub.f32 %v25785_v28, %v40062_v46 }
 0x815   :  { %v25382_v23 = vand.u32 4294901760, %v25381_v54 }
 0x816   :  { %v25858_v25 = vand.u32 4294901760, %v25857_v0 }
 0x817   :  { %v23371_v37 = vpop.f32.mrb[98].mxu1  ;;  %v40115_v14 = vpack.c.bf16 %v25389_v34, %v25382_v23 }
 0x818   :  { %v32085_v59 = vpop.f32.mrb[99].mxu1  ;;  %v25859_v51 = vsub.f32 %v25857_v0, %v25858_v25  ;;  %v23372_v55 = vadd.f32 %v39978_v18, %v23371_v37 }
 0x81a   :  { %v25860_v22 = vand.u32 4294901760, %v25859_v51 }
 0x81c   :  { %32414 = vmatmul.mubr.f32.vlgmr.msra.gmra.mrb[40].mxu0 %v25860_v22 }
 0x81d   :  { %34411 = vmatpush3.bf16.msra.mxu0 %v40034_v53  ;;  %32424 = vmatprep.mubr.msk.f32.mxu0 %vm35896_vm1, %v40510_v16 }
 0x81e   :  { %34412 = vmatprep.subr.bf16.mxu0 %v40509_v8 }
 0x81f   :  { %v23462_v20 = vpop.f32.mrb[100].mxu1 }
 0x820   :  { %v23463_v10 = vadd.f32 %v23462_v20, %v23372_v55  ;;  %v32096_v43 = vpop.f32.mrb[101].mxu1 }
 0x821   :  { %34414 = vmatpush3.bf16.msra.mxu0 %v40038_v19  ;;  %v25366_v19 = vand.u32 4294901760, %v40066_v33 }
 0x822   :  { %34415 = vmatprep.subr.bf16.mxu0 %v40509_v8 }
 0x823   :  { %v25367_v44 = vsub.f32 %v40066_v33, %v25366_v19 }
 0x824   :  { %32425 = vmatmul.mubr.f32.vlgmr.msra.gmra.mrb[40].mxu0 %v40062_v46 }
 0x825   :  { %34417 = vmatpush3.bf16.msra.mxu0 %v34416_v35  ;;  %32435 = vmatprep.mubr.msk.f32.mxu0 %vm35896_vm1, %v40510_v16 }
 0x826   :  { %34418 = vmatprep.subr.bf16.mxu0 %v40509_v8 }
 0x827   :  { %v23542_v18 = vpop.f32.mrb[102].mxu1 }
 0x828   :  { %v23543_v53 = vadd.f32 %v23542_v18, %v23463_v10  ;;  %v32107_v56 = vpop.f32.mrb[103].mxu1 }
 0x829   :  { %34420 = vmatpush3.bf16.msra.mxu0 %v34419_v11  ;;  %v25368_v11 = vand.u32 4294901760, %v25367_v44  ;;  %v26776_v56 = vld [vmem:[%s40662_s20] sm:$0xff] }
 0x82a   :  { %34421 = vmatprep.subr.bf16.mxu0 %v40509_v8  ;;  %v26791_v44 = vand.u32 4294901760, %v26776_v56 }
 0x82b   :  { %v40112_v31 = vpack.c.bf16 %v25375_v45, %v25368_v11 }
 0x82c   :  { %32436 = vmatmul.mubr.f32.vlgmr.msra.gmra.mrb[40].mxu0 %v25857_v0 }
 0x82d   :  { %34423 = vmatpush3.bf16.msra.mxu0 %v40000_v32  ;;  %32446 = vmatprep.mubr.msk.f32.mxu0 %vm35896_vm1, %v40510_v16 }
 0x82e   :  { %34424 = vmatprep.subr.bf16.mxu0 %v40509_v8 }
 0x82f   :  { %v23619_v35 = vpop.f32.mrb[104].mxu1 }
 0x830   :  { %v23620_v1 = vadd.f32 %v23619_v35, %v23543_v53  ;;  %v32118_v63 = vpop.f32.mrb[105].mxu1 }
 0x831   :  { %34426 = vmatpush3.bf16.msra.mxu0 %v40014_v21 }
 0x832   :  { %34427 = vmatprep.subr.bf16.mxu0 %v40509_v8 }
 0x834   :  { %32447 = vmatmul.mubr.f32.vlgmr.msra.gmra.mrb[40].mxu0 %v25858_v25 }
 0x835   :  { %34429 = vmatpush3.bf16.msra.mxu0 %v40042_v27  ;;  %32457 = vmatprep.mubr.msk.f32.mxu0 %vm35896_vm1, %v40510_v16 }
 0x836   :  { %34430 = vmatprep.subr.bf16.mxu0 %v40509_v8 }
 0x837   :  { %v23702_v12 = vpop.f32.mrb[106].mxu1 }
 0x838   :  { %v23703_v2 = vadd.f32 %v23702_v12, %v23620_v1  ;;  %v32129_v7 = vpop.f32.mrb[107].mxu1 }
 0x839   :  { %34432 = vmatpush3.bf16.msra.mxu0 %v40044_v36  ;;  %v40135_v36 = vpack.c.bf16 %v25373_v52, %v25366_v19  ;;  %v26778_v19 = vld [vmem:[%s40662_s20 + $0x10] sm:$0xff] }
 0x83a   :  { %34433 = vmatprep.subr.bf16.mxu0 %v40509_v8 }
 0x83b   :  { %v24750_v4 = vpop.f32.mrb[36].mxu0 }
 0x83c   :  { %v32272_v9 = vpop.f32.mrb[37].mxu0  ;;  %32458 = vmatmul.mubr.f32.vlgmr.msra.gmra.mrb[40].mxu0 %v40062_v46 }
 0x83d   :  { %34435 = vmatpush3.bf16.msra.mxu0 %v40000_v32  ;;  %32468 = vmatprep.mubr.msk.f32.mxu0 %vm35896_vm1, %v40510_v16  ;;  %v40139_v32 = vpack.c.bf16 %v25387_v61, %v25380_v24  ;;  %v26779_v24 = vld [vmem:[%s40662_s20 + $0x18] sm:$0xff]  ;;  %v26797_v61 = vand.u32 4294901760, %v26778_v19 }
 0x83e   :  { %34436 = vmatprep.subr.bf16.mxu0 %v40509_v8  ;;  %v26800_v11 = vand.u32 4294901760, %v26779_v24 }
 0x83f   :  { %v23777_v27 = vpop.f32.mrb[108].mxu1 }
 0x840   :  { %v23778_v17 = vadd.f32 %v23777_v27, %v23703_v2  ;;  %v32140_v50 = vpop.f32.mrb[109].mxu1  ;;  %v40163_v54 = vsub.f32 %v26779_v24, %v26800_v11  ;;  %v40166_v38 = vpack.c.bf16 %v26800_v11, %v26797_v61 }
 0x841   :  { %34438 = vmatpush3.bf16.msra.mxu0 %v40014_v21  ;;  %v34552_v21 = vadd.f32 %v40048_v29, %v24750_v4 }
 0x842   :  { %34475 = vmatprep.subr.bf16.mxu0 %v40509_v8 }
 0x843   :  { %v27450_v49 = vmul.f32 -1.442695, %v34552_v21 }
 0x844   :  { %32469 = vmatmul.mubr.f32.vlgmr.msra.gmra.mrb[40].mxu0 %v40062_v46 }
 0x845   :  { %32545 = vmatprep.mubr.msk.f32.mxu0 %vm35896_vm1, %v40510_v16 }
 0x86b   :  { %v25235_v57 = vpop.f32.mrb[38].mxu0 }
 0x86c   :  { %v32338_v28 = vpop.f32.mrb[39].mxu0  ;;  %v34553_v59 = vadd.f32 %v40052_v6, %v25235_v57  ;;  %v26777_v6 = vld [vmem:[%s40662_s20 + $0x8] sm:$0xff] }
 0x86d   :  { %v26794_v62 = vand.u32 4294901760, %v26777_v6 }
 0x86f   :  { %v24265_v13 = vpop.f32.mrb[96].mxu1  ;;  %v40154_v45 = vpack.c.bf16 %v26794_v62, %v26791_v44  ;;  %v40158_v1 = vsub.f32 %v26777_v6, %v26794_v62 }
 0x870   :  { %v34550_v58 = vadd.f32 %v40046_v30, %v24265_v13  ;;  %v32206_v3 = vpop.f32.mrb[97].mxu1 }
 0x871   :  { %34477 = vmatpush3.bf16.msra.mxu0 %v40154_v45  ;;  %v26879_v12 = vand.u32 4294901760, %v40158_v1 }
 0x872   :  { %v27449_v26 = vmul.f32 -1.442695, %v34550_v58  ;;  %34478 = vmatprep.subr.bf16.mxu0 %v40509_v8 }
 0x873   :  { %v26880_v4 = vsub.f32 %v40158_v1, %v26879_v12 }
 0x874   :  { %35194 = vpow2.f32 %v27449_v26 }
 0x875   :  { %35196 = vpow2.f32 %v27450_v49  ;;  %34480 = vmatpush3.bf16.msra.mxu0 %v40166_v38  ;;  %v26881_v57 = vand.u32 4294901760, %v26880_v4 }
 0x876   :  { %34481 = vmatprep.subr.bf16.mxu0 %v40509_v8 }
 0x87e   :  { %v35195_v46 = vpop.eup %35194 }
 0x87f   :  { %v25243_v0 = vadd.f32 1.0, %v35195_v46  ;;  %v35197_v25 = vpop.eup %35196 }
 0x880   :  { %v25250_v37 = vadd.f32 1.0, %v35197_v25 }
 0x881   :  { %35198 = vrcp.f32 %v25243_v0 }
 0x882   :  { %35200 = vrcp.f32 %v25250_v37 }
 0x88b   :  { %v35199_v51 = vpop.eup %35198 }
 0x88c   :  { %v25253_v30 = vmul.f32 %v35199_v51, %v34553_v59  ;;  %v35201_v29 = vpop.eup %35200  ;;  %v26275_v59 = vld [vmem:[%s40664_s18] sm:$0xff]  ;;  %v26276_v51 = vld [vmem:[%s40664_s18 + $0x8] sm:$0xff] }
 0x88d   :  { %v25256_v55 = vsub.f32 1.0, %v35201_v29  ;;  %v25258_v10 = vmul.f32 %v35201_v29, %v39772_v47  ;;  %v40156_v47 = vsub.f32 %v26776_v56, %v26791_v44  ;;  %v26293_v29 = vand.u32 4294901760, %v26276_v51 }
 0x88e   :  { %v25254_v22 = vadd.f32 %v25253_v30, %v23778_v17  ;;  %v26893_v17 = vand.u32 4294901760, %v40163_v54  ;;  %v26277_v30 = vld [vmem:[%s40664_s18 + $0x10] sm:$0xff] }
 0x88f   :  { %v26872_v34 = vand.u32 4294901760, %v40156_v47  ;;  %v34488_v49 = vpack.c.bf16 %v40158_v1, %v40156_v47 }
 0x890   :  { %35202 = vtanh.f32 %v25254_v22  ;;  %v26894_v13 = vsub.f32 %v40163_v54, %v26893_v17  ;;  %v26290_v22 = vand.u32 4294901760, %v26275_v59 }
 0x891   :  { %v26873_v7 = vsub.f32 %v40156_v47, %v26872_v34  ;;  %v40204_v33 = vpack.c.bf16 %v26879_v12, %v26872_v34 }
 0x892   :  { %v26895_v26 = vand.u32 4294901760, %v26894_v13 }
 0x893   :  { %v26874_v50 = vand.u32 4294901760, %v26873_v7 }
 0x895   :  { %v34482_v58 = vpack.c.bf16 %v26881_v57, %v26874_v50 }
 0x89a   :  { %v35203_v20 = vpop.eup %35202 }
 0x89b   :  { %v25257_v43 = vmul.f32 %v35203_v20, %v25256_v55  ;;  %v26278_v55 = vld [vmem:[%s40664_s18 + $0x18] sm:$0xff]  ;;  %v26296_v20 = vand.u32 4294901760, %v26277_v30 }
 0x89d   :  { %v25259_v18 = vadd.f32 %v25258_v10, %v25257_v43  ;;  %v26299_v10 = vand.u32 4294901760, %v26278_v55  ;;  %v40248_v43 = vpack.c.bf16 %v26293_v29, %v26290_v22  ;;  %v40254_v56 = vsub.f32 %v26277_v30, %v26296_v20 }
 0x89f   :  { %v25268_v53 = vsub.f32 %v39625_v48, %v25259_v18  ;;  %25267 = vst.msk [vmem:[#allocation43 + $0x2] sm:$0x3] %vm13351_vm6, %v25259_v18  ;;  %v40160_v48 = vsub.f32 %v26778_v19, %v26797_v61  ;;  %v40250_v18 = vsub.f32 %v26275_v59, %v26290_v22  ;;  %v40256_v6 = vsub.f32 %v26278_v55, %v26299_v10 }
 0x8a0   :  { %v40264_v19 = vpack.c.bf16 %v26299_v10, %v26296_v20  ;;  %v26385_v61 = vand.u32 4294901760, %v40254_v56 }
 0x8a1   :  { %v25282_v52 = vsel %vm1468_vm4, %v25268_v53, 0  ;;  %v26886_v27 = vand.u32 4294901760, %v40160_v48  ;;  %v34491_v46 = vpack.c.bf16 %v40163_v54, %v40160_v48  ;;  %v40252_v53 = vsub.f32 %v26276_v51, %v26293_v29 }
 0x8a2   :  { %v40152_v35 = vand.u32 4294901760, %v25282_v52  ;;  %v26386_v1 = vsub.f32 %v40254_v56, %v26385_v61 }
 0x8a3   :  { %v26887_v28 = vsub.f32 %v40160_v48, %v26886_v27  ;;  %v40208_v15 = vpack.c.bf16 %v26893_v17, %v26886_v27  ;;  %v26378_v44 = vand.u32 4294901760, %v40252_v53  ;;  %v34452_v12 = vpack.c.bf16 %v40252_v53, %v40250_v18 }
 0x8a4   :  { %v25354_v63 = vsub.f32 %v25282_v52, %v40152_v35  ;;  %v26371_v52 = vand.u32 4294901760, %v40250_v18  ;;  %v26387_v54 = vand.u32 4294901760, %v26386_v1 }
 0x8a5   :  { %v26888_v3 = vand.u32 4294901760, %v26887_v28  ;;  %v26379_v24 = vsub.f32 %v40252_v53, %v26378_v44 }
 0x8a6   :  { %v25355_v23 = vand.u32 4294901760, %v25354_v63  ;;  %v26372_v62 = vsub.f32 %v40250_v18, %v26371_v52  ;;  %v34464_v7 = vpack.c.bf16 %v26378_v44, %v26371_v52 }
 0x8a7   :  { %v34485_v21 = vpack.c.bf16 %v26895_v26, %v26888_v3  ;;  %v26380_v47 = vand.u32 4294901760, %v26379_v24 }
 0x8a8   :  { %v25356_v2 = vsub.f32 %v25354_v63, %v25355_v23  ;;  %v26373_v11 = vand.u32 4294901760, %v26372_v62 }
 0x8aa   :  { %v25357_v9 = vand.u32 4294901760, %v25356_v2  ;;  %v34455_v2 = vpack.c.bf16 %v40256_v6, %v40254_v56 }
 0x8ac   :  { %32348 = vmatmul.mubr.f32.vlgmr.msra.gmra.mrb[110].mxu1 %v25357_v9  ;;  %v27451_v9 = vld [vmem:[%s40665_s21] ss:$0 sm:$0xff] }
 0x8ad   :  { %34375 = vmatpush3.bf16.msra.mxu1 %v40112_v31  ;;  %32358 = vmatprep.mubr.msk.f32.mxu1 %vm35896_vm1, %v40510_v16 }
 0x8ae   :  { %34376 = vmatprep.subr.bf16.mxu1 %v40509_v8 }
 0x8b1   :  { %34378 = vmatpush3.bf16.msra.mxu1 %v40115_v14 }
 0x8b2   :  { %34379 = vmatprep.subr.bf16.mxu1 %v40509_v8 }
 0x8b4   :  { %32359 = vmatmul.mubr.f32.vlgmr.msra.gmra.mrb[110].mxu1 %v40152_v35 }
 0x8b5   :  { %34381 = vmatpush3.bf16.msra.mxu1 %v34380_v41  ;;  %32369 = vmatprep.mubr.msk.f32.mxu1 %vm35896_vm1, %v40510_v16 }
 0x8b6   :  { %34382 = vmatprep.subr.bf16.mxu1 %v40509_v8 }
 0x8b9   :  { %34384 = vmatpush3.bf16.msra.mxu1 %v34383_v39 }
 0x8ba   :  { %34385 = vmatprep.subr.bf16.mxu1 %v40509_v8 }
 0x8bc   :  { %32370 = vmatmul.mubr.f32.vlgmr.msra.gmra.mrb[110].mxu1 %v25354_v63  ;;  %v34446_v63 = vpack.c.bf16 %v26380_v47, %v26373_v11 }
 0x8bd   :  { %34387 = vmatpush3.bf16.msra.mxu1 %v40064_v42  ;;  %32380 = vmatprep.mubr.msk.f32.mxu1 %vm35896_vm1, %v40510_v16 }
 0x8be   :  { %34388 = vmatprep.subr.bf16.mxu1 %v40509_v8 }
 0x8c1   :  { %34390 = vmatpush3.bf16.msra.mxu1 %v40076_v5 }
 0x8c2   :  { %34391 = vmatprep.subr.bf16.mxu1 %v40509_v8 }
 0x8c4   :  { %32381 = vmatmul.mubr.f32.vlgmr.msra.gmra.mrb[110].mxu1 %v25355_v23 }
 0x8c5   :  { %34393 = vmatpush3.bf16.msra.mxu1 %v40135_v36  ;;  %32391 = vmatprep.mubr.msk.f32.mxu1 %vm35896_vm1, %v40510_v16 }
 0x8c6   :  { %34394 = vmatprep.subr.bf16.mxu1 %v40509_v8 }
 0x8c9   :  { %34396 = vmatpush3.bf16.msra.mxu1 %v40139_v32 }
 0x8ca   :  { %34397 = vmatprep.subr.bf16.mxu1 %v40509_v8 }
 0x8cc   :  { %32392 = vmatmul.mubr.f32.vlgmr.msra.gmra.mrb[110].mxu1 %v40152_v35 }
 0x8cd   :  { %34399 = vmatpush3.bf16.msra.mxu1 %v40064_v42  ;;  %32402 = vmatprep.mubr.msk.f32.mxu1 %vm35896_vm1, %v40510_v16  ;;  %v25770_v42 = vstv %s40226_s27 }
 0x8ce   :  { %34400 = vmatprep.subr.bf16.mxu1 %v40509_v8 }
 0x8d1   :  { %34402 = vmatpush3.bf16.msra.mxu1 %v40076_v5 }
 0x8d2   :  { %34439 = vmatprep.subr.bf16.mxu1 %v40509_v8 }
 0x8d4   :  { %32403 = vmatmul.mubr.f32.vlgmr.msra.gmra.mrb[110].mxu1 %v40152_v35  ;;  %v26392_v35 = vand.u32 4294901760, %v40256_v6 }
 0x8d5   :  { %32479 = vmatprep.mubr.msk.f32.mxu1 %vm35896_vm1, %v40510_v16  ;;  %34441 = vmatpush3.bf16.msra.mxu1 %v40248_v43 }
 0x8d6   :  { %34442 = vmatprep.subr.bf16.mxu1 %v40509_v8  ;;  %v26393_v48 = vsub.f32 %v40256_v6, %v26392_v35  ;;  %v34467_v4 = vpack.c.bf16 %v26392_v35, %v26385_v61 }
 0x8d8   :  { %v26394_v23 = vand.u32 4294901760, %v26393_v48 }
 0x8d9   :  { %34444 = vmatpush3.bf16.msra.mxu1 %v40264_v19 }
 0x8da   :  { %34445 = vmatprep.subr.bf16.mxu1 %v40509_v8  ;;  %v34449_v34 = vpack.c.bf16 %v26394_v23, %v26387_v54 }
 0x917   :  { %v26268_v60 = vpop.f32.mrb[40].mxu0 }
 0x918   :  { %v34555_v31 = vadd.f32 %v27452_v40, %v26268_v60  ;;  %v32470_v14 = vpop.f32.mrb[41].mxu0 }
 0x91a   :  { %vm26272_vm7 = vcmp.ge.f32.partialorder %v34555_v31, 0.0  ;;  %v26273_v5 = vmul.f32 %v34555_v31, %v25770_v42 }
 0x91c   :  { %v26274_v41 = vsel %vm26272_vm7, %v34555_v31, %v26273_v5 }
 0x91d   :  { %v26788_v39 = vsel %vm1468_vm4, %v26274_v41, 0 }
 0x91e   :  { %v40233_v36 = vand.u32 4294901760, %v26788_v39 }
 0x920   :  { %v26860_v32 = vsub.f32 %v26788_v39, %v40233_v36 }
 0x922   :  { %v26861_v0 = vand.u32 4294901760, %v26860_v32 }
 0x924   :  { %v26862_v25 = vsub.f32 %v26860_v32, %v26861_v0 }
 0x926   :  { %v26863_v37 = vand.u32 4294901760, %v26862_v25 }
 0x928   :  { %32546 = vmatmul.mubr.f32.vlgmr.msra.gmra.mrb[42].mxu0 %v26863_v37 }
 0x929   :  { %34483 = vmatpush3.bf16.msra.mxu0 %v34482_v58  ;;  %32556 = vmatprep.mubr.msk.f32.mxu0 %vm35896_vm1, %v40510_v16 }
 0x92a   :  { %34484 = vmatprep.subr.bf16.mxu0 %v40509_v8 }
 0x92d   :  { %34486 = vmatpush3.bf16.msra.mxu0 %v34485_v21 }
 0x92e   :  { %34487 = vmatprep.subr.bf16.mxu0 %v40509_v8 }
 0x930   :  { %32557 = vmatmul.mubr.f32.vlgmr.msra.gmra.mrb[42].mxu0 %v40233_v36 }
 0x931   :  { %34489 = vmatpush3.bf16.msra.mxu0 %v34488_v49  ;;  %32567 = vmatprep.mubr.msk.f32.mxu0 %vm35896_vm1, %v40510_v16 }
 0x932   :  { %34490 = vmatprep.subr.bf16.mxu0 %v40509_v8 }
 0x935   :  { %34492 = vmatpush3.bf16.msra.mxu0 %v34491_v46 }
 0x936   :  { %34493 = vmatprep.subr.bf16.mxu0 %v40509_v8 }
 0x938   :  { %32568 = vmatmul.mubr.f32.vlgmr.msra.gmra.mrb[42].mxu0 %v26860_v32 }
 0x939   :  { %34495 = vmatpush3.bf16.msra.mxu0 %v40154_v45  ;;  %32578 = vmatprep.mubr.msk.f32.mxu0 %vm35896_vm1, %v40510_v16 }
 0x93a   :  { %34496 = vmatprep.subr.bf16.mxu0 %v40509_v8 }
 0x93d   :  { %34498 = vmatpush3.bf16.msra.mxu0 %v40166_v38 }
 0x93e   :  { %34499 = vmatprep.subr.bf16.mxu0 %v40509_v8 }
 0x940   :  { %32579 = vmatmul.mubr.f32.vlgmr.msra.gmra.mrb[42].mxu0 %v26861_v0 }
 0x941   :  { %34501 = vmatpush3.bf16.msra.mxu0 %v40204_v33  ;;  %32589 = vmatprep.mubr.msk.f32.mxu0 %vm35896_vm1, %v40510_v16 }
 0x942   :  { %34502 = vmatprep.subr.bf16.mxu0 %v40509_v8 }
 0x945   :  { %34504 = vmatpush3.bf16.msra.mxu0 %v40208_v15 }
 0x946   :  { %34505 = vmatprep.subr.bf16.mxu0 %v40509_v8 }
 0x948   :  { %32590 = vmatmul.mubr.f32.vlgmr.msra.gmra.mrb[42].mxu0 %v40233_v36 }
 0x949   :  { %34507 = vmatpush3.bf16.msra.mxu0 %v40154_v45  ;;  %32600 = vmatprep.mubr.msk.f32.mxu0 %vm35896_vm1, %v40510_v16 }
 0x94a   :  { %34508 = vmatprep.subr.bf16.mxu0 %v40509_v8 }
 0x94d   :  { %34510 = vmatpush3.bf16.msra.mxu0 %v40166_v38  ;;  %v27454_v38 = vld [vmem:[%s40666_s11] ss:$0 sm:$0xff] }
 0x950   :  { %32601 = vmatmul.mubr.f32.vlgmr.msra.gmra.mrb[42].mxu0 %v40233_v36 }
 0x9a7   :  { %v25765_v27 = vpop.f32.mrb[110].mxu1 }
 0x9a8   :  { %v34554_v17 = vadd.f32 %v27451_v9, %v25765_v27  ;;  %v32404_v50 = vpop.f32.mrb[111].mxu1 }
 0x9aa   :  { %vm25769_vm8 = vcmp.ge.f32.partialorder %v34554_v17, 0.0  ;;  %v25771_v57 = vmul.f32 %v34554_v17, %v25770_v42 }
 0x9ac   :  { %v25772_v28 = vsel %vm25769_vm8, %v34554_v17, %v25771_v57 }
 0x9ad   :  { %v26287_v45 = vsel %vm1468_vm4, %v25772_v28, 0 }
 0x9ae   :  { %v26358_v13 = vand.u32 4294901760, %v26287_v45 }
 0x9b0   :  { %v26359_v58 = vsub.f32 %v26287_v45, %v26358_v13 }
 0x9b2   :  { %v26360_v3 = vand.u32 4294901760, %v26359_v58 }
 0x9b4   :  { %v26361_v26 = vsub.f32 %v26359_v58, %v26360_v3 }
 0x9b6   :  { %v26362_v21 = vand.u32 4294901760, %v26361_v26 }
 0x9b8   :  { %32480 = vmatmul.mubr.f32.vlgmr.msra.gmra.mrb[112].mxu1 %v26362_v21 }
 0x9b9   :  { %34447 = vmatpush3.bf16.msra.mxu1 %v34446_v63  ;;  %32490 = vmatprep.mubr.msk.f32.mxu1 %vm35896_vm1, %v40510_v16 }
 0x9ba   :  { %34448 = vmatprep.subr.bf16.mxu1 %v40509_v8 }
 0x9bd   :  { %34450 = vmatpush3.bf16.msra.mxu1 %v34449_v34 }
 0x9be   :  { %34451 = vmatprep.subr.bf16.mxu1 %v40509_v8 }
 0x9c0   :  { %32491 = vmatmul.mubr.f32.vlgmr.msra.gmra.mrb[112].mxu1 %v26358_v13 }
 0x9c1   :  { %34453 = vmatpush3.bf16.msra.mxu1 %v34452_v12  ;;  %32501 = vmatprep.mubr.msk.f32.mxu1 %vm35896_vm1, %v40510_v16 }
 0x9c2   :  { %34454 = vmatprep.subr.bf16.mxu1 %v40509_v8 }
 0x9c5   :  { %34456 = vmatpush3.bf16.msra.mxu1 %v34455_v2 }
 0x9c6   :  { %34457 = vmatprep.subr.bf16.mxu1 %v40509_v8 }
 0x9c8   :  { %32502 = vmatmul.mubr.f32.vlgmr.msra.gmra.mrb[112].mxu1 %v26359_v58 }
 0x9c9   :  { %34459 = vmatpush3.bf16.msra.mxu1 %v40248_v43  ;;  %32512 = vmatprep.mubr.msk.f32.mxu1 %vm35896_vm1, %v40510_v16 }
 0x9ca   :  { %34460 = vmatprep.subr.bf16.mxu1 %v40509_v8 }
 0x9cd   :  { %34462 = vmatpush3.bf16.msra.mxu1 %v40264_v19 }
 0x9ce   :  { %34463 = vmatprep.subr.bf16.mxu1 %v40509_v8 }
 0x9d0   :  { %32513 = vmatmul.mubr.f32.vlgmr.msra.gmra.mrb[112].mxu1 %v26360_v3 }
 0x9d1   :  { %34465 = vmatpush3.bf16.msra.mxu1 %v34464_v7  ;;  %32523 = vmatprep.mubr.msk.f32.mxu1 %vm35896_vm1, %v40510_v16 }
 0x9d2   :  { %34466 = vmatprep.subr.bf16.mxu1 %v40509_v8 }
 0x9d5   :  { %34468 = vmatpush3.bf16.msra.mxu1 %v34467_v4 }
 0x9d6   :  { %34469 = vmatprep.subr.bf16.mxu1 %v40509_v8 }
 0x9d8   :  { %32524 = vmatmul.mubr.f32.vlgmr.msra.gmra.mrb[112].mxu1 %v26358_v13 }
 0x9d9   :  { %34471 = vmatpush3.bf16.msra.mxu1 %v40248_v43  ;;  %32534 = vmatprep.mubr.msk.f32.mxu1 %vm35896_vm1, %v40510_v16 }
 0x9da   :  { %34472 = vmatprep.subr.bf16.mxu1 %v40509_v8 }
 0x9dd   :  { %34474 = vmatpush3.bf16.msra.mxu1 %v40264_v19 }
 0x9e0   :  { %32535 = vmatmul.mubr.f32.vlgmr.msra.gmra.mrb[112].mxu1 %v26358_v13 }
 0xa23   :  { %v27271_v49 = vpop.f32.mrb[42].mxu0 }
 0xa24   :  { %v34557_v46 = vadd.f32 %v27454_v38, %v27271_v49  ;;  %v32602_v33 = vpop.f32.mrb[43].mxu0 }
 0xa26   :  { %27275 = vst.msk [vmem:[%s40667_s15] sm:$0x3] %vm26774_vm9, %v34557_v46 }
 0xa27   :  { %35717 = shalt.err (!%p35714_p1)
}
 0xa28   :  { %s35718_s23 = scalar_lea.hbm %s36100_s6, 64 }
 0xa29   :  { %p35719_p2 = scmp.ne.s32.totalorder %s36100_s6, %s35718_s23  ;;  %p35722_p3 = scmp.lt.u32.totalorder %s35718_s23, %s36100_s6 }
 0xa2b   :  { %p35724_p4 = pnand %p35722_p3, %p35719_p2 }
 0xa2d   :  { %35727 = shalt.err (!%p35724_p4)
}
 0xa2e   :  { %27303 = dma.vmem_to_hbm [thread:$0]  %s27298_s17, 64, %s36100_s6, [#allocation41], %s35881_s7, %s35881_s7, %s35882_s4  }
 0xa2f   :  { %s35728_s0 = scalar_lea.vmem %s40329_s2, 64  ;;  %p35733_p6 = scmp.lt.s32.totalorder %s40329_s2, %s40329_s2 }
 0xa30   :  { %p35729_p5 = scmp.ne.s32.totalorder %s40329_s2, %s35728_s0  ;;  %p35734_p7 = scmp.lt.s32.totalorder %s35728_s0, %s35728_s0 }
 0xa32   :  { %p35735_p8 = por %p35734_p7, %p35733_p6 }
 0xa34   :  { %p35736_p9 = pnand %p35735_p8, %p35729_p5 }
 0xa36   :  { %35739 = shalt.err (!%p35736_p9)
}
 0xa37   :  { %s35740_s9 = scalar_lea.hbm %s36095_s5, 64 }
 0xa38   :  { %p35741_p10 = scmp.ne.s32.totalorder %s36095_s5, %s35740_s9  ;;  %p35744_p11 = scmp.lt.u32.totalorder %s35740_s9, %s36095_s5 }
 0xa3a   :  { %p35746_p12 = pnand %p35744_p11, %p35741_p10 }
 0xa3c   :  { %35749 = shalt.err (!%p35746_p12)
}
 0xa3d   :  { %27291 = dma.vmem_to_hbm [thread:$0]  %s40329_s2, 64, %s36095_s5, [#allocation4], %s35881_s7, %s35881_s7, %s35882_s4  }
 0xa3e   :  { %s35900_s6 = smov [#allocation42]   ;;  %s35901_s25 = smov [#allocation43]  }
 0xa3f   :  { %s27309_s30 = sshll.u32 %s35900_s6, 4  ;;  %s27321_s26 = sshll.u32 %s35901_s25, 4  ;;  %s27310_s30 = int_to_ptr.vmem [resolvable:$true] %s27309_s30  ;;  %s40350_s26 = int_to_ptr.vmem [resolvable:$true] %s27321_s26 }
 0xa40   :  { %s35750_s29 = scalar_lea.vmem %s27310_s30, 64  ;;  %p35755_p0 = scmp.lt.s32.totalorder %s27310_s30, %s27310_s30 }
 0xa41   :  { %p35751_p13 = scmp.ne.s32.totalorder %s27310_s30, %s35750_s29  ;;  %p35756_p1 = scmp.lt.s32.totalorder %s35750_s29, %s35750_s29 }
 0xa43   :  { %p35757_p2 = por %p35756_p1, %p35755_p0 }
 0xa45   :  { %p35758_p3 = pnand %p35757_p2, %p35751_p13 }
 0xa47   :  { %35761 = shalt.err (!%p35758_p3)
}
 0xa48   :  { %s35762_s12 = scalar_lea.hbm %s36105_s3, 64 }
 0xa49   :  { %p35763_p4 = scmp.ne.s32.totalorder %s36105_s3, %s35762_s12  ;;  %p35766_p5 = scmp.lt.u32.totalorder %s35762_s12, %s36105_s3 }
 0xa4b   :  { %p35768_p6 = pnand %p35766_p5, %p35763_p4 }
 0xa4d   :  { %35771 = shalt.err (!%p35768_p6)
}
 0xa4e   :  { %27315 = dma.vmem_to_hbm [thread:$0]  %s27310_s30, 64, %s36105_s3, [#allocation41], %s35881_s7, %s35881_s7, %s35882_s4  }
 0xa4f   :  { %s35772_s5 = scalar_lea.vmem %s40350_s26, 64  ;;  %p35777_p8 = scmp.lt.s32.totalorder %s40350_s26, %s40350_s26 }
 0xa50   :  { %p35773_p7 = scmp.ne.s32.totalorder %s40350_s26, %s35772_s5  ;;  %p35778_p9 = scmp.lt.s32.totalorder %s35772_s5, %s35772_s5 }
 0xa52   :  { %p35779_p10 = por %p35778_p9, %p35777_p8 }
 0xa54   :  { %p35780_p11 = pnand %p35779_p10, %p35773_p7 }
 0xa56   :  { %35783 = shalt.err (!%p35780_p11)
}
 0xa57   :  { %s35784_s28 = scalar_lea.hbm %s36110_s24, 64 }
 0xa58   :  { %p35785_p12 = scmp.ne.s32.totalorder %s36110_s24, %s35784_s28  ;;  %p35788_p13 = scmp.lt.u32.totalorder %s35784_s28, %s36110_s24 }
 0xa5a   :  { %p35790_p0 = pnand %p35788_p13, %p35785_p12 }
 0xa5c   :  { %35793 = shalt.err (!%p35790_p0)
}
 0xa5d   :  { %s40668_s3 = sld [smem:[#allocation80_spill]]  ;;  %s40669_s1 = sld [smem:[#allocation82_spill]] }
 0xa5e   :  { %27327 = dma.vmem_to_hbm [thread:$0]  %s40350_s26, 64, %s36110_s24, [#allocation44], %s35881_s7, %s35881_s7, %s35882_s4  }
 0xa63   :  { %v27453_v8 = vld [vmem:[%s40668_s3] ss:$0 sm:$0xff] }
 0xab3   :  { %v26770_v16 = vpop.f32.mrb[112].mxu1 }
 0xab4   :  { %v34556_v15 = vadd.f32 %v27453_v8, %v26770_v16  ;;  %v32536_v40 = vpop.f32.mrb[113].mxu1 }
 0xab6   :  { %26775 = vst.msk [vmem:[%s40669_s1] sm:$0x3] %vm26774_vm9, %v34556_v15 }
 0xab7   :  { %35820 = dma.done.wait [#allocation4], 64  }
 0xab8   :  { %35821 = vsyncadd [#allocation4], 4294967232 }
 0xab9   :  { %35822 = dma.done.wait [#allocation41], 128  }
 0xaba   :  { %35823 = vsyncadd [#allocation41], 4294967168 }
 0xabb   :  { %35824 = dma.done.wait [#allocation44], 64  }
 0xabc   :  { %35825 = vsyncadd [#allocation44], 4294967232 }
 0xabd   :  { %27344 = vsyncpa [#allocation3], 1 }
 0xabe   :  { %27345 = vsyncpa [#allocation7], 1 }
 0xabf   :  { %27346 = vsyncpa [#allocation11], 1 }
 0xac0   :  { %27347 = vsyncpa [#allocation14], 1 }
 0xac1   :  { %27348 = vsyncpa [#allocation17], 1 }
 0xac2   :  { %27349 = vsyncpa [#allocation20], 1 }
 0xac3   :  { %27350 = vsyncpa [#allocation23], 1 }
 0xac4   :  { %27351 = vsyncpa [#allocation26], 1 }
 0xac5   :  { %27352 = vsyncpa [#allocation29], 1 }
 0xac6   :  { %27353 = vsyncpa [#allocation32], 1 }
 0xac7   :  { %27354 = vsyncpa [#allocation35], 1 }
 0xac8   :  { %27355 = vsyncpa [#allocation38], 1 }
 0xac9   :  { %27356 = vsyncpa [#allocation4], 1 }
 0xaca   :  { %27357 = vsyncpa [#allocation41], 1 }
 0xacb   :  { %27358 = vsyncpa [#allocation44], 1 }
 0xacc   :  { %27359 = vsyncpa [#allocation5], 1 }

</bundles_post_ra>
